<compile_context>
chip_gen: v7x
topology: tpu7x:2x2x1
jax: 0.10.0
libtpu: 0.0.40
codegen_flags: <defaults>
</compile_context>

<pallas_src>
import functools
import math
import random

import jax
import jax.numpy as jnp
from jax.experimental import pallas as pl
from jax.experimental.pallas import tpu as pltpu


# ----------------------------------------------------------------------------
# helpers
# ----------------------------------------------------------------------------

def _round_up(x, m):
    return (x + m - 1) // m * m


def _pick_tile(dim, cap, unit):
    """Largest multiple of `unit` that divides `dim` and is <= cap."""
    cap = max(unit, min(cap, dim))
    t = (cap // unit) * unit
    while dim % t != 0:
        t -= unit
    return t


# ----------------------------------------------------------------------------
# Pallas kernels
# ----------------------------------------------------------------------------

def _mm_kernel(a_ref, w_ref, b_ref, o_ref, acc_ref, *, act, n_k):
    """Tiled matmul; bias folded into acc init; activation in finalize."""
    @pl.when(pl.program_id(2) == 0)
    def _():
        acc_ref[...] = jnp.broadcast_to(b_ref[...], acc_ref.shape)

    acc_ref[...] += jnp.dot(a_ref[...], w_ref[...],
                            preferred_element_type=jnp.float32)

    @pl.when(pl.program_id(2) == n_k - 1)
    def _():
        acc = acc_ref[...]
        if act == "relu":
            acc = jnp.maximum(acc, 0.0)
        elif act == "sigmoid":
            acc = jax.nn.sigmoid(acc)
        o_ref[...] = acc


def _inf_gates_kernel(a_ref, w_ref, base_ref, state_ref,
                      state_out_ref, prior_out_ref, acc_ref, *, H, n_k):
    """Inference Conv2dLSTM gate conv fused with the prior conv.

    acc = base + hg_col @ [W_gates | W_prior]   (base = static contrib + biases)
    gate channel order: forget, input, output, state.
    state refs are packed 128-lane blocks [c | h | pad].
    """
    kk = pl.program_id(1)
    G = 4 * H

    @pl.when(kk == 0)
    def _():
        acc_ref[...] = base_ref[...]

    acc_ref[...] += jnp.dot(a_ref[...], w_ref[...],
                            preferred_element_type=jnp.float32)

    @pl.when(kk == n_k - 1)
    def _():
        g = acc_ref[...]
        f = jax.nn.sigmoid(g[:, 0:H])
        i = jax.nn.sigmoid(g[:, H:2 * H])
        o = jax.nn.sigmoid(g[:, 2 * H:3 * H])
        s = jnp.tanh(g[:, 3 * H:G])
        c = state_ref[:, 0:H]
        c_new = f * c + i * s
        h_new = o * jnp.tanh(c_new)
        pad = jnp.zeros_like(g[:, 0:2 * H])
        state_out_ref[...] = jnp.concatenate([c_new, h_new, pad], axis=-1)
        prior_out_ref[...] = g[:, G:]        # 128-lane padded prior params


def _gen_gates_kernel(a_ref, w_ref, base_ref, state_ref, up_w_ref,
                      state_out_ref, up_out_ref, acc_ref, *, H, n_k):
    """Generator Conv2dLSTM gate conv; upsample matmul fused into epilogue."""
    kk = pl.program_id(1)
    G = 4 * H

    @pl.when(kk == 0)
    def _():
        acc_ref[...] = base_ref[...]

    acc_ref[...] += jnp.dot(a_ref[...], w_ref[...],
                            preferred_element_type=jnp.float32)

    @pl.when(kk == n_k - 1)
    def _():
        g = acc_ref[...]
        f = jax.nn.sigmoid(g[:, 0:H])
        i = jax.nn.sigmoid(g[:, H:2 * H])
        o = jax.nn.sigmoid(g[:, 2 * H:3 * H])
        s = jnp.tanh(g[:, 3 * H:G])
        c = state_ref[:, 0:H]
        c_new = f * c + i * s
        h_new = o * jnp.tanh(c_new)
        pad = jnp.zeros_like(g[:, 0:2 * H])
        state_out_ref[...] = jnp.concatenate([c_new, h_new, pad], axis=-1)
        up_out_ref[...] = jnp.dot(h_new.astype(jnp.bfloat16), up_w_ref[...],
                                  preferred_element_type=jnp.float32)


def _post_latent_kernel(a_ref, w_ref, b_ref, pe_ref, zkl_ref, acc_ref,
                        *, Z, n_k):
    """Posterior conv + reparameterized sample + Normal KL.

    pe_ref lanes: [p_mu(Z) | p_logvar(Z) | eps(Z) | 0...]; output lanes:
    [z(Z) | kl(Z) | 0...] (single lane-dense store).
    """
    kk = pl.program_id(1)

    @pl.when(kk == 0)
    def _():
        acc_ref[...] = jnp.broadcast_to(b_ref[...], acc_ref.shape)

    acc_ref[...] += jnp.dot(a_ref[...], w_ref[...],
                            preferred_element_type=jnp.float32)

    @pl.when(kk == n_k - 1)
    def _():
        q = acc_ref[...]
        q_mu, q_lv = q[:, 0:Z], q[:, Z:2 * Z]
        pe = pe_ref[...]
        p_mu, p_lv, eps = pe[:, 0:Z], pe[:, Z:2 * Z], pe[:, 2 * Z:3 * Z]
        # TODO(synk): scale = exp(log_var) assumed (generator source not in
        # spec); the KL below is self-consistent with that convention.
        q_std = jnp.exp(q_lv)
        inv_p_std = jnp.exp(-p_lv)
        z = q_mu + q_std * eps
        ratio = q_std * inv_p_std
        diff = (q_mu - p_mu) * inv_p_std
        kl = 0.5 * (ratio * ratio + diff * diff - 1.0 - 2.0 * (q_lv - p_lv))
        pad = jnp.zeros_like(q[:, 2 * Z:])
        zkl_ref[...] = jnp.concatenate([z, kl, pad], axis=-1)


# ----------------------------------------------------------------------------
# Kernel wrappers
# ----------------------------------------------------------------------------

def matmul_fused(a, w_p, b_p, cout, act="none", keep_padded=False,
                 tm_cap=128, tk_cap=1536, tn_cap=256):
    """act(a @ w + b); a: (M,K) f32 im2col, w_p: (Kp,Np) bf16, b_p: (1,Np) f32."""
    M, K = a.shape
    Kp, Np = w_p.shape
    pad_m = (-M) % 16
    pad_k = Kp - K
    if pad_m or pad_k:
        a = jnp.pad(a, ((0, pad_m), (0, pad_k)))
    a = a.astype(jnp.bfloat16)
    Mp = M + pad_m

    tm = _pick_tile(Mp, tm_cap, 16)
    tk = _pick_tile(Kp, tk_cap, 128)
    tn = _pick_tile(Np, tn_cap, 128)
    n_k = Kp // tk

    out = pl.pallas_call(
        functools.partial(_mm_kernel, act=act, n_k=n_k),
        out_shape=jax.ShapeDtypeStruct((Mp, Np), jnp.float32),
        grid=(Mp // tm, Np // tn, n_k),
        in_specs=[
            pl.BlockSpec((tm, tk), lambda i, j, k: (i, k)),
            pl.BlockSpec((tk, tn), lambda i, j, k: (k, j)),
            pl.BlockSpec((1, tn), lambda i, j, k: (0, j)),
        ],
        out_specs=pl.BlockSpec((tm, tn), lambda i, j, k: (i, j)),
        scratch_shapes=[pltpu.VMEM((tm, tn), jnp.float32)],
        compiler_params=pltpu.CompilerParams(
            dimension_semantics=("parallel", "parallel", "arbitrary")),
    )(a, w_p, b_p)

    if keep_padded:
        return out[:M]
    return out[:M, :cout]


def conv_inf_gates_prior(a, w_c, base_c, state, H, tm_cap=128, tk_cap=1536):
    """Fused inference-gate conv + Conv2dLSTM update + prior conv.

    a: (M,K) hg_col; w_c: (Kp, 4H+Pw) bf16 (gates | prior, padded);
    base_c: (M, 4H+Pw) f32 (static gate contrib + biases); state: (M, 4H) packed.
    Returns (state_new (M,4H), prior_params (M,Pw)).
    """
    M, K = a.shape
    Kp, Nc = w_c.shape
    G = 4 * H
    Pw = Nc - G
    pad_m = (-M) % 16
    if pad_m:
        base_c = jnp.pad(base_c, ((0, pad_m), (0, 0)))
        state = jnp.pad(state, ((0, pad_m), (0, 0)))
    if pad_m or K != Kp:
        a = jnp.pad(a, ((0, pad_m), (0, Kp - K)))
    a = a.astype(jnp.bfloat16)
    Mp = M + pad_m

    tm = _pick_tile(Mp, tm_cap, 16)
    tk = _pick_tile(Kp, tk_cap, 128)
    n_k = Kp // tk

    state_new, prior = pl.pallas_call(
        functools.partial(_inf_gates_kernel, H=H, n_k=n_k),
        out_shape=(jax.ShapeDtypeStruct((Mp, G), jnp.float32),
                   jax.ShapeDtypeStruct((Mp, Pw), jnp.float32)),
        grid=(Mp // tm, n_k),
        in_specs=[
            pl.BlockSpec((tm, tk), lambda i, k: (i, k)),
            pl.BlockSpec((tk, Nc), lambda i, k: (k, 0)),
            pl.BlockSpec((tm, Nc), lambda i, k: (i, 0)),
            pl.BlockSpec((tm, G), lambda i, k: (i, 0)),
        ],
        out_specs=(pl.BlockSpec((tm, G), lambda i, k: (i, 0)),
                   pl.BlockSpec((tm, Pw), lambda i, k: (i, 0))),
        scratch_shapes=[pltpu.VMEM((tm, Nc), jnp.float32)],
        compiler_params=pltpu.CompilerParams(
            dimension_semantics=("parallel", "arbitrary")),
    )(a, w_c, base_c, state)
    if pad_m:
        state_new, prior = state_new[:M], prior[:M]
    return state_new, prior


def conv_gen_gates_up(a, w_p, base, state, up_w, H, tm_cap=128, tk_cap=1536):
    """Fused generator-gate conv + Conv2dLSTM update + upsample matmul."""
    M, K = a.shape
    Kp, G = w_p.shape
    assert G == 4 * H
    U = up_w.shape[1]
    pad_m = (-M) % 16
    if pad_m:
        base = jnp.pad(base, ((0, pad_m), (0, 0)))
        state = jnp.pad(state, ((0, pad_m), (0, 0)))
    if pad_m or K != Kp:
        a = jnp.pad(a, ((0, pad_m), (0, Kp - K)))
    a = a.astype(jnp.bfloat16)
    Mp = M + pad_m

    tm = _pick_tile(Mp, tm_cap, 16)
    tk = _pick_tile(Kp, tk_cap, 128)
    n_k = Kp // tk

    state_new, up = pl.pallas_call(
        functools.partial(_gen_gates_kernel, H=H, n_k=n_k),
        out_shape=(jax.ShapeDtypeStruct((Mp, G), jnp.float32),
                   jax.ShapeDtypeStruct((Mp, U), jnp.float32)),
        grid=(Mp // tm, n_k),
        in_specs=[
            pl.BlockSpec((tm, tk), lambda i, k: (i, k)),
            pl.BlockSpec((tk, G), lambda i, k: (k, 0)),
            pl.BlockSpec((tm, G), lambda i, k: (i, 0)),
            pl.BlockSpec((tm, G), lambda i, k: (i, 0)),
            pl.BlockSpec((H, U), lambda i, k: (0, 0)),
        ],
        out_specs=(pl.BlockSpec((tm, G), lambda i, k: (i, 0)),
                   pl.BlockSpec((tm, U), lambda i, k: (i, 0))),
        scratch_shapes=[pltpu.VMEM((tm, G), jnp.float32)],
        compiler_params=pltpu.CompilerParams(
            dimension_semantics=("parallel", "arbitrary")),
    )(a, w_p, base, state, up_w)
    if pad_m:
        state_new, up = state_new[:M], up[:M]
    return state_new, up


def conv_posterior_latent(a, w_p, b_p, pe, Z, tm_cap=128, tk_cap=1536):
    """Posterior conv + reparameterized sample + KL, packed 128-lane I/O."""
    M, K = a.shape
    Kp, Np = w_p.shape
    assert 3 * Z <= Np
    pad_m = (-M) % 16
    if pad_m:
        pe = jnp.pad(pe, ((0, pad_m), (0, 0)))
    if pad_m or K != Kp:
        a = jnp.pad(a, ((0, pad_m), (0, Kp - K)))
    a = a.astype(jnp.bfloat16)
    Mp = M + pad_m

    tm = _pick_tile(Mp, tm_cap, 16)
    tk = _pick_tile(Kp, tk_cap, 128)
    n_k = Kp // tk

    zkl = pl.pallas_call(
        functools.partial(_post_latent_kernel, Z=Z, n_k=n_k),
        out_shape=jax.ShapeDtypeStruct((Mp, Np), jnp.float32),
        grid=(Mp // tm, n_k),
        in_specs=[
            pl.BlockSpec((tm, tk), lambda i, k: (i, k)),
            pl.BlockSpec((tk, Np), lambda i, k: (k, 0)),
            pl.BlockSpec((1, Np), lambda i, k: (0, 0)),
            pl.BlockSpec((tm, Np), lambda i, k: (i, 0)),
        ],
        out_specs=pl.BlockSpec((tm, Np), lambda i, k: (i, 0)),
        scratch_shapes=[pltpu.VMEM((tm, Np), jnp.float32)],
        compiler_params=pltpu.CompilerParams(
            dimension_semantics=("parallel", "arbitrary")),
    )(a, w_p, b_p, pe)
    return zkl[:M] if pad_m else zkl


# ----------------------------------------------------------------------------
# Conv glue: im2col (fused under jit) + Pallas matmul
# ----------------------------------------------------------------------------

def _im2col(x, k, stride, pad):
    """x: (N,H,W,C) -> ((N*Ho*Wo, k*k*C), (N,Ho,Wo))."""
    N, H, W, C = x.shape
    if pad:
        x = jnp.pad(x, ((0, 0), (pad, pad), (pad, pad), (0, 0)))
    Ho = (H + 2 * pad - k) // stride + 1
    Wo = (W + 2 * pad - k) // stride + 1
    cols = []
    for di in range(k):
        for dj in range(k):
            cols.append(x[:, di:di + stride * Ho:stride,
                          dj:dj + stride * Wo:stride, :])
    col = jnp.concatenate(cols, axis=-1)
    return col.reshape(N * Ho * Wo, k * k * C), (N, Ho, Wo)


def conv2d(x, wb, cout, *, k, stride=1, pad=0, act="none"):
    """x: NHWC; wb = (padded weight bf16, padded bias f32)."""
    w_p, b_p = wb
    col, (N, Ho, Wo) = _im2col(x, k, stride, pad)
    out = matmul_fused(col, w_p, b_p, cout, act=act)
    return out.reshape(N, Ho, Wo, cout)


# ----------------------------------------------------------------------------
# Parameter init (deterministic, PyTorch-conv-style uniform), pre-padded/bf16
# ----------------------------------------------------------------------------

def _pad_weight(w, b):
    K, N = w.shape
    Kp, Np = _round_up(K, 128), _round_up(N, 128)
    w_p = jnp.pad(w, ((0, Kp - K), (0, Np - N))).astype(jnp.bfloat16)
    b_p = jnp.pad(b.reshape(1, N), ((0, 0), (0, Np - N))).astype(jnp.float32)
    return w_p, b_p


def _conv_init_raw(key, cin, cout, k, bias=True):
    fan_in = cin * k * k
    bound = 1.0 / math.sqrt(fan_in)
    kw, kb = jax.random.split(key)
    w = jax.random.uniform(kw, (k * k * cin, cout), jnp.float32, -bound, bound)
    b = (jax.random.uniform(kb, (cout,), jnp.float32, -bound, bound)
         if bias else jnp.zeros((cout,), jnp.float32))
    return w, b


def _conv_init(key, cin, cout, k, bias=True):
    return _pad_weight(*_conv_init_raw(key, cin, cout, k, bias))


def _split_conv_init(key, cin_dyn, cin_static, cout, k):
    """Gate conv split into a dynamic (per-refinement) part and a static
    (loop-invariant) part along input channels; bias on the static part."""
    fan_in = (cin_dyn + cin_static) * k * k
    bound = 1.0 / math.sqrt(fan_in)
    kd, ks, kb = jax.random.split(key, 3)
    w_dyn = jax.random.uniform(kd, (k * k * cin_dyn, cout), jnp.float32, -bound, bound)
    w_sta = jax.random.uniform(ks, (k * k * cin_static, cout), jnp.float32, -bound, bound)
    b = jax.random.uniform(kb, (cout,), jnp.float32, -bound, bound)
    wd_p, _ = _pad_weight(w_dyn, jnp.zeros((cout,), jnp.float32))
    ws_p, b_p = _pad_weight(w_sta, b)
    return wd_p, ws_p, b_p


def init_tower(key, x_dim, v_dim, r_dim):
    rc = r_dim
    keys = jax.random.split(key, 8)
    # c5 + c6 share the same 3x3/s1/p1 im2col LHS -> fuse along N.
    w5, b5 = _conv_init_raw(keys[4], rc + v_dim, rc, 3)
    w6, b6 = _conv_init_raw(keys[5], rc + v_dim, rc // 2, 3)
    c56 = _pad_weight(jnp.concatenate([w5, w6], axis=1),
                      jnp.concatenate([b5, b6]))
    return {
        "c1": _conv_init(keys[0], x_dim, rc, 2),
        "c2": _conv_init(keys[1], rc, rc, 2),
        "c3": _conv_init(keys[2], rc, rc // 2, 3),
        "c4": _conv_init(keys[3], rc // 2, rc, 2),
        "c56": c56,
        "c7": _conv_init(keys[6], rc // 2, rc, 3),
        "c8": _conv_init(keys[7], rc, rc, 1),
    }


def init_generator(key, x_dim, v_dim, r_dim, z_dim, h_dim):
    keys = jax.random.split(key, 7)
    inf_wd, inf_ws, inf_b = _split_conv_init(
        keys[0], h_dim, x_dim + v_dim + r_dim, 4 * h_dim, 5)
    gen_wd, gen_ws, gen_b = _split_conv_init(
        keys[1], z_dim, v_dim + r_dim, 4 * h_dim, 5)
    post_w, post_b = _conv_init(keys[2], h_dim, 2 * z_dim, 5)
    prior_w, prior_b = _conv_init(keys[3], h_dim, 2 * z_dim, 5)
    # prior conv shares its LHS (hg_col) with the inference gate conv: fuse
    # their weights along N once, at init.
    inf_prior_w = jnp.concatenate([inf_wd, prior_w], axis=1)

    up_bound = 1.0 / math.sqrt(h_dim * 16)
    up_w = jax.random.uniform(keys[5], (h_dim, 16 * h_dim), jnp.float32,
                              -up_bound, up_bound).astype(jnp.bfloat16)
    # TODO(synk): upsample ConvTranspose bias taken as zero (generator
    # submodule source unavailable in the spec).
    return {
        "inf_core": (inf_prior_w, inf_ws, inf_b, prior_b),
        "gen_core": (gen_wd, gen_ws, gen_b),
        "posterior": (post_w, post_b),
        "observation": _conv_init(keys[4], h_dim, x_dim, 1),
        "upsample": up_w,
        "downsample": _conv_init(keys[6], x_dim, x_dim, 4, bias=False),
    }


# ----------------------------------------------------------------------------
# TowerRepresentation (pool=False)
# ----------------------------------------------------------------------------

def tower_representation(p, x_nchw, v, r_dim):
    rc = r_dim
    x = jnp.transpose(x_nchw, (0, 2, 3, 1))  # -> NHWC
    N, H, W, _ = x.shape
    skip_in = conv2d(x, p["c1"], rc, k=2, stride=2, act="relu")            # H/2
    skip_out = conv2d(skip_in, p["c2"], rc, k=2, stride=2, act="relu")     # H/4
    r = conv2d(skip_in, p["c3"], rc // 2, k=3, stride=1, pad=1, act="relu")
    r = conv2d(r, p["c4"], rc, k=2, stride=2, act="relu") + skip_out       # H/4
    h4, w4 = H // 4, W // 4
    v_b = jnp.broadcast_to(v.reshape(N, 1, 1, -1), (N, h4, w4, v.shape[-1]))
    skip_in = jnp.concatenate([r, v_b], axis=-1)
    s56 = conv2d(skip_in, p["c56"], rc + rc // 2, k=3, stride=1, pad=1, act="relu")
    skip_out = s56[..., :rc]
    r = s56[..., rc:]
    r = conv2d(r, p["c7"], rc, k=3, stride=1, pad=1, act="relu") + skip_out
    r = conv2d(r, p["c8"], rc, k=1, act="relu")
    return r  # (N, H/4, W/4, r_dim), NHWC


# ----------------------------------------------------------------------------
# GeneratorNetwork (DRAW-style, L refinements)
# ----------------------------------------------------------------------------

def generator_network(p, x_q_nchw, v_q, r, key, L, x_dim, z_dim, h_dim):
    # TODO(synk): the torch call passes an extra boolean flag to the generator
    # whose submodule source is unavailable; it is ignored here.
    assert 4 * h_dim == 128, "packed-state layout assumes 4*h_dim == 128"
    x = jnp.transpose(x_q_nchw, (0, 2, 3, 1))  # -> NHWC
    B, H, W, _ = x.shape
    h4, w4 = H // 4, W // 4
    v_b = jnp.broadcast_to(v_q.reshape(B, 1, 1, -1), (B, h4, w4, v_q.shape[-1]))
    M = B * h4 * w4
    G = 4 * h_dim

    inf_prior_w, inf_ws, inf_b, prior_b = p["inf_core"]
    gen_wd, gen_ws, gen_b = p["gen_core"]
    post_w, post_b = p["posterior"]
    up_w = p["upsample"]
    Np_post = post_w.shape[1]

    # packed LSTM states: [cell | hidden | pad] per row, kept packed across L
    state_i = jnp.zeros((M, G), jnp.float32)
    state_g = jnp.zeros((M, G), jnp.float32)
    u = jnp.zeros((B, H, W, h_dim), jnp.float32)
    kl_acc = jnp.zeros((M, Np_post), jnp.float32)

    x_ds = conv2d(x, p["downsample"], x_dim, k=4, stride=4)  # (B, h4, w4, x_dim)

    # Loop-invariant gate contributions (gate bias folded in), computed once;
    # prior bias occupies the second half of the combined base.
    inf_static_col, _ = _im2col(jnp.concatenate([x_ds, v_b, r], axis=-1), 5, 1, 2)
    inf_base = matmul_fused(inf_static_col, inf_ws, inf_b, G, keep_padded=True)
    inf_base_c = jnp.concatenate(
        [inf_base, jnp.broadcast_to(prior_b, (M, prior_b.shape[1]))], axis=-1)
    gen_static_col, _ = _im2col(jnp.concatenate([v_b, r], axis=-1), 5, 1, 2)
    gen_base = matmul_fused(gen_static_col, gen_ws, gen_b, G, keep_padded=True)

    keys = jax.random.split(key, L)

    for l in range(L):
        hidden_g = state_g[:, h_dim:2 * h_dim].reshape(B, h4, w4, h_dim)
        hg_col, _ = _im2col(hidden_g, 5, 1, 2)
        # inference gates + LSTM update + prior conv, one kernel
        state_i, prior = conv_inf_gates_prior(hg_col, inf_prior_w, inf_base_c,
                                              state_i, h_dim)

        hidden_i = state_i[:, h_dim:2 * h_dim].reshape(B, h4, w4, h_dim)
        hi_col, _ = _im2col(hidden_i, 5, 1, 2)
        eps = jax.random.normal(keys[l], (M, z_dim), jnp.float32)
        pe = prior.at[:, 2 * z_dim:3 * z_dim].set(eps)   # [p_mu|p_lv|eps|0...]
        zkl = conv_posterior_latent(hi_col, post_w, post_b, pe, z_dim)
        kl_acc = kl_acc + zkl
        z = zkl[:, :z_dim].reshape(B, h4, w4, z_dim)

        z_col, _ = _im2col(z, 5, 1, 2)
        # generator gates + LSTM update + upsample matmul, one kernel
        state_g, up = conv_gen_gates_up(z_col, gen_wd, gen_base, state_g,
                                        up_w, h_dim)
        u = u + up.reshape(B, h4, w4, 4, 4, h_dim).transpose(
            0, 1, 3, 2, 4, 5).reshape(B, H, W, h_dim)

    x_mu = conv2d(u, p["observation"], x_dim, k=1, act="sigmoid")
    kl = kl_acc[:, z_dim:2 * z_dim].reshape(B, h4, w4, z_dim)
    return x_mu, kl  # NHWC


# ----------------------------------------------------------------------------
# GenerativeQueryNetwork.forward
# ----------------------------------------------------------------------------

def compute_view_index(n_views, m, query_idx):
    view_bias = random.randint(0, m - 1)
    step = math.ceil(m / n_views)
    view_index = [(step * g + view_bias) % m for g in range(n_views)]
    return sorted(view_index)


def _gqn_apply(params, images, viewpoints, idx, query_idx, key, *, cfg):
    B, m, C, H, W = images.shape
    n_views = idx.shape[0]

    x = images[:, idx].reshape(B * n_views, C, H, W)
    v = viewpoints[:, idx].reshape(B * n_views, -1)

    phi = tower_representation(params["tower"], x, v, cfg["r_dim"])
    h4, w4 = H // 4, W // 4
    r = jnp.sum(phi.reshape(B, n_views, h4, w4, cfg["r_dim"]), axis=1)

    x_q = images[:, query_idx]
    v_q = viewpoints[:, query_idx]
    x_o = images[:, idx]

    x_mu, kl = generator_network(params["generator"], x_q, v_q, r, key,
                                 cfg["L"], cfg["x_dim"], cfg["z_dim"], cfg["h_dim"])

    # kernel-side NHWC -> PyTorch NCHW
    x_mu = jnp.transpose(x_mu, (0, 3, 1, 2))
    kl = jnp.transpose(kl, (0, 3, 1, 2))
    r_out = jnp.transpose(r, (0, 3, 1, 2))
    return x_mu, x_q, x_o, r_out, kl


_apply_cache = {}


def _get_apply_fn(cfg):
    key = tuple(sorted(cfg.items()))
    if key not in _apply_cache:
        _apply_cache[key] = jax.jit(functools.partial(_gqn_apply, cfg=dict(cfg)))
    return _apply_cache[key]


def gqn_forward(params, images, viewpoints, flag, frame, key, cfg):
    # Host-side view selection stays OUTSIDE jit; n_views is encoded
    # statically in the idx array shape (at most 4 cached jit variants).
    B, m = viewpoints.shape[:2]
    n_views = random.randint(2, 5)
    indices = list(range(m))  # torch.randperm(m).sort()[0] == arange(m)
    query_idx = random.randint(0, m - 1) if flag else frame
    view_index = compute_view_index(n_views, m, query_idx)
    idx = jnp.array([indices[i] for i in view_index], dtype=jnp.int32)

    apply_fn = _get_apply_fn(cfg)
    x_mu, x_q, x_o, r_out, kl = apply_fn(params, images, viewpoints, idx,
                                         jnp.int32(query_idx), key)
    return [x_mu, x_q, x_o, r_out, kl, query_idx]


# ----------------------------------------------------------------------------
# Main
# ----------------------------------------------------------------------------

if __name__ == "__main__":
    random.seed(0)
    key = jax.random.PRNGKey(0)
    cfg = dict(x_dim=3, v_dim=7, r_dim=32, h_dim=32, z_dim=8, L=3)
    B, m, H, W = 2, 6, 16, 16

    k_img, k_vp, k_tower, k_gen, k_noise = jax.random.split(key, 5)
    images = jax.random.uniform(k_img, (B, m, cfg["x_dim"], H, W), jnp.float32)
    viewpoints = jax.random.normal(k_vp, (B, m, cfg["v_dim"]), jnp.float32)

    params = {
        "tower": init_tower(k_tower, cfg["x_dim"], cfg["v_dim"], cfg["r_dim"]),
        "generator": init_generator(k_gen, cfg["x_dim"], cfg["v_dim"],
                                    cfg["r_dim"], cfg["z_dim"], cfg["h_dim"]),
    }

    x_mu, x_q, x_o, r, kl, query_idx = gqn_forward(
        params, images, viewpoints, True, 0, k_noise, cfg)
    jax.block_until_ready((x_mu, x_q, x_o, r, kl))

    assert x_mu.shape == (B, cfg["x_dim"], H, W)
    assert x_q.shape == (B, cfg["x_dim"], H, W)
    assert r.shape == (B, cfg["r_dim"], H // 4, W // 4)
    assert kl.shape == (B, cfg["z_dim"], H // 4, W // 4)
    assert bool(jnp.all(jnp.isfinite(x_mu))) and bool(jnp.all(jnp.isfinite(kl)))
    print("KERNEL_OK")
</pallas_src>

<mosaic_0001>
module attributes {stable_mosaic.version = 11 : i64} {
  func.func @_mm_kernel(%arg0: i32, %arg1: i32, %arg2: i32, %arg3: memref<128x128xbf16, #tpu.memory_space<vmem>>, %arg4: memref<128x128xbf16, #tpu.memory_space<vmem>>, %arg5: memref<1x128xf32, #tpu.memory_space<vmem>>, %arg6: memref<128x128xf32, #tpu.memory_space<vmem>>, %arg7: memref<128x128xf32, #tpu.memory_space<vmem>>) attributes {dimension_semantics = [#tpu.dimension_semantics<parallel>, #tpu.dimension_semantics<parallel>, #tpu.dimension_semantics<arbitrary>], iteration_bounds = array<i64: 5, 1, 1>, scalar_prefetch = 0 : i64, scratch_operands = 1 : i64, tpu.core_type = #tpu.core_type<tc>, window_params = [{transform_indices = @transform_0, window_bounds = array<i64: 128, 128>}, {transform_indices = @transform_1, window_bounds = array<i64: 128, 128>}, {transform_indices = @transform_2, window_bounds = array<i64: 1, 128>}, {transform_indices = @transform_3, window_bounds = array<i64: 128, 128>}]} {
    %c0_i32 = arith.constant 0 : i32
    %0 = arith.cmpi eq, %arg2, %c0_i32 : i32
    %1 = arith.extui %0 : i1 to i32
    %c0_i32_0 = arith.constant 0 : i32
    %2 = arith.cmpi ne, %1, %c0_i32_0 : i32
    scf.if %2 {
      %c0_10 = arith.constant 0 : index
      %c0_11 = arith.constant 0 : index
      %12 = vector.load %arg5[%c0_10, %c0_11] : memref<1x128xf32, #tpu.memory_space<vmem>>, vector<1x128xf32>
      %13 = vector.shape_cast %12 : vector<1x128xf32> to vector<1x128xf32>
      %14 = vector.broadcast %13 : vector<1x128xf32> to vector<128x128xf32>
      %c0_12 = arith.constant 0 : index
      %c0_13 = arith.constant 0 : index
      %15 = vector.load %arg7[%c0_12, %c0_13] : memref<128x128xf32, #tpu.memory_space<vmem>>, vector<128x128xf32>
      tpu.vector_store %arg7[%c0_12, %c0_13], %14 {strides = array<i32>} : memref<128x128xf32, #tpu.memory_space<vmem>>, vector<128x128xf32>,
    } else {
    }
    %c0 = arith.constant 0 : index
    %c0_1 = arith.constant 0 : index
    %3 = vector.load %arg7[%c0, %c0_1] : memref<128x128xf32, #tpu.memory_space<vmem>>, vector<128x128xf32>
    %c0_2 = arith.constant 0 : index
    %c0_3 = arith.constant 0 : index
    %4 = vector.load %arg3[%c0_2, %c0_3] : memref<128x128xbf16, #tpu.memory_space<vmem>>, vector<128x128xbf16>
    %c0_4 = arith.constant 0 : index
    %c0_5 = arith.constant 0 : index
    %5 = vector.load %arg4[%c0_4, %c0_5] : memref<128x128xbf16, #tpu.memory_space<vmem>>, vector<128x128xbf16>
    %cst = arith.constant dense<0.000000e+00> : vector<128x128xf32>
    %6 = tpu.matmul %4, %5, %cst {dimension_numbers = #tpu.dot_dimension_numbers<[1], [0], [0], [1], [0, 0, 1, 1], [], []>} : vector<128x128xbf16>, vector<128x128xbf16>, vector<128x128xf32> -> vector<128x128xf32>
    %7 = arith.addf %3, %6 : vector<128x128xf32>
    %c0_6 = arith.constant 0 : index
    %c0_7 = arith.constant 0 : index
    %8 = vector.load %arg7[%c0_6, %c0_7] : memref<128x128xf32, #tpu.memory_space<vmem>>, vector<128x128xf32>
    tpu.vector_store %arg7[%c0_6, %c0_7], %7 {strides = array<i32>} : memref<128x128xf32, #tpu.memory_space<vmem>>, vector<128x128xf32>,
    %c0_i32_8 = arith.constant 0 : i32
    %9 = arith.cmpi eq, %arg2, %c0_i32_8 : i32
    %10 = arith.extui %9 : i1 to i32
    %c0_i32_9 = arith.constant 0 : i32
    %11 = arith.cmpi ne, %10, %c0_i32_9 : i32
    scf.if %11 {
      %c0_10 = arith.constant 0 : index
      %c0_11 = arith.constant 0 : index
      %12 = vector.load %arg7[%c0_10, %c0_11] : memref<128x128xf32, #tpu.memory_space<vmem>>, vector<128x128xf32>
      %cst_12 = arith.constant 0.000000e+00 : f32
      %13 = vector.broadcast %cst_12 : f32 to vector<128x128xf32>
      %14 = arith.maximumf %12, %13 : vector<128x128xf32>
      %c0_13 = arith.constant 0 : index
      %c0_14 = arith.constant 0 : index
      %15 = vector.load %arg6[%c0_13, %c0_14] : memref<128x128xf32, #tpu.memory_space<vmem>>, vector<128x128xf32>
      tpu.vector_store %arg6[%c0_13, %c0_14], %14 {strides = array<i32>} : memref<128x128xf32, #tpu.memory_space<vmem>>, vector<128x128xf32>,
    } else {
    }
    return
  }
  func.func @transform_0(%arg0: i32, %arg1: i32, %arg2: i32) -> (i32, i32) {
    %c0_i32 = arith.constant 0 : i32
    return %arg0, %arg2 : i32, i32
  }
  func.func @transform_1(%arg0: i32, %arg1: i32, %arg2: i32) -> (i32, i32) {
    %c0_i32 = arith.constant 0 : i32
    return %arg2, %arg1 : i32, i32
  }
  func.func @transform_2(%arg0: i32, %arg1: i32, %arg2: i32) -> (i32, i32) {
    %c0_i32 = arith.constant 0 : i32
    %c0_i32_0 = arith.constant 0 : i32
    return %c0_i32, %arg1 : i32, i32
  }
  func.func @transform_3(%arg0: i32, %arg1: i32, %arg2: i32) -> (i32, i32) {
    %c0_i32 = arith.constant 0 : i32
    return %arg0, %arg1 : i32, i32
  }
}

module attributes {stable_mosaic.version = 11 : i64} {
  func.func @_mm_kernel(%arg0: i32, %arg1: i32, %arg2: i32, %arg3: memref<128x384xbf16, #tpu.memory_space<vmem>>, %arg4: memref<384x128xbf16, #tpu.memory_space<vmem>>, %arg5: memref<1x128xf32, #tpu.memory_space<vmem>>, %arg6: memref<128x128xf32, #tpu.memory_space<vmem>>, %arg7: memref<128x128xf32, #tpu.memory_space<vmem>>) attributes {dimension_semantics = [#tpu.dimension_semantics<parallel>, #tpu.dimension_semantics<parallel>, #tpu.dimension_semantics<arbitrary>], iteration_bounds = array<i64: 5, 1, 1>, scalar_prefetch = 0 : i64, scratch_operands = 1 : i64, tpu.core_type = #tpu.core_type<tc>, window_params = [{transform_indices = @transform_0, window_bounds = array<i64: 128, 384>}, {transform_indices = @transform_1, window_bounds = array<i64: 384, 128>}, {transform_indices = @transform_2, window_bounds = array<i64: 1, 128>}, {transform_indices = @transform_3, window_bounds = array<i64: 128, 128>}]} {
    %c0_i32 = arith.constant 0 : i32
    %0 = arith.cmpi eq, %arg2, %c0_i32 : i32
    %1 = arith.extui %0 : i1 to i32
    %c0_i32_0 = arith.constant 0 : i32
    %2 = arith.cmpi ne, %1, %c0_i32_0 : i32
    scf.if %2 {
      %c0_10 = arith.constant 0 : index
      %c0_11 = arith.constant 0 : index
      %12 = vector.load %arg5[%c0_10, %c0_11] : memref<1x128xf32, #tpu.memory_space<vmem>>, vector<1x128xf32>
      %13 = vector.shape_cast %12 : vector<1x128xf32> to vector<1x128xf32>
      %14 = vector.broadcast %13 : vector<1x128xf32> to vector<128x128xf32>
      %c0_12 = arith.constant 0 : index
      %c0_13 = arith.constant 0 : index
      %15 = vector.load %arg7[%c0_12, %c0_13] : memref<128x128xf32, #tpu.memory_space<vmem>>, vector<128x128xf32>
      tpu.vector_store %arg7[%c0_12, %c0_13], %14 {strides = array<i32>} : memref<128x128xf32, #tpu.memory_space<vmem>>, vector<128x128xf32>,
    } else {
    }
    %c0 = arith.constant 0 : index
    %c0_1 = arith.constant 0 : index
    %3 = vector.load %arg7[%c0, %c0_1] : memref<128x128xf32, #tpu.memory_space<vmem>>, vector<128x128xf32>
    %c0_2 = arith.constant 0 : index
    %c0_3 = arith.constant 0 : index
    %4 = vector.load %arg3[%c0_2, %c0_3] : memref<128x384xbf16, #tpu.memory_space<vmem>>, vector<128x384xbf16>
    %c0_4 = arith.constant 0 : index
    %c0_5 = arith.constant 0 : index
    %5 = vector.load %arg4[%c0_4, %c0_5] : memref<384x128xbf16, #tpu.memory_space<vmem>>, vector<384x128xbf16>
    %cst = arith.constant dense<0.000000e+00> : vector<128x128xf32>
    %6 = tpu.matmul %4, %5, %cst {dimension_numbers = #tpu.dot_dimension_numbers<[1], [0], [0], [1], [0, 0, 1, 1], [], []>} : vector<128x384xbf16>, vector<384x128xbf16>, vector<128x128xf32> -> vector<128x128xf32>
    %7 = arith.addf %3, %6 : vector<128x128xf32>
    %c0_6 = arith.constant 0 : index
    %c0_7 = arith.constant 0 : index
    %8 = vector.load %arg7[%c0_6, %c0_7] : memref<128x128xf32, #tpu.memory_space<vmem>>, vector<128x128xf32>
    tpu.vector_store %arg7[%c0_6, %c0_7], %7 {strides = array<i32>} : memref<128x128xf32, #tpu.memory_space<vmem>>, vector<128x128xf32>,
    %c0_i32_8 = arith.constant 0 : i32
    %9 = arith.cmpi eq, %arg2, %c0_i32_8 : i32
    %10 = arith.extui %9 : i1 to i32
    %c0_i32_9 = arith.constant 0 : i32
    %11 = arith.cmpi ne, %10, %c0_i32_9 : i32
    scf.if %11 {
      %c0_10 = arith.constant 0 : index
      %c0_11 = arith.constant 0 : index
      %12 = vector.load %arg7[%c0_10, %c0_11] : memref<128x128xf32, #tpu.memory_space<vmem>>, vector<128x128xf32>
      %cst_12 = arith.constant 0.000000e+00 : f32
      %13 = vector.broadcast %cst_12 : f32 to vector<128x128xf32>
      %14 = arith.maximumf %12, %13 : vector<128x128xf32>
      %c0_13 = arith.constant 0 : index
      %c0_14 = arith.constant 0 : index
      %15 = vector.load %arg6[%c0_13, %c0_14] : memref<128x128xf32, #tpu.memory_space<vmem>>, vector<128x128xf32>
      tpu.vector_store %arg6[%c0_13, %c0_14], %14 {strides = array<i32>} : memref<128x128xf32, #tpu.memory_space<vmem>>, vector<128x128xf32>,
    } else {
    }
    return
  }
  func.func @transform_0(%arg0: i32, %arg1: i32, %arg2: i32) -> (i32, i32) {
    %c0_i32 = arith.constant 0 : i32
    return %arg0, %arg2 : i32, i32
  }
  func.func @transform_1(%arg0: i32, %arg1: i32, %arg2: i32) -> (i32, i32) {
    %c0_i32 = arith.constant 0 : i32
    return %arg2, %arg1 : i32, i32
  }
  func.func @transform_2(%arg0: i32, %arg1: i32, %arg2: i32) -> (i32, i32) {
    %c0_i32 = arith.constant 0 : i32
    %c0_i32_0 = arith.constant 0 : i32
    return %c0_i32, %arg1 : i32, i32
  }
  func.func @transform_3(%arg0: i32, %arg1: i32, %arg2: i32) -> (i32, i32) {
    %c0_i32 = arith.constant 0 : i32
    return %arg0, %arg1 : i32, i32
  }
}

module attributes {stable_mosaic.version = 11 : i64} {
  func.func @_mm_kernel(%arg0: i32, %arg1: i32, %arg2: i32, %arg3: memref<80x128xbf16, #tpu.memory_space<vmem>>, %arg4: memref<128x128xbf16, #tpu.memory_space<vmem>>, %arg5: memref<1x128xf32, #tpu.memory_space<vmem>>, %arg6: memref<80x128xf32, #tpu.memory_space<vmem>>, %arg7: memref<80x128xf32, #tpu.memory_space<vmem>>) attributes {dimension_semantics = [#tpu.dimension_semantics<parallel>, #tpu.dimension_semantics<parallel>, #tpu.dimension_semantics<arbitrary>], iteration_bounds = array<i64: 2, 1, 1>, scalar_prefetch = 0 : i64, scratch_operands = 1 : i64, tpu.core_type = #tpu.core_type<tc>, window_params = [{transform_indices = @transform_0, window_bounds = array<i64: 80, 128>}, {transform_indices = @transform_1, window_bounds = array<i64: 128, 128>}, {transform_indices = @transform_2, window_bounds = array<i64: 1, 128>}, {transform_indices = @transform_3, window_bounds = array<i64: 80, 128>}]} {
    %c0_i32 = arith.constant 0 : i32
    %0 = arith.cmpi eq, %arg2, %c0_i32 : i32
    %1 = arith.extui %0 : i1 to i32
    %c0_i32_0 = arith.constant 0 : i32
    %2 = arith.cmpi ne, %1, %c0_i32_0 : i32
    scf.if %2 {
      %c0_10 = arith.constant 0 : index
      %c0_11 = arith.constant 0 : index
      %12 = vector.load %arg5[%c0_10, %c0_11] : memref<1x128xf32, #tpu.memory_space<vmem>>, vector<1x128xf32>
      %13 = vector.shape_cast %12 : vector<1x128xf32> to vector<1x128xf32>
      %14 = vector.broadcast %13 : vector<1x128xf32> to vector<80x128xf32>
      %c0_12 = arith.constant 0 : index
      %c0_13 = arith.constant 0 : index
      %15 = vector.load %arg7[%c0_12, %c0_13] : memref<80x128xf32, #tpu.memory_space<vmem>>, vector<80x128xf32>
      tpu.vector_store %arg7[%c0_12, %c0_13], %14 {strides = array<i32>} : memref<80x128xf32, #tpu.memory_space<vmem>>, vector<80x128xf32>,
    } else {
    }
    %c0 = arith.constant 0 : index
    %c0_1 = arith.constant 0 : index
    %3 = vector.load %arg7[%c0, %c0_1] : memref<80x128xf32, #tpu.memory_space<vmem>>, vector<80x128xf32>
    %c0_2 = arith.constant 0 : index
    %c0_3 = arith.constant 0 : index
    %4 = vector.load %arg3[%c0_2, %c0_3] : memref<80x128xbf16, #tpu.memory_space<vmem>>, vector<80x128xbf16>
    %c0_4 = arith.constant 0 : index
    %c0_5 = arith.constant 0 : index
    %5 = vector.load %arg4[%c0_4, %c0_5] : memref<128x128xbf16, #tpu.memory_space<vmem>>, vector<128x128xbf16>
    %cst = arith.constant dense<0.000000e+00> : vector<80x128xf32>
    %6 = tpu.matmul %4, %5, %cst {dimension_numbers = #tpu.dot_dimension_numbers<[1], [0], [0], [1], [0, 0, 1, 1], [], []>} : vector<80x128xbf16>, vector<128x128xbf16>, vector<80x128xf32> -> vector<80x128xf32>
    %7 = arith.addf %3, %6 : vector<80x128xf32>
    %c0_6 = arith.constant 0 : index
    %c0_7 = arith.constant 0 : index
    %8 = vector.load %arg7[%c0_6, %c0_7] : memref<80x128xf32, #tpu.memory_space<vmem>>, vector<80x128xf32>
    tpu.vector_store %arg7[%c0_6, %c0_7], %7 {strides = array<i32>} : memref<80x128xf32, #tpu.memory_space<vmem>>, vector<80x128xf32>,
    %c0_i32_8 = arith.constant 0 : i32
    %9 = arith.cmpi eq, %arg2, %c0_i32_8 : i32
    %10 = arith.extui %9 : i1 to i32
    %c0_i32_9 = arith.constant 0 : i32
    %11 = arith.cmpi ne, %10, %c0_i32_9 : i32
    scf.if %11 {
      %c0_10 = arith.constant 0 : index
      %c0_11 = arith.constant 0 : index
      %12 = vector.load %arg7[%c0_10, %c0_11] : memref<80x128xf32, #tpu.memory_space<vmem>>, vector<80x128xf32>
      %cst_12 = arith.constant 0.000000e+00 : f32
      %13 = vector.broadcast %cst_12 : f32 to vector<80x128xf32>
      %14 = arith.maximumf %12, %13 : vector<80x128xf32>
      %c0_13 = arith.constant 0 : index
      %c0_14 = arith.constant 0 : index
      %15 = vector.load %arg6[%c0_13, %c0_14] : memref<80x128xf32, #tpu.memory_space<vmem>>, vector<80x128xf32>
      tpu.vector_store %arg6[%c0_13, %c0_14], %14 {strides = array<i32>} : memref<80x128xf32, #tpu.memory_space<vmem>>, vector<80x128xf32>,
    } else {
    }
    return
  }
  func.func @transform_0(%arg0: i32, %arg1: i32, %arg2: i32) -> (i32, i32) {
    %c0_i32 = arith.constant 0 : i32
    return %arg0, %arg2 : i32, i32
  }
  func.func @transform_1(%arg0: i32, %arg1: i32, %arg2: i32) -> (i32, i32) {
    %c0_i32 = arith.constant 0 : i32
    return %arg2, %arg1 : i32, i32
  }
  func.func @transform_2(%arg0: i32, %arg1: i32, %arg2: i32) -> (i32, i32) {
    %c0_i32 = arith.constant 0 : i32
    %c0_i32_0 = arith.constant 0 : i32
    return %c0_i32, %arg1 : i32, i32
  }
  func.func @transform_3(%arg0: i32, %arg1: i32, %arg2: i32) -> (i32, i32) {
    %c0_i32 = arith.constant 0 : i32
    return %arg0, %arg1 : i32, i32
  }
}

module attributes {stable_mosaic.version = 11 : i64} {
  func.func @_mm_kernel(%arg0: i32, %arg1: i32, %arg2: i32, %arg3: memref<80x384xbf16, #tpu.memory_space<vmem>>, %arg4: memref<384x128xbf16, #tpu.memory_space<vmem>>, %arg5: memref<1x128xf32, #tpu.memory_space<vmem>>, %arg6: memref<80x128xf32, #tpu.memory_space<vmem>>, %arg7: memref<80x128xf32, #tpu.memory_space<vmem>>) attributes {dimension_semantics = [#tpu.dimension_semantics<parallel>, #tpu.dimension_semantics<parallel>, #tpu.dimension_semantics<arbitrary>], iteration_bounds = array<i64: 2, 1, 1>, scalar_prefetch = 0 : i64, scratch_operands = 1 : i64, tpu.core_type = #tpu.core_type<tc>, window_params = [{transform_indices = @transform_0, window_bounds = array<i64: 80, 384>}, {transform_indices = @transform_1, window_bounds = array<i64: 384, 128>}, {transform_indices = @transform_2, window_bounds = array<i64: 1, 128>}, {transform_indices = @transform_3, window_bounds = array<i64: 80, 128>}]} {
    %c0_i32 = arith.constant 0 : i32
    %0 = arith.cmpi eq, %arg2, %c0_i32 : i32
    %1 = arith.extui %0 : i1 to i32
    %c0_i32_0 = arith.constant 0 : i32
    %2 = arith.cmpi ne, %1, %c0_i32_0 : i32
    scf.if %2 {
      %c0_10 = arith.constant 0 : index
      %c0_11 = arith.constant 0 : index
      %12 = vector.load %arg5[%c0_10, %c0_11] : memref<1x128xf32, #tpu.memory_space<vmem>>, vector<1x128xf32>
      %13 = vector.shape_cast %12 : vector<1x128xf32> to vector<1x128xf32>
      %14 = vector.broadcast %13 : vector<1x128xf32> to vector<80x128xf32>
      %c0_12 = arith.constant 0 : index
      %c0_13 = arith.constant 0 : index
      %15 = vector.load %arg7[%c0_12, %c0_13] : memref<80x128xf32, #tpu.memory_space<vmem>>, vector<80x128xf32>
      tpu.vector_store %arg7[%c0_12, %c0_13], %14 {strides = array<i32>} : memref<80x128xf32, #tpu.memory_space<vmem>>, vector<80x128xf32>,
    } else {
    }
    %c0 = arith.constant 0 : index
    %c0_1 = arith.constant 0 : index
    %3 = vector.load %arg7[%c0, %c0_1] : memref<80x128xf32, #tpu.memory_space<vmem>>, vector<80x128xf32>
    %c0_2 = arith.constant 0 : index
    %c0_3 = arith.constant 0 : index
    %4 = vector.load %arg3[%c0_2, %c0_3] : memref<80x384xbf16, #tpu.memory_space<vmem>>, vector<80x384xbf16>
    %c0_4 = arith.constant 0 : index
    %c0_5 = arith.constant 0 : index
    %5 = vector.load %arg4[%c0_4, %c0_5] : memref<384x128xbf16, #tpu.memory_space<vmem>>, vector<384x128xbf16>
    %cst = arith.constant dense<0.000000e+00> : vector<80x128xf32>
    %6 = tpu.matmul %4, %5, %cst {dimension_numbers = #tpu.dot_dimension_numbers<[1], [0], [0], [1], [0, 0, 1, 1], [], []>} : vector<80x384xbf16>, vector<384x128xbf16>, vector<80x128xf32> -> vector<80x128xf32>
    %7 = arith.addf %3, %6 : vector<80x128xf32>
    %c0_6 = arith.constant 0 : index
    %c0_7 = arith.constant 0 : index
    %8 = vector.load %arg7[%c0_6, %c0_7] : memref<80x128xf32, #tpu.memory_space<vmem>>, vector<80x128xf32>
    tpu.vector_store %arg7[%c0_6, %c0_7], %7 {strides = array<i32>} : memref<80x128xf32, #tpu.memory_space<vmem>>, vector<80x128xf32>,
    %c0_i32_8 = arith.constant 0 : i32
    %9 = arith.cmpi eq, %arg2, %c0_i32_8 : i32
    %10 = arith.extui %9 : i1 to i32
    %c0_i32_9 = arith.constant 0 : i32
    %11 = arith.cmpi ne, %10, %c0_i32_9 : i32
    scf.if %11 {
      %c0_10 = arith.constant 0 : index
      %c0_11 = arith.constant 0 : index
      %12 = vector.load %arg7[%c0_10, %c0_11] : memref<80x128xf32, #tpu.memory_space<vmem>>, vector<80x128xf32>
      %cst_12 = arith.constant 0.000000e+00 : f32
      %13 = vector.broadcast %cst_12 : f32 to vector<80x128xf32>
      %14 = arith.maximumf %12, %13 : vector<80x128xf32>
      %c0_13 = arith.constant 0 : index
      %c0_14 = arith.constant 0 : index
      %15 = vector.load %arg6[%c0_13, %c0_14] : memref<80x128xf32, #tpu.memory_space<vmem>>, vector<80x128xf32>
      tpu.vector_store %arg6[%c0_13, %c0_14], %14 {strides = array<i32>} : memref<80x128xf32, #tpu.memory_space<vmem>>, vector<80x128xf32>,
    } else {
    }
    return
  }
  func.func @transform_0(%arg0: i32, %arg1: i32, %arg2: i32) -> (i32, i32) {
    %c0_i32 = arith.constant 0 : i32
    return %arg0, %arg2 : i32, i32
  }
  func.func @transform_1(%arg0: i32, %arg1: i32, %arg2: i32) -> (i32, i32) {
    %c0_i32 = arith.constant 0 : i32
    return %arg2, %arg1 : i32, i32
  }
  func.func @transform_2(%arg0: i32, %arg1: i32, %arg2: i32) -> (i32, i32) {
    %c0_i32 = arith.constant 0 : i32
    %c0_i32_0 = arith.constant 0 : i32
    return %c0_i32, %arg1 : i32, i32
  }
  func.func @transform_3(%arg0: i32, %arg1: i32, %arg2: i32) -> (i32, i32) {
    %c0_i32 = arith.constant 0 : i32
    return %arg0, %arg1 : i32, i32
  }
}

module attributes {stable_mosaic.version = 11 : i64} {
  func.func @_mm_kernel(%arg0: i32, %arg1: i32, %arg2: i32, %arg3: memref<80x256xbf16, #tpu.memory_space<vmem>>, %arg4: memref<256x128xbf16, #tpu.memory_space<vmem>>, %arg5: memref<1x128xf32, #tpu.memory_space<vmem>>, %arg6: memref<80x128xf32, #tpu.memory_space<vmem>>, %arg7: memref<80x128xf32, #tpu.memory_space<vmem>>) attributes {dimension_semantics = [#tpu.dimension_semantics<parallel>, #tpu.dimension_semantics<parallel>, #tpu.dimension_semantics<arbitrary>], iteration_bounds = array<i64: 2, 1, 1>, scalar_prefetch = 0 : i64, scratch_operands = 1 : i64, tpu.core_type = #tpu.core_type<tc>, window_params = [{transform_indices = @transform_0, window_bounds = array<i64: 80, 256>}, {transform_indices = @transform_1, window_bounds = array<i64: 256, 128>}, {transform_indices = @transform_2, window_bounds = array<i64: 1, 128>}, {transform_indices = @transform_3, window_bounds = array<i64: 80, 128>}]} {
    %c0_i32 = arith.constant 0 : i32
    %0 = arith.cmpi eq, %arg2, %c0_i32 : i32
    %1 = arith.extui %0 : i1 to i32
    %c0_i32_0 = arith.constant 0 : i32
    %2 = arith.cmpi ne, %1, %c0_i32_0 : i32
    scf.if %2 {
      %c0_10 = arith.constant 0 : index
      %c0_11 = arith.constant 0 : index
      %12 = vector.load %arg5[%c0_10, %c0_11] : memref<1x128xf32, #tpu.memory_space<vmem>>, vector<1x128xf32>
      %13 = vector.shape_cast %12 : vector<1x128xf32> to vector<1x128xf32>
      %14 = vector.broadcast %13 : vector<1x128xf32> to vector<80x128xf32>
      %c0_12 = arith.constant 0 : index
      %c0_13 = arith.constant 0 : index
      %15 = vector.load %arg7[%c0_12, %c0_13] : memref<80x128xf32, #tpu.memory_space<vmem>>, vector<80x128xf32>
      tpu.vector_store %arg7[%c0_12, %c0_13], %14 {strides = array<i32>} : memref<80x128xf32, #tpu.memory_space<vmem>>, vector<80x128xf32>,
    } else {
    }
    %c0 = arith.constant 0 : index
    %c0_1 = arith.constant 0 : index
    %3 = vector.load %arg7[%c0, %c0_1] : memref<80x128xf32, #tpu.memory_space<vmem>>, vector<80x128xf32>
    %c0_2 = arith.constant 0 : index
    %c0_3 = arith.constant 0 : index
    %4 = vector.load %arg3[%c0_2, %c0_3] : memref<80x256xbf16, #tpu.memory_space<vmem>>, vector<80x256xbf16>
    %c0_4 = arith.constant 0 : index
    %c0_5 = arith.constant 0 : index
    %5 = vector.load %arg4[%c0_4, %c0_5] : memref<256x128xbf16, #tpu.memory_space<vmem>>, vector<256x128xbf16>
    %cst = arith.constant dense<0.000000e+00> : vector<80x128xf32>
    %6 = tpu.matmul %4, %5, %cst {dimension_numbers = #tpu.dot_dimension_numbers<[1], [0], [0], [1], [0, 0, 1, 1], [], []>} : vector<80x256xbf16>, vector<256x128xbf16>, vector<80x128xf32> -> vector<80x128xf32>
    %7 = arith.addf %3, %6 : vector<80x128xf32>
    %c0_6 = arith.constant 0 : index
    %c0_7 = arith.constant 0 : index
    %8 = vector.load %arg7[%c0_6, %c0_7] : memref<80x128xf32, #tpu.memory_space<vmem>>, vector<80x128xf32>
    tpu.vector_store %arg7[%c0_6, %c0_7], %7 {strides = array<i32>} : memref<80x128xf32, #tpu.memory_space<vmem>>, vector<80x128xf32>,
    %c0_i32_8 = arith.constant 0 : i32
    %9 = arith.cmpi eq, %arg2, %c0_i32_8 : i32
    %10 = arith.extui %9 : i1 to i32
    %c0_i32_9 = arith.constant 0 : i32
    %11 = arith.cmpi ne, %10, %c0_i32_9 : i32
    scf.if %11 {
      %c0_10 = arith.constant 0 : index
      %c0_11 = arith.constant 0 : index
      %12 = vector.load %arg7[%c0_10, %c0_11] : memref<80x128xf32, #tpu.memory_space<vmem>>, vector<80x128xf32>
      %cst_12 = arith.constant 0.000000e+00 : f32
      %13 = vector.broadcast %cst_12 : f32 to vector<80x128xf32>
      %14 = arith.maximumf %12, %13 : vector<80x128xf32>
      %c0_13 = arith.constant 0 : index
      %c0_14 = arith.constant 0 : index
      %15 = vector.load %arg6[%c0_13, %c0_14] : memref<80x128xf32, #tpu.memory_space<vmem>>, vector<80x128xf32>
      tpu.vector_store %arg6[%c0_13, %c0_14], %14 {strides = array<i32>} : memref<80x128xf32, #tpu.memory_space<vmem>>, vector<80x128xf32>,
    } else {
    }
    return
  }
  func.func @transform_0(%arg0: i32, %arg1: i32, %arg2: i32) -> (i32, i32) {
    %c0_i32 = arith.constant 0 : i32
    return %arg0, %arg2 : i32, i32
  }
  func.func @transform_1(%arg0: i32, %arg1: i32, %arg2: i32) -> (i32, i32) {
    %c0_i32 = arith.constant 0 : i32
    return %arg2, %arg1 : i32, i32
  }
  func.func @transform_2(%arg0: i32, %arg1: i32, %arg2: i32) -> (i32, i32) {
    %c0_i32 = arith.constant 0 : i32
    %c0_i32_0 = arith.constant 0 : i32
    return %c0_i32, %arg1 : i32, i32
  }
  func.func @transform_3(%arg0: i32, %arg1: i32, %arg2: i32) -> (i32, i32) {
    %c0_i32 = arith.constant 0 : i32
    return %arg0, %arg1 : i32, i32
  }
}

module attributes {stable_mosaic.version = 11 : i64} {
  func.func @_mm_kernel(%arg0: i32, %arg1: i32, %arg2: i32, %arg3: memref<32x1024xbf16, #tpu.memory_space<vmem>>, %arg4: memref<1024x128xbf16, #tpu.memory_space<vmem>>, %arg5: memref<1x128xf32, #tpu.memory_space<vmem>>, %arg6: memref<32x128xf32, #tpu.memory_space<vmem>>, %arg7: memref<32x128xf32, #tpu.memory_space<vmem>>) attributes {dimension_semantics = [#tpu.dimension_semantics<parallel>, #tpu.dimension_semantics<parallel>, #tpu.dimension_semantics<arbitrary>], iteration_bounds = array<i64: 1, 1, 1>, scalar_prefetch = 0 : i64, scratch_operands = 1 : i64, tpu.core_type = #tpu.core_type<tc>, window_params = [{transform_indices = @transform_0, window_bounds = array<i64: 32, 1024>}, {transform_indices = @transform_1, window_bounds = array<i64: 1024, 128>}, {transform_indices = @transform_2, window_bounds = array<i64: 1, 128>}, {transform_indices = @transform_3, window_bounds = array<i64: 32, 128>}]} {
    %c0_i32 = arith.constant 0 : i32
    %0 = arith.cmpi eq, %arg2, %c0_i32 : i32
    %1 = arith.extui %0 : i1 to i32
    %c0_i32_0 = arith.constant 0 : i32
    %2 = arith.cmpi ne, %1, %c0_i32_0 : i32
    scf.if %2 {
      %c0_10 = arith.constant 0 : index
      %c0_11 = arith.constant 0 : index
      %12 = vector.load %arg5[%c0_10, %c0_11] : memref<1x128xf32, #tpu.memory_space<vmem>>, vector<1x128xf32>
      %13 = vector.shape_cast %12 : vector<1x128xf32> to vector<1x128xf32>
      %14 = vector.broadcast %13 : vector<1x128xf32> to vector<32x128xf32>
      %c0_12 = arith.constant 0 : index
      %c0_13 = arith.constant 0 : index
      %15 = vector.load %arg7[%c0_12, %c0_13] : memref<32x128xf32, #tpu.memory_space<vmem>>, vector<32x128xf32>
      tpu.vector_store %arg7[%c0_12, %c0_13], %14 {strides = array<i32>} : memref<32x128xf32, #tpu.memory_space<vmem>>, vector<32x128xf32>,
    } else {
    }
    %c0 = arith.constant 0 : index
    %c0_1 = arith.constant 0 : index
    %3 = vector.load %arg7[%c0, %c0_1] : memref<32x128xf32, #tpu.memory_space<vmem>>, vector<32x128xf32>
    %c0_2 = arith.constant 0 : index
    %c0_3 = arith.constant 0 : index
    %4 = vector.load %arg3[%c0_2, %c0_3] : memref<32x1024xbf16, #tpu.memory_space<vmem>>, vector<32x1024xbf16>
    %c0_4 = arith.constant 0 : index
    %c0_5 = arith.constant 0 : index
    %5 = vector.load %arg4[%c0_4, %c0_5] : memref<1024x128xbf16, #tpu.memory_space<vmem>>, vector<1024x128xbf16>
    %cst = arith.constant dense<0.000000e+00> : vector<32x128xf32>
    %6 = tpu.matmul %4, %5, %cst {dimension_numbers = #tpu.dot_dimension_numbers<[1], [0], [0], [1], [0, 0, 1, 1], [], []>} : vector<32x1024xbf16>, vector<1024x128xbf16>, vector<32x128xf32> -> vector<32x128xf32>
    %7 = arith.addf %3, %6 : vector<32x128xf32>
    %c0_6 = arith.constant 0 : index
    %c0_7 = arith.constant 0 : index
    %8 = vector.load %arg7[%c0_6, %c0_7] : memref<32x128xf32, #tpu.memory_space<vmem>>, vector<32x128xf32>
    tpu.vector_store %arg7[%c0_6, %c0_7], %7 {strides = array<i32>} : memref<32x128xf32, #tpu.memory_space<vmem>>, vector<32x128xf32>,
    %c0_i32_8 = arith.constant 0 : i32
    %9 = arith.cmpi eq, %arg2, %c0_i32_8 : i32
    %10 = arith.extui %9 : i1 to i32
    %c0_i32_9 = arith.constant 0 : i32
    %11 = arith.cmpi ne, %10, %c0_i32_9 : i32
    scf.if %11 {
      %c0_10 = arith.constant 0 : index
      %c0_11 = arith.constant 0 : index
      %12 = vector.load %arg7[%c0_10, %c0_11] : memref<32x128xf32, #tpu.memory_space<vmem>>, vector<32x128xf32>
      %c0_12 = arith.constant 0 : index
      %c0_13 = arith.constant 0 : index
      %13 = vector.load %arg6[%c0_12, %c0_13] : memref<32x128xf32, #tpu.memory_space<vmem>>, vector<32x128xf32>
      tpu.vector_store %arg6[%c0_12, %c0_13], %12 {strides = array<i32>} : memref<32x128xf32, #tpu.memory_space<vmem>>, vector<32x128xf32>,
    } else {
    }
    return
  }
  func.func @transform_0(%arg0: i32, %arg1: i32, %arg2: i32) -> (i32, i32) {
    %c0_i32 = arith.constant 0 : i32
    return %arg0, %arg2 : i32, i32
  }
  func.func @transform_1(%arg0: i32, %arg1: i32, %arg2: i32) -> (i32, i32) {
    %c0_i32 = arith.constant 0 : i32
    return %arg2, %arg1 : i32, i32
  }
  func.func @transform_2(%arg0: i32, %arg1: i32, %arg2: i32) -> (i32, i32) {
    %c0_i32 = arith.constant 0 : i32
    %c0_i32_0 = arith.constant 0 : i32
    return %c0_i32, %arg1 : i32, i32
  }
  func.func @transform_3(%arg0: i32, %arg1: i32, %arg2: i32) -> (i32, i32) {
    %c0_i32 = arith.constant 0 : i32
    return %arg0, %arg1 : i32, i32
  }
}

module attributes {stable_mosaic.version = 11 : i64} {
  func.func @_mm_kernel(%arg0: i32, %arg1: i32, %arg2: i32, %arg3: memref<32x128xbf16, #tpu.memory_space<vmem>>, %arg4: memref<128x128xbf16, #tpu.memory_space<vmem>>, %arg5: memref<1x128xf32, #tpu.memory_space<vmem>>, %arg6: memref<32x128xf32, #tpu.memory_space<vmem>>, %arg7: memref<32x128xf32, #tpu.memory_space<vmem>>) attributes {dimension_semantics = [#tpu.dimension_semantics<parallel>, #tpu.dimension_semantics<parallel>, #tpu.dimension_semantics<arbitrary>], iteration_bounds = array<i64: 1, 1, 1>, scalar_prefetch = 0 : i64, scratch_operands = 1 : i64, tpu.core_type = #tpu.core_type<tc>, window_params = [{transform_indices = @transform_0, window_bounds = array<i64: 32, 128>}, {transform_indices = @transform_1, window_bounds = array<i64: 128, 128>}, {transform_indices = @transform_2, window_bounds = array<i64: 1, 128>}, {transform_indices = @transform_3, window_bounds = array<i64: 32, 128>}]} {
    %c0_i32 = arith.constant 0 : i32
    %0 = arith.cmpi eq, %arg2, %c0_i32 : i32
    %1 = arith.extui %0 : i1 to i32
    %c0_i32_0 = arith.constant 0 : i32
    %2 = arith.cmpi ne, %1, %c0_i32_0 : i32
    scf.if %2 {
      %c0_10 = arith.constant 0 : index
      %c0_11 = arith.constant 0 : index
      %12 = vector.load %arg5[%c0_10, %c0_11] : memref<1x128xf32, #tpu.memory_space<vmem>>, vector<1x128xf32>
      %13 = vector.shape_cast %12 : vector<1x128xf32> to vector<1x128xf32>
      %14 = vector.broadcast %13 : vector<1x128xf32> to vector<32x128xf32>
      %c0_12 = arith.constant 0 : index
      %c0_13 = arith.constant 0 : index
      %15 = vector.load %arg7[%c0_12, %c0_13] : memref<32x128xf32, #tpu.memory_space<vmem>>, vector<32x128xf32>
      tpu.vector_store %arg7[%c0_12, %c0_13], %14 {strides = array<i32>} : memref<32x128xf32, #tpu.memory_space<vmem>>, vector<32x128xf32>,
    } else {
    }
    %c0 = arith.constant 0 : index
    %c0_1 = arith.constant 0 : index
    %3 = vector.load %arg7[%c0, %c0_1] : memref<32x128xf32, #tpu.memory_space<vmem>>, vector<32x128xf32>
    %c0_2 = arith.constant 0 : index
    %c0_3 = arith.constant 0 : index
    %4 = vector.load %arg3[%c0_2, %c0_3] : memref<32x128xbf16, #tpu.memory_space<vmem>>, vector<32x128xbf16>
    %c0_4 = arith.constant 0 : index
    %c0_5 = arith.constant 0 : index
    %5 = vector.load %arg4[%c0_4, %c0_5] : memref<128x128xbf16, #tpu.memory_space<vmem>>, vector<128x128xbf16>
    %cst = arith.constant dense<0.000000e+00> : vector<32x128xf32>
    %6 = tpu.matmul %4, %5, %cst {dimension_numbers = #tpu.dot_dimension_numbers<[1], [0], [0], [1], [0, 0, 1, 1], [], []>} : vector<32x128xbf16>, vector<128x128xbf16>, vector<32x128xf32> -> vector<32x128xf32>
    %7 = arith.addf %3, %6 : vector<32x128xf32>
    %c0_6 = arith.constant 0 : index
    %c0_7 = arith.constant 0 : index
    %8 = vector.load %arg7[%c0_6, %c0_7] : memref<32x128xf32, #tpu.memory_space<vmem>>, vector<32x128xf32>
    tpu.vector_store %arg7[%c0_6, %c0_7], %7 {strides = array<i32>} : memref<32x128xf32, #tpu.memory_space<vmem>>, vector<32x128xf32>,
    %c0_i32_8 = arith.constant 0 : i32
    %9 = arith.cmpi eq, %arg2, %c0_i32_8 : i32
    %10 = arith.extui %9 : i1 to i32
    %c0_i32_9 = arith.constant 0 : i32
    %11 = arith.cmpi ne, %10, %c0_i32_9 : i32
    scf.if %11 {
      %c0_10 = arith.constant 0 : index
      %c0_11 = arith.constant 0 : index
      %12 = vector.load %arg7[%c0_10, %c0_11] : memref<32x128xf32, #tpu.memory_space<vmem>>, vector<32x128xf32>
      %c0_12 = arith.constant 0 : index
      %c0_13 = arith.constant 0 : index
      %13 = vector.load %arg6[%c0_12, %c0_13] : memref<32x128xf32, #tpu.memory_space<vmem>>, vector<32x128xf32>
      tpu.vector_store %arg6[%c0_12, %c0_13], %12 {strides = array<i32>} : memref<32x128xf32, #tpu.memory_space<vmem>>, vector<32x128xf32>,
    } else {
    }
    return
  }
  func.func @transform_0(%arg0: i32, %arg1: i32, %arg2: i32) -> (i32, i32) {
    %c0_i32 = arith.constant 0 : i32
    return %arg0, %arg2 : i32, i32
  }
  func.func @transform_1(%arg0: i32, %arg1: i32, %arg2: i32) -> (i32, i32) {
    %c0_i32 = arith.constant 0 : i32
    return %arg2, %arg1 : i32, i32
  }
  func.func @transform_2(%arg0: i32, %arg1: i32, %arg2: i32) -> (i32, i32) {
    %c0_i32 = arith.constant 0 : i32
    %c0_i32_0 = arith.constant 0 : i32
    return %c0_i32, %arg1 : i32, i32
  }
  func.func @transform_3(%arg0: i32, %arg1: i32, %arg2: i32) -> (i32, i32) {
    %c0_i32 = arith.constant 0 : i32
    return %arg0, %arg1 : i32, i32
  }
}

module attributes {stable_mosaic.version = 11 : i64} {
  func.func @_mm_kernel(%arg0: i32, %arg1: i32, %arg2: i32, %arg3: memref<32x1152xbf16, #tpu.memory_space<vmem>>, %arg4: memref<1152x128xbf16, #tpu.memory_space<vmem>>, %arg5: memref<1x128xf32, #tpu.memory_space<vmem>>, %arg6: memref<32x128xf32, #tpu.memory_space<vmem>>, %arg7: memref<32x128xf32, #tpu.memory_space<vmem>>) attributes {dimension_semantics = [#tpu.dimension_semantics<parallel>, #tpu.dimension_semantics<parallel>, #tpu.dimension_semantics<arbitrary>], iteration_bounds = array<i64: 1, 1, 1>, scalar_prefetch = 0 : i64, scratch_operands = 1 : i64, tpu.core_type = #tpu.core_type<tc>, window_params = [{transform_indices = @transform_0, window_bounds = array<i64: 32, 1152>}, {transform_indices = @transform_1, window_bounds = array<i64: 1152, 128>}, {transform_indices = @transform_2, window_bounds = array<i64: 1, 128>}, {transform_indices = @transform_3, window_bounds = array<i64: 32, 128>}]} {
    %c0_i32 = arith.constant 0 : i32
    %0 = arith.cmpi eq, %arg2, %c0_i32 : i32
    %1 = arith.extui %0 : i1 to i32
    %c0_i32_0 = arith.constant 0 : i32
    %2 = arith.cmpi ne, %1, %c0_i32_0 : i32
    scf.if %2 {
      %c0_10 = arith.constant 0 : index
      %c0_11 = arith.constant 0 : index
      %12 = vector.load %arg5[%c0_10, %c0_11] : memref<1x128xf32, #tpu.memory_space<vmem>>, vector<1x128xf32>
      %13 = vector.shape_cast %12 : vector<1x128xf32> to vector<1x128xf32>
      %14 = vector.broadcast %13 : vector<1x128xf32> to vector<32x128xf32>
      %c0_12 = arith.constant 0 : index
      %c0_13 = arith.constant 0 : index
      %15 = vector.load %arg7[%c0_12, %c0_13] : memref<32x128xf32, #tpu.memory_space<vmem>>, vector<32x128xf32>
      tpu.vector_store %arg7[%c0_12, %c0_13], %14 {strides = array<i32>} : memref<32x128xf32, #tpu.memory_space<vmem>>, vector<32x128xf32>,
    } else {
    }
    %c0 = arith.constant 0 : index
    %c0_1 = arith.constant 0 : index
    %3 = vector.load %arg7[%c0, %c0_1] : memref<32x128xf32, #tpu.memory_space<vmem>>, vector<32x128xf32>
    %c0_2 = arith.constant 0 : index
    %c0_3 = arith.constant 0 : index
    %4 = vector.load %arg3[%c0_2, %c0_3] : memref<32x1152xbf16, #tpu.memory_space<vmem>>, vector<32x1152xbf16>
    %c0_4 = arith.constant 0 : index
    %c0_5 = arith.constant 0 : index
    %5 = vector.load %arg4[%c0_4, %c0_5] : memref<1152x128xbf16, #tpu.memory_space<vmem>>, vector<1152x128xbf16>
    %cst = arith.constant dense<0.000000e+00> : vector<32x128xf32>
    %6 = tpu.matmul %4, %5, %cst {dimension_numbers = #tpu.dot_dimension_numbers<[1], [0], [0], [1], [0, 0, 1, 1], [], []>} : vector<32x1152xbf16>, vector<1152x128xbf16>, vector<32x128xf32> -> vector<32x128xf32>
    %7 = arith.addf %3, %6 : vector<32x128xf32>
    %c0_6 = arith.constant 0 : index
    %c0_7 = arith.constant 0 : index
    %8 = vector.load %arg7[%c0_6, %c0_7] : memref<32x128xf32, #tpu.memory_space<vmem>>, vector<32x128xf32>
    tpu.vector_store %arg7[%c0_6, %c0_7], %7 {strides = array<i32>} : memref<32x128xf32, #tpu.memory_space<vmem>>, vector<32x128xf32>,
    %c0_i32_8 = arith.constant 0 : i32
    %9 = arith.cmpi eq, %arg2, %c0_i32_8 : i32
    %10 = arith.extui %9 : i1 to i32
    %c0_i32_9 = arith.constant 0 : i32
    %11 = arith.cmpi ne, %10, %c0_i32_9 : i32
    scf.if %11 {
      %c0_10 = arith.constant 0 : index
      %c0_11 = arith.constant 0 : index
      %12 = vector.load %arg7[%c0_10, %c0_11] : memref<32x128xf32, #tpu.memory_space<vmem>>, vector<32x128xf32>
      %c0_12 = arith.constant 0 : index
      %c0_13 = arith.constant 0 : index
      %13 = vector.load %arg6[%c0_12, %c0_13] : memref<32x128xf32, #tpu.memory_space<vmem>>, vector<32x128xf32>
      tpu.vector_store %arg6[%c0_12, %c0_13], %12 {strides = array<i32>} : memref<32x128xf32, #tpu.memory_space<vmem>>, vector<32x128xf32>,
    } else {
    }
    return
  }
  func.func @transform_0(%arg0: i32, %arg1: i32, %arg2: i32) -> (i32, i32) {
    %c0_i32 = arith.constant 0 : i32
    return %arg0, %arg2 : i32, i32
  }
  func.func @transform_1(%arg0: i32, %arg1: i32, %arg2: i32) -> (i32, i32) {
    %c0_i32 = arith.constant 0 : i32
    return %arg2, %arg1 : i32, i32
  }
  func.func @transform_2(%arg0: i32, %arg1: i32, %arg2: i32) -> (i32, i32) {
    %c0_i32 = arith.constant 0 : i32
    %c0_i32_0 = arith.constant 0 : i32
    return %c0_i32, %arg1 : i32, i32
  }
  func.func @transform_3(%arg0: i32, %arg1: i32, %arg2: i32) -> (i32, i32) {
    %c0_i32 = arith.constant 0 : i32
    return %arg0, %arg1 : i32, i32
  }
}

module attributes {stable_mosaic.version = 11 : i64} {
  func.func @_inf_gates_kernel(%arg0: i32, %arg1: i32, %arg2: memref<32x896xbf16, #tpu.memory_space<vmem>>, %arg3: memref<896x256xbf16, #tpu.memory_space<vmem>>, %arg4: memref<32x256xf32, #tpu.memory_space<vmem>>, %arg5: memref<32x128xf32, #tpu.memory_space<vmem>>, %arg6: memref<32x128xf32, #tpu.memory_space<vmem>>, %arg7: memref<32x128xf32, #tpu.memory_space<vmem>>, %arg8: memref<32x256xf32, #tpu.memory_space<vmem>>) attributes {dimension_semantics = [#tpu.dimension_semantics<parallel>, #tpu.dimension_semantics<arbitrary>], iteration_bounds = array<i64: 1, 1>, scalar_prefetch = 0 : i64, scratch_operands = 1 : i64, tpu.core_type = #tpu.core_type<tc>, window_params = [{transform_indices = @transform_0, window_bounds = array<i64: 32, 896>}, {transform_indices = @transform_1, window_bounds = array<i64: 896, 256>}, {transform_indices = @transform_2, window_bounds = array<i64: 32, 256>}, {transform_indices = @transform_3, window_bounds = array<i64: 32, 128>}, {transform_indices = @transform_4, window_bounds = array<i64: 32, 128>}, {transform_indices = @transform_5, window_bounds = array<i64: 32, 128>}]} {
    %c0_i32 = arith.constant 0 : i32
    %0 = arith.cmpi eq, %arg1, %c0_i32 : i32
    %1 = arith.extui %0 : i1 to i32
    %c0_i32_0 = arith.constant 0 : i32
    %2 = arith.cmpi ne, %1, %c0_i32_0 : i32
    scf.if %2 {
      %c0_10 = arith.constant 0 : index
      %c0_11 = arith.constant 0 : index
      %12 = vector.load %arg4[%c0_10, %c0_11] : memref<32x256xf32, #tpu.memory_space<vmem>>, vector<32x256xf32>
      %c0_12 = arith.constant 0 : index
      %c0_13 = arith.constant 0 : index
      %13 = vector.load %arg8[%c0_12, %c0_13] : memref<32x256xf32, #tpu.memory_space<vmem>>, vector<32x256xf32>
      tpu.vector_store %arg8[%c0_12, %c0_13], %12 {strides = array<i32>} : memref<32x256xf32, #tpu.memory_space<vmem>>, vector<32x256xf32>,
    } else {
    }
    %c0 = arith.constant 0 : index
    %c0_1 = arith.constant 0 : index
    %3 = vector.load %arg8[%c0, %c0_1] : memref<32x256xf32, #tpu.memory_space<vmem>>, vector<32x256xf32>
    %c0_2 = arith.constant 0 : index
    %c0_3 = arith.constant 0 : index
    %4 = vector.load %arg2[%c0_2, %c0_3] : memref<32x896xbf16, #tpu.memory_space<vmem>>, vector<32x896xbf16>
    %c0_4 = arith.constant 0 : index
    %c0_5 = arith.constant 0 : index
    %5 = vector.load %arg3[%c0_4, %c0_5] : memref<896x256xbf16, #tpu.memory_space<vmem>>, vector<896x256xbf16>
    %cst = arith.constant dense<0.000000e+00> : vector<32x256xf32>
    %6 = tpu.matmul %4, %5, %cst {dimension_numbers = #tpu.dot_dimension_numbers<[1], [0], [0], [1], [0, 0, 1, 1], [], []>} : vector<32x896xbf16>, vector<896x256xbf16>, vector<32x256xf32> -> vector<32x256xf32>
    %7 = arith.addf %3, %6 : vector<32x256xf32>
    %c0_6 = arith.constant 0 : index
    %c0_7 = arith.constant 0 : index
    %8 = vector.load %arg8[%c0_6, %c0_7] : memref<32x256xf32, #tpu.memory_space<vmem>>, vector<32x256xf32>
    tpu.vector_store %arg8[%c0_6, %c0_7], %7 {strides = array<i32>} : memref<32x256xf32, #tpu.memory_space<vmem>>, vector<32x256xf32>,
    %c0_i32_8 = arith.constant 0 : i32
    %9 = arith.cmpi eq, %arg1, %c0_i32_8 : i32
    %10 = arith.extui %9 : i1 to i32
    %c0_i32_9 = arith.constant 0 : i32
    %11 = arith.cmpi ne, %10, %c0_i32_9 : i32
    scf.if %11 {
      %c0_10 = arith.constant 0 : index
      %c0_11 = arith.constant 0 : index
      %12 = vector.load %arg8[%c0_10, %c0_11] : memref<32x256xf32, #tpu.memory_space<vmem>>, vector<32x256xf32>
      %13 = vector.extract_strided_slice %12 {offsets = [0, 0], sizes = [32, 32], strides = [1, 1]} : vector<32x256xf32> to vector<32x32xf32>
      %14 = arith.negf %13 : vector<32x32xf32>
      %15 = math.exp %14 : vector<32x32xf32>
      %cst_12 = arith.constant 1.000000e+00 : f32
      %16 = vector.broadcast %cst_12 : f32 to vector<32x32xf32>
      %17 = arith.addf %16, %15 : vector<32x32xf32>
      %18 = arith.divf %16, %17 : vector<32x32xf32>
      %19 = vector.extract_strided_slice %12 {offsets = [0, 32], sizes = [32, 32], strides = [1, 1]} : vector<32x256xf32> to vector<32x32xf32>
      %20 = arith.negf %19 : vector<32x32xf32>
      %21 = math.exp %20 : vector<32x32xf32>
      %cst_13 = arith.constant 1.000000e+00 : f32
      %22 = vector.broadcast %cst_13 : f32 to vector<32x32xf32>
      %23 = arith.addf %22, %21 : vector<32x32xf32>
      %24 = arith.divf %22, %23 : vector<32x32xf32>
      %25 = vector.extract_strided_slice %12 {offsets = [0, 64], sizes = [32, 32], strides = [1, 1]} : vector<32x256xf32> to vector<32x32xf32>
      %26 = arith.negf %25 : vector<32x32xf32>
      %27 = math.exp %26 : vector<32x32xf32>
      %cst_14 = arith.constant 1.000000e+00 : f32
      %28 = vector.broadcast %cst_14 : f32 to vector<32x32xf32>
      %29 = arith.addf %28, %27 : vector<32x32xf32>
      %30 = arith.divf %28, %29 : vector<32x32xf32>
      %31 = vector.extract_strided_slice %12 {offsets = [0, 96], sizes = [32, 32], strides = [1, 1]} : vector<32x256xf32> to vector<32x32xf32>
      %32 = math.tanh %31 : vector<32x32xf32>
      %c0_15 = arith.constant 0 : index
      %c0_16 = arith.constant 0 : index
      %33 = vector.load %arg5[%c0_15, %c0_16] : memref<32x128xf32, #tpu.memory_space<vmem>>, vector<32x32xf32>
      %34 = arith.mulf %18, %33 : vector<32x32xf32>
      %35 = arith.mulf %24, %32 : vector<32x32xf32>
      %36 = arith.addf %34, %35 : vector<32x32xf32>
      %37 = math.tanh %36 : vector<32x32xf32>
      %38 = arith.mulf %30, %37 : vector<32x32xf32>
      %cst_17 = arith.constant 0.000000e+00 : f32
      %39 = vector.broadcast %cst_17 : f32 to vector<32x64xf32>
      %40 = tpu.concatenate %36, %38, %39 in 1 : vector<32x32xf32>, vector<32x32xf32>, vector<32x64xf32> -> vector<32x128xf32>
      %c0_18 = arith.constant 0 : index
      %c0_19 = arith.constant 0 : index
      %41 = vector.load %arg6[%c0_18, %c0_19] : memref<32x128xf32, #tpu.memory_space<vmem>>, vector<32x128xf32>
      tpu.vector_store %arg6[%c0_18, %c0_19], %40 {strides = array<i32>} : memref<32x128xf32, #tpu.memory_space<vmem>>, vector<32x128xf32>,
      %42 = vector.extract_strided_slice %12 {offsets = [0, 128], sizes = [32, 128], strides = [1, 1]} : vector<32x256xf32> to vector<32x128xf32>
      %c0_20 = arith.constant 0 : index
      %c0_21 = arith.constant 0 : index
      %43 = vector.load %arg7[%c0_20, %c0_21] : memref<32x128xf32, #tpu.memory_space<vmem>>, vector<32x128xf32>
      tpu.vector_store %arg7[%c0_20, %c0_21], %42 {strides = array<i32>} : memref<32x128xf32, #tpu.memory_space<vmem>>, vector<32x128xf32>,
    } else {
    }
    return
  }
  func.func @transform_0(%arg0: i32, %arg1: i32) -> (i32, i32) {
    %c0_i32 = arith.constant 0 : i32
    return %arg0, %arg1 : i32, i32
  }
  func.func @transform_1(%arg0: i32, %arg1: i32) -> (i32, i32) {
    %c0_i32 = arith.constant 0 : i32
    %c0_i32_0 = arith.constant 0 : i32
    return %arg1, %c0_i32 : i32, i32
  }
  func.func @transform_2(%arg0: i32, %arg1: i32) -> (i32, i32) {
    %c0_i32 = arith.constant 0 : i32
    %c0_i32_0 = arith.constant 0 : i32
    return %arg0, %c0_i32 : i32, i32
  }
  func.func @transform_3(%arg0: i32, %arg1: i32) -> (i32, i32) {
    %c0_i32 = arith.constant 0 : i32
    %c0_i32_0 = arith.constant 0 : i32
    return %arg0, %c0_i32 : i32, i32
  }
  func.func @transform_4(%arg0: i32, %arg1: i32) -> (i32, i32) {
    %c0_i32 = arith.constant 0 : i32
    %c0_i32_0 = arith.constant 0 : i32
    return %arg0, %c0_i32 : i32, i32
  }
  func.func @transform_5(%arg0: i32, %arg1: i32) -> (i32, i32) {
    %c0_i32 = arith.constant 0 : i32
    %c0_i32_0 = arith.constant 0 : i32
    return %arg0, %c0_i32 : i32, i32
  }
}

module attributes {stable_mosaic.version = 11 : i64} {
  func.func @_post_latent_kernel(%arg0: i32, %arg1: i32, %arg2: memref<32x896xbf16, #tpu.memory_space<vmem>>, %arg3: memref<896x128xbf16, #tpu.memory_space<vmem>>, %arg4: memref<1x128xf32, #tpu.memory_space<vmem>>, %arg5: memref<32x128xf32, #tpu.memory_space<vmem>>, %arg6: memref<32x128xf32, #tpu.memory_space<vmem>>, %arg7: memref<32x128xf32, #tpu.memory_space<vmem>>) attributes {dimension_semantics = [#tpu.dimension_semantics<parallel>, #tpu.dimension_semantics<arbitrary>], iteration_bounds = array<i64: 1, 1>, scalar_prefetch = 0 : i64, scratch_operands = 1 : i64, tpu.core_type = #tpu.core_type<tc>, window_params = [{transform_indices = @transform_0, window_bounds = array<i64: 32, 896>}, {transform_indices = @transform_1, window_bounds = array<i64: 896, 128>}, {pipeline_mode = #tpu.pipeline_mode<synchronous>, transform_indices = @transform_2, window_bounds = array<i64: 1, 128>}, {transform_indices = @transform_3, window_bounds = array<i64: 32, 128>}, {transform_indices = @transform_4, window_bounds = array<i64: 32, 128>}]} {
    %c0_i32 = arith.constant 0 : i32
    %0 = arith.cmpi eq, %arg1, %c0_i32 : i32
    %1 = arith.extui %0 : i1 to i32
    %c0_i32_0 = arith.constant 0 : i32
    %2 = arith.cmpi ne, %1, %c0_i32_0 : i32
    scf.if %2 {
      %c0_10 = arith.constant 0 : index
      %c0_11 = arith.constant 0 : index
      %12 = vector.load %arg4[%c0_10, %c0_11] : memref<1x128xf32, #tpu.memory_space<vmem>>, vector<1x128xf32>
      %13 = vector.shape_cast %12 : vector<1x128xf32> to vector<1x128xf32>
      %14 = vector.broadcast %13 : vector<1x128xf32> to vector<32x128xf32>
      %c0_12 = arith.constant 0 : index
      %c0_13 = arith.constant 0 : index
      %15 = vector.load %arg7[%c0_12, %c0_13] : memref<32x128xf32, #tpu.memory_space<vmem>>, vector<32x128xf32>
      tpu.vector_store %arg7[%c0_12, %c0_13], %14 {strides = array<i32>} : memref<32x128xf32, #tpu.memory_space<vmem>>, vector<32x128xf32>,
    } else {
    }
    %c0 = arith.constant 0 : index
    %c0_1 = arith.constant 0 : index
    %3 = vector.load %arg7[%c0, %c0_1] : memref<32x128xf32, #tpu.memory_space<vmem>>, vector<32x128xf32>
    %c0_2 = arith.constant 0 : index
    %c0_3 = arith.constant 0 : index
    %4 = vector.load %arg2[%c0_2, %c0_3] : memref<32x896xbf16, #tpu.memory_space<vmem>>, vector<32x896xbf16>
    %c0_4 = arith.constant 0 : index
    %c0_5 = arith.constant 0 : index
    %5 = vector.load %arg3[%c0_4, %c0_5] : memref<896x128xbf16, #tpu.memory_space<vmem>>, vector<896x128xbf16>
    %cst = arith.constant dense<0.000000e+00> : vector<32x128xf32>
    %6 = tpu.matmul %4, %5, %cst {dimension_numbers = #tpu.dot_dimension_numbers<[1], [0], [0], [1], [0, 0, 1, 1], [], []>} : vector<32x896xbf16>, vector<896x128xbf16>, vector<32x128xf32> -> vector<32x128xf32>
    %7 = arith.addf %3, %6 : vector<32x128xf32>
    %c0_6 = arith.constant 0 : index
    %c0_7 = arith.constant 0 : index
    %8 = vector.load %arg7[%c0_6, %c0_7] : memref<32x128xf32, #tpu.memory_space<vmem>>, vector<32x128xf32>
    tpu.vector_store %arg7[%c0_6, %c0_7], %7 {strides = array<i32>} : memref<32x128xf32, #tpu.memory_space<vmem>>, vector<32x128xf32>,
    %c0_i32_8 = arith.constant 0 : i32
    %9 = arith.cmpi eq, %arg1, %c0_i32_8 : i32
    %10 = arith.extui %9 : i1 to i32
    %c0_i32_9 = arith.constant 0 : i32
    %11 = arith.cmpi ne, %10, %c0_i32_9 : i32
    scf.if %11 {
      %c0_10 = arith.constant 0 : index
      %c0_11 = arith.constant 0 : index
      %12 = vector.load %arg7[%c0_10, %c0_11] : memref<32x128xf32, #tpu.memory_space<vmem>>, vector<32x128xf32>
      %13 = vector.extract_strided_slice %12 {offsets = [0, 0], sizes = [32, 8], strides = [1, 1]} : vector<32x128xf32> to vector<32x8xf32>
      %14 = vector.extract_strided_slice %12 {offsets = [0, 8], sizes = [32, 8], strides = [1, 1]} : vector<32x128xf32> to vector<32x8xf32>
      %c0_12 = arith.constant 0 : index
      %c0_13 = arith.constant 0 : index
      %15 = vector.load %arg5[%c0_12, %c0_13] : memref<32x128xf32, #tpu.memory_space<vmem>>, vector<32x128xf32>
      %16 = vector.extract_strided_slice %15 {offsets = [0, 0], sizes = [32, 8], strides = [1, 1]} : vector<32x128xf32> to vector<32x8xf32>
      %17 = vector.extract_strided_slice %15 {offsets = [0, 8], sizes = [32, 8], strides = [1, 1]} : vector<32x128xf32> to vector<32x8xf32>
      %18 = vector.extract_strided_slice %15 {offsets = [0, 16], sizes = [32, 8], strides = [1, 1]} : vector<32x128xf32> to vector<32x8xf32>
      %19 = math.exp %14 : vector<32x8xf32>
      %cst_14 = arith.constant 0.000000e+00 : f32
      %20 = vector.broadcast %cst_14 : f32 to vector<32x8xf32>
      %21 = arith.subf %20, %17 : vector<32x8xf32>
      %22 = math.exp %21 : vector<32x8xf32>
      %23 = arith.mulf %19, %18 : vector<32x8xf32>
      %24 = arith.addf %13, %23 : vector<32x8xf32>
      %25 = arith.mulf %19, %22 : vector<32x8xf32>
      %26 = arith.subf %13, %16 : vector<32x8xf32>
      %27 = arith.mulf %26, %22 : vector<32x8xf32>
      %28 = arith.mulf %25, %25 : vector<32x8xf32>
      %29 = arith.mulf %27, %27 : vector<32x8xf32>
      %30 = arith.addf %28, %29 : vector<32x8xf32>
      %cst_15 = arith.constant 1.000000e+00 : f32
      %31 = vector.broadcast %cst_15 : f32 to vector<32x8xf32>
      %32 = arith.subf %30, %31 : vector<32x8xf32>
      %33 = arith.subf %14, %17 : vector<32x8xf32>
      %cst_16 = arith.constant 2.000000e+00 : f32
      %34 = vector.broadcast %cst_16 : f32 to vector<32x8xf32>
      %35 = arith.mulf %34, %33 : vector<32x8xf32>
      %36 = arith.subf %32, %35 : vector<32x8xf32>
      %cst_17 = arith.constant 5.000000e-01 : f32
      %37 = vector.broadcast %cst_17 : f32 to vector<32x8xf32>
      %38 = arith.mulf %37, %36 : vector<32x8xf32>
      %cst_18 = arith.constant 0.000000e+00 : f32
      %39 = vector.broadcast %cst_18 : f32 to vector<32x112xf32>
      %40 = tpu.concatenate %24, %38, %39 in 1 : vector<32x8xf32>, vector<32x8xf32>, vector<32x112xf32> -> vector<32x128xf32>
      %c0_19 = arith.constant 0 : index
      %c0_20 = arith.constant 0 : index
      %41 = vector.load %arg6[%c0_19, %c0_20] : memref<32x128xf32, #tpu.memory_space<vmem>>, vector<32x128xf32>
      tpu.vector_store %arg6[%c0_19, %c0_20], %40 {strides = array<i32>} : memref<32x128xf32, #tpu.memory_space<vmem>>, vector<32x128xf32>,
    } else {
    }
    return
  }
  func.func @transform_0(%arg0: i32, %arg1: i32) -> (i32, i32) {
    %c0_i32 = arith.constant 0 : i32
    return %arg0, %arg1 : i32, i32
  }
  func.func @transform_1(%arg0: i32, %arg1: i32) -> (i32, i32) {
    %c0_i32 = arith.constant 0 : i32
    %c0_i32_0 = arith.constant 0 : i32
    return %arg1, %c0_i32 : i32, i32
  }
  func.func @transform_2(%arg0: i32, %arg1: i32) -> (i32, i32) {
    %c0_i32 = arith.constant 0 : i32
    %c0_i32_0 = arith.constant 0 : i32
    %c0_i32_1 = arith.constant 0 : i32
    return %c0_i32, %c0_i32_0 : i32, i32
  }
  func.func @transform_3(%arg0: i32, %arg1: i32) -> (i32, i32) {
    %c0_i32 = arith.constant 0 : i32
    %c0_i32_0 = arith.constant 0 : i32
    return %arg0, %c0_i32 : i32, i32
  }
  func.func @transform_4(%arg0: i32, %arg1: i32) -> (i32, i32) {
    %c0_i32 = arith.constant 0 : i32
    %c0_i32_0 = arith.constant 0 : i32
    return %arg0, %c0_i32 : i32, i32
  }
}

module attributes {stable_mosaic.version = 11 : i64} {
  func.func @_gen_gates_kernel(%arg0: i32, %arg1: i32, %arg2: memref<32x256xbf16, #tpu.memory_space<vmem>>, %arg3: memref<256x128xbf16, #tpu.memory_space<vmem>>, %arg4: memref<32x128xf32, #tpu.memory_space<vmem>>, %arg5: memref<32x128xf32, #tpu.memory_space<vmem>>, %arg6: memref<32x512xbf16, #tpu.memory_space<vmem>>, %arg7: memref<32x128xf32, #tpu.memory_space<vmem>>, %arg8: memref<32x512xf32, #tpu.memory_space<vmem>>, %arg9: memref<32x128xf32, #tpu.memory_space<vmem>>) attributes {dimension_semantics = [#tpu.dimension_semantics<parallel>, #tpu.dimension_semantics<arbitrary>], iteration_bounds = array<i64: 1, 1>, scalar_prefetch = 0 : i64, scratch_operands = 1 : i64, tpu.core_type = #tpu.core_type<tc>, window_params = [{transform_indices = @transform_0, window_bounds = array<i64: 32, 256>}, {transform_indices = @transform_1, window_bounds = array<i64: 256, 128>}, {transform_indices = @transform_2, window_bounds = array<i64: 32, 128>}, {transform_indices = @transform_3, window_bounds = array<i64: 32, 128>}, {pipeline_mode = #tpu.pipeline_mode<synchronous>, transform_indices = @transform_4, window_bounds = array<i64: 32, 512>}, {transform_indices = @transform_5, window_bounds = array<i64: 32, 128>}, {transform_indices = @transform_6, window_bounds = array<i64: 32, 512>}]} {
    %c0_i32 = arith.constant 0 : i32
    %0 = arith.cmpi eq, %arg1, %c0_i32 : i32
    %1 = arith.extui %0 : i1 to i32
    %c0_i32_0 = arith.constant 0 : i32
    %2 = arith.cmpi ne, %1, %c0_i32_0 : i32
    scf.if %2 {
      %c0_10 = arith.constant 0 : index
      %c0_11 = arith.constant 0 : index
      %12 = vector.load %arg4[%c0_10, %c0_11] : memref<32x128xf32, #tpu.memory_space<vmem>>, vector<32x128xf32>
      %c0_12 = arith.constant 0 : index
      %c0_13 = arith.constant 0 : index
      %13 = vector.load %arg9[%c0_12, %c0_13] : memref<32x128xf32, #tpu.memory_space<vmem>>, vector<32x128xf32>
      tpu.vector_store %arg9[%c0_12, %c0_13], %12 {strides = array<i32>} : memref<32x128xf32, #tpu.memory_space<vmem>>, vector<32x128xf32>,
    } else {
    }
    %c0 = arith.constant 0 : index
    %c0_1 = arith.constant 0 : index
    %3 = vector.load %arg9[%c0, %c0_1] : memref<32x128xf32, #tpu.memory_space<vmem>>, vector<32x128xf32>
    %c0_2 = arith.constant 0 : index
    %c0_3 = arith.constant 0 : index
    %4 = vector.load %arg2[%c0_2, %c0_3] : memref<32x256xbf16, #tpu.memory_space<vmem>>, vector<32x256xbf16>
    %c0_4 = arith.constant 0 : index
    %c0_5 = arith.constant 0 : index
    %5 = vector.load %arg3[%c0_4, %c0_5] : memref<256x128xbf16, #tpu.memory_space<vmem>>, vector<256x128xbf16>
    %cst = arith.constant dense<0.000000e+00> : vector<32x128xf32>
    %6 = tpu.matmul %4, %5, %cst {dimension_numbers = #tpu.dot_dimension_numbers<[1], [0], [0], [1], [0, 0, 1, 1], [], []>} : vector<32x256xbf16>, vector<256x128xbf16>, vector<32x128xf32> -> vector<32x128xf32>
    %7 = arith.addf %3, %6 : vector<32x128xf32>
    %c0_6 = arith.constant 0 : index
    %c0_7 = arith.constant 0 : index
    %8 = vector.load %arg9[%c0_6, %c0_7] : memref<32x128xf32, #tpu.memory_space<vmem>>, vector<32x128xf32>
    tpu.vector_store %arg9[%c0_6, %c0_7], %7 {strides = array<i32>} : memref<32x128xf32, #tpu.memory_space<vmem>>, vector<32x128xf32>,
    %c0_i32_8 = arith.constant 0 : i32
    %9 = arith.cmpi eq, %arg1, %c0_i32_8 : i32
    %10 = arith.extui %9 : i1 to i32
    %c0_i32_9 = arith.constant 0 : i32
    %11 = arith.cmpi ne, %10, %c0_i32_9 : i32
    scf.if %11 {
      %c0_10 = arith.constant 0 : index
      %c0_11 = arith.constant 0 : index
      %12 = vector.load %arg9[%c0_10, %c0_11] : memref<32x128xf32, #tpu.memory_space<vmem>>, vector<32x128xf32>
      %13 = vector.extract_strided_slice %12 {offsets = [0, 0], sizes = [32, 32], strides = [1, 1]} : vector<32x128xf32> to vector<32x32xf32>
      %14 = arith.negf %13 : vector<32x32xf32>
      %15 = math.exp %14 : vector<32x32xf32>
      %cst_12 = arith.constant 1.000000e+00 : f32
      %16 = vector.broadcast %cst_12 : f32 to vector<32x32xf32>
      %17 = arith.addf %16, %15 : vector<32x32xf32>
      %18 = arith.divf %16, %17 : vector<32x32xf32>
      %19 = vector.extract_strided_slice %12 {offsets = [0, 32], sizes = [32, 32], strides = [1, 1]} : vector<32x128xf32> to vector<32x32xf32>
      %20 = arith.negf %19 : vector<32x32xf32>
      %21 = math.exp %20 : vector<32x32xf32>
      %cst_13 = arith.constant 1.000000e+00 : f32
      %22 = vector.broadcast %cst_13 : f32 to vector<32x32xf32>
      %23 = arith.addf %22, %21 : vector<32x32xf32>
      %24 = arith.divf %22, %23 : vector<32x32xf32>
      %25 = vector.extract_strided_slice %12 {offsets = [0, 64], sizes = [32, 32], strides = [1, 1]} : vector<32x128xf32> to vector<32x32xf32>
      %26 = arith.negf %25 : vector<32x32xf32>
      %27 = math.exp %26 : vector<32x32xf32>
      %cst_14 = arith.constant 1.000000e+00 : f32
      %28 = vector.broadcast %cst_14 : f32 to vector<32x32xf32>
      %29 = arith.addf %28, %27 : vector<32x32xf32>
      %30 = arith.divf %28, %29 : vector<32x32xf32>
      %31 = vector.extract_strided_slice %12 {offsets = [0, 96], sizes = [32, 32], strides = [1, 1]} : vector<32x128xf32> to vector<32x32xf32>
      %32 = math.tanh %31 : vector<32x32xf32>
      %c0_15 = arith.constant 0 : index
      %c0_16 = arith.constant 0 : index
      %33 = vector.load %arg5[%c0_15, %c0_16] : memref<32x128xf32, #tpu.memory_space<vmem>>, vector<32x32xf32>
      %34 = arith.mulf %18, %33 : vector<32x32xf32>
      %35 = arith.mulf %24, %32 : vector<32x32xf32>
      %36 = arith.addf %34, %35 : vector<32x32xf32>
      %37 = math.tanh %36 : vector<32x32xf32>
      %38 = arith.mulf %30, %37 : vector<32x32xf32>
      %cst_17 = arith.constant 0.000000e+00 : f32
      %39 = vector.broadcast %cst_17 : f32 to vector<32x64xf32>
      %40 = tpu.concatenate %36, %38, %39 in 1 : vector<32x32xf32>, vector<32x32xf32>, vector<32x64xf32> -> vector<32x128xf32>
      %c0_18 = arith.constant 0 : index
      %c0_19 = arith.constant 0 : index
      %41 = vector.load %arg7[%c0_18, %c0_19] : memref<32x128xf32, #tpu.memory_space<vmem>>, vector<32x128xf32>
      tpu.vector_store %arg7[%c0_18, %c0_19], %40 {strides = array<i32>} : memref<32x128xf32, #tpu.memory_space<vmem>>, vector<32x128xf32>,
      %42 = arith.truncf %38 : vector<32x32xf32> to vector<32x32xbf16>
      %c0_20 = arith.constant 0 : index
      %c0_21 = arith.constant 0 : index
      %43 = vector.load %arg6[%c0_20, %c0_21] : memref<32x512xbf16, #tpu.memory_space<vmem>>, vector<32x512xbf16>
      %cst_22 = arith.constant dense<0.000000e+00> : vector<32x512xf32>
      %44 = tpu.matmul %42, %43, %cst_22 {dimension_numbers = #tpu.dot_dimension_numbers<[1], [0], [0], [1], [0, 0, 1, 1], [], []>} : vector<32x32xbf16>, vector<32x512xbf16>, vector<32x512xf32> -> vector<32x512xf32>
      %c0_23 = arith.constant 0 : index
      %c0_24 = arith.constant 0 : index
      %45 = vector.load %arg8[%c0_23, %c0_24] : memref<32x512xf32, #tpu.memory_space<vmem>>, vector<32x512xf32>
      tpu.vector_store %arg8[%c0_23, %c0_24], %44 {strides = array<i32>} : memref<32x512xf32, #tpu.memory_space<vmem>>, vector<32x512xf32>,
    } else {
    }
    return
  }
  func.func @transform_0(%arg0: i32, %arg1: i32) -> (i32, i32) {
    %c0_i32 = arith.constant 0 : i32
    return %arg0, %arg1 : i32, i32
  }
  func.func @transform_1(%arg0: i32, %arg1: i32) -> (i32, i32) {
    %c0_i32 = arith.constant 0 : i32
    %c0_i32_0 = arith.constant 0 : i32
    return %arg1, %c0_i32 : i32, i32
  }
  func.func @transform_2(%arg0: i32, %arg1: i32) -> (i32, i32) {
    %c0_i32 = arith.constant 0 : i32
    %c0_i32_0 = arith.constant 0 : i32
    return %arg0, %c0_i32 : i32, i32
  }
  func.func @transform_3(%arg0: i32, %arg1: i32) -> (i32, i32) {
    %c0_i32 = arith.constant 0 : i32
    %c0_i32_0 = arith.constant 0 : i32
    return %arg0, %c0_i32 : i32, i32
  }
  func.func @transform_4(%arg0: i32, %arg1: i32) -> (i32, i32) {
    %c0_i32 = arith.constant 0 : i32
    %c0_i32_0 = arith.constant 0 : i32
    %c0_i32_1 = arith.constant 0 : i32
    return %c0_i32, %c0_i32_0 : i32, i32
  }
  func.func @transform_5(%arg0: i32, %arg1: i32) -> (i32, i32) {
    %c0_i32 = arith.constant 0 : i32
    %c0_i32_0 = arith.constant 0 : i32
    return %arg0, %c0_i32 : i32, i32
  }
  func.func @transform_6(%arg0: i32, %arg1: i32) -> (i32, i32) {
    %c0_i32 = arith.constant 0 : i32
    %c0_i32_0 = arith.constant 0 : i32
    return %arg0, %c0_i32 : i32, i32
  }
}

module attributes {stable_mosaic.version = 11 : i64} {
  func.func @_gen_gates_kernel(%arg0: i32, %arg1: i32, %arg2: memref<32x256xbf16, #tpu.memory_space<vmem>>, %arg3: memref<256x128xbf16, #tpu.memory_space<vmem>>, %arg4: memref<32x128xf32, #tpu.memory_space<vmem>>, %arg5: memref<32x128xf32, #tpu.memory_space<vmem>>, %arg6: memref<32x512xbf16, #tpu.memory_space<vmem>>, %arg7: memref<32x128xf32, #tpu.memory_space<vmem>>, %arg8: memref<32x512xf32, #tpu.memory_space<vmem>>, %arg9: memref<32x128xf32, #tpu.memory_space<vmem>>) attributes {dimension_semantics = [#tpu.dimension_semantics<parallel>, #tpu.dimension_semantics<arbitrary>], iteration_bounds = array<i64: 1, 1>, scalar_prefetch = 0 : i64, scratch_operands = 1 : i64, tpu.core_type = #tpu.core_type<tc>, window_params = [{transform_indices = @transform_0, window_bounds = array<i64: 32, 256>}, {transform_indices = @transform_1, window_bounds = array<i64: 256, 128>}, {transform_indices = @transform_2, window_bounds = array<i64: 32, 128>}, {transform_indices = @transform_3, window_bounds = array<i64: 32, 128>}, {pipeline_mode = #tpu.pipeline_mode<synchronous>, transform_indices = @transform_4, window_bounds = array<i64: 32, 512>}, {transform_indices = @transform_5, window_bounds = array<i64: 32, 128>}, {transform_indices = @transform_6, window_bounds = array<i64: 32, 512>}]} {
    %c0_i32 = arith.constant 0 : i32
    %0 = arith.cmpi eq, %arg1, %c0_i32 : i32
    %1 = arith.extui %0 : i1 to i32
    %c0_i32_0 = arith.constant 0 : i32
    %2 = arith.cmpi ne, %1, %c0_i32_0 : i32
    scf.if %2 {
      %c0_10 = arith.constant 0 : index
      %c0_11 = arith.constant 0 : index
      %12 = vector.load %arg4[%c0_10, %c0_11] : memref<32x128xf32, #tpu.memory_space<vmem>>, vector<32x128xf32>
      %c0_12 = arith.constant 0 : index
      %c0_13 = arith.constant 0 : index
      %13 = vector.load %arg9[%c0_12, %c0_13] : memref<32x128xf32, #tpu.memory_space<vmem>>, vector<32x128xf32>
      tpu.vector_store %arg9[%c0_12, %c0_13], %12 {strides = array<i32>} : memref<32x128xf32, #tpu.memory_space<vmem>>, vector<32x128xf32>,
    } else {
    }
    %c0 = arith.constant 0 : index
    %c0_1 = arith.constant 0 : index
    %3 = vector.load %arg9[%c0, %c0_1] : memref<32x128xf32, #tpu.memory_space<vmem>>, vector<32x128xf32>
    %c0_2 = arith.constant 0 : index
    %c0_3 = arith.constant 0 : index
    %4 = vector.load %arg2[%c0_2, %c0_3] : memref<32x256xbf16, #tpu.memory_space<vmem>>, vector<32x256xbf16>
    %c0_4 = arith.constant 0 : index
    %c0_5 = arith.constant 0 : index
    %5 = vector.load %arg3[%c0_4, %c0_5] : memref<256x128xbf16, #tpu.memory_space<vmem>>, vector<256x128xbf16>
    %cst = arith.constant dense<0.000000e+00> : vector<32x128xf32>
    %6 = tpu.matmul %4, %5, %cst {dimension_numbers = #tpu.dot_dimension_numbers<[1], [0], [0], [1], [0, 0, 1, 1], [], []>} : vector<32x256xbf16>, vector<256x128xbf16>, vector<32x128xf32> -> vector<32x128xf32>
    %7 = arith.addf %3, %6 : vector<32x128xf32>
    %c0_6 = arith.constant 0 : index
    %c0_7 = arith.constant 0 : index
    %8 = vector.load %arg9[%c0_6, %c0_7] : memref<32x128xf32, #tpu.memory_space<vmem>>, vector<32x128xf32>
    tpu.vector_store %arg9[%c0_6, %c0_7], %7 {strides = array<i32>} : memref<32x128xf32, #tpu.memory_space<vmem>>, vector<32x128xf32>,
    %c0_i32_8 = arith.constant 0 : i32
    %9 = arith.cmpi eq, %arg1, %c0_i32_8 : i32
    %10 = arith.extui %9 : i1 to i32
    %c0_i32_9 = arith.constant 0 : i32
    %11 = arith.cmpi ne, %10, %c0_i32_9 : i32
    scf.if %11 {
      %c0_10 = arith.constant 0 : index
      %c0_11 = arith.constant 0 : index
      %12 = vector.load %arg9[%c0_10, %c0_11] : memref<32x128xf32, #tpu.memory_space<vmem>>, vector<32x128xf32>
      %13 = vector.extract_strided_slice %12 {offsets = [0, 0], sizes = [32, 32], strides = [1, 1]} : vector<32x128xf32> to vector<32x32xf32>
      %14 = arith.negf %13 : vector<32x32xf32>
      %15 = math.exp %14 : vector<32x32xf32>
      %cst_12 = arith.constant 1.000000e+00 : f32
      %16 = vector.broadcast %cst_12 : f32 to vector<32x32xf32>
      %17 = arith.addf %16, %15 : vector<32x32xf32>
      %18 = arith.divf %16, %17 : vector<32x32xf32>
      %19 = vector.extract_strided_slice %12 {offsets = [0, 32], sizes = [32, 32], strides = [1, 1]} : vector<32x128xf32> to vector<32x32xf32>
      %20 = arith.negf %19 : vector<32x32xf32>
      %21 = math.exp %20 : vector<32x32xf32>
      %cst_13 = arith.constant 1.000000e+00 : f32
      %22 = vector.broadcast %cst_13 : f32 to vector<32x32xf32>
      %23 = arith.addf %22, %21 : vector<32x32xf32>
      %24 = arith.divf %22, %23 : vector<32x32xf32>
      %25 = vector.extract_strided_slice %12 {offsets = [0, 64], sizes = [32, 32], strides = [1, 1]} : vector<32x128xf32> to vector<32x32xf32>
      %26 = arith.negf %25 : vector<32x32xf32>
      %27 = math.exp %26 : vector<32x32xf32>
      %cst_14 = arith.constant 1.000000e+00 : f32
      %28 = vector.broadcast %cst_14 : f32 to vector<32x32xf32>
      %29 = arith.addf %28, %27 : vector<32x32xf32>
      %30 = arith.divf %28, %29 : vector<32x32xf32>
      %31 = vector.extract_strided_slice %12 {offsets = [0, 96], sizes = [32, 32], strides = [1, 1]} : vector<32x128xf32> to vector<32x32xf32>
      %32 = math.tanh %31 : vector<32x32xf32>
      %c0_15 = arith.constant 0 : index
      %c0_16 = arith.constant 0 : index
      %33 = vector.load %arg5[%c0_15, %c0_16] : memref<32x128xf32, #tpu.memory_space<vmem>>, vector<32x32xf32>
      %34 = arith.mulf %18, %33 : vector<32x32xf32>
      %35 = arith.mulf %24, %32 : vector<32x32xf32>
      %36 = arith.addf %34, %35 : vector<32x32xf32>
      %37 = math.tanh %36 : vector<32x32xf32>
      %38 = arith.mulf %30, %37 : vector<32x32xf32>
      %cst_17 = arith.constant 0.000000e+00 : f32
      %39 = vector.broadcast %cst_17 : f32 to vector<32x64xf32>
      %40 = tpu.concatenate %36, %38, %39 in 1 : vector<32x32xf32>, vector<32x32xf32>, vector<32x64xf32> -> vector<32x128xf32>
      %c0_18 = arith.constant 0 : index
      %c0_19 = arith.constant 0 : index
      %41 = vector.load %arg7[%c0_18, %c0_19] : memref<32x128xf32, #tpu.memory_space<vmem>>, vector<32x128xf32>
      tpu.vector_store %arg7[%c0_18, %c0_19], %40 {strides = array<i32>} : memref<32x128xf32, #tpu.memory_space<vmem>>, vector<32x128xf32>,
      %42 = arith.truncf %38 : vector<32x32xf32> to vector<32x32xbf16>
      %c0_20 = arith.constant 0 : index
      %c0_21 = arith.constant 0 : index
      %43 = vector.load %arg6[%c0_20, %c0_21] : memref<32x512xbf16, #tpu.memory_space<vmem>>, vector<32x512xbf16>
      %cst_22 = arith.constant dense<0.000000e+00> : vector<32x512xf32>
      %44 = tpu.matmul %42, %43, %cst_22 {dimension_numbers = #tpu.dot_dimension_numbers<[1], [0], [0], [1], [0, 0, 1, 1], [], []>} : vector<32x32xbf16>, vector<32x512xbf16>, vector<32x512xf32> -> vector<32x512xf32>
      %c0_23 = arith.constant 0 : index
      %c0_24 = arith.constant 0 : index
      %45 = vector.load %arg8[%c0_23, %c0_24] : memref<32x512xf32, #tpu.memory_space<vmem>>, vector<32x512xf32>
      tpu.vector_store %arg8[%c0_23, %c0_24], %44 {strides = array<i32>} : memref<32x512xf32, #tpu.memory_space<vmem>>, vector<32x512xf32>,
    } else {
    }
    return
  }
  func.func @transform_0(%arg0: i32, %arg1: i32) -> (i32, i32) {
    %c0_i32 = arith.constant 0 : i32
    return %arg0, %arg1 : i32, i32
  }
  func.func @transform_1(%arg0: i32, %arg1: i32) -> (i32, i32) {
    %c0_i32 = arith.constant 0 : i32
    %c0_i32_0 = arith.constant 0 : i32
    return %arg1, %c0_i32 : i32, i32
  }
  func.func @transform_2(%arg0: i32, %arg1: i32) -> (i32, i32) {
    %c0_i32 = arith.constant 0 : i32
    %c0_i32_0 = arith.constant 0 : i32
    return %arg0, %c0_i32 : i32, i32
  }
  func.func @transform_3(%arg0: i32, %arg1: i32) -> (i32, i32) {
    %c0_i32 = arith.constant 0 : i32
    %c0_i32_0 = arith.constant 0 : i32
    return %arg0, %c0_i32 : i32, i32
  }
  func.func @transform_4(%arg0: i32, %arg1: i32) -> (i32, i32) {
    %c0_i32 = arith.constant 0 : i32
    %c0_i32_0 = arith.constant 0 : i32
    %c0_i32_1 = arith.constant 0 : i32
    return %c0_i32, %c0_i32_0 : i32, i32
  }
  func.func @transform_5(%arg0: i32, %arg1: i32) -> (i32, i32) {
    %c0_i32 = arith.constant 0 : i32
    %c0_i32_0 = arith.constant 0 : i32
    return %arg0, %c0_i32 : i32, i32
  }
  func.func @transform_6(%arg0: i32, %arg1: i32) -> (i32, i32) {
    %c0_i32 = arith.constant 0 : i32
    %c0_i32_0 = arith.constant 0 : i32
    return %arg0, %c0_i32 : i32, i32
  }
}

module attributes {stable_mosaic.version = 11 : i64} {
  func.func @_mm_kernel(%arg0: i32, %arg1: i32, %arg2: i32, %arg3: memref<128x128xbf16, #tpu.memory_space<vmem>>, %arg4: memref<128x128xbf16, #tpu.memory_space<vmem>>, %arg5: memref<1x128xf32, #tpu.memory_space<vmem>>, %arg6: memref<128x128xf32, #tpu.memory_space<vmem>>, %arg7: memref<128x128xf32, #tpu.memory_space<vmem>>) attributes {dimension_semantics = [#tpu.dimension_semantics<parallel>, #tpu.dimension_semantics<parallel>, #tpu.dimension_semantics<arbitrary>], iteration_bounds = array<i64: 4, 1, 1>, scalar_prefetch = 0 : i64, scratch_operands = 1 : i64, tpu.core_type = #tpu.core_type<tc>, window_params = [{transform_indices = @transform_0, window_bounds = array<i64: 128, 128>}, {transform_indices = @transform_1, window_bounds = array<i64: 128, 128>}, {transform_indices = @transform_2, window_bounds = array<i64: 1, 128>}, {transform_indices = @transform_3, window_bounds = array<i64: 128, 128>}]} {
    %c0_i32 = arith.constant 0 : i32
    %0 = arith.cmpi eq, %arg2, %c0_i32 : i32
    %1 = arith.extui %0 : i1 to i32
    %c0_i32_0 = arith.constant 0 : i32
    %2 = arith.cmpi ne, %1, %c0_i32_0 : i32
    scf.if %2 {
      %c0_10 = arith.constant 0 : index
      %c0_11 = arith.constant 0 : index
      %12 = vector.load %arg5[%c0_10, %c0_11] : memref<1x128xf32, #tpu.memory_space<vmem>>, vector<1x128xf32>
      %13 = vector.shape_cast %12 : vector<1x128xf32> to vector<1x128xf32>
      %14 = vector.broadcast %13 : vector<1x128xf32> to vector<128x128xf32>
      %c0_12 = arith.constant 0 : index
      %c0_13 = arith.constant 0 : index
      %15 = vector.load %arg7[%c0_12, %c0_13] : memref<128x128xf32, #tpu.memory_space<vmem>>, vector<128x128xf32>
      tpu.vector_store %arg7[%c0_12, %c0_13], %14 {strides = array<i32>} : memref<128x128xf32, #tpu.memory_space<vmem>>, vector<128x128xf32>,
    } else {
    }
    %c0 = arith.constant 0 : index
    %c0_1 = arith.constant 0 : index
    %3 = vector.load %arg7[%c0, %c0_1] : memref<128x128xf32, #tpu.memory_space<vmem>>, vector<128x128xf32>
    %c0_2 = arith.constant 0 : index
    %c0_3 = arith.constant 0 : index
    %4 = vector.load %arg3[%c0_2, %c0_3] : memref<128x128xbf16, #tpu.memory_space<vmem>>, vector<128x128xbf16>
    %c0_4 = arith.constant 0 : index
    %c0_5 = arith.constant 0 : index
    %5 = vector.load %arg4[%c0_4, %c0_5] : memref<128x128xbf16, #tpu.memory_space<vmem>>, vector<128x128xbf16>
    %cst = arith.constant dense<0.000000e+00> : vector<128x128xf32>
    %6 = tpu.matmul %4, %5, %cst {dimension_numbers = #tpu.dot_dimension_numbers<[1], [0], [0], [1], [0, 0, 1, 1], [], []>} : vector<128x128xbf16>, vector<128x128xbf16>, vector<128x128xf32> -> vector<128x128xf32>
    %7 = arith.addf %3, %6 : vector<128x128xf32>
    %c0_6 = arith.constant 0 : index
    %c0_7 = arith.constant 0 : index
    %8 = vector.load %arg7[%c0_6, %c0_7] : memref<128x128xf32, #tpu.memory_space<vmem>>, vector<128x128xf32>
    tpu.vector_store %arg7[%c0_6, %c0_7], %7 {strides = array<i32>} : memref<128x128xf32, #tpu.memory_space<vmem>>, vector<128x128xf32>,
    %c0_i32_8 = arith.constant 0 : i32
    %9 = arith.cmpi eq, %arg2, %c0_i32_8 : i32
    %10 = arith.extui %9 : i1 to i32
    %c0_i32_9 = arith.constant 0 : i32
    %11 = arith.cmpi ne, %10, %c0_i32_9 : i32
    scf.if %11 {
      %c0_10 = arith.constant 0 : index
      %c0_11 = arith.constant 0 : index
      %12 = vector.load %arg7[%c0_10, %c0_11] : memref<128x128xf32, #tpu.memory_space<vmem>>, vector<128x128xf32>
      %13 = arith.negf %12 : vector<128x128xf32>
      %14 = math.exp %13 : vector<128x128xf32>
      %cst_12 = arith.constant 1.000000e+00 : f32
      %15 = vector.broadcast %cst_12 : f32 to vector<128x128xf32>
      %16 = arith.addf %15, %14 : vector<128x128xf32>
      %17 = arith.divf %15, %16 : vector<128x128xf32>
      %c0_13 = arith.constant 0 : index
      %c0_14 = arith.constant 0 : index
      %18 = vector.load %arg6[%c0_13, %c0_14] : memref<128x128xf32, #tpu.memory_space<vmem>>, vector<128x128xf32>
      tpu.vector_store %arg6[%c0_13, %c0_14], %17 {strides = array<i32>} : memref<128x128xf32, #tpu.memory_space<vmem>>, vector<128x128xf32>,
    } else {
    }
    return
  }
  func.func @transform_0(%arg0: i32, %arg1: i32, %arg2: i32) -> (i32, i32) {
    %c0_i32 = arith.constant 0 : i32
    return %arg0, %arg2 : i32, i32
  }
  func.func @transform_1(%arg0: i32, %arg1: i32, %arg2: i32) -> (i32, i32) {
    %c0_i32 = arith.constant 0 : i32
    return %arg2, %arg1 : i32, i32
  }
  func.func @transform_2(%arg0: i32, %arg1: i32, %arg2: i32) -> (i32, i32) {
    %c0_i32 = arith.constant 0 : i32
    %c0_i32_0 = arith.constant 0 : i32
    return %c0_i32, %arg1 : i32, i32
  }
  func.func @transform_3(%arg0: i32, %arg1: i32, %arg2: i32) -> (i32, i32) {
    %c0_i32 = arith.constant 0 : i32
    return %arg0, %arg1 : i32, i32
  }
}

</mosaic_0001>

<bundles_post_ra>
// kernel: _gqn_apply.21
= control target key start
LH: loop header
LB: loop body
LE: loop exit
PB: predicated region body
PF: predicated region fallthrough
CT: control target
= control target key end

     0   :  { %s900_s12 = smov 0   ;;  %s902_s13 = smov 0   ;;  %s992_s0 = inlined_call_operand.vmem [shape: bf16[640,128], index: 0, kind: input, shape index: {}]   ;;  %s993_s1 = inlined_call_operand.vmem [shape: bf16[128,128], index: 1, kind: input, shape index: {}]   ;;  %s994_s2 = inlined_call_operand.vmem [shape: f32[1,128], index: 2, kind: input, shape index: {}]   ;;  %s995_s3 = inlined_call_operand.vmem [shape: f32[640,128], index: 3, kind: output, shape index: {}]  }
   0x1   :  { %s904_s14 = smov 0  }
   0x2 LB: > { %s32_s15 = sadd.s32 1, %s874_s13  ;;  %p728_p0 = scmp.ge.s32.totalorder %s878_s14, 1  ;;  %s878_s14 = sphi %s904_s14, %s13_s14   ;;  %s874_s13 = sphi %s902_s13, %s997_s13   ;;  %s870_s12 = sphi %s900_s12, %s996_s12  }
   0x3   : > { %p34_p1 = scmp.ge.s32.totalorder %s32_s15, 5  ;;  %p188_p2 = scmp.lt.s32.totalorder %s878_s14, 6 }
   0x5   : > { %s999_s15 = smov (%p34_p1, %s32_s15), 0  ;;  %p189_p3 = pnand %p728_p0, %p188_p2 }
   0x6   : > { %v840_v0 = vld [vmem:[%s993_s1] sm:$0xff] (!%p189_p3)   ;;  %s729_s18 = sshll.u32 (!%p189_p3), %s870_s12, 4  ;;  %v841_v1 = vld [vmem:[%s993_s1 + $0x8] sm:$0xff] (!%p189_p3)   ;;  %v842_v2 = vld [vmem:[%s993_s1 + $0x10] sm:$0xff] (!%p189_p3)  }
   0x7   : > { %192 = sbr.rel (%p189_p3) target bundleno = 267 (0x10b), region = 32  ;;  %p230_p4 = scmp.lt.s32.totalorder (!%p189_p3), %s729_s18, 79  ;;  %768 = vmatprep.subr.bf16.mxu0 (!%p189_p3), %v840_v0  ;;  %800 = vmatprep.subr.bf16.mxu1 (!%p189_p3), %v840_v0  ;;  %v843_v3 = vld [vmem:[%s993_s1 + $0x18] sm:$0xff] (!%p189_p3)   ;;  %v844_v6 = vld [vmem:[%s993_s1 + $0x20] sm:$0xff] (!%p189_p3)   ;;  %v845_v7 = vld [vmem:[%s993_s1 + $0x28] sm:$0xff] (!%p189_p3)  }
   0x8   : > { %769 = vmatpush3.bf16.msra.mxu0 (!%p189_p3), %v840_v0  ;;  %808 = vmatpush3.bf16.msra.mxu1 (!%p189_p3), %v840_v0  ;;  %v846_v8 = vld [vmem:[%s993_s1 + $0x30] sm:$0xff] (!%p189_p3)   ;;  %v847_v9 = vld [vmem:[%s993_s1 + $0x38] sm:$0xff] (!%p189_p3)   ;;  %v733_v16 = vld [vmem:[%s994_s2] ss:$0 sm:$0xff] (!%p189_p3) }
   0x9   : > { %770 = vmatprep.subr.bf16.mxu0 (!%p189_p3), %v841_v1  ;;  %801 = vmatprep.subr.bf16.mxu1 (!%p189_p3), %v841_v1 }
   0xc   : > { %771 = vmatpush3.bf16.msra.mxu0 (!%p189_p3), %v841_v1  ;;  %809 = vmatpush3.bf16.msra.mxu1 (!%p189_p3), %v841_v1 }
   0xd   : > { %772 = vmatprep.subr.bf16.mxu0 (!%p189_p3), %v842_v2  ;;  %802 = vmatprep.subr.bf16.mxu1 (!%p189_p3), %v842_v2 }
   0xe   : > { %s1001_s18 = smov (!%p230_p4, %s729_s18), 79 }
   0xf   : > { %s730_s23 = sshll.u32 %s1001_s18, 2  ;;  %s732_s12 = sshll.u32 %s1001_s18, 3 }
  0x10   : > { %s933_s26 = scalar_lea.vmem %s992_s0, %s730_s23  ;;  %773 = vmatpush3.bf16.msra.mxu0 %v842_v2  ;;  %810 = vmatpush3.bf16.msra.mxu1 %v842_v2  ;;  %s965_s19 = scalar_lea.vmem %s995_s3, %s732_s12 }
  0x11   : > { %v848_v4 = vld [vmem:[%s933_s26] sm:$0xff]   ;;  %774 = vmatprep.subr.bf16.mxu0 %v843_v3  ;;  %803 = vmatprep.subr.bf16.mxu1 %v843_v3  ;;  %v850_v10 = vld [vmem:[%s933_s26 + $0x8] sm:$0xff]   ;;  %v852_v12 = vld [vmem:[%s933_s26 + $0x10] sm:$0xff]  }
  0x12   : > { %v849_v5 = vld [vmem:[%s933_s26 + $0x20] sm:$0xff]   ;;  %784 = vmatprep.mubr.bf16.mxu0 %v848_v4  ;;  %v851_v11 = vld [vmem:[%s933_s26 + $0x28] sm:$0xff]   ;;  %v853_v13 = vld [vmem:[%s933_s26 + $0x30] sm:$0xff]  }
  0x13   : > { %792 = vmatprep.mubr.bf16.mxu1 %v849_v5  ;;  %v854_v14 = vld [vmem:[%s933_s26 + $0x18] sm:$0xff]  }
  0x14   : > { %775 = vmatpush3.bf16.msra.mxu0 %v843_v3  ;;  %811 = vmatpush3.bf16.msra.mxu1 %v843_v3  ;;  %v855_v15 = vld [vmem:[%s933_s26 + $0x38] sm:$0xff]  }
  0x15   : > { %776 = vmatprep.subr.bf16.mxu0 %v844_v6  ;;  %804 = vmatprep.subr.bf16.mxu1 %v844_v6 }
  0x18   : > { %777 = vmatpush3.bf16.msra.mxu0 %v844_v6  ;;  %812 = vmatpush3.bf16.msra.mxu1 %v844_v6 }
  0x19   : > { %778 = vmatprep.subr.bf16.mxu0 %v845_v7  ;;  %805 = vmatprep.subr.bf16.mxu1 %v845_v7 }
  0x1c   : > { %779 = vmatpush3.bf16.msra.mxu0 %v845_v7  ;;  %813 = vmatpush3.bf16.msra.mxu1 %v845_v7 }
  0x1d   : > { %780 = vmatprep.subr.bf16.mxu0 %v846_v8  ;;  %806 = vmatprep.subr.bf16.mxu1 %v846_v8 }
  0x20   : > { %781 = vmatpush3.bf16.msra.mxu0 %v846_v8  ;;  %814 = vmatpush3.bf16.msra.mxu1 %v846_v8 }
  0x21   : > { %782 = vmatprep.subr.bf16.mxu0 %v847_v9  ;;  %807 = vmatprep.subr.bf16.mxu1 %v847_v9 }
  0x24   : > { %783 = vmatpush3.bf16.msra.mxu0 %v847_v9  ;;  %815 = vmatpush3.bf16.msra.mxu1 %v847_v9 }
  0x27   : > { %785 = vmatmul.mubr.bf16.vlgmr.msra.gmra.mrb[0].mxu0 %v850_v10  ;;  %793 = vmatmul.mubr.bf16.vlgmr.msra.gmra.mrb[0].mxu1 %v851_v11 }
  0x28   : > { %788 = vmatprep.mubr.bf16.mxu0 %v852_v12  ;;  %796 = vmatprep.mubr.bf16.mxu1 %v853_v13 }
  0x2f   : > { %789 = vmatmul.mubr.bf16.gmra.mrb[4].mxu0 %v854_v14  ;;  %797 = vmatmul.mubr.bf16.gmra.mrb[4].mxu1 %v855_v15 }
  0xfa   : > { %v786_v17 = vpop.f32.mrb[0].mxu0  ;;  %v794_v18 = vpop.f32.mrb[0].mxu1 }
  0xfb   : > { %v530_v19 = vadd.f32 %v786_v17, %v733_v16  ;;  %v538_v20 = vadd.f32 %v794_v18, %v733_v16  ;;  %v465_v21 = vpop.f32.mrb[1].mxu0  ;;  %v497_v22 = vpop.f32.mrb[1].mxu1 }
  0xfc   : > { %v528_v23 = vadd.f32 %v733_v16, %v465_v21  ;;  %v536_v24 = vadd.f32 %v733_v16, %v497_v22  ;;  %v787_v25 = vpop.f32.mrb[2].mxu0  ;;  %v795_v26 = vpop.f32.mrb[2].mxu1 }
  0xfd   : > { %v581_v27 = vmax.f32 %v530_v19, 0.0  ;;  %v589_v28 = vmax.f32 %v538_v20, 0.0  ;;  %v531_v29 = vadd.f32 %v787_v25, %v733_v16  ;;  %v539_v30 = vadd.f32 %v795_v26, %v733_v16  ;;  %v468_v31 = vpop.f32.mrb[3].mxu0  ;;  %v500_v32 = vpop.f32.mrb[3].mxu1 }
  0xfe   : > { %v579_v33 = vmax.f32 %v528_v23, 0.0  ;;  %v587_v34 = vmax.f32 %v536_v24, 0.0  ;;  %v529_v35 = vadd.f32 %v733_v16, %v468_v31  ;;  %v537_v36 = vadd.f32 %v733_v16, %v500_v32 }
  0xff   : > { %597 = vst [vmem:[%s965_s19 + $0x10] sm:$0xff] %v581_v27  ;;  %605 = vst [vmem:[%s965_s19 + $0x50] sm:$0xff] %v589_v28  ;;  %v582_v37 = vmax.f32 %v531_v29, 0.0  ;;  %v590_v38 = vmax.f32 %v539_v30, 0.0 }
 0x100   : > { %595 = vst [vmem:[%s965_s19] sm:$0xff] %v579_v33  ;;  %603 = vst [vmem:[%s965_s19 + $0x40] sm:$0xff] %v587_v34  ;;  %v580_v39 = vmax.f32 %v529_v35, 0.0  ;;  %v588_v40 = vmax.f32 %v537_v36, 0.0 }
 0x101   : > { %598 = vst [vmem:[%s965_s19 + $0x18] sm:$0xff] %v582_v37  ;;  %606 = vst [vmem:[%s965_s19 + $0x58] sm:$0xff] %v590_v38 }
 0x102   : > { %596 = vst [vmem:[%s965_s19 + $0x8] sm:$0xff] %v580_v39  ;;  %604 = vst [vmem:[%s965_s19 + $0x48] sm:$0xff] %v588_v40  ;;  %v790_v41 = vpop.f32.mrb[4].mxu0  ;;  %v798_v42 = vpop.f32.mrb[4].mxu1 }
 0x103   : > { %v534_v43 = vadd.f32 %v790_v41, %v733_v16  ;;  %v542_v44 = vadd.f32 %v798_v42, %v733_v16  ;;  %v481_v45 = vpop.f32.mrb[5].mxu0  ;;  %v513_v46 = vpop.f32.mrb[5].mxu1 }
 0x104   : > { %v532_v47 = vadd.f32 %v733_v16, %v481_v45  ;;  %v540_v48 = vadd.f32 %v733_v16, %v513_v46  ;;  %v791_v49 = vpop.f32.mrb[6].mxu0  ;;  %v799_v50 = vpop.f32.mrb[6].mxu1 }
 0x105   : > { %v585_v51 = vmax.f32 %v534_v43, 0.0  ;;  %v593_v52 = vmax.f32 %v542_v44, 0.0  ;;  %v535_v53 = vadd.f32 %v791_v49, %v733_v16  ;;  %v543_v54 = vadd.f32 %v799_v50, %v733_v16  ;;  %v484_v55 = vpop.f32.mrb[7].mxu0  ;;  %v516_v56 = vpop.f32.mrb[7].mxu1 }
 0x106   : > { %v583_v57 = vmax.f32 %v532_v47, 0.0  ;;  %v591_v58 = vmax.f32 %v540_v48, 0.0  ;;  %v533_v59 = vadd.f32 %v733_v16, %v484_v55  ;;  %v541_v60 = vadd.f32 %v733_v16, %v516_v56 }
 0x107   : > { %601 = vst [vmem:[%s965_s19 + $0x30] sm:$0xff] %v585_v51  ;;  %609 = vst [vmem:[%s965_s19 + $0x70] sm:$0xff] %v593_v52  ;;  %v586_v61 = vmax.f32 %v535_v53, 0.0  ;;  %v594_v62 = vmax.f32 %v543_v54, 0.0 }
 0x108   : > { %599 = vst [vmem:[%s965_s19 + $0x20] sm:$0xff] %v583_v57  ;;  %607 = vst [vmem:[%s965_s19 + $0x60] sm:$0xff] %v591_v58  ;;  %v584_v63 = vmax.f32 %v533_v59, 0.0  ;;  %v592_v0 = vmax.f32 %v541_v60, 0.0 }
 0x109   : > { %602 = vst [vmem:[%s965_s19 + $0x38] sm:$0xff] %v586_v61  ;;  %610 = vst [vmem:[%s965_s19 + $0x78] sm:$0xff] %v594_v62 }
 0x10a   : > { %600 = vst [vmem:[%s965_s19 + $0x28] sm:$0xff] %v584_v63  ;;  %608 = vst [vmem:[%s965_s19 + $0x68] sm:$0xff] %v592_v0 }
 0x10b PF: > { %s13_s14 = sadd.s32 1, %s878_s14   ;;  %s996_s12 = smov %s874_s13 }
 0x10c   : > { %p10_p5 = scmp.ge.s32.totalorder %s13_s14, 7   ;;  %s997_s13 = smov %s999_s15 }
 0x10e   :  { %12 = sbr.rel (!%p10_p5) target bundleno = 2 (0x2), region = 76 }

// kernel: _gqn_apply.22
= control target key start
LH: loop header
LB: loop body
LE: loop exit
PB: predicated region body
PF: predicated region fallthrough
CT: control target
= control target key end

     0   :  { %s1353_s12 = smov 0   ;;  %s1355_s13 = smov 0   ;;  %s1530_s0 = inlined_call_operand.vmem [shape: bf16[640,384], index: 0, kind: input, shape index: {}]   ;;  %s1531_s1 = inlined_call_operand.vmem [shape: bf16[384,128], index: 1, kind: input, shape index: {}]   ;;  %s1532_s2 = inlined_call_operand.vmem [shape: f32[1,128], index: 2, kind: input, shape index: {}]   ;;  %s1533_s3 = inlined_call_operand.vmem [shape: f32[640,128], index: 3, kind: output, shape index: {}]  }
   0x1   :  { %s1357_s14 = smov 0  }
   0x2 LB: > { %s32_s15 = sadd.s32 1, %s1327_s13  ;;  %p1060_p0 = scmp.ge.s32.totalorder %s1331_s14, 1  ;;  %s1331_s14 = sphi %s1357_s14, %s13_s14   ;;  %s1327_s13 = sphi %s1355_s13, %s1535_s13   ;;  %s1323_s12 = sphi %s1353_s12, %s1534_s12  }
   0x3   : > { %p34_p1 = scmp.ge.s32.totalorder %s32_s15, 5  ;;  %p191_p2 = scmp.lt.s32.totalorder %s1331_s14, 6 }
   0x5   : > { %s1537_s15 = smov (%p34_p1, %s32_s15), 0  ;;  %p192_p3 = pnand %p1060_p0, %p191_p2 }
   0x6   : > { %v1253_v0 = vld [vmem:[%s1531_s1 + $0x40] sm:$0xff] (!%p192_p3)   ;;  %v1256_v3 = vld [vmem:[%s1531_s1 + $0x48] sm:$0xff] (!%p192_p3)   ;;  %v1259_v6 = vld [vmem:[%s1531_s1 + $0x50] sm:$0xff] (!%p192_p3)   ;;  %s1061_s5 = sshll.u32 (!%p192_p3), %s1323_s12, 4 }
   0x7   : > { %195 = sbr.rel (%p192_p3) target bundleno = 319 (0x13f), region = 32  ;;  %v1254_v1 = vld [vmem:[%s1531_s1] sm:$0xff] (!%p192_p3)   ;;  %1116 = vmatprep.subr.bf16.mxu0 (!%p192_p3), %v1253_v0  ;;  %v1257_v4 = vld [vmem:[%s1531_s1 + $0x8] sm:$0xff] (!%p192_p3)   ;;  %v1260_v7 = vld [vmem:[%s1531_s1 + $0x10] sm:$0xff] (!%p192_p3)   ;;  %p236_p4 = scmp.lt.s32.totalorder (!%p192_p3), %s1061_s5, 79 }
   0x8   : > { %v1255_v2 = vld [vmem:[%s1531_s1 + $0x80] sm:$0xff] (!%p192_p3)   ;;  %1117 = vmatpush3.bf16.msra.mxu0 (!%p192_p3), %v1254_v1  ;;  %v1258_v5 = vld [vmem:[%s1531_s1 + $0x88] sm:$0xff] (!%p192_p3)   ;;  %v1261_v8 = vld [vmem:[%s1531_s1 + $0x90] sm:$0xff] (!%p192_p3)  }
   0x9   : > { %1196 = vmatprep.subr.bf16.mxu1 (!%p192_p3), %v1255_v2  ;;  %1118 = vmatprep.subr.bf16.mxu0 (!%p192_p3), %v1256_v3  ;;  %v1262_v9 = vld [vmem:[%s1531_s1 + $0x58] sm:$0xff] (!%p192_p3)   ;;  %v1265_v12 = vld [vmem:[%s1531_s1 + $0x60] sm:$0xff] (!%p192_p3)   ;;  %v1268_v15 = vld [vmem:[%s1531_s1 + $0x68] sm:$0xff] (!%p192_p3)  }
   0xa   : > { %1197 = vmatpush3.bf16.msra.mxu1 (!%p192_p3), %v1255_v2  ;;  %v1263_v10 = vld [vmem:[%s1531_s1 + $0x18] sm:$0xff] (!%p192_p3)   ;;  %v1267_v13 = vld [vmem:[%s1531_s1 + $0xa0] sm:$0xff] (!%p192_p3)   ;;  %v1270_v16 = vld [vmem:[%s1531_s1 + $0xa8] sm:$0xff] (!%p192_p3)  }
   0xb   : > { %1198 = vmatprep.subr.bf16.mxu1 (!%p192_p3), %v1258_v5  ;;  %v1264_v11 = vld [vmem:[%s1531_s1 + $0x98] sm:$0xff] (!%p192_p3)   ;;  %v1266_v14 = vld [vmem:[%s1531_s1 + $0x20] sm:$0xff] (!%p192_p3)   ;;  %v1269_v17 = vld [vmem:[%s1531_s1 + $0x28] sm:$0xff] (!%p192_p3)  }
   0xc   : > { %1119 = vmatpush3.bf16.msra.mxu0 (!%p192_p3), %v1257_v4  ;;  %v1271_v18 = vld [vmem:[%s1531_s1 + $0x70] sm:$0xff] (!%p192_p3)   ;;  %v1274_v21 = vld [vmem:[%s1531_s1 + $0x78] sm:$0xff] (!%p192_p3)   ;;  %v1481_v54 = vld [vmem:[%s1532_s2] ss:$0 sm:$0xff] (!%p192_p3) }
   0xd   : > { %1120 = vmatprep.subr.bf16.mxu0 (!%p192_p3), %v1259_v6  ;;  %v1272_v19 = vld [vmem:[%s1531_s1 + $0x30] sm:$0xff] (!%p192_p3)   ;;  %v1276_v22 = vld [vmem:[%s1531_s1 + $0xb8] sm:$0xff] (!%p192_p3)  }
   0xe   : > { %1199 = vmatpush3.bf16.msra.mxu1 %v1258_v5  ;;  %s1539_s5 = smov (!%p236_p4, %s1061_s5), 79  ;;  %v1273_v20 = vld [vmem:[%s1531_s1 + $0xb0] sm:$0xff]   ;;  %v1275_v25 = vld [vmem:[%s1531_s1 + $0x38] sm:$0xff]  }
   0xf   : > { %1200 = vmatprep.subr.bf16.mxu1 %v1261_v8  ;;  %s1228_s27 = smul.u32 12, %s1539_s5  ;;  %s1064_s24 = sshll.u32 %s1539_s5, 3 }
  0x10   : > { %1121 = vmatpush3.bf16.msra.mxu0 %v1260_v7 }
  0x11   : > { %1122 = vmatprep.subr.bf16.mxu0 %v1262_v9  ;;  %s1443_s16 = scalar_lea.vmem %s1530_s0, %s1228_s27  ;;  %s1488_s27 = scalar_lea.vmem %s1533_s3, %s1064_s24 }
  0x12   : > { %1201 = vmatpush3.bf16.msra.mxu1 %v1261_v8  ;;  %v1279_v23 = vld [vmem:[%s1443_s16 + $0x4] ss:$12 sps:$4 sm:$0xff]   ;;  %v1280_v24 = vld [vmem:[%s1443_s16 + $0x8] ss:$12 sps:$4 sm:$0xff]   ;;  %v1277_v26 = vld [vmem:[%s1443_s16] ss:$12 sps:$4 sm:$0xff]  }
  0x13   : > { %1202 = vmatprep.subr.bf16.mxu1 %v1264_v11  ;;  %695 = vmatprep.mubr.bf16.mxu0 %v1279_v23  ;;  %v1282_v27 = vld [vmem:[%s1443_s16 + $0x1c] ss:$12 sps:$4 sm:$0xff]   ;;  %v1281_v28 = vld [vmem:[%s1443_s16 + $0x20] ss:$12 sps:$4 sm:$0xff]   ;;  %v1288_v29 = vld [vmem:[%s1443_s16 + $0x38] ss:$12 sps:$4 sm:$0xff]  }
  0x14   : > { %1123 = vmatpush3.bf16.msra.mxu0 %v1263_v10  ;;  %1212 = vmatprep.mubr.bf16.mxu1 %v1280_v24  ;;  %v1284_v30 = vld [vmem:[%s1443_s16 + $0x18] ss:$12 sps:$4 sm:$0xff]   ;;  %v1285_v31 = vld [vmem:[%s1443_s16 + $0x34] ss:$12 sps:$4 sm:$0xff]   ;;  %v1289_v32 = vld [vmem:[%s1443_s16 + $0x50] ss:$12 sps:$4 sm:$0xff]  }
  0x15   : > { %1124 = vmatprep.subr.bf16.mxu0 %v1265_v12  ;;  %v1296_v33 = vld [vmem:[%s1443_s16 + $0x68] ss:$12 sps:$4 sm:$0xff]   ;;  %v1287_v34 = vld [vmem:[%s1443_s16 + $0x30] ss:$12 sps:$4 sm:$0xff]   ;;  %v1290_v35 = vld [vmem:[%s1443_s16 + $0x4c] ss:$12 sps:$4 sm:$0xff]  }
  0x16   : > { %1203 = vmatpush3.bf16.msra.mxu1 %v1264_v11  ;;  %v1297_v36 = vld [vmem:[%s1443_s16 + $0x80] ss:$12 sps:$4 sm:$0xff]   ;;  %v1304_v37 = vld [vmem:[%s1443_s16 + $0x98] ss:$12 sps:$4 sm:$0xff]   ;;  %v1292_v38 = vld [vmem:[%s1443_s16 + $0x48] ss:$12 sps:$4 sm:$0xff]  }
  0x17   : > { %1204 = vmatprep.subr.bf16.mxu1 %v1267_v13  ;;  %v1293_v39 = vld [vmem:[%s1443_s16 + $0x64] ss:$12 sps:$4 sm:$0xff]   ;;  %v1295_v41 = vld [vmem:[%s1443_s16 + $0x60] ss:$12 sps:$4 sm:$0xff]   ;;  %v1298_v42 = vld [vmem:[%s1443_s16 + $0x7c] ss:$12 sps:$4 sm:$0xff]  }
  0x18   : > { %1125 = vmatpush3.bf16.msra.mxu0 %v1266_v14  ;;  %v1305_v40 = vld [vmem:[%s1443_s16 + $0xb0] ss:$12 sps:$4 sm:$0xff]   ;;  %v1300_v43 = vld [vmem:[%s1443_s16 + $0x78] ss:$12 sps:$4 sm:$0xff]   ;;  %v1301_v44 = vld [vmem:[%s1443_s16 + $0x94] ss:$12 sps:$4 sm:$0xff]  }
  0x19   : > { %1126 = vmatprep.subr.bf16.mxu0 %v1268_v15  ;;  %v1303_v45 = vld [vmem:[%s1443_s16 + $0x90] ss:$12 sps:$4 sm:$0xff]   ;;  %v1306_v46 = vld [vmem:[%s1443_s16 + $0xac] ss:$12 sps:$4 sm:$0xff]   ;;  %v1308_v47 = vld [vmem:[%s1443_s16 + $0xa8] ss:$12 sps:$4 sm:$0xff]  }
  0x1a   : > { %1205 = vmatpush3.bf16.msra.mxu1 %v1267_v13 }
  0x1b   : > { %1206 = vmatprep.subr.bf16.mxu1 %v1270_v16 }
  0x1c   : > { %1127 = vmatpush3.bf16.msra.mxu0 %v1269_v17 }
  0x1d   : > { %1128 = vmatprep.subr.bf16.mxu0 %v1271_v18 }
  0x1e   : > { %1207 = vmatpush3.bf16.msra.mxu1 %v1270_v16 }
  0x1f   : > { %1208 = vmatprep.subr.bf16.mxu1 %v1273_v20 }
  0x20   : > { %1129 = vmatpush3.bf16.msra.mxu0 %v1272_v19 }
  0x21   : > { %1130 = vmatprep.subr.bf16.mxu0 %v1274_v21 }
  0x22   : > { %1209 = vmatpush3.bf16.msra.mxu1 %v1273_v20 }
  0x23   : > { %1210 = vmatprep.subr.bf16.mxu1 %v1276_v22 }
  0x24   : > { %1131 = vmatpush3.bf16.msra.mxu0 %v1275_v25 }
  0x26   : > { %1211 = vmatpush3.bf16.msra.mxu1 %v1276_v22 }
  0x27   : > { %696 = vmatmul.mubr.bf16.vlgmr.msra.gmra.mrb[0].mxu0 %v1277_v26 }
  0x28   : > { %703 = vmatprep.mubr.bf16.mxu0 %v1282_v27 }
  0x29   : > { %1213 = vmatmul.mubr.bf16.vlgmr.msra.gmra.mrb[0].mxu1 %v1281_v28 }
  0x2a   : > { %1216 = vmatprep.mubr.bf16.mxu1 %v1288_v29 }
  0x2f   : > { %704 = vmatmul.mubr.bf16.gmra.mrb[4].mxu0 %v1284_v30 }
  0x30   : > { %711 = vmatprep.mubr.bf16.mxu0 %v1285_v31 }
  0x31   : > { %1217 = vmatmul.mubr.bf16.gmra.mrb[4].mxu1 %v1289_v32 }
  0x32   : > { %1220 = vmatprep.mubr.bf16.mxu1 %v1296_v33 }
  0x37   : > { %712 = vmatmul.mubr.bf16.gmra.mrb[8].mxu0 %v1287_v34 }
  0x38   : > { %719 = vmatprep.mubr.bf16.mxu0 %v1290_v35 }
  0x39   : > { %1221 = vmatmul.mubr.bf16.gmra.mrb[8].mxu1 %v1297_v36 }
  0x3a   : > { %1224 = vmatprep.mubr.bf16.mxu1 %v1304_v37 }
  0x3f   : > { %720 = vmatmul.mubr.bf16.gmra.mrb[12].mxu0 %v1292_v38 }
  0x40   : > { %727 = vmatprep.mubr.bf16.mxu0 %v1293_v39 }
  0x41   : > { %1225 = vmatmul.mubr.bf16.gmra.mrb[12].mxu1 %v1305_v40 }
  0x47   : > { %728 = vmatmul.mubr.bf16.gmra.mrb[16].mxu0 %v1295_v41 }
  0x48   : > { %735 = vmatprep.mubr.bf16.mxu0 %v1298_v42 }
  0x4f   : > { %736 = vmatmul.mubr.bf16.gmra.mrb[20].mxu0 %v1300_v43 }
  0x50   : > { %743 = vmatprep.mubr.bf16.mxu0 %v1301_v44 }
  0x57   : > { %744 = vmatmul.mubr.bf16.gmra.mrb[24].mxu0 %v1303_v45 }
  0x58   : > { %751 = vmatprep.mubr.bf16.mxu0 %v1306_v46 }
  0x5f   : > { %752 = vmatmul.mubr.bf16.gmra.mrb[28].mxu0 %v1308_v47 }
  0xfa   : > { %v1132_v48 = vpop.f32.mrb[0].mxu0 }
  0xfb   : > { %v1133_v49 = vpop.f32.mrb[1].mxu0 }
  0xfc   : > { %v1134_v50 = vadd.f32 %v1133_v49, %v1132_v48  ;;  %v1135_v51 = vpop.f32.mrb[2].mxu0  ;;  %v1214_v52 = vpop.f32.mrb[0].mxu1 }
  0xfd   : > { %v1136_v53 = vpop.f32.mrb[3].mxu0  ;;  %v794_v55 = vpop.f32.mrb[1].mxu1 }
  0xfe   : > { %v1137_v56 = vadd.f32 %v1136_v53, %v1135_v51  ;;  %v795_v57 = vadd.f32 %v1134_v50, %v794_v55  ;;  %v1215_v58 = vpop.f32.mrb[2].mxu1 }
  0xff   : > { %v797_v59 = vpop.f32.mrb[3].mxu1 }
 0x100   : > { %v857_v60 = vadd.f32 %v1481_v54, %v795_v57  ;;  %v798_v61 = vadd.f32 %v1137_v56, %v797_v59 }
 0x102   : > { %v908_v62 = vmax.f32 %v857_v60, 0.0  ;;  %v858_v63 = vadd.f32 %v1481_v54, %v798_v61  ;;  %v1138_v0 = vpop.f32.mrb[4].mxu0 }
 0x103   : > { %v1139_v1 = vpop.f32.mrb[5].mxu0 }
 0x104   : > { %924 = vst [vmem:[%s1488_s27] sm:$0xff] %v908_v62  ;;  %v909_v2 = vmax.f32 %v858_v63, 0.0  ;;  %v1140_v3 = vadd.f32 %v1139_v1, %v1138_v0  ;;  %v1141_v4 = vpop.f32.mrb[6].mxu0  ;;  %v1218_v5 = vpop.f32.mrb[4].mxu1 }
 0x105   : > { %v1142_v6 = vpop.f32.mrb[7].mxu0  ;;  %v810_v7 = vpop.f32.mrb[5].mxu1 }
 0x106   : > { %925 = vst [vmem:[%s1488_s27 + $0x8] sm:$0xff] %v909_v2  ;;  %v803_v8 = vadd.f32 %v1214_v52, %v1140_v3  ;;  %v1143_v9 = vadd.f32 %v1142_v6, %v1141_v4  ;;  %v1219_v10 = vpop.f32.mrb[6].mxu1 }
 0x107   : > { %v813_v11 = vpop.f32.mrb[7].mxu1 }
 0x108   : > { %v859_v12 = vadd.f32 %v1481_v54, %v803_v8  ;;  %v806_v13 = vadd.f32 %v1215_v58, %v1143_v9 }
 0x10a   : > { %v910_v14 = vmax.f32 %v859_v12, 0.0  ;;  %v860_v15 = vadd.f32 %v1481_v54, %v806_v13  ;;  %v1144_v16 = vpop.f32.mrb[8].mxu0 }
 0x10b   : > { %v1145_v17 = vpop.f32.mrb[9].mxu0 }
 0x10c   : > { %926 = vst [vmem:[%s1488_s27 + $0x10] sm:$0xff] %v910_v14  ;;  %v911_v18 = vmax.f32 %v860_v15, 0.0  ;;  %v1146_v19 = vadd.f32 %v1145_v17, %v1144_v16  ;;  %v1147_v20 = vpop.f32.mrb[10].mxu0  ;;  %v1222_v21 = vpop.f32.mrb[8].mxu1 }
 0x10d   : > { %v1148_v22 = vpop.f32.mrb[11].mxu0  ;;  %v826_v23 = vpop.f32.mrb[9].mxu1 }
 0x10e   : > { %927 = vst [vmem:[%s1488_s27 + $0x18] sm:$0xff] %v911_v18  ;;  %v1149_v24 = vadd.f32 %v1148_v22, %v1147_v20  ;;  %v811_v25 = vadd.f32 %v1146_v19, %v810_v7  ;;  %v1223_v26 = vpop.f32.mrb[10].mxu1 }
 0x10f   : > { %v829_v27 = vpop.f32.mrb[11].mxu1 }
 0x110   : > { %v861_v28 = vadd.f32 %v1481_v54, %v811_v25  ;;  %v814_v29 = vadd.f32 %v1149_v24, %v813_v11 }
 0x112   : > { %v912_v30 = vmax.f32 %v861_v28, 0.0  ;;  %v862_v31 = vadd.f32 %v1481_v54, %v814_v29  ;;  %v1150_v32 = vpop.f32.mrb[12].mxu0 }
 0x113   : > { %v1151_v33 = vpop.f32.mrb[13].mxu0 }
 0x114   : > { %928 = vst [vmem:[%s1488_s27 + $0x20] sm:$0xff] %v912_v30  ;;  %v913_v34 = vmax.f32 %v862_v31, 0.0  ;;  %v1152_v35 = vadd.f32 %v1151_v33, %v1150_v32  ;;  %v1153_v36 = vpop.f32.mrb[14].mxu0  ;;  %v1226_v37 = vpop.f32.mrb[12].mxu1 }
 0x115   : > { %v1154_v38 = vpop.f32.mrb[15].mxu0  ;;  %v842_v39 = vpop.f32.mrb[13].mxu1 }
 0x116   : > { %929 = vst [vmem:[%s1488_s27 + $0x28] sm:$0xff] %v913_v34  ;;  %v819_v40 = vadd.f32 %v1218_v5, %v1152_v35  ;;  %v1155_v41 = vadd.f32 %v1154_v38, %v1153_v36  ;;  %v1227_v42 = vpop.f32.mrb[14].mxu1 }
 0x117   : > { %v845_v43 = vpop.f32.mrb[15].mxu1 }
 0x118   : > { %v863_v44 = vadd.f32 %v1481_v54, %v819_v40  ;;  %v822_v45 = vadd.f32 %v1219_v10, %v1155_v41 }
 0x11a   : > { %v914_v46 = vmax.f32 %v863_v44, 0.0  ;;  %v864_v47 = vadd.f32 %v1481_v54, %v822_v45  ;;  %v1156_v48 = vpop.f32.mrb[16].mxu0 }
 0x11b   : > { %v1157_v49 = vpop.f32.mrb[17].mxu0 }
 0x11c   : > { %930 = vst [vmem:[%s1488_s27 + $0x30] sm:$0xff] %v914_v46  ;;  %v915_v50 = vmax.f32 %v864_v47, 0.0  ;;  %v1158_v51 = vadd.f32 %v1157_v49, %v1156_v48  ;;  %v1159_v52 = vpop.f32.mrb[18].mxu0 }
 0x11d   : > { %v1160_v53 = vpop.f32.mrb[19].mxu0 }
 0x11e   : > { %931 = vst [vmem:[%s1488_s27 + $0x38] sm:$0xff] %v915_v50  ;;  %v1161_v55 = vadd.f32 %v1160_v53, %v1159_v52  ;;  %v827_v56 = vadd.f32 %v1158_v51, %v826_v23 }
 0x120   : > { %v865_v57 = vadd.f32 %v1481_v54, %v827_v56  ;;  %v830_v58 = vadd.f32 %v1161_v55, %v829_v27 }
 0x122   : > { %v916_v59 = vmax.f32 %v865_v57, 0.0  ;;  %v866_v60 = vadd.f32 %v1481_v54, %v830_v58  ;;  %v1162_v61 = vpop.f32.mrb[20].mxu0 }
 0x123   : > { %v1163_v62 = vpop.f32.mrb[21].mxu0 }
 0x124   : > { %932 = vst [vmem:[%s1488_s27 + $0x40] sm:$0xff] %v916_v59  ;;  %v917_v63 = vmax.f32 %v866_v60, 0.0  ;;  %v1164_v0 = vadd.f32 %v1163_v62, %v1162_v61  ;;  %v1165_v1 = vpop.f32.mrb[22].mxu0 }
 0x125   : > { %v1166_v2 = vpop.f32.mrb[23].mxu0 }
 0x126   : > { %933 = vst [vmem:[%s1488_s27 + $0x48] sm:$0xff] %v917_v63  ;;  %v835_v3 = vadd.f32 %v1222_v21, %v1164_v0  ;;  %v1167_v4 = vadd.f32 %v1166_v2, %v1165_v1 }
 0x128   : > { %v867_v5 = vadd.f32 %v1481_v54, %v835_v3  ;;  %v838_v6 = vadd.f32 %v1223_v26, %v1167_v4 }
 0x12a   : > { %v918_v7 = vmax.f32 %v867_v5, 0.0  ;;  %v868_v8 = vadd.f32 %v1481_v54, %v838_v6  ;;  %v1168_v9 = vpop.f32.mrb[24].mxu0 }
 0x12b   : > { %v1169_v10 = vpop.f32.mrb[25].mxu0 }
 0x12c   : > { %934 = vst [vmem:[%s1488_s27 + $0x50] sm:$0xff] %v918_v7  ;;  %v919_v11 = vmax.f32 %v868_v8, 0.0  ;;  %v1170_v12 = vadd.f32 %v1169_v10, %v1168_v9  ;;  %v1171_v13 = vpop.f32.mrb[26].mxu0 }
 0x12d   : > { %v1172_v14 = vpop.f32.mrb[27].mxu0 }
 0x12e   : > { %935 = vst [vmem:[%s1488_s27 + $0x58] sm:$0xff] %v919_v11  ;;  %v1173_v15 = vadd.f32 %v1172_v14, %v1171_v13  ;;  %v843_v16 = vadd.f32 %v1170_v12, %v842_v39 }
 0x130   : > { %v869_v17 = vadd.f32 %v1481_v54, %v843_v16  ;;  %v846_v18 = vadd.f32 %v1173_v15, %v845_v43 }
 0x132   : > { %v920_v19 = vmax.f32 %v869_v17, 0.0  ;;  %v870_v20 = vadd.f32 %v1481_v54, %v846_v18  ;;  %v1174_v21 = vpop.f32.mrb[28].mxu0 }
 0x133   : > { %v1175_v22 = vpop.f32.mrb[29].mxu0 }
 0x134   : > { %936 = vst [vmem:[%s1488_s27 + $0x60] sm:$0xff] %v920_v19  ;;  %v921_v23 = vmax.f32 %v870_v20, 0.0  ;;  %v1176_v24 = vadd.f32 %v1175_v22, %v1174_v21  ;;  %v1177_v25 = vpop.f32.mrb[30].mxu0 }
 0x135   : > { %v1178_v26 = vpop.f32.mrb[31].mxu0 }
 0x136   : > { %937 = vst [vmem:[%s1488_s27 + $0x68] sm:$0xff] %v921_v23  ;;  %v851_v27 = vadd.f32 %v1226_v37, %v1176_v24  ;;  %v1179_v28 = vadd.f32 %v1178_v26, %v1177_v25 }
 0x138   : > { %v871_v29 = vadd.f32 %v1481_v54, %v851_v27  ;;  %v854_v30 = vadd.f32 %v1227_v42, %v1179_v28 }
 0x13a   : > { %v922_v31 = vmax.f32 %v871_v29, 0.0  ;;  %v872_v32 = vadd.f32 %v1481_v54, %v854_v30 }
 0x13c   : > { %938 = vst [vmem:[%s1488_s27 + $0x70] sm:$0xff] %v922_v31  ;;  %v923_v33 = vmax.f32 %v872_v32, 0.0 }
 0x13e   : > { %939 = vst [vmem:[%s1488_s27 + $0x78] sm:$0xff] %v923_v33 }
 0x13f PF: > { %s13_s14 = sadd.s32 1, %s1331_s14   ;;  %s1534_s12 = smov %s1327_s13 }
 0x140   : > { %p10_p5 = scmp.ge.s32.totalorder %s13_s14, 7   ;;  %s1535_s13 = smov %s1537_s15 }
 0x142   :  { %12 = sbr.rel (!%p10_p5) target bundleno = 2 (0x2), region = 76 }

// kernel: _gqn_apply.23
= control target key start
LH: loop header
LB: loop body
LE: loop exit
PB: predicated region body
PF: predicated region fallthrough
CT: control target
= control target key end

     0   :  { %s807_s12 = smov 0   ;;  %s809_s13 = smov 0   ;;  %s895_s0 = inlined_call_operand.vmem [shape: bf16[160,128], index: 0, kind: input, shape index: {}]   ;;  %s896_s1 = inlined_call_operand.vmem [shape: bf16[128,128], index: 1, kind: input, shape index: {}]   ;;  %s897_s2 = inlined_call_operand.vmem [shape: f32[1,128], index: 2, kind: input, shape index: {}]   ;;  %s898_s3 = inlined_call_operand.vmem [shape: f32[160,128], index: 3, kind: output, shape index: {}]  }
   0x1   :  { %s811_s14 = smov 0  }
   0x2 LB: > { %s32_s15 = sadd.s32 1, %s779_s13  ;;  %p638_p0 = scmp.ge.s32.totalorder %s783_s14, 1  ;;  %s783_s14 = sphi %s811_s14, %s13_s14   ;;  %s779_s13 = sphi %s809_s13, %s900_s13   ;;  %s775_s12 = sphi %s807_s12, %s899_s12  }
   0x3   : > { %p34_p1 = scmp.ge.s32.totalorder %s32_s15, 2  ;;  %p188_p2 = scmp.lt.s32.totalorder %s783_s14, 3 }
   0x5   : > { %s902_s15 = smov (%p34_p1, %s32_s15), 0  ;;  %p189_p3 = pnand %p638_p0, %p188_p2 }
   0x6   : > { %v748_v0 = vld [vmem:[%s896_s1] sm:$0xff] (!%p189_p3)   ;;  %v785_v1 = vmov (!%p189_p3), 0.0   ;;  %v749_v2 = vld [vmem:[%s896_s1 + $0x8] sm:$0xff] (!%p189_p3)   ;;  %s229_s20 = smul.u32 (!%p189_p3), 10, %s775_s12  ;;  %vm786_vm0 = vmmov (!%p189_p3), 0   ;;  %v750_v3 = vld [vmem:[%s896_s1 + $0x10] sm:$0xff] (!%p189_p3)  }
   0x7   : > { %192 = sbr.rel (%p189_p3) target bundleno = 274 (0x112), region = 32  ;;  %670 = vmatprep.subr.bf16.mxu0 (!%p189_p3), %v785_v1  ;;  %706 = vmatprep.subr.bf16.mxu1 (!%p189_p3), %v785_v1  ;;  %v751_v4 = vld [vmem:[%s896_s1 + $0x18] sm:$0xff] (!%p189_p3)   ;;  %v752_v5 = vld [vmem:[%s896_s1 + $0x20] sm:$0xff] (!%p189_p3)   ;;  %v753_v6 = vld [vmem:[%s896_s1 + $0x28] sm:$0xff] (!%p189_p3)  }
   0x8   : > { %671 = vmatpush3.bf16.msra.mxu0 (!%p189_p3), %v748_v0  ;;  %714 = vmatpush3.bf16.msra.mxu1 (!%p189_p3), %v748_v0  ;;  %p230_p4 = scmp.lt.s32.totalorder (!%p189_p3), %s229_s20, 19  ;;  %v754_v7 = vld [vmem:[%s896_s1 + $0x30] sm:$0xff] (!%p189_p3)   ;;  %v755_v8 = vld [vmem:[%s896_s1 + $0x38] sm:$0xff] (!%p189_p3)   ;;  %v641_v14 = vld [vmem:[%s897_s2] ss:$0 sm:$0xff] (!%p189_p3) }
   0x9   : > { %672 = vmatprep.subr.bf16.mxu0 (!%p189_p3), %v785_v1  ;;  %707 = vmatprep.subr.bf16.mxu1 (!%p189_p3), %v785_v1 }
   0xa   : > { %686 = vmatprep.mubr.msk.bf16.mxu0 (!%p189_p3), %vm786_vm0, %v785_v1  ;;  %698 = vmatprep.mubr.msk.bf16.mxu1 (!%p189_p3), %vm786_vm0, %v785_v1 }
   0xc   : > { %673 = vmatpush3.bf16.msra.mxu0 (!%p189_p3), %v749_v2  ;;  %715 = vmatpush3.bf16.msra.mxu1 (!%p189_p3), %v749_v2 }
   0xd   : > { %674 = vmatprep.subr.bf16.mxu0 (!%p189_p3), %v785_v1  ;;  %708 = vmatprep.subr.bf16.mxu1 (!%p189_p3), %v785_v1 }
   0xe   : > { %s904_s20 = smov (!%p230_p4, %s229_s20), 19 }
   0xf   : > { %s639_s23 = sshll.u32 %s904_s20, 2  ;;  %s640_s12 = sshll.u32 %s904_s20, 3 }
  0x10   : > { %s842_s26 = scalar_lea.vmem %s895_s0, %s639_s23  ;;  %675 = vmatpush3.bf16.msra.mxu0 %v750_v3  ;;  %716 = vmatpush3.bf16.msra.mxu1 %v750_v3  ;;  %s874_s18 = scalar_lea.vmem %s898_s3, %s640_s12 }
  0x11   : > { %676 = vmatprep.subr.bf16.mxu0 %v785_v1  ;;  %709 = vmatprep.subr.bf16.mxu1 %v785_v1  ;;  %v756_v9 = vld [vmem:[%s842_s26] sm:$0xff]   ;;  %v757_v10 = vld [vmem:[%s842_s26 + $0x18] sm:$0xff]   ;;  %v758_v11 = vld [vmem:[%s842_s26 + $0x8] sm:$0xff]  }
  0x12   : > { %v759_v12 = vld [vmem:[%s842_s26 + $0x20] sm:$0xff]   ;;  %v760_v13 = vld [vmem:[%s842_s26 + $0x10] sm:$0xff]  }
  0x14   : > { %677 = vmatpush3.bf16.msra.mxu0 %v751_v4  ;;  %717 = vmatpush3.bf16.msra.mxu1 %v751_v4 }
  0x15   : > { %678 = vmatprep.subr.bf16.mxu0 %v785_v1  ;;  %710 = vmatprep.subr.bf16.mxu1 %v785_v1 }
  0x18   : > { %679 = vmatpush3.bf16.msra.mxu0 %v752_v5  ;;  %718 = vmatpush3.bf16.msra.mxu1 %v752_v5 }
  0x19   : > { %680 = vmatprep.subr.bf16.mxu0 %v785_v1  ;;  %711 = vmatprep.subr.bf16.mxu1 %v785_v1 }
  0x1c   : > { %681 = vmatpush3.bf16.msra.mxu0 %v753_v6  ;;  %719 = vmatpush3.bf16.msra.mxu1 %v753_v6 }
  0x1d   : > { %682 = vmatprep.subr.bf16.mxu0 %v785_v1  ;;  %712 = vmatprep.subr.bf16.mxu1 %v785_v1 }
  0x20   : > { %683 = vmatpush3.bf16.msra.mxu0 %v754_v7  ;;  %720 = vmatpush3.bf16.msra.mxu1 %v754_v7 }
  0x21   : > { %684 = vmatprep.subr.bf16.mxu0 %v785_v1  ;;  %713 = vmatprep.subr.bf16.mxu1 %v785_v1 }
  0x24   : > { %685 = vmatpush3.bf16.msra.mxu0 %v755_v8  ;;  %721 = vmatpush3.bf16.msra.mxu1 %v755_v8 }
  0x27   : > { %687 = vmatmul.mubr.bf16.vlgmr.msra.gmra.mrb[0].mxu0 %v756_v9  ;;  %699 = vmatmul.mubr.bf16.vlgmr.msra.gmra.mrb[0].mxu1 %v757_v10 }
  0x28   : > { %690 = vmatprep.mubr.msk.bf16.mxu0 %vm786_vm0, %v785_v1  ;;  %702 = vmatprep.mubr.msk.bf16.mxu1 %vm786_vm0, %v785_v1 }
  0x2f   : > { %691 = vmatmul.mubr.bf16.gmra.mrb[4].mxu0 %v758_v11  ;;  %703 = vmatmul.mubr.bf16.gmra.mrb[4].mxu1 %v759_v12 }
  0x30   : > { %694 = vmatprep.mubr.msk.bf16.mxu0 %vm786_vm0, %v785_v1 }
  0x37   : > { %695 = vmatmul.mubr.bf16.gmra.mrb[8].mxu0 %v760_v13 }
  0xfa   : > { %v429_v15 = vpop.f32.mrb[0].mxu0  ;;  %v453_v16 = vpop.f32.mrb[0].mxu1 }
  0xfb   : > { %v468_v17 = vadd.f32 %v641_v14, %v429_v15  ;;  %v688_v18 = vpop.f32.mrb[1].mxu0  ;;  %v474_v19 = vadd.f32 %v641_v14, %v453_v16  ;;  %v700_v20 = vpop.f32.mrb[1].mxu1 }
  0xfc   : > { %v432_v21 = vpop.f32.mrb[2].mxu0  ;;  %v456_v22 = vpop.f32.mrb[2].mxu1 }
  0xfd   : > { %v501_v23 = vmax.f32 %v468_v17, 0.0  ;;  %v469_v24 = vadd.f32 %v641_v14, %v432_v21  ;;  %v689_v25 = vpop.f32.mrb[3].mxu0  ;;  %v507_v26 = vmax.f32 %v474_v19, 0.0  ;;  %v475_v27 = vadd.f32 %v641_v14, %v456_v22  ;;  %v701_v28 = vpop.f32.mrb[3].mxu1 }
  0xff   : > { %511 = vst [vmem:[%s874_s18] sm:$0xff] %v501_v23  ;;  %v502_v29 = vmax.f32 %v469_v24, 0.0  ;;  %517 = vst [vmem:[%s874_s18 + $0x30] sm:$0xff] %v507_v26  ;;  %v508_v30 = vmax.f32 %v475_v27, 0.0 }
 0x101   : > { %512 = vst [vmem:[%s874_s18 + $0x8] sm:$0xff] %v502_v29  ;;  %518 = vst [vmem:[%s874_s18 + $0x38] sm:$0xff] %v508_v30 }
 0x102   : > { %v437_v31 = vpop.f32.mrb[4].mxu0  ;;  %v461_v32 = vpop.f32.mrb[4].mxu1 }
 0x103   : > { %v470_v33 = vadd.f32 %v641_v14, %v437_v31  ;;  %v692_v34 = vpop.f32.mrb[5].mxu0  ;;  %v476_v35 = vadd.f32 %v641_v14, %v461_v32  ;;  %v704_v36 = vpop.f32.mrb[5].mxu1 }
 0x104   : > { %v440_v37 = vpop.f32.mrb[6].mxu0  ;;  %v464_v38 = vpop.f32.mrb[6].mxu1 }
 0x105   : > { %v503_v39 = vmax.f32 %v470_v33, 0.0  ;;  %v471_v40 = vadd.f32 %v641_v14, %v440_v37  ;;  %v693_v41 = vpop.f32.mrb[7].mxu0  ;;  %v509_v42 = vmax.f32 %v476_v35, 0.0  ;;  %v477_v43 = vadd.f32 %v641_v14, %v464_v38  ;;  %v705_v44 = vpop.f32.mrb[7].mxu1 }
 0x107   : > { %513 = vst [vmem:[%s874_s18 + $0x10] sm:$0xff] %v503_v39  ;;  %v504_v45 = vmax.f32 %v471_v40, 0.0  ;;  %519 = vst [vmem:[%s874_s18 + $0x40] sm:$0xff] %v509_v42  ;;  %v510_v46 = vmax.f32 %v477_v43, 0.0 }
 0x109   : > { %514 = vst [vmem:[%s874_s18 + $0x18] sm:$0xff] %v504_v45  ;;  %520 = vst [vmem:[%s874_s18 + $0x48] sm:$0xff] %v510_v46 }
 0x10a   : > { %v445_v47 = vpop.f32.mrb[8].mxu0 }
 0x10b   : > { %v472_v48 = vadd.f32 %v641_v14, %v445_v47  ;;  %v696_v49 = vpop.f32.mrb[9].mxu0 }
 0x10c   : > { %v448_v50 = vpop.f32.mrb[10].mxu0 }
 0x10d   : > { %v505_v51 = vmax.f32 %v472_v48, 0.0  ;;  %v473_v52 = vadd.f32 %v641_v14, %v448_v50  ;;  %v697_v53 = vpop.f32.mrb[11].mxu0 }
 0x10f   : > { %515 = vst [vmem:[%s874_s18 + $0x20] sm:$0xff] %v505_v51  ;;  %v506_v54 = vmax.f32 %v473_v52, 0.0 }
 0x111   : > { %516 = vst [vmem:[%s874_s18 + $0x28] sm:$0xff] %v506_v54 }
 0x112 PF: > { %s13_s14 = sadd.s32 1, %s783_s14   ;;  %s899_s12 = smov %s779_s13 }
 0x113   : > { %p10_p5 = scmp.ge.s32.totalorder %s13_s14, 4   ;;  %s900_s13 = smov %s902_s15 }
 0x115   :  { %12 = sbr.rel (!%p10_p5) target bundleno = 2 (0x2), region = 76 }

// kernel: _gqn_apply.25
= control target key start
LH: loop header
LB: loop body
LE: loop exit
PB: predicated region body
PF: predicated region fallthrough
CT: control target
= control target key end

     0   :  { %s1167_s12 = smov 0   ;;  %s1169_s13 = smov 0   ;;  %s1341_s0 = inlined_call_operand.vmem [shape: bf16[160,384], index: 0, kind: input, shape index: {}]   ;;  %s1342_s1 = inlined_call_operand.vmem [shape: bf16[384,128], index: 1, kind: input, shape index: {}]   ;;  %s1343_s2 = inlined_call_operand.vmem [shape: f32[1,128], index: 2, kind: input, shape index: {}]   ;;  %s1344_s3 = inlined_call_operand.vmem [shape: f32[160,128], index: 3, kind: output, shape index: {}]  }
   0x1   :  { %s1171_s14 = smov 0  }
   0x2 LB: > { %s32_s15 = sadd.s32 1, %s1139_s13  ;;  %p910_p0 = scmp.ge.s32.totalorder %s1143_s14, 1  ;;  %s1143_s14 = sphi %s1171_s14, %s13_s14   ;;  %s1139_s13 = sphi %s1169_s13, %s1346_s13   ;;  %s1135_s12 = sphi %s1167_s12, %s1345_s12  }
   0x3   : > { %p34_p1 = scmp.ge.s32.totalorder %s32_s15, 2  ;;  %p191_p2 = scmp.lt.s32.totalorder %s1143_s14, 3 }
   0x5   : > { %s1348_s15 = smov (%p34_p1, %s32_s15), 0  ;;  %p192_p3 = pnand %p910_p0, %p191_p2 }
   0x6   : > { %v1077_v0 = vld [vmem:[%s1342_s1 + $0x40] sm:$0xff] (!%p192_p3)   ;;  %v1145_v1 = vmov (!%p192_p3), 0.0   ;;  %v1080_v4 = vld [vmem:[%s1342_s1 + $0x48] sm:$0xff] (!%p192_p3)   ;;  %vm1146_vm0 = vmmov (!%p192_p3), 0   ;;  %v1083_v7 = vld [vmem:[%s1342_s1 + $0x50] sm:$0xff] (!%p192_p3)   ;;  %s234_s30 = smul.u32 (!%p192_p3), 10, %s1135_s12 }
   0x7   : > { %195 = sbr.rel (%p192_p3) target bundleno = 295 (0x127), region = 32  ;;  %1014 = vmatprep.subr.bf16.mxu1 (!%p192_p3), %v1145_v1  ;;  %v1078_v2 = vld [vmem:[%s1342_s1] sm:$0xff] (!%p192_p3)   ;;  %955 = vmatprep.subr.bf16.mxu0 (!%p192_p3), %v1077_v0  ;;  %v1081_v5 = vld [vmem:[%s1342_s1 + $0x8] sm:$0xff] (!%p192_p3)   ;;  %v1084_v8 = vld [vmem:[%s1342_s1 + $0x10] sm:$0xff] (!%p192_p3)  }
   0x8   : > { %v1079_v3 = vld [vmem:[%s1342_s1 + $0x80] sm:$0xff] (!%p192_p3)   ;;  %956 = vmatpush3.bf16.msra.mxu0 (!%p192_p3), %v1078_v2  ;;  %1030 = vmatprep.mubr.msk.bf16.mxu1 (!%p192_p3), %vm1146_vm0, %v1145_v1  ;;  %v1082_v6 = vld [vmem:[%s1342_s1 + $0x88] sm:$0xff] (!%p192_p3)   ;;  %v1085_v9 = vld [vmem:[%s1342_s1 + $0x90] sm:$0xff] (!%p192_p3)   ;;  %p236_p4 = scmp.lt.s32.totalorder (!%p192_p3), %s234_s30, 19 }
   0x9   : > { %1015 = vmatpush3.bf16.msra.mxu1 (!%p192_p3), %v1079_v3  ;;  %957 = vmatprep.subr.bf16.mxu0 (!%p192_p3), %v1080_v4  ;;  %v1086_v10 = vld [vmem:[%s1342_s1 + $0x58] sm:$0xff] (!%p192_p3)   ;;  %v1089_v13 = vld [vmem:[%s1342_s1 + $0x60] sm:$0xff] (!%p192_p3)   ;;  %v1092_v16 = vld [vmem:[%s1342_s1 + $0x68] sm:$0xff] (!%p192_p3)  }
   0xa   : > { %1016 = vmatprep.subr.bf16.mxu1 (!%p192_p3), %v1145_v1  ;;  %v1087_v11 = vld [vmem:[%s1342_s1 + $0x18] sm:$0xff] (!%p192_p3)   ;;  %v1090_v14 = vld [vmem:[%s1342_s1 + $0x20] sm:$0xff] (!%p192_p3)   ;;  %v1093_v17 = vld [vmem:[%s1342_s1 + $0x28] sm:$0xff] (!%p192_p3)  }
   0xb   : > { %v1088_v12 = vld [vmem:[%s1342_s1 + $0x98] sm:$0xff] (!%p192_p3)   ;;  %v1091_v15 = vld [vmem:[%s1342_s1 + $0xa0] sm:$0xff] (!%p192_p3)   ;;  %v1094_v18 = vld [vmem:[%s1342_s1 + $0xa8] sm:$0xff] (!%p192_p3)  }
   0xc   : > { %958 = vmatpush3.bf16.msra.mxu0 (!%p192_p3), %v1081_v5  ;;  %v1095_v19 = vld [vmem:[%s1342_s1 + $0x70] sm:$0xff] (!%p192_p3)   ;;  %v1098_v22 = vld [vmem:[%s1342_s1 + $0x78] sm:$0xff] (!%p192_p3)   ;;  %v1304_v46 = vld [vmem:[%s1343_s2] ss:$0 sm:$0xff] (!%p192_p3) }
   0xd   : > { %1017 = vmatpush3.bf16.msra.mxu1 (!%p192_p3), %v1082_v6  ;;  %959 = vmatprep.subr.bf16.mxu0 (!%p192_p3), %v1083_v7  ;;  %v1096_v20 = vld [vmem:[%s1342_s1 + $0x30] sm:$0xff] (!%p192_p3)   ;;  %v1099_v24 = vld [vmem:[%s1342_s1 + $0x38] sm:$0xff] (!%p192_p3)  }
   0xe   : > { %1018 = vmatprep.subr.bf16.mxu1 %v1145_v1  ;;  %s1350_s30 = smov (!%p236_p4, %s234_s30), 19  ;;  %v1097_v21 = vld [vmem:[%s1342_s1 + $0xb0] sm:$0xff]   ;;  %v1100_v25 = vld [vmem:[%s1342_s1 + $0xb8] sm:$0xff]  }
   0xf   : > { %s1050_s27 = smul.u32 12, %s1350_s30  ;;  %s912_s24 = sshll.u32 %s1350_s30, 3 }
  0x10   : > { %960 = vmatpush3.bf16.msra.mxu0 %v1084_v8 }
  0x11   : > { %1019 = vmatpush3.bf16.msra.mxu1 %v1085_v9  ;;  %961 = vmatprep.subr.bf16.mxu0 %v1086_v10  ;;  %s1262_s10 = scalar_lea.vmem %s1341_s0, %s1050_s27  ;;  %s1311_s27 = scalar_lea.vmem %s1344_s3, %s912_s24 }
  0x12   : > { %1020 = vmatprep.subr.bf16.mxu1 %v1145_v1  ;;  %v1103_v23 = vld [vmem:[%s1262_s10 + $0x4] ss:$12 sps:$4 sm:$0xff]   ;;  %v1101_v26 = vld [vmem:[%s1262_s10] ss:$12 sps:$4 sm:$0xff]   ;;  %v1104_v27 = vld [vmem:[%s1262_s10 + $0x8] ss:$12 sps:$4 sm:$0xff]  }
  0x13   : > { %623 = vmatprep.mubr.bf16.mxu0 %v1103_v23  ;;  %v1105_v28 = vld [vmem:[%s1262_s10 + $0x1c] ss:$12 sps:$4 sm:$0xff]   ;;  %v1107_v29 = vld [vmem:[%s1262_s10 + $0x18] ss:$12 sps:$4 sm:$0xff]   ;;  %v1108_v30 = vld [vmem:[%s1262_s10 + $0x20] ss:$12 sps:$4 sm:$0xff]  }
  0x14   : > { %962 = vmatpush3.bf16.msra.mxu0 %v1087_v11  ;;  %v1109_v31 = vld [vmem:[%s1262_s10 + $0x34] ss:$12 sps:$4 sm:$0xff]   ;;  %v1111_v32 = vld [vmem:[%s1262_s10 + $0x30] ss:$12 sps:$4 sm:$0xff]   ;;  %v1112_v33 = vld [vmem:[%s1262_s10 + $0x38] ss:$12 sps:$4 sm:$0xff]  }
  0x15   : > { %1021 = vmatpush3.bf16.msra.mxu1 %v1088_v12  ;;  %963 = vmatprep.subr.bf16.mxu0 %v1089_v13  ;;  %v1113_v34 = vld [vmem:[%s1262_s10 + $0x4c] ss:$12 sps:$4 sm:$0xff]   ;;  %v1115_v35 = vld [vmem:[%s1262_s10 + $0x48] ss:$12 sps:$4 sm:$0xff]   ;;  %v1116_v36 = vld [vmem:[%s1262_s10 + $0x50] ss:$12 sps:$4 sm:$0xff]  }
  0x16   : > { %1022 = vmatprep.subr.bf16.mxu1 %v1145_v1  ;;  %v1117_v37 = vld [vmem:[%s1262_s10 + $0x64] ss:$12 sps:$4 sm:$0xff]   ;;  %v1119_v38 = vld [vmem:[%s1262_s10 + $0x60] ss:$12 sps:$4 sm:$0xff]   ;;  %v1120_v39 = vld [vmem:[%s1262_s10 + $0x68] ss:$12 sps:$4 sm:$0xff]  }
  0x18   : > { %964 = vmatpush3.bf16.msra.mxu0 %v1090_v14 }
  0x19   : > { %1023 = vmatpush3.bf16.msra.mxu1 %v1091_v15  ;;  %965 = vmatprep.subr.bf16.mxu0 %v1092_v16 }
  0x1a   : > { %1024 = vmatprep.subr.bf16.mxu1 %v1145_v1 }
  0x1c   : > { %966 = vmatpush3.bf16.msra.mxu0 %v1093_v17 }
  0x1d   : > { %1025 = vmatpush3.bf16.msra.mxu1 %v1094_v18  ;;  %967 = vmatprep.subr.bf16.mxu0 %v1095_v19 }
  0x1e   : > { %1026 = vmatprep.subr.bf16.mxu1 %v1145_v1 }
  0x20   : > { %968 = vmatpush3.bf16.msra.mxu0 %v1096_v20 }
  0x21   : > { %1027 = vmatpush3.bf16.msra.mxu1 %v1097_v21  ;;  %969 = vmatprep.subr.bf16.mxu0 %v1098_v22 }
  0x22   : > { %1028 = vmatprep.subr.bf16.mxu1 %v1145_v1 }
  0x24   : > { %970 = vmatpush3.bf16.msra.mxu0 %v1099_v24 }
  0x25   : > { %1029 = vmatpush3.bf16.msra.mxu1 %v1100_v25 }
  0x27   : > { %624 = vmatmul.mubr.bf16.vlgmr.msra.gmra.mrb[0].mxu0 %v1101_v26 }
  0x28   : > { %1031 = vmatmul.mubr.bf16.vlgmr.msra.gmra.mrb[0].mxu1 %v1104_v27  ;;  %631 = vmatprep.mubr.bf16.mxu0 %v1105_v28 }
  0x29   : > { %1034 = vmatprep.mubr.msk.bf16.mxu1 %vm1146_vm0, %v1145_v1 }
  0x2f   : > { %632 = vmatmul.mubr.bf16.gmra.mrb[4].mxu0 %v1107_v29 }
  0x30   : > { %1035 = vmatmul.mubr.bf16.gmra.mrb[4].mxu1 %v1108_v30  ;;  %639 = vmatprep.mubr.bf16.mxu0 %v1109_v31 }
  0x31   : > { %1038 = vmatprep.mubr.msk.bf16.mxu1 %vm1146_vm0, %v1145_v1 }
  0x37   : > { %640 = vmatmul.mubr.bf16.gmra.mrb[8].mxu0 %v1111_v32 }
  0x38   : > { %1039 = vmatmul.mubr.bf16.gmra.mrb[8].mxu1 %v1112_v33  ;;  %647 = vmatprep.mubr.bf16.mxu0 %v1113_v34 }
  0x39   : > { %1042 = vmatprep.mubr.msk.bf16.mxu1 %vm1146_vm0, %v1145_v1 }
  0x3f   : > { %648 = vmatmul.mubr.bf16.gmra.mrb[12].mxu0 %v1115_v35 }
  0x40   : > { %1043 = vmatmul.mubr.bf16.gmra.mrb[12].mxu1 %v1116_v36  ;;  %655 = vmatprep.mubr.bf16.mxu0 %v1117_v37 }
  0x41   : > { %1046 = vmatprep.mubr.msk.bf16.mxu1 %vm1146_vm0, %v1145_v1 }
  0x47   : > { %656 = vmatmul.mubr.bf16.gmra.mrb[16].mxu0 %v1119_v38 }
  0x48   : > { %1047 = vmatmul.mubr.bf16.gmra.mrb[16].mxu1 %v1120_v39 }
  0xfa   : > { %v971_v40 = vpop.f32.mrb[0].mxu0 }
  0xfb   : > { %v698_v41 = vpop.f32.mrb[0].mxu1  ;;  %v972_v42 = vpop.f32.mrb[1].mxu0 }
  0xfc   : > { %v973_v43 = vadd.f32 %v972_v42, %v971_v40  ;;  %v1032_v44 = vpop.f32.mrb[1].mxu1  ;;  %v974_v45 = vpop.f32.mrb[2].mxu0 }
  0xfd   : > { %v701_v47 = vpop.f32.mrb[2].mxu1  ;;  %v975_v48 = vpop.f32.mrb[3].mxu0 }
  0xfe   : > { %v699_v49 = vadd.f32 %v973_v43, %v698_v41  ;;  %v976_v50 = vadd.f32 %v975_v48, %v974_v45  ;;  %v1033_v51 = vpop.f32.mrb[3].mxu1 }
 0x100   : > { %v737_v52 = vadd.f32 %v1304_v46, %v699_v49  ;;  %v702_v53 = vadd.f32 %v976_v50, %v701_v47 }
 0x102   : > { %v770_v54 = vmax.f32 %v737_v52, 0.0  ;;  %v738_v55 = vadd.f32 %v1304_v46, %v702_v53  ;;  %v977_v56 = vpop.f32.mrb[4].mxu0 }
 0x103   : > { %v706_v57 = vpop.f32.mrb[4].mxu1  ;;  %v978_v58 = vpop.f32.mrb[5].mxu0 }
 0x104   : > { %780 = vst [vmem:[%s1311_s27] sm:$0xff] %v770_v54  ;;  %v771_v59 = vmax.f32 %v738_v55, 0.0  ;;  %v979_v60 = vadd.f32 %v978_v58, %v977_v56  ;;  %v1036_v61 = vpop.f32.mrb[5].mxu1  ;;  %v980_v62 = vpop.f32.mrb[6].mxu0 }
 0x105   : > { %v709_v63 = vpop.f32.mrb[6].mxu1  ;;  %v981_v0 = vpop.f32.mrb[7].mxu0 }
 0x106   : > { %781 = vst [vmem:[%s1311_s27 + $0x8] sm:$0xff] %v771_v59  ;;  %v707_v1 = vadd.f32 %v979_v60, %v706_v57  ;;  %v982_v2 = vadd.f32 %v981_v0, %v980_v62  ;;  %v1037_v3 = vpop.f32.mrb[7].mxu1 }
 0x108   : > { %v739_v4 = vadd.f32 %v1304_v46, %v707_v1  ;;  %v710_v5 = vadd.f32 %v982_v2, %v709_v63 }
 0x10a   : > { %v772_v6 = vmax.f32 %v739_v4, 0.0  ;;  %v740_v7 = vadd.f32 %v1304_v46, %v710_v5  ;;  %v983_v8 = vpop.f32.mrb[8].mxu0 }
 0x10b   : > { %v714_v9 = vpop.f32.mrb[8].mxu1  ;;  %v984_v10 = vpop.f32.mrb[9].mxu0 }
 0x10c   : > { %782 = vst [vmem:[%s1311_s27 + $0x10] sm:$0xff] %v772_v6  ;;  %v773_v11 = vmax.f32 %v740_v7, 0.0  ;;  %v985_v12 = vadd.f32 %v984_v10, %v983_v8  ;;  %v1040_v13 = vpop.f32.mrb[9].mxu1  ;;  %v986_v14 = vpop.f32.mrb[10].mxu0 }
 0x10d   : > { %v717_v15 = vpop.f32.mrb[10].mxu1  ;;  %v987_v16 = vpop.f32.mrb[11].mxu0 }
 0x10e   : > { %783 = vst [vmem:[%s1311_s27 + $0x18] sm:$0xff] %v773_v11  ;;  %v715_v17 = vadd.f32 %v985_v12, %v714_v9  ;;  %v988_v18 = vadd.f32 %v987_v16, %v986_v14  ;;  %v1041_v19 = vpop.f32.mrb[11].mxu1 }
 0x110   : > { %v741_v20 = vadd.f32 %v1304_v46, %v715_v17  ;;  %v718_v21 = vadd.f32 %v988_v18, %v717_v15 }
 0x112   : > { %v774_v22 = vmax.f32 %v741_v20, 0.0  ;;  %v742_v23 = vadd.f32 %v1304_v46, %v718_v21  ;;  %v989_v24 = vpop.f32.mrb[12].mxu0 }
 0x113   : > { %v722_v25 = vpop.f32.mrb[12].mxu1  ;;  %v990_v26 = vpop.f32.mrb[13].mxu0 }
 0x114   : > { %784 = vst [vmem:[%s1311_s27 + $0x20] sm:$0xff] %v774_v22  ;;  %v775_v27 = vmax.f32 %v742_v23, 0.0  ;;  %v991_v28 = vadd.f32 %v990_v26, %v989_v24  ;;  %v1044_v29 = vpop.f32.mrb[13].mxu1  ;;  %v992_v30 = vpop.f32.mrb[14].mxu0 }
 0x115   : > { %v725_v31 = vpop.f32.mrb[14].mxu1  ;;  %v993_v32 = vpop.f32.mrb[15].mxu0 }
 0x116   : > { %785 = vst [vmem:[%s1311_s27 + $0x28] sm:$0xff] %v775_v27  ;;  %v723_v33 = vadd.f32 %v991_v28, %v722_v25  ;;  %v994_v34 = vadd.f32 %v993_v32, %v992_v30  ;;  %v1045_v35 = vpop.f32.mrb[15].mxu1 }
 0x118   : > { %v743_v36 = vadd.f32 %v1304_v46, %v723_v33  ;;  %v726_v37 = vadd.f32 %v994_v34, %v725_v31 }
 0x11a   : > { %v776_v38 = vmax.f32 %v743_v36, 0.0  ;;  %v744_v39 = vadd.f32 %v1304_v46, %v726_v37  ;;  %v995_v40 = vpop.f32.mrb[16].mxu0 }
 0x11b   : > { %v730_v41 = vpop.f32.mrb[16].mxu1  ;;  %v996_v42 = vpop.f32.mrb[17].mxu0 }
 0x11c   : > { %786 = vst [vmem:[%s1311_s27 + $0x30] sm:$0xff] %v776_v38  ;;  %v777_v43 = vmax.f32 %v744_v39, 0.0  ;;  %v997_v44 = vadd.f32 %v996_v42, %v995_v40  ;;  %v1048_v45 = vpop.f32.mrb[17].mxu1  ;;  %v998_v47 = vpop.f32.mrb[18].mxu0 }
 0x11d   : > { %v733_v48 = vpop.f32.mrb[18].mxu1  ;;  %v999_v49 = vpop.f32.mrb[19].mxu0 }
 0x11e   : > { %787 = vst [vmem:[%s1311_s27 + $0x38] sm:$0xff] %v777_v43  ;;  %v731_v50 = vadd.f32 %v997_v44, %v730_v41  ;;  %v1000_v51 = vadd.f32 %v999_v49, %v998_v47  ;;  %v1049_v52 = vpop.f32.mrb[19].mxu1 }
 0x120   : > { %v745_v53 = vadd.f32 %v1304_v46, %v731_v50  ;;  %v734_v54 = vadd.f32 %v1000_v51, %v733_v48 }
 0x122   : > { %v778_v55 = vmax.f32 %v745_v53, 0.0  ;;  %v746_v56 = vadd.f32 %v1304_v46, %v734_v54 }
 0x124   : > { %788 = vst [vmem:[%s1311_s27 + $0x40] sm:$0xff] %v778_v55  ;;  %v779_v57 = vmax.f32 %v746_v56, 0.0 }
 0x126   : > { %789 = vst [vmem:[%s1311_s27 + $0x48] sm:$0xff] %v779_v57 }
 0x127 PF: > { %s13_s14 = sadd.s32 1, %s1143_s14   ;;  %s1345_s12 = smov %s1139_s13 }
 0x128   : > { %p10_p5 = scmp.ge.s32.totalorder %s13_s14, 4   ;;  %s1346_s13 = smov %s1348_s15 }
 0x12a   :  { %12 = sbr.rel (!%p10_p5) target bundleno = 2 (0x2), region = 76 }

// kernel: _gqn_apply.26
= control target key start
LH: loop header
LB: loop body
LE: loop exit
PB: predicated region body
PF: predicated region fallthrough
CT: control target
= control target key end

     0   :  { %s928_s12 = smov 0   ;;  %s930_s13 = smov 0   ;;  %s1043_s0 = inlined_call_operand.vmem [shape: bf16[160,256], index: 0, kind: input, shape index: {}]   ;;  %s1044_s1 = inlined_call_operand.vmem [shape: bf16[256,128], index: 1, kind: input, shape index: {}]   ;;  %s1045_s2 = inlined_call_operand.vmem [shape: f32[1,128], index: 2, kind: input, shape index: {}]   ;;  %s1046_s3 = inlined_call_operand.vmem [shape: f32[160,128], index: 3, kind: output, shape index: {}]  }
   0x1   :  { %s932_s14 = smov 0  }
   0x2 LB: > { %s32_s15 = sadd.s32 1, %s902_s13  ;;  %p733_p0 = scmp.ge.s32.totalorder %s906_s14, 1  ;;  %s906_s14 = sphi %s932_s14, %s13_s14   ;;  %s902_s13 = sphi %s930_s13, %s1048_s13   ;;  %s898_s12 = sphi %s928_s12, %s1047_s12  }
   0x3   : > { %p34_p1 = scmp.ge.s32.totalorder %s32_s15, 2  ;;  %p191_p2 = scmp.lt.s32.totalorder %s906_s14, 3 }
   0x5   : > { %s1050_s15 = smov (%p34_p1, %s32_s15), 0  ;;  %p192_p3 = pnand %p733_p0, %p191_p2 }
   0x6   : > { %v853_v0 = vld [vmem:[%s1044_s1 + $0x40] sm:$0xff] (!%p192_p3)   ;;  %s234_s18 = smul.u32 (!%p192_p3), 10, %s898_s12  ;;  %v855_v2 = vld [vmem:[%s1044_s1 + $0x48] sm:$0xff] (!%p192_p3)   ;;  %v857_v4 = vld [vmem:[%s1044_s1 + $0x50] sm:$0xff] (!%p192_p3)  }
   0x7   : > { %195 = sbr.rel (%p192_p3) target bundleno = 277 (0x115), region = 32  ;;  %v854_v1 = vld [vmem:[%s1044_s1] sm:$0xff] (!%p192_p3)   ;;  %767 = vmatprep.subr.bf16.mxu0 (!%p192_p3), %v853_v0  ;;  %813 = vmatprep.subr.bf16.mxu1 (!%p192_p3), %v853_v0  ;;  %v856_v3 = vld [vmem:[%s1044_s1 + $0x8] sm:$0xff] (!%p192_p3)   ;;  %v858_v5 = vld [vmem:[%s1044_s1 + $0x10] sm:$0xff] (!%p192_p3)  }
   0x8   : > { %768 = vmatpush3.bf16.msra.mxu0 (!%p192_p3), %v854_v1  ;;  %821 = vmatpush3.bf16.msra.mxu1 (!%p192_p3), %v854_v1  ;;  %p236_p4 = scmp.lt.s32.totalorder (!%p192_p3), %s234_s18, 19  ;;  %v859_v6 = vld [vmem:[%s1044_s1 + $0x58] sm:$0xff] (!%p192_p3)   ;;  %v861_v8 = vld [vmem:[%s1044_s1 + $0x60] sm:$0xff] (!%p192_p3)   ;;  %v863_v10 = vld [vmem:[%s1044_s1 + $0x68] sm:$0xff] (!%p192_p3)  }
   0x9   : > { %769 = vmatprep.subr.bf16.mxu0 (!%p192_p3), %v855_v2  ;;  %814 = vmatprep.subr.bf16.mxu1 (!%p192_p3), %v855_v2  ;;  %v860_v7 = vld [vmem:[%s1044_s1 + $0x18] sm:$0xff] (!%p192_p3)   ;;  %v862_v9 = vld [vmem:[%s1044_s1 + $0x20] sm:$0xff] (!%p192_p3)   ;;  %v864_v13 = vld [vmem:[%s1044_s1 + $0x28] sm:$0xff] (!%p192_p3)  }
   0xa   : > { %v865_v14 = vld [vmem:[%s1044_s1 + $0x70] sm:$0xff] (!%p192_p3)   ;;  %v867_v16 = vld [vmem:[%s1044_s1 + $0x78] sm:$0xff] (!%p192_p3)   ;;  %v737_v28 = vld [vmem:[%s1045_s2] ss:$0 sm:$0xff] (!%p192_p3) }
   0xb   : > { %v866_v15 = vld [vmem:[%s1044_s1 + $0x30] sm:$0xff] (!%p192_p3)   ;;  %v868_v17 = vld [vmem:[%s1044_s1 + $0x38] sm:$0xff] (!%p192_p3)  }
   0xc   : > { %770 = vmatpush3.bf16.msra.mxu0 (!%p192_p3), %v856_v3  ;;  %822 = vmatpush3.bf16.msra.mxu1 (!%p192_p3), %v856_v3 }
   0xd   : > { %771 = vmatprep.subr.bf16.mxu0 (!%p192_p3), %v857_v4  ;;  %815 = vmatprep.subr.bf16.mxu1 (!%p192_p3), %v857_v4 }
   0xe   : > { %s1052_s18 = smov (!%p236_p4, %s234_s18), 19 }
   0xf   : > { %s766_s6 = sshll.u32 %s1052_s18, 3 }
  0x10   : > { %772 = vmatpush3.bf16.msra.mxu0 %v858_v5  ;;  %823 = vmatpush3.bf16.msra.mxu1 %v858_v5  ;;  %s981_s11 = scalar_lea.vmem %s1043_s0, %s766_s6  ;;  %s1022_s8 = scalar_lea.vmem %s1046_s3, %s766_s6 }
  0x11   : > { %773 = vmatprep.subr.bf16.mxu0 %v859_v6  ;;  %816 = vmatprep.subr.bf16.mxu1 %v859_v6  ;;  %v871_v11 = vld [vmem:[%s981_s11 + $0x4] ss:$8 sps:$4 sm:$0xff]   ;;  %v874_v12 = vld [vmem:[%s981_s11 + $0x34] ss:$8 sps:$4 sm:$0xff]   ;;  %v869_v18 = vld [vmem:[%s981_s11] ss:$8 sps:$4 sm:$0xff]  }
  0x12   : > { %519 = vmatprep.mubr.bf16.mxu0 %v871_v11  ;;  %543 = vmatprep.mubr.bf16.mxu1 %v874_v12  ;;  %v872_v19 = vld [vmem:[%s981_s11 + $0x30] ss:$8 sps:$4 sm:$0xff]   ;;  %v875_v20 = vld [vmem:[%s981_s11 + $0x14] ss:$8 sps:$4 sm:$0xff]   ;;  %v878_v21 = vld [vmem:[%s981_s11 + $0x44] ss:$8 sps:$4 sm:$0xff]  }
  0x13   : > { %v877_v22 = vld [vmem:[%s981_s11 + $0x10] ss:$8 sps:$4 sm:$0xff]   ;;  %v880_v23 = vld [vmem:[%s981_s11 + $0x40] ss:$8 sps:$4 sm:$0xff]   ;;  %v881_v24 = vld [vmem:[%s981_s11 + $0x24] ss:$8 sps:$4 sm:$0xff]  }
  0x14   : > { %774 = vmatpush3.bf16.msra.mxu0 %v860_v7  ;;  %824 = vmatpush3.bf16.msra.mxu1 %v860_v7  ;;  %v883_v25 = vld [vmem:[%s981_s11 + $0x20] ss:$8 sps:$4 sm:$0xff]  }
  0x15   : > { %775 = vmatprep.subr.bf16.mxu0 %v861_v8  ;;  %817 = vmatprep.subr.bf16.mxu1 %v861_v8 }
  0x18   : > { %776 = vmatpush3.bf16.msra.mxu0 %v862_v9  ;;  %825 = vmatpush3.bf16.msra.mxu1 %v862_v9 }
  0x19   : > { %777 = vmatprep.subr.bf16.mxu0 %v863_v10  ;;  %818 = vmatprep.subr.bf16.mxu1 %v863_v10 }
  0x1c   : > { %778 = vmatpush3.bf16.msra.mxu0 %v864_v13  ;;  %826 = vmatpush3.bf16.msra.mxu1 %v864_v13 }
  0x1d   : > { %779 = vmatprep.subr.bf16.mxu0 %v865_v14  ;;  %819 = vmatprep.subr.bf16.mxu1 %v865_v14 }
  0x20   : > { %780 = vmatpush3.bf16.msra.mxu0 %v866_v15  ;;  %827 = vmatpush3.bf16.msra.mxu1 %v866_v15 }
  0x21   : > { %781 = vmatprep.subr.bf16.mxu0 %v867_v16  ;;  %820 = vmatprep.subr.bf16.mxu1 %v867_v16 }
  0x24   : > { %782 = vmatpush3.bf16.msra.mxu0 %v868_v17  ;;  %828 = vmatpush3.bf16.msra.mxu1 %v868_v17 }
  0x27   : > { %520 = vmatmul.mubr.bf16.vlgmr.msra.gmra.mrb[0].mxu0 %v869_v18  ;;  %544 = vmatmul.mubr.bf16.vlgmr.msra.gmra.mrb[0].mxu1 %v872_v19 }
  0x28   : > { %527 = vmatprep.mubr.bf16.mxu0 %v875_v20  ;;  %551 = vmatprep.mubr.bf16.mxu1 %v878_v21 }
  0x2f   : > { %528 = vmatmul.mubr.bf16.gmra.mrb[4].mxu0 %v877_v22  ;;  %552 = vmatmul.mubr.bf16.gmra.mrb[4].mxu1 %v880_v23 }
  0x30   : > { %535 = vmatprep.mubr.bf16.mxu0 %v881_v24 }
  0x37   : > { %536 = vmatmul.mubr.bf16.gmra.mrb[8].mxu0 %v883_v25 }
  0xfa   : > { %v783_v26 = vpop.f32.mrb[0].mxu0  ;;  %v801_v27 = vpop.f32.mrb[0].mxu1 }
  0xfb   : > { %v784_v29 = vpop.f32.mrb[1].mxu0  ;;  %v802_v30 = vpop.f32.mrb[1].mxu1 }
  0xfc   : > { %v785_v31 = vadd.f32 %v784_v29, %v783_v26  ;;  %v786_v32 = vpop.f32.mrb[2].mxu0  ;;  %v803_v33 = vadd.f32 %v802_v30, %v801_v27  ;;  %v804_v34 = vpop.f32.mrb[2].mxu1 }
  0xfd   : > { %v787_v35 = vpop.f32.mrb[3].mxu0  ;;  %v805_v36 = vpop.f32.mrb[3].mxu1 }
  0xfe   : > { %v560_v37 = vadd.f32 %v785_v31, %v737_v28  ;;  %v788_v38 = vadd.f32 %v787_v35, %v786_v32  ;;  %v566_v39 = vadd.f32 %v803_v33, %v737_v28  ;;  %v806_v40 = vadd.f32 %v805_v36, %v804_v34 }
 0x100   : > { %v593_v41 = vmax.f32 %v560_v37, 0.0  ;;  %v561_v42 = vadd.f32 %v788_v38, %v737_v28  ;;  %v599_v43 = vmax.f32 %v566_v39, 0.0  ;;  %v567_v44 = vadd.f32 %v806_v40, %v737_v28 }
 0x102   : > { %603 = vst [vmem:[%s1022_s8] sm:$0xff] %v593_v41  ;;  %v594_v45 = vmax.f32 %v561_v42, 0.0  ;;  %609 = vst [vmem:[%s1022_s8 + $0x30] sm:$0xff] %v599_v43  ;;  %v789_v46 = vpop.f32.mrb[4].mxu0  ;;  %v600_v47 = vmax.f32 %v567_v44, 0.0  ;;  %v807_v48 = vpop.f32.mrb[4].mxu1 }
 0x103   : > { %v790_v49 = vpop.f32.mrb[5].mxu0  ;;  %v808_v50 = vpop.f32.mrb[5].mxu1 }
 0x104   : > { %604 = vst [vmem:[%s1022_s8 + $0x8] sm:$0xff] %v594_v45  ;;  %610 = vst [vmem:[%s1022_s8 + $0x38] sm:$0xff] %v600_v47  ;;  %v791_v51 = vadd.f32 %v790_v49, %v789_v46  ;;  %v792_v52 = vpop.f32.mrb[6].mxu0  ;;  %v809_v53 = vadd.f32 %v808_v50, %v807_v48  ;;  %v810_v54 = vpop.f32.mrb[6].mxu1 }
 0x105   : > { %v793_v55 = vpop.f32.mrb[7].mxu0  ;;  %v811_v56 = vpop.f32.mrb[7].mxu1 }
 0x106   : > { %v562_v57 = vadd.f32 %v791_v51, %v737_v28  ;;  %v794_v58 = vadd.f32 %v793_v55, %v792_v52  ;;  %v568_v59 = vadd.f32 %v809_v53, %v737_v28  ;;  %v812_v60 = vadd.f32 %v811_v56, %v810_v54 }
 0x108   : > { %v595_v61 = vmax.f32 %v562_v57, 0.0  ;;  %v563_v62 = vadd.f32 %v794_v58, %v737_v28  ;;  %v601_v63 = vmax.f32 %v568_v59, 0.0  ;;  %v569_v0 = vadd.f32 %v812_v60, %v737_v28 }
 0x10a   : > { %605 = vst [vmem:[%s1022_s8 + $0x10] sm:$0xff] %v595_v61  ;;  %v596_v1 = vmax.f32 %v563_v62, 0.0  ;;  %611 = vst [vmem:[%s1022_s8 + $0x40] sm:$0xff] %v601_v63  ;;  %v795_v2 = vpop.f32.mrb[8].mxu0  ;;  %v602_v3 = vmax.f32 %v569_v0, 0.0 }
 0x10b   : > { %v796_v4 = vpop.f32.mrb[9].mxu0 }
 0x10c   : > { %606 = vst [vmem:[%s1022_s8 + $0x18] sm:$0xff] %v596_v1  ;;  %612 = vst [vmem:[%s1022_s8 + $0x48] sm:$0xff] %v602_v3  ;;  %v797_v5 = vadd.f32 %v796_v4, %v795_v2  ;;  %v798_v6 = vpop.f32.mrb[10].mxu0 }
 0x10d   : > { %v799_v7 = vpop.f32.mrb[11].mxu0 }
 0x10e   : > { %v564_v8 = vadd.f32 %v797_v5, %v737_v28  ;;  %v800_v9 = vadd.f32 %v799_v7, %v798_v6 }
 0x110   : > { %v597_v10 = vmax.f32 %v564_v8, 0.0  ;;  %v565_v11 = vadd.f32 %v800_v9, %v737_v28 }
 0x112   : > { %607 = vst [vmem:[%s1022_s8 + $0x20] sm:$0xff] %v597_v10  ;;  %v598_v12 = vmax.f32 %v565_v11, 0.0 }
 0x114   : > { %608 = vst [vmem:[%s1022_s8 + $0x28] sm:$0xff] %v598_v12 }
 0x115 PF: > { %s13_s14 = sadd.s32 1, %s906_s14   ;;  %s1047_s12 = smov %s902_s13 }
 0x116   : > { %p10_p5 = scmp.ge.s32.totalorder %s13_s14, 4   ;;  %s1048_s13 = smov %s1050_s15 }
 0x118   :  { %12 = sbr.rel (!%p10_p5) target bundleno = 2 (0x2), region = 76 }

// kernel: _gqn_apply.31
= control target key start
LH: loop header
LB: loop body
LE: loop exit
PB: predicated region body
PF: predicated region fallthrough
CT: control target
= control target key end

     0   :  { %s1393_s1 = inlined_call_operand.vmem [shape: bf16[1024,128], index: 1, kind: input, shape index: {}]   ;;  %s1394_s0 = inlined_call_operand.vmem [shape: bf16[32,1024], index: 0, kind: input, shape index: {}]   ;;  %s1395_s2 = inlined_call_operand.vmem [shape: f32[1,128], index: 2, kind: input, shape index: {}]   ;;  %s1396_s3 = inlined_call_operand.vmem [shape: f32[32,128], index: 3, kind: output, shape index: {}]  }
   0x1   :  { %v1054_v0 = vld [vmem:[%s1393_s1 + $0x40] sm:$0xff]   ;;  %v1058_v4 = vld [vmem:[%s1393_s1 + $0x48] sm:$0xff]   ;;  %v1062_v8 = vld [vmem:[%s1393_s1 + $0x50] sm:$0xff]  }
   0x2   :  { %v1055_v1 = vld [vmem:[%s1393_s1 + $0xc0] sm:$0xff]   ;;  %942 = vmatprep.subr.bf16.mxu0 %v1054_v0  ;;  %v1059_v5 = vld [vmem:[%s1393_s1 + $0xc8] sm:$0xff]   ;;  %v1063_v9 = vld [vmem:[%s1393_s1 + $0xd0] sm:$0xff]  }
   0x3   :  { %v1056_v2 = vld [vmem:[%s1393_s1] sm:$0xff]   ;;  %970 = vmatprep.subr.bf16.mxu1 %v1055_v1  ;;  %v1060_v6 = vld [vmem:[%s1393_s1 + $0x8] sm:$0xff]   ;;  %v1064_v10 = vld [vmem:[%s1393_s1 + $0x10] sm:$0xff]  }
   0x4   :  { %v1057_v3 = vld [vmem:[%s1393_s1 + $0x80] sm:$0xff]   ;;  %943 = vmatpush3.bf16.msra.mxu0 %v1056_v2  ;;  %v1061_v7 = vld [vmem:[%s1393_s1 + $0x88] sm:$0xff]   ;;  %v1065_v11 = vld [vmem:[%s1393_s1 + $0x90] sm:$0xff]  }
   0x5   :  { %971 = vmatpush3.bf16.msra.mxu1 %v1057_v3  ;;  %944 = vmatprep.subr.bf16.mxu0 %v1058_v4  ;;  %v1066_v12 = vld [vmem:[%s1393_s1 + $0x58] sm:$0xff]   ;;  %v1070_v16 = vld [vmem:[%s1393_s1 + $0x60] sm:$0xff]   ;;  %v1074_v20 = vld [vmem:[%s1393_s1 + $0x68] sm:$0xff]  }
   0x6   :  { %972 = vmatprep.subr.bf16.mxu1 %v1059_v5  ;;  %v1067_v13 = vld [vmem:[%s1393_s1 + $0xd8] sm:$0xff]   ;;  %v1071_v17 = vld [vmem:[%s1393_s1 + $0xe0] sm:$0xff]   ;;  %v1075_v21 = vld [vmem:[%s1393_s1 + $0xe8] sm:$0xff]  }
   0x7   :  { %v1068_v14 = vld [vmem:[%s1393_s1 + $0x18] sm:$0xff]   ;;  %v1072_v18 = vld [vmem:[%s1393_s1 + $0x20] sm:$0xff]   ;;  %v1076_v22 = vld [vmem:[%s1393_s1 + $0x28] sm:$0xff]  }
   0x8   :  { %945 = vmatpush3.bf16.msra.mxu0 %v1060_v6  ;;  %v1069_v15 = vld [vmem:[%s1393_s1 + $0x98] sm:$0xff]   ;;  %v1073_v19 = vld [vmem:[%s1393_s1 + $0xa0] sm:$0xff]   ;;  %v1077_v23 = vld [vmem:[%s1393_s1 + $0xa8] sm:$0xff]  }
   0x9   :  { %973 = vmatpush3.bf16.msra.mxu1 %v1061_v7  ;;  %946 = vmatprep.subr.bf16.mxu0 %v1062_v8  ;;  %v1078_v24 = vld [vmem:[%s1393_s1 + $0x70] sm:$0xff]   ;;  %v1082_v28 = vld [vmem:[%s1393_s1 + $0x78] sm:$0xff]   ;;  %v34_v32 = vld [vmem:[%s1394_s0] sm:$0xff] }
   0xa   :  { %974 = vmatprep.subr.bf16.mxu1 %v1063_v9  ;;  %v1079_v25 = vld [vmem:[%s1393_s1 + $0xf0] sm:$0xff]   ;;  %v1083_v29 = vld [vmem:[%s1393_s1 + $0xf8] sm:$0xff]   ;;  %v38_v33 = vld [vmem:[%s1394_s0 + $0x20] sm:$0xff] }
   0xb   :  { %v1080_v26 = vld [vmem:[%s1393_s1 + $0x30] sm:$0xff]   ;;  %v1084_v30 = vld [vmem:[%s1393_s1 + $0x38] sm:$0xff]   ;;  %v35_v34 = vld [vmem:[%s1394_s0 + $0x8] sm:$0xff]  ;;  %v862_v35 = vcombine.low %v34_v32, %v38_v33  ;;  %v863_v36 = vcombine.high %v34_v32, %v38_v33 }
   0xc   :  { %947 = vmatpush3.bf16.msra.mxu0 %v1064_v10  ;;  %v1081_v27 = vld [vmem:[%s1393_s1 + $0xb0] sm:$0xff]   ;;  %v1085_v31 = vld [vmem:[%s1393_s1 + $0xb8] sm:$0xff]   ;;  %v39_v37 = vld [vmem:[%s1394_s0 + $0x28] sm:$0xff] }
   0xd   :  { %975 = vmatpush3.bf16.msra.mxu1 %v1065_v11  ;;  %948 = vmatprep.subr.bf16.mxu0 %v1066_v12  ;;  %v864_v38 = vcombine.low %v35_v34, %v39_v37  ;;  %v865_v39 = vcombine.high %v35_v34, %v39_v37  ;;  %v1086_v40 = vld [vmem:[%s1393_s1 + $0x140] sm:$0xff]   ;;  %v1090_v44 = vld [vmem:[%s1393_s1 + $0x148] sm:$0xff]   ;;  %v1094_v48 = vld [vmem:[%s1393_s1 + $0x150] sm:$0xff]  }
   0xe   :  { %976 = vmatprep.subr.bf16.mxu1 %v1067_v13  ;;  %674 = vmatprep.mubr.bf16.mxu0 %v863_v36  ;;  %v1087_v41 = vld [vmem:[%s1393_s1 + $0x1c0] sm:$0xff]   ;;  %v1091_v45 = vld [vmem:[%s1393_s1 + $0x1c8] sm:$0xff]   ;;  %v1095_v49 = vld [vmem:[%s1393_s1 + $0x1d0] sm:$0xff]  }
   0xf   :  { %723 = vmatprep.mubr.bf16.mxu1 %v865_v39  ;;  %v1088_v42 = vld [vmem:[%s1393_s1 + $0x100] sm:$0xff]   ;;  %v1092_v46 = vld [vmem:[%s1393_s1 + $0x108] sm:$0xff]   ;;  %v1096_v50 = vld [vmem:[%s1393_s1 + $0x110] sm:$0xff]  }
  0x10   :  { %949 = vmatpush3.bf16.msra.mxu0 %v1068_v14  ;;  %v1089_v43 = vld [vmem:[%s1393_s1 + $0x180] sm:$0xff]   ;;  %v1093_v47 = vld [vmem:[%s1393_s1 + $0x188] sm:$0xff]   ;;  %v1097_v51 = vld [vmem:[%s1393_s1 + $0x190] sm:$0xff]  }
  0x11   :  { %977 = vmatpush3.bf16.msra.mxu1 %v1069_v15  ;;  %950 = vmatprep.subr.bf16.mxu0 %v1070_v16  ;;  %v1098_v52 = vld [vmem:[%s1393_s1 + $0x158] sm:$0xff]   ;;  %v1102_v56 = vld [vmem:[%s1393_s1 + $0x160] sm:$0xff]   ;;  %v43_v63 = vld [vmem:[%s1394_s0 + $0x48] sm:$0xff] }
  0x12   :  { %978 = vmatprep.subr.bf16.mxu1 %v1071_v17  ;;  %v1099_v53 = vld [vmem:[%s1393_s1 + $0x1d8] sm:$0xff]   ;;  %v1103_v57 = vld [vmem:[%s1393_s1 + $0x1e0] sm:$0xff]   ;;  %v47_v0 = vld [vmem:[%s1394_s0 + $0x68] sm:$0xff] }
  0x13   :  { %v1100_v54 = vld [vmem:[%s1393_s1 + $0x118] sm:$0xff]   ;;  %v1104_v58 = vld [vmem:[%s1393_s1 + $0x120] sm:$0xff]   ;;  %v873_v2 = vcombine.high %v43_v63, %v47_v0  ;;  %v1106_v3 = vld [vmem:[%s1393_s1 + $0x168] sm:$0xff]   ;;  %v872_v4 = vcombine.low %v43_v63, %v47_v0 }
  0x14   :  { %951 = vmatpush3.bf16.msra.mxu0 %v1072_v18  ;;  %v1101_v55 = vld [vmem:[%s1393_s1 + $0x198] sm:$0xff]   ;;  %v1105_v59 = vld [vmem:[%s1393_s1 + $0x1a0] sm:$0xff]   ;;  %v1107_v5 = vld [vmem:[%s1393_s1 + $0x1e8] sm:$0xff]  }
  0x15   :  { %979 = vmatpush3.bf16.msra.mxu1 %v1073_v19  ;;  %952 = vmatprep.subr.bf16.mxu0 %v1074_v20  ;;  %v42_v60 = vld [vmem:[%s1394_s0 + $0x40] sm:$0xff]  ;;  %v1108_v6 = vld [vmem:[%s1393_s1 + $0x128] sm:$0xff]   ;;  %v1110_v8 = vld [vmem:[%s1393_s1 + $0x170] sm:$0xff]  }
  0x16   :  { %980 = vmatprep.subr.bf16.mxu1 %v1075_v21  ;;  %v46_v61 = vld [vmem:[%s1394_s0 + $0x60] sm:$0xff]  ;;  %v1109_v7 = vld [vmem:[%s1393_s1 + $0x1a8] sm:$0xff]   ;;  %v1111_v9 = vld [vmem:[%s1393_s1 + $0x1f0] sm:$0xff]  }
  0x17   :  { %v871_v62 = vcombine.high %v42_v60, %v46_v61  ;;  %v870_v1 = vcombine.low %v42_v60, %v46_v61  ;;  %v1112_v10 = vld [vmem:[%s1393_s1 + $0x130] sm:$0xff]   ;;  %v1114_v12 = vld [vmem:[%s1393_s1 + $0x178] sm:$0xff]  }
  0x18   :  { %953 = vmatpush3.bf16.msra.mxu0 %v1076_v22  ;;  %v1113_v11 = vld [vmem:[%s1393_s1 + $0x1b0] sm:$0xff]   ;;  %v1115_v13 = vld [vmem:[%s1393_s1 + $0x1f8] sm:$0xff]  }
  0x19   :  { %981 = vmatpush3.bf16.msra.mxu1 %v1077_v23  ;;  %954 = vmatprep.subr.bf16.mxu0 %v1078_v24  ;;  %v1116_v14 = vld [vmem:[%s1393_s1 + $0x138] sm:$0xff]   ;;  %v36_v16 = vld [vmem:[%s1394_s0 + $0x10] sm:$0xff] }
  0x1a   :  { %982 = vmatprep.subr.bf16.mxu1 %v1079_v25  ;;  %v1117_v15 = vld [vmem:[%s1393_s1 + $0x1b8] sm:$0xff]   ;;  %v40_v17 = vld [vmem:[%s1394_s0 + $0x30] sm:$0xff] }
  0x1b   :  { %v37_v18 = vld [vmem:[%s1394_s0 + $0x18] sm:$0xff]  ;;  %v866_v20 = vcombine.low %v36_v16, %v40_v17  ;;  %v867_v21 = vcombine.high %v36_v16, %v40_v17  ;;  %v44_v24 = vld [vmem:[%s1394_s0 + $0x50] sm:$0xff] }
  0x1c   :  { %955 = vmatpush3.bf16.msra.mxu0 %v1080_v26  ;;  %v41_v19 = vld [vmem:[%s1394_s0 + $0x38] sm:$0xff]  ;;  %v48_v25 = vld [vmem:[%s1394_s0 + $0x70] sm:$0xff] }
  0x1d   :  { %983 = vmatpush3.bf16.msra.mxu1 %v1081_v27  ;;  %956 = vmatprep.subr.bf16.mxu0 %v1082_v28  ;;  %v868_v22 = vcombine.low %v37_v18, %v41_v19  ;;  %v869_v23 = vcombine.high %v37_v18, %v41_v19  ;;  %v45_v26 = vld [vmem:[%s1394_s0 + $0x58] sm:$0xff]  ;;  %v875_v27 = vcombine.high %v44_v24, %v48_v25 }
  0x1e   :  { %984 = vmatprep.subr.bf16.mxu1 %v1083_v29  ;;  %v49_v28 = vld [vmem:[%s1394_s0 + $0x78] sm:$0xff] }
  0x1f   :  { %v877_v29 = vcombine.high %v45_v26, %v49_v28 }
  0x20   :  { %957 = vmatpush3.bf16.msra.mxu0 %v1084_v30  ;;  %v874_v30 = vcombine.low %v44_v24, %v48_v25 }
  0x21   :  { %985 = vmatpush3.bf16.msra.mxu1 %v1085_v31  ;;  %998 = vmatprep.subr.bf16.mxu0 %v1086_v40  ;;  %v876_v31 = vcombine.low %v45_v26, %v49_v28 }
  0x22   :  { %1026 = vmatprep.subr.bf16.mxu1 %v1087_v41 }
  0x23   :  { %675 = vmatmul.mubr.bf16.vlgmr.msra.gmra.mrb[0].mxu0 %v862_v35 }
  0x24   :  { %724 = vmatmul.mubr.bf16.vlgmr.msra.gmra.mrb[0].mxu1 %v864_v38  ;;  %999 = vmatpush3.bf16.msra.mxu0 %v1088_v42 }
  0x25   :  { %1027 = vmatpush3.bf16.msra.mxu1 %v1089_v43  ;;  %1000 = vmatprep.subr.bf16.mxu0 %v1090_v44 }
  0x26   :  { %1028 = vmatprep.subr.bf16.mxu1 %v1091_v45  ;;  %682 = vmatprep.mubr.bf16.mxu0 %v871_v62 }
  0x27   :  { %731 = vmatprep.mubr.bf16.mxu1 %v873_v2 }
  0x28   :  { %1001 = vmatpush3.bf16.msra.mxu0 %v1092_v46 }
  0x29   :  { %1029 = vmatpush3.bf16.msra.mxu1 %v1093_v47  ;;  %1002 = vmatprep.subr.bf16.mxu0 %v1094_v48 }
  0x2a   :  { %1030 = vmatprep.subr.bf16.mxu1 %v1095_v49 }
  0x2b   :  { %683 = vmatmul.mubr.bf16.gmra.mrb[4].mxu0 %v870_v1 }
  0x2c   :  { %1003 = vmatpush3.bf16.msra.mxu0 %v1096_v50  ;;  %732 = vmatmul.mubr.bf16.gmra.mrb[4].mxu1 %v872_v4 }
  0x2d   :  { %1031 = vmatpush3.bf16.msra.mxu1 %v1097_v51  ;;  %1004 = vmatprep.subr.bf16.mxu0 %v1098_v52 }
  0x2e   :  { %1032 = vmatprep.subr.bf16.mxu1 %v1099_v53  ;;  %772 = vmatprep.mubr.bf16.mxu0 %v867_v21 }
  0x2f   :  { %821 = vmatprep.mubr.bf16.mxu1 %v869_v23 }
  0x30   :  { %1005 = vmatpush3.bf16.msra.mxu0 %v1100_v54 }
  0x31   :  { %1033 = vmatpush3.bf16.msra.mxu1 %v1101_v55  ;;  %1006 = vmatprep.subr.bf16.mxu0 %v1102_v56 }
  0x32   :  { %1034 = vmatprep.subr.bf16.mxu1 %v1103_v57 }
  0x34   :  { %1007 = vmatpush3.bf16.msra.mxu0 %v1104_v58 }
  0x35   :  { %1035 = vmatpush3.bf16.msra.mxu1 %v1105_v59  ;;  %1008 = vmatprep.subr.bf16.mxu0 %v1106_v3 }
  0x36   :  { %1036 = vmatprep.subr.bf16.mxu1 %v1107_v5 }
  0x38   :  { %1009 = vmatpush3.bf16.msra.mxu0 %v1108_v6 }
  0x39   :  { %1037 = vmatpush3.bf16.msra.mxu1 %v1109_v7  ;;  %1010 = vmatprep.subr.bf16.mxu0 %v1110_v8 }
  0x3a   :  { %1038 = vmatprep.subr.bf16.mxu1 %v1111_v9  ;;  %v861_v9 = vld [vmem:[%s1395_s2] ss:$0 sm:$0xff] }
  0x3c   :  { %1011 = vmatpush3.bf16.msra.mxu0 %v1112_v10 }
  0x3d   :  { %1039 = vmatpush3.bf16.msra.mxu1 %v1113_v11  ;;  %1012 = vmatprep.subr.bf16.mxu0 %v1114_v12 }
  0x3e   :  { %1040 = vmatprep.subr.bf16.mxu1 %v1115_v13 }
  0x40   :  { %1013 = vmatpush3.bf16.msra.mxu0 %v1116_v14 }
  0x41   :  { %1041 = vmatpush3.bf16.msra.mxu1 %v1117_v15 }
  0x43   :  { %773 = vmatmul.mubr.bf16.vlgmr.msra.gmra.mrb[8].mxu0 %v866_v20 }
  0x44   :  { %822 = vmatmul.mubr.bf16.vlgmr.msra.gmra.mrb[8].mxu1 %v868_v22  ;;  %780 = vmatprep.mubr.bf16.mxu0 %v875_v27 }
  0x45   :  { %829 = vmatprep.mubr.bf16.mxu1 %v877_v29 }
  0x4b   :  { %781 = vmatmul.mubr.bf16.gmra.mrb[12].mxu0 %v874_v30 }
  0x4c   :  { %830 = vmatmul.mubr.bf16.gmra.mrb[12].mxu1 %v876_v31 }
  0xf6   :  { %v958_v32 = vpop.f32.mrb[0].mxu0 }
  0xf7   :  { %v986_v33 = vpop.f32.mrb[0].mxu1  ;;  %v959_v34 = vpop.f32.mrb[1].mxu0 }
  0xf8   :  { %v960_v35 = vadd.f32 %v959_v34, %v958_v32  ;;  %v987_v36 = vpop.f32.mrb[1].mxu1  ;;  %v961_v37 = vpop.f32.mrb[2].mxu0 }
  0xf9   :  { %v988_v38 = vadd.f32 %v987_v36, %v986_v33  ;;  %v989_v39 = vpop.f32.mrb[2].mxu1  ;;  %v962_v40 = vpop.f32.mrb[3].mxu0 }
  0xfa   :  { %v963_v41 = vadd.f32 %v962_v40, %v961_v37  ;;  %v990_v42 = vpop.f32.mrb[3].mxu1 }
  0xfb   :  { %v726_v43 = vadd.f32 %v988_v38, %v960_v35  ;;  %v991_v44 = vadd.f32 %v990_v42, %v989_v39 }
  0xfd   :  { %v729_v45 = vadd.f32 %v991_v44, %v963_v41 }
  0xfe   :  { %v964_v46 = vpop.f32.mrb[4].mxu0 }
  0xff   :  { %v992_v47 = vpop.f32.mrb[4].mxu1  ;;  %v965_v48 = vpop.f32.mrb[5].mxu0 }
 0x100   :  { %v966_v49 = vadd.f32 %v965_v48, %v964_v46  ;;  %v993_v50 = vpop.f32.mrb[5].mxu1  ;;  %v967_v51 = vpop.f32.mrb[6].mxu0 }
 0x101   :  { %v994_v52 = vadd.f32 %v993_v50, %v992_v47  ;;  %v995_v53 = vpop.f32.mrb[6].mxu1  ;;  %v968_v54 = vpop.f32.mrb[7].mxu0 }
 0x102   :  { %v969_v55 = vadd.f32 %v968_v54, %v967_v51  ;;  %v996_v56 = vpop.f32.mrb[7].mxu1 }
 0x103   :  { %v734_v57 = vadd.f32 %v994_v52, %v966_v49  ;;  %v997_v58 = vadd.f32 %v996_v56, %v995_v53 }
 0x105   :  { %v737_v59 = vadd.f32 %v997_v58, %v969_v55 }
 0x116   :  { %v1014_v60 = vpop.f32.mrb[8].mxu0 }
 0x117   :  { %v1042_v61 = vpop.f32.mrb[8].mxu1  ;;  %v1015_v62 = vpop.f32.mrb[9].mxu0 }
 0x118   :  { %v1043_v63 = vpop.f32.mrb[9].mxu1  ;;  %v1016_v0 = vadd.f32 %v1015_v62, %v1014_v60  ;;  %v1017_v2 = vpop.f32.mrb[10].mxu0 }
 0x119   :  { %v1044_v1 = vadd.f32 %v1043_v63, %v1042_v61  ;;  %v1045_v3 = vpop.f32.mrb[10].mxu1  ;;  %v1018_v4 = vpop.f32.mrb[11].mxu0 }
 0x11a   :  { %v1046_v5 = vpop.f32.mrb[11].mxu1  ;;  %v775_v6 = vadd.f32 %v1016_v0, %v726_v43  ;;  %v1019_v7 = vadd.f32 %v1018_v4, %v1017_v2 }
 0x11b   :  { %v1047_v8 = vadd.f32 %v1046_v5, %v1045_v3 }
 0x11c   :  { %v824_v10 = vadd.f32 %v1044_v1, %v775_v6  ;;  %v778_v11 = vadd.f32 %v1019_v7, %v729_v45 }
 0x11e   :  { %v838_v12 = vadd.f32 %v861_v9, %v824_v10  ;;  %v827_v13 = vadd.f32 %v1047_v8, %v778_v11  ;;  %v1020_v14 = vpop.f32.mrb[12].mxu0 }
 0x11f   :  { %v1048_v15 = vpop.f32.mrb[12].mxu1  ;;  %v1021_v16 = vpop.f32.mrb[13].mxu0 }
 0x120   :  { %v1049_v17 = vpop.f32.mrb[13].mxu1  ;;  %853 = vst [vmem:[%s1396_s3] sm:$0xff] %v838_v12  ;;  %v839_v18 = vadd.f32 %v861_v9, %v827_v13  ;;  %v1022_v19 = vadd.f32 %v1021_v16, %v1020_v14  ;;  %v1023_v21 = vpop.f32.mrb[14].mxu0 }
 0x121   :  { %v1050_v20 = vadd.f32 %v1049_v17, %v1048_v15  ;;  %v1051_v22 = vpop.f32.mrb[14].mxu1  ;;  %v1024_v23 = vpop.f32.mrb[15].mxu0 }
 0x122   :  { %v1052_v24 = vpop.f32.mrb[15].mxu1  ;;  %854 = vst [vmem:[%s1396_s3 + $0x8] sm:$0xff] %v839_v18  ;;  %v783_v25 = vadd.f32 %v1022_v19, %v734_v57  ;;  %v1025_v26 = vadd.f32 %v1024_v23, %v1023_v21 }
 0x123   :  { %v1053_v27 = vadd.f32 %v1052_v24, %v1051_v22 }
 0x124   :  { %v832_v28 = vadd.f32 %v1050_v20, %v783_v25  ;;  %v786_v29 = vadd.f32 %v1025_v26, %v737_v59 }
 0x126   :  { %v840_v30 = vadd.f32 %v861_v9, %v832_v28  ;;  %v835_v31 = vadd.f32 %v1053_v27, %v786_v29 }
 0x128   :  { %855 = vst [vmem:[%s1396_s3 + $0x10] sm:$0xff] %v840_v30  ;;  %v841_v32 = vadd.f32 %v861_v9, %v835_v31 }
 0x12a   :  { %856 = vst [vmem:[%s1396_s3 + $0x18] sm:$0xff] %v841_v32 }

// kernel: _gqn_apply.20
= control target key start
LH: loop header
LB: loop body
LE: loop exit
PB: predicated region body
PF: predicated region fallthrough
CT: control target
= control target key end

     0   :  { %s302_s1 = inlined_call_operand.vmem [shape: bf16[128,128], index: 1, kind: input, shape index: {}]   ;;  %s303_s0 = inlined_call_operand.vmem [shape: bf16[32,128], index: 0, kind: input, shape index: {}]   ;;  %s304_s2 = inlined_call_operand.vmem [shape: f32[1,128], index: 2, kind: input, shape index: {}]   ;;  %s305_s3 = inlined_call_operand.vmem [shape: f32[32,128], index: 3, kind: output, shape index: {}]  }
   0x1   :  { %v227_v0 = vld [vmem:[%s302_s1] sm:$0xff]   ;;  %v228_v1 = vld [vmem:[%s302_s1 + $0x8] sm:$0xff]   ;;  %v229_v2 = vld [vmem:[%s302_s1 + $0x10] sm:$0xff]  }
   0x2   :  { %207 = vmatprep.subr.bf16.mxu0 %v227_v0  ;;  %v230_v3 = vld [vmem:[%s302_s1 + $0x18] sm:$0xff]   ;;  %v235_v4 = vld [vmem:[%s303_s0] sm:$0xff]   ;;  %v232_v6 = vld [vmem:[%s302_s1 + $0x28] sm:$0xff]  }
   0x3   :  { %208 = vmatpush3.bf16.msra.mxu0 %v227_v0  ;;  %223 = vmatprep.mubr.bf16.mxu0 %v235_v4  ;;  %v231_v5 = vld [vmem:[%s302_s1 + $0x20] sm:$0xff]   ;;  %v233_v7 = vld [vmem:[%s302_s1 + $0x30] sm:$0xff]   ;;  %v234_v8 = vld [vmem:[%s302_s1 + $0x38] sm:$0xff]  }
   0x4   :  { %209 = vmatprep.subr.bf16.mxu0 %v228_v1  ;;  %v236_v9 = vld [vmem:[%s303_s0 + $0x8] sm:$0xff]   ;;  %v186_v10 = vld [vmem:[%s304_s2] ss:$0 sm:$0xff] }
   0x7   :  { %210 = vmatpush3.bf16.msra.mxu0 %v228_v1 }
   0x8   :  { %211 = vmatprep.subr.bf16.mxu0 %v229_v2 }
   0xb   :  { %212 = vmatpush3.bf16.msra.mxu0 %v229_v2 }
   0xc   :  { %213 = vmatprep.subr.bf16.mxu0 %v230_v3 }
   0xf   :  { %214 = vmatpush3.bf16.msra.mxu0 %v230_v3 }
  0x10   :  { %215 = vmatprep.subr.bf16.mxu0 %v231_v5 }
  0x13   :  { %216 = vmatpush3.bf16.msra.mxu0 %v231_v5 }
  0x14   :  { %217 = vmatprep.subr.bf16.mxu0 %v232_v6 }
  0x17   :  { %218 = vmatpush3.bf16.msra.mxu0 %v232_v6 }
  0x18   :  { %219 = vmatprep.subr.bf16.mxu0 %v233_v7 }
  0x1b   :  { %220 = vmatpush3.bf16.msra.mxu0 %v233_v7 }
  0x1c   :  { %221 = vmatprep.subr.bf16.mxu0 %v234_v8 }
  0x1f   :  { %222 = vmatpush3.bf16.msra.mxu0 %v234_v8 }
  0x22   :  { %224 = vmatmul.mubr.bf16.vlgmr.msra.gmra.mrb[0].mxu0 %v236_v9 }
  0xf5   :  { %v225_v11 = vpop.f32.mrb[0].mxu0 }
  0xf6   :  { %v165_v12 = vadd.f32 %v225_v11, %v186_v10  ;;  %v148_v13 = vpop.f32.mrb[1].mxu0 }
  0xf7   :  { %v163_v14 = vadd.f32 %v186_v10, %v148_v13  ;;  %v226_v15 = vpop.f32.mrb[2].mxu0 }
  0xf8   :  { %180 = vst [vmem:[%s305_s3 + $0x10] sm:$0xff] %v165_v12  ;;  %v166_v16 = vadd.f32 %v226_v15, %v186_v10  ;;  %v151_v17 = vpop.f32.mrb[3].mxu0 }
  0xf9   :  { %178 = vst [vmem:[%s305_s3] sm:$0xff] %v163_v14  ;;  %v164_v18 = vadd.f32 %v186_v10, %v151_v17 }
  0xfa   :  { %181 = vst [vmem:[%s305_s3 + $0x18] sm:$0xff] %v166_v16 }
  0xfb   :  { %179 = vst [vmem:[%s305_s3 + $0x8] sm:$0xff] %v164_v18 }

// kernel: _gqn_apply.28
= control target key start
LH: loop header
LB: loop body
LE: loop exit
PB: predicated region body
PF: predicated region fallthrough
CT: control target
= control target key end

     0   :  { %s1626_s1 = inlined_call_operand.vmem [shape: bf16[1152,128], index: 1, kind: input, shape index: {}]   ;;  %s1627_s0 = inlined_call_operand.vmem [shape: bf16[32,1152], index: 0, kind: input, shape index: {}]   ;;  %s1628_s2 = inlined_call_operand.vmem [shape: f32[1,128], index: 2, kind: input, shape index: {}]   ;;  %s1629_s3 = inlined_call_operand.vmem [shape: f32[32,128], index: 3, kind: output, shape index: {}]  }
   0x1   :  { %v1223_v0 = vld [vmem:[%s1626_s1 + $0x40] sm:$0xff]   ;;  %v1227_v4 = vld [vmem:[%s1626_s1 + $0x48] sm:$0xff]   ;;  %v1231_v8 = vld [vmem:[%s1626_s1 + $0x50] sm:$0xff]  }
   0x2   :  { %v1224_v1 = vld [vmem:[%s1626_s1 + $0xc0] sm:$0xff]   ;;  %1081 = vmatprep.subr.bf16.mxu0 %v1223_v0  ;;  %v1228_v5 = vld [vmem:[%s1626_s1 + $0xc8] sm:$0xff]   ;;  %v1232_v9 = vld [vmem:[%s1626_s1 + $0xd0] sm:$0xff]  }
   0x3   :  { %v1225_v2 = vld [vmem:[%s1626_s1] sm:$0xff]   ;;  %1109 = vmatprep.subr.bf16.mxu1 %v1224_v1  ;;  %v1229_v6 = vld [vmem:[%s1626_s1 + $0x8] sm:$0xff]   ;;  %v1233_v10 = vld [vmem:[%s1626_s1 + $0x10] sm:$0xff]  }
   0x4   :  { %v1226_v3 = vld [vmem:[%s1626_s1 + $0x80] sm:$0xff]   ;;  %1082 = vmatpush3.bf16.msra.mxu0 %v1225_v2  ;;  %v1230_v7 = vld [vmem:[%s1626_s1 + $0x88] sm:$0xff]   ;;  %v1234_v11 = vld [vmem:[%s1626_s1 + $0x90] sm:$0xff]  }
   0x5   :  { %1110 = vmatpush3.bf16.msra.mxu1 %v1226_v3  ;;  %1083 = vmatprep.subr.bf16.mxu0 %v1227_v4  ;;  %v1235_v12 = vld [vmem:[%s1626_s1 + $0x58] sm:$0xff]   ;;  %v1239_v16 = vld [vmem:[%s1626_s1 + $0x60] sm:$0xff]   ;;  %v1243_v20 = vld [vmem:[%s1626_s1 + $0x68] sm:$0xff]  }
   0x6   :  { %1111 = vmatprep.subr.bf16.mxu1 %v1228_v5  ;;  %v1236_v13 = vld [vmem:[%s1626_s1 + $0xd8] sm:$0xff]   ;;  %v1240_v17 = vld [vmem:[%s1626_s1 + $0xe0] sm:$0xff]   ;;  %v1244_v21 = vld [vmem:[%s1626_s1 + $0xe8] sm:$0xff]  }
   0x7   :  { %v1237_v14 = vld [vmem:[%s1626_s1 + $0x18] sm:$0xff]   ;;  %v1241_v18 = vld [vmem:[%s1626_s1 + $0x20] sm:$0xff]   ;;  %v1245_v22 = vld [vmem:[%s1626_s1 + $0x28] sm:$0xff]  }
   0x8   :  { %1084 = vmatpush3.bf16.msra.mxu0 %v1229_v6  ;;  %v1238_v15 = vld [vmem:[%s1626_s1 + $0x98] sm:$0xff]   ;;  %v1242_v19 = vld [vmem:[%s1626_s1 + $0xa0] sm:$0xff]   ;;  %v1246_v23 = vld [vmem:[%s1626_s1 + $0xa8] sm:$0xff]  }
   0x9   :  { %1112 = vmatpush3.bf16.msra.mxu1 %v1230_v7  ;;  %1085 = vmatprep.subr.bf16.mxu0 %v1231_v8  ;;  %v1247_v24 = vld [vmem:[%s1626_s1 + $0x70] sm:$0xff]   ;;  %v1251_v28 = vld [vmem:[%s1626_s1 + $0x78] sm:$0xff]   ;;  %v1255_v32 = vld [vmem:[%s1627_s0] ss:$36 sps:$4 sm:$0xff]  }
   0xa   :  { %1113 = vmatprep.subr.bf16.mxu1 %v1232_v9  ;;  %v1248_v25 = vld [vmem:[%s1626_s1 + $0xf0] sm:$0xff]   ;;  %v1252_v29 = vld [vmem:[%s1626_s1 + $0xf8] sm:$0xff]   ;;  %v1257_v33 = vld [vmem:[%s1627_s0 + $0x4] ss:$36 sps:$4 sm:$0xff]  }
   0xb   :  { %v1249_v26 = vld [vmem:[%s1626_s1 + $0x30] sm:$0xff]   ;;  %v1253_v30 = vld [vmem:[%s1626_s1 + $0x38] sm:$0xff]   ;;  %v1258_v34 = vld [vmem:[%s1627_s0 + $0x8] ss:$36 sps:$4 sm:$0xff]   ;;  %754 = vmatprep.mubr.bf16.mxu0 %v1257_v33 }
   0xc   :  { %1086 = vmatpush3.bf16.msra.mxu0 %v1233_v10  ;;  %v1250_v27 = vld [vmem:[%s1626_s1 + $0xb0] sm:$0xff]   ;;  %v1254_v31 = vld [vmem:[%s1626_s1 + $0xb8] sm:$0xff]   ;;  %v1261_v36 = vld [vmem:[%s1626_s1 + $0x140] sm:$0xff]  }
   0xd   :  { %1114 = vmatpush3.bf16.msra.mxu1 %v1234_v11  ;;  %1087 = vmatprep.subr.bf16.mxu0 %v1235_v12  ;;  %v1260_v35 = vld [vmem:[%s1627_s0 + $0xc] ss:$36 sps:$4 sm:$0xff]   ;;  %v1262_v37 = vld [vmem:[%s1626_s1 + $0x100] sm:$0xff]   ;;  %v1273_v48 = vld [vmem:[%s1626_s1 + $0x158] sm:$0xff]  }
   0xe   :  { %1115 = vmatprep.subr.bf16.mxu1 %v1236_v13  ;;  %803 = vmatprep.mubr.bf16.mxu1 %v1260_v35  ;;  %v1263_v38 = vld [vmem:[%s1626_s1 + $0x1c0] sm:$0xff]   ;;  %v1265_v40 = vld [vmem:[%s1626_s1 + $0x148] sm:$0xff]   ;;  %v1269_v44 = vld [vmem:[%s1626_s1 + $0x150] sm:$0xff]  }
   0xf   :  { %v1264_v39 = vld [vmem:[%s1626_s1 + $0x180] sm:$0xff]   ;;  %v1266_v41 = vld [vmem:[%s1626_s1 + $0x108] sm:$0xff]   ;;  %v1270_v45 = vld [vmem:[%s1626_s1 + $0x110] sm:$0xff]  }
  0x10   :  { %1088 = vmatpush3.bf16.msra.mxu0 %v1237_v14  ;;  %v1267_v42 = vld [vmem:[%s1626_s1 + $0x1c8] sm:$0xff]   ;;  %v1271_v46 = vld [vmem:[%s1626_s1 + $0x1d0] sm:$0xff]   ;;  %v1274_v49 = vld [vmem:[%s1626_s1 + $0x118] sm:$0xff]  }
  0x11   :  { %1116 = vmatpush3.bf16.msra.mxu1 %v1238_v15  ;;  %1089 = vmatprep.subr.bf16.mxu0 %v1239_v16  ;;  %v1268_v43 = vld [vmem:[%s1626_s1 + $0x188] sm:$0xff]   ;;  %v1272_v47 = vld [vmem:[%s1626_s1 + $0x190] sm:$0xff]   ;;  %v1275_v50 = vld [vmem:[%s1626_s1 + $0x1d8] sm:$0xff]  }
  0x12   :  { %1117 = vmatprep.subr.bf16.mxu1 %v1240_v17  ;;  %v1276_v51 = vld [vmem:[%s1626_s1 + $0x198] sm:$0xff]   ;;  %v1277_v52 = vld [vmem:[%s1626_s1 + $0x160] sm:$0xff]   ;;  %v1281_v56 = vld [vmem:[%s1626_s1 + $0x168] sm:$0xff]  }
  0x13   :  { %v1278_v53 = vld [vmem:[%s1626_s1 + $0x120] sm:$0xff]   ;;  %v1282_v57 = vld [vmem:[%s1627_s0 + $0x4c] ss:$36 sps:$4 sm:$0xff]   ;;  %v1284_v58 = vld [vmem:[%s1627_s0 + $0x54] ss:$36 sps:$4 sm:$0xff]  }
  0x14   :  { %1090 = vmatpush3.bf16.msra.mxu0 %v1241_v18  ;;  %v1279_v54 = vld [vmem:[%s1626_s1 + $0x1e0] sm:$0xff]   ;;  %v1286_v59 = vld [vmem:[%s1626_s1 + $0x128] sm:$0xff]   ;;  %v1288_v61 = vld [vmem:[%s1627_s0 + $0x50] ss:$36 sps:$4 sm:$0xff]  }
  0x15   :  { %1118 = vmatpush3.bf16.msra.mxu1 %v1242_v19  ;;  %1091 = vmatprep.subr.bf16.mxu0 %v1243_v20  ;;  %v1280_v55 = vld [vmem:[%s1626_s1 + $0x1a0] sm:$0xff]   ;;  %v1287_v60 = vld [vmem:[%s1627_s0 + $0x48] ss:$36 sps:$4 sm:$0xff]   ;;  %v1291_v0 = vld [vmem:[%s1626_s1 + $0x170] sm:$0xff]  }
  0x16   :  { %1119 = vmatprep.subr.bf16.mxu1 %v1244_v21  ;;  %v1289_v62 = vld [vmem:[%s1626_s1 + $0x1e8] sm:$0xff]   ;;  %v1292_v1 = vld [vmem:[%s1626_s1 + $0x130] sm:$0xff]   ;;  %v1295_v4 = vld [vmem:[%s1626_s1 + $0x178] sm:$0xff]  }
  0x17   :  { %v1290_v63 = vld [vmem:[%s1626_s1 + $0x1a8] sm:$0xff]   ;;  %v1293_v2 = vld [vmem:[%s1626_s1 + $0x1f0] sm:$0xff]   ;;  %v1296_v5 = vld [vmem:[%s1626_s1 + $0x138] sm:$0xff]  }
  0x18   :  { %1092 = vmatpush3.bf16.msra.mxu0 %v1245_v22  ;;  %v1294_v3 = vld [vmem:[%s1626_s1 + $0x1b0] sm:$0xff]   ;;  %v1297_v6 = vld [vmem:[%s1626_s1 + $0x1f8] sm:$0xff]   ;;  %v1302_v10 = vld [vmem:[%s1626_s1 + $0x200] sm:$0xff]  }
  0x19   :  { %1120 = vmatpush3.bf16.msra.mxu1 %v1246_v23  ;;  %1093 = vmatprep.subr.bf16.mxu0 %v1247_v24  ;;  %v1298_v7 = vld [vmem:[%s1627_s0 + $0x10] ss:$36 sps:$4 sm:$0xff]   ;;  %v1301_v9 = vld [vmem:[%s1626_s1 + $0x1b8] sm:$0xff]   ;;  %v1306_v13 = vld [vmem:[%s1626_s1 + $0x208] sm:$0xff]  }
  0x1a   :  { %1121 = vmatprep.subr.bf16.mxu1 %v1248_v25  ;;  %v1300_v8 = vld [vmem:[%s1627_s0 + $0x14] ss:$36 sps:$4 sm:$0xff]   ;;  %v1305_v12 = vld [vmem:[%s1627_s0 + $0x1c] ss:$36 sps:$4 sm:$0xff]   ;;  %v1311_v17 = vld [vmem:[%s1627_s0 + $0x64] ss:$36 sps:$4 sm:$0xff]  }
  0x1b   :  { %v1303_v11 = vld [vmem:[%s1627_s0 + $0x18] ss:$36 sps:$4 sm:$0xff]   ;;  %v1310_v16 = vld [vmem:[%s1626_s1 + $0x210] sm:$0xff]   ;;  %v1313_v18 = vld [vmem:[%s1627_s0 + $0x60] ss:$36 sps:$4 sm:$0xff]  }
  0x1c   :  { %1094 = vmatpush3.bf16.msra.mxu0 %v1249_v26  ;;  %v1307_v14 = vld [vmem:[%s1627_s0 + $0x5c] ss:$36 sps:$4 sm:$0xff]   ;;  %v1316_v22 = vld [vmem:[%s1626_s1 + $0x228] sm:$0xff]   ;;  %v1317_v23 = vld [vmem:[%s1626_s1 + $0x230] sm:$0xff]  }
  0x1d   :  { %1122 = vmatpush3.bf16.msra.mxu1 %v1250_v27  ;;  %1095 = vmatprep.subr.bf16.mxu0 %v1251_v28  ;;  %v1309_v15 = vld [vmem:[%s1627_s0 + $0x58] ss:$36 sps:$4 sm:$0xff]   ;;  %v1315_v20 = vld [vmem:[%s1626_s1 + $0x220] sm:$0xff]   ;;  %v1320_v25 = vld [vmem:[%s1627_s0 + $0x68] ss:$36 sps:$4 sm:$0xff]  }
  0x1e   :  { %1123 = vmatprep.subr.bf16.mxu1 %v1252_v29  ;;  %v1314_v19 = vld [vmem:[%s1626_s1 + $0x218] sm:$0xff]   ;;  %v1319_v21 = vld [vmem:[%s1627_s0 + $0x20] ss:$36 sps:$4 sm:$0xff]  }
  0x1f   :  { %v1318_v24 = vld [vmem:[%s1626_s1 + $0x238] sm:$0xff]  }
  0x20   :  { %1096 = vmatpush3.bf16.msra.mxu0 %v1253_v30 }
  0x21   :  { %1124 = vmatpush3.bf16.msra.mxu1 %v1254_v31  ;;  %1137 = vmatprep.subr.bf16.mxu0 %v1261_v36 }
  0x22   :  { %1165 = vmatprep.subr.bf16.mxu1 %v1263_v38 }
  0x23   :  { %755 = vmatmul.mubr.bf16.vlgmr.msra.gmra.mrb[0].mxu0 %v1255_v32 }
  0x24   :  { %804 = vmatmul.mubr.bf16.vlgmr.msra.gmra.mrb[0].mxu1 %v1258_v34  ;;  %1138 = vmatpush3.bf16.msra.mxu0 %v1262_v37 }
  0x25   :  { %1166 = vmatpush3.bf16.msra.mxu1 %v1264_v39  ;;  %1139 = vmatprep.subr.bf16.mxu0 %v1265_v40 }
  0x26   :  { %1167 = vmatprep.subr.bf16.mxu1 %v1267_v42  ;;  %762 = vmatprep.mubr.bf16.mxu0 %v1282_v57 }
  0x27   :  { %811 = vmatprep.mubr.bf16.mxu1 %v1284_v58 }
  0x28   :  { %1140 = vmatpush3.bf16.msra.mxu0 %v1266_v41 }
  0x29   :  { %1168 = vmatpush3.bf16.msra.mxu1 %v1268_v43  ;;  %1141 = vmatprep.subr.bf16.mxu0 %v1269_v44 }
  0x2a   :  { %1169 = vmatprep.subr.bf16.mxu1 %v1271_v46 }
  0x2b   :  { %763 = vmatmul.mubr.bf16.gmra.mrb[4].mxu0 %v1287_v60 }
  0x2c   :  { %1142 = vmatpush3.bf16.msra.mxu0 %v1270_v45  ;;  %812 = vmatmul.mubr.bf16.gmra.mrb[4].mxu1 %v1288_v61 }
  0x2d   :  { %1170 = vmatpush3.bf16.msra.mxu1 %v1272_v47  ;;  %1143 = vmatprep.subr.bf16.mxu0 %v1273_v48 }
  0x2e   :  { %1171 = vmatprep.subr.bf16.mxu1 %v1275_v50  ;;  %852 = vmatprep.mubr.bf16.mxu0 %v1300_v8 }
  0x2f   :  { %901 = vmatprep.mubr.bf16.mxu1 %v1305_v12 }
  0x30   :  { %1144 = vmatpush3.bf16.msra.mxu0 %v1274_v49 }
  0x31   :  { %1172 = vmatpush3.bf16.msra.mxu1 %v1276_v51  ;;  %1145 = vmatprep.subr.bf16.mxu0 %v1277_v52 }
  0x32   :  { %1173 = vmatprep.subr.bf16.mxu1 %v1279_v54 }
  0x34   :  { %1146 = vmatpush3.bf16.msra.mxu0 %v1278_v53 }
  0x35   :  { %1174 = vmatpush3.bf16.msra.mxu1 %v1280_v55  ;;  %1147 = vmatprep.subr.bf16.mxu0 %v1281_v56 }
  0x36   :  { %1175 = vmatprep.subr.bf16.mxu1 %v1289_v62 }
  0x38   :  { %1148 = vmatpush3.bf16.msra.mxu0 %v1286_v59 }
  0x39   :  { %1176 = vmatpush3.bf16.msra.mxu1 %v1290_v63  ;;  %1149 = vmatprep.subr.bf16.mxu0 %v1291_v0 }
  0x3a   :  { %1177 = vmatprep.subr.bf16.mxu1 %v1293_v2 }
  0x3c   :  { %1150 = vmatpush3.bf16.msra.mxu0 %v1292_v1 }
  0x3d   :  { %1178 = vmatpush3.bf16.msra.mxu1 %v1294_v3  ;;  %1151 = vmatprep.subr.bf16.mxu0 %v1295_v4 }
  0x3e   :  { %1179 = vmatprep.subr.bf16.mxu1 %v1297_v6 }
  0x40   :  { %1152 = vmatpush3.bf16.msra.mxu0 %v1296_v5 }
  0x41   :  { %1180 = vmatpush3.bf16.msra.mxu1 %v1301_v9  ;;  %1203 = vmatprep.subr.bf16.mxu0 %v1302_v10 }
  0x43   :  { %853 = vmatmul.mubr.bf16.vlgmr.msra.gmra.mrb[8].mxu0 %v1298_v7 }
  0x44   :  { %1204 = vmatpush3.bf16.msra.mxu0 %v1302_v10  ;;  %902 = vmatmul.mubr.bf16.vlgmr.msra.gmra.mrb[8].mxu1 %v1303_v11 }
  0x45   :  { %1205 = vmatprep.subr.bf16.mxu0 %v1306_v13  ;;  %860 = vmatprep.mubr.bf16.mxu0 %v1307_v14 }
  0x46   :  { %909 = vmatprep.mubr.bf16.mxu1 %v1311_v17 }
  0x48   :  { %1206 = vmatpush3.bf16.msra.mxu0 %v1306_v13 }
  0x49   :  { %1207 = vmatprep.subr.bf16.mxu0 %v1310_v16 }
  0x4b   :  { %861 = vmatmul.mubr.bf16.gmra.mrb[12].mxu0 %v1309_v15 }
  0x4c   :  { %1208 = vmatpush3.bf16.msra.mxu0 %v1310_v16  ;;  %910 = vmatmul.mubr.bf16.gmra.mrb[12].mxu1 %v1313_v18 }
  0x4d   :  { %1209 = vmatprep.subr.bf16.mxu0 %v1314_v19  ;;  %1219 = vmatprep.mubr.bf16.mxu0 %v1319_v21 }
  0x50   :  { %1210 = vmatpush3.bf16.msra.mxu0 %v1314_v19 }
  0x51   :  { %1211 = vmatprep.subr.bf16.mxu0 %v1315_v20 }
  0x54   :  { %1212 = vmatpush3.bf16.msra.mxu0 %v1315_v20 }
  0x55   :  { %1213 = vmatprep.subr.bf16.mxu0 %v1316_v22 }
  0x58   :  { %1214 = vmatpush3.bf16.msra.mxu0 %v1316_v22  ;;  %v990_v22 = vld [vmem:[%s1628_s2] ss:$0 sm:$0xff] }
  0x59   :  { %1215 = vmatprep.subr.bf16.mxu0 %v1317_v23 }
  0x5c   :  { %1216 = vmatpush3.bf16.msra.mxu0 %v1317_v23 }
  0x5d   :  { %1217 = vmatprep.subr.bf16.mxu0 %v1318_v24 }
  0x60   :  { %1218 = vmatpush3.bf16.msra.mxu0 %v1318_v24 }
  0x63   :  { %1220 = vmatmul.mubr.bf16.vlgmr.msra.gmra.mrb[16].mxu0 %v1320_v25 }
  0xf6   :  { %v1097_v26 = vpop.f32.mrb[0].mxu0 }
  0xf7   :  { %v1125_v27 = vpop.f32.mrb[0].mxu1  ;;  %v1098_v28 = vpop.f32.mrb[1].mxu0 }
  0xf8   :  { %v1099_v29 = vadd.f32 %v1098_v28, %v1097_v26  ;;  %v1126_v30 = vpop.f32.mrb[1].mxu1  ;;  %v1100_v31 = vpop.f32.mrb[2].mxu0 }
  0xf9   :  { %v1127_v32 = vadd.f32 %v1126_v30, %v1125_v27  ;;  %v1128_v33 = vpop.f32.mrb[2].mxu1  ;;  %v1101_v34 = vpop.f32.mrb[3].mxu0 }
  0xfa   :  { %v1102_v35 = vadd.f32 %v1101_v34, %v1100_v31  ;;  %v1129_v36 = vpop.f32.mrb[3].mxu1 }
  0xfb   :  { %v806_v37 = vadd.f32 %v1127_v32, %v1099_v29  ;;  %v1130_v38 = vadd.f32 %v1129_v36, %v1128_v33 }
  0xfd   :  { %v809_v39 = vadd.f32 %v1130_v38, %v1102_v35 }
  0xfe   :  { %v1103_v40 = vpop.f32.mrb[4].mxu0 }
  0xff   :  { %v1131_v41 = vpop.f32.mrb[4].mxu1  ;;  %v1104_v42 = vpop.f32.mrb[5].mxu0 }
 0x100   :  { %v1132_v43 = vpop.f32.mrb[5].mxu1  ;;  %v1105_v44 = vadd.f32 %v1104_v42, %v1103_v40  ;;  %v1106_v46 = vpop.f32.mrb[6].mxu0 }
 0x101   :  { %v1133_v45 = vadd.f32 %v1132_v43, %v1131_v41  ;;  %v1134_v47 = vpop.f32.mrb[6].mxu1  ;;  %v1107_v48 = vpop.f32.mrb[7].mxu0 }
 0x102   :  { %v1135_v49 = vpop.f32.mrb[7].mxu1  ;;  %v1108_v51 = vadd.f32 %v1107_v48, %v1106_v46 }
 0x103   :  { %v814_v50 = vadd.f32 %v1133_v45, %v1105_v44  ;;  %v1136_v52 = vadd.f32 %v1135_v49, %v1134_v47 }
 0x105   :  { %v817_v53 = vadd.f32 %v1136_v52, %v1108_v51 }
 0x116   :  { %v1153_v54 = vpop.f32.mrb[8].mxu0 }
 0x117   :  { %v1154_v55 = vpop.f32.mrb[9].mxu0  ;;  %v1181_v58 = vpop.f32.mrb[8].mxu1 }
 0x118   :  { %v1155_v56 = vadd.f32 %v1154_v55, %v1153_v54  ;;  %v1156_v57 = vpop.f32.mrb[10].mxu0  ;;  %v1182_v62 = vpop.f32.mrb[9].mxu1 }
 0x119   :  { %v1157_v59 = vpop.f32.mrb[11].mxu0  ;;  %v1183_v63 = vadd.f32 %v1182_v62, %v1181_v58  ;;  %v1184_v0 = vpop.f32.mrb[10].mxu1 }
 0x11a   :  { %v855_v60 = vadd.f32 %v1155_v56, %v806_v37  ;;  %v1158_v61 = vadd.f32 %v1157_v59, %v1156_v57  ;;  %v1185_v2 = vpop.f32.mrb[11].mxu1 }
 0x11b   :  { %v1186_v3 = vadd.f32 %v1185_v2, %v1184_v0 }
 0x11c   :  { %v858_v1 = vadd.f32 %v1158_v61, %v809_v39  ;;  %v904_v4 = vadd.f32 %v1183_v63, %v855_v60 }
 0x11e   :  { %v1159_v5 = vpop.f32.mrb[12].mxu0  ;;  %v907_v7 = vadd.f32 %v1186_v3, %v858_v1 }
 0x11f   :  { %v1160_v6 = vpop.f32.mrb[13].mxu0  ;;  %v1187_v10 = vpop.f32.mrb[12].mxu1 }
 0x120   :  { %v1161_v8 = vadd.f32 %v1160_v6, %v1159_v5  ;;  %v1162_v9 = vpop.f32.mrb[14].mxu0  ;;  %v1188_v14 = vpop.f32.mrb[13].mxu1 }
 0x121   :  { %v1163_v11 = vpop.f32.mrb[15].mxu0  ;;  %v1189_v15 = vadd.f32 %v1188_v14, %v1187_v10  ;;  %v1190_v16 = vpop.f32.mrb[14].mxu1 }
 0x122   :  { %v863_v12 = vadd.f32 %v1161_v8, %v814_v50  ;;  %v1164_v13 = vadd.f32 %v1163_v11, %v1162_v9  ;;  %v1191_v18 = vpop.f32.mrb[15].mxu1 }
 0x123   :  { %v1192_v19 = vadd.f32 %v1191_v18, %v1190_v16 }
 0x124   :  { %v866_v17 = vadd.f32 %v1164_v13, %v817_v53  ;;  %v912_v20 = vadd.f32 %v1189_v15, %v863_v12 }
 0x126   :  { %v915_v21 = vadd.f32 %v1192_v19, %v866_v17 }
 0x136   :  { %v1221_v23 = vpop.f32.mrb[16].mxu0 }
 0x137   :  { %v961_v24 = vadd.f32 %v1221_v23, %v912_v20  ;;  %v952_v25 = vpop.f32.mrb[17].mxu0 }
 0x138   :  { %v953_v26 = vadd.f32 %v952_v25, %v904_v4  ;;  %v1222_v27 = vpop.f32.mrb[18].mxu0 }
 0x139   :  { %v969_v28 = vadd.f32 %v990_v22, %v961_v24  ;;  %v964_v29 = vadd.f32 %v1222_v27, %v915_v21  ;;  %v955_v30 = vpop.f32.mrb[19].mxu0 }
 0x13a   :  { %v967_v31 = vadd.f32 %v990_v22, %v953_v26  ;;  %v956_v32 = vadd.f32 %v955_v30, %v907_v7 }
 0x13b   :  { %984 = vst [vmem:[%s1629_s3 + $0x10] sm:$0xff] %v969_v28  ;;  %v970_v33 = vadd.f32 %v990_v22, %v964_v29 }
 0x13c   :  { %982 = vst [vmem:[%s1629_s3] sm:$0xff] %v967_v31  ;;  %v968_v34 = vadd.f32 %v990_v22, %v956_v32 }
 0x13d   :  { %985 = vst [vmem:[%s1629_s3 + $0x18] sm:$0xff] %v970_v33 }
 0x13e   :  { %983 = vst [vmem:[%s1629_s3 + $0x8] sm:$0xff] %v968_v34 }

// kernel: _gqn_apply.29
= control target key start
LH: loop header
LB: loop body
LE: loop exit
PB: predicated region body
PF: predicated region fallthrough
CT: control target
= control target key end

     0   :  { %s1567_s17 = smov 64   ;;  %vm1163_vm0 = vcmask 261120   ;;  %vm1168_vm1 = vcmask 523264   ;;  %s2061_s1 = inlined_call_operand.vmem [shape: bf16[896,256], index: 1, kind: input, shape index: {}]   ;;  %s2062_s0 = inlined_call_operand.vmem [shape: bf16[32,896], index: 0, kind: input, shape index: {}]   ;;  %s2063_s2 = inlined_call_operand.vmem [shape: f32[32,256], index: 2, kind: input, shape index: {}]   ;;  %s2064_s5 = inlined_call_operand.vmem [shape: f32[32,128], index: 5, kind: output, shape index: {1}]   ;;  %s2065_s3 = inlined_call_operand.vmem [shape: f32[32,128], index: 3, kind: input, shape index: {}]   ;;  %s2066_s4 = inlined_call_operand.vmem [shape: f32[32,128], index: 4, kind: output, shape index: {0}]  }
   0x1   :  { %v1346_v0 = vld [vmem:[%s2061_s1 + $0x4] ss:$8 sps:$4 sm:$0xff]   ;;  %v1350_v2 = vld [vmem:[%s2061_s1] ss:$8 sps:$4 sm:$0xff]   ;;  %v1352_v4 = vld [vmem:[%s2061_s1 + $0x14] ss:$8 sps:$4 sm:$0xff]  }
   0x2   :  { %v1348_v1 = vld [vmem:[%s2061_s1 + $0x204] ss:$8 sps:$4 sm:$0xff]   ;;  %808 = vmatprep.subr.bf16.mxu1 %v1346_v0  ;;  %v1351_v3 = vld [vmem:[%s2061_s1 + $0x200] ss:$8 sps:$4 sm:$0xff]   ;;  %v1354_v5 = vld [vmem:[%s2061_s1 + $0x214] ss:$8 sps:$4 sm:$0xff]  }
   0x3   :  { %914 = vmatprep.subr.bf16.mxu0 %v1348_v1  ;;  %809 = vmatpush1.bf16.msra.mxu1 %v1350_v2  ;;  %v1356_v6 = vld [vmem:[%s2061_s1 + $0x10] ss:$8 sps:$4 sm:$0xff]   ;;  %v1358_v8 = vld [vmem:[%s2061_s1 + $0x24] ss:$8 sps:$4 sm:$0xff]   ;;  %v1362_v10 = vld [vmem:[%s2061_s1 + $0x20] ss:$8 sps:$4 sm:$0xff]  }
   0x4   :  { %915 = vmatpush1.bf16.msra.mxu0 %v1351_v3  ;;  %810 = vmatprep.subr.bf16.mxu1 %v1352_v4  ;;  %v1357_v7 = vld [vmem:[%s2061_s1 + $0x210] ss:$8 sps:$4 sm:$0xff]   ;;  %v1360_v9 = vld [vmem:[%s2061_s1 + $0x224] ss:$8 sps:$4 sm:$0xff]   ;;  %v1363_v11 = vld [vmem:[%s2061_s1 + $0x220] ss:$8 sps:$4 sm:$0xff]  }
   0x5   :  { %916 = vmatprep.subr.bf16.mxu0 %v1354_v5  ;;  %v1364_v12 = vld [vmem:[%s2061_s1 + $0x34] ss:$8 sps:$4 sm:$0xff]   ;;  %v1368_v14 = vld [vmem:[%s2061_s1 + $0x30] ss:$8 sps:$4 sm:$0xff]   ;;  %v1370_v16 = vld [vmem:[%s2061_s1 + $0x44] ss:$8 sps:$4 sm:$0xff]  }
   0x6   :  { %v1366_v13 = vld [vmem:[%s2061_s1 + $0x234] ss:$8 sps:$4 sm:$0xff]   ;;  %v1369_v15 = vld [vmem:[%s2061_s1 + $0x230] ss:$8 sps:$4 sm:$0xff]   ;;  %v1372_v17 = vld [vmem:[%s2061_s1 + $0x244] ss:$8 sps:$4 sm:$0xff]  }
   0x7   :  { %811 = vmatpush1.bf16.msra.mxu1 %v1356_v6  ;;  %v1374_v18 = vld [vmem:[%s2061_s1 + $0x40] ss:$8 sps:$4 sm:$0xff]   ;;  %v1376_v20 = vld [vmem:[%s2061_s1 + $0x54] ss:$8 sps:$4 sm:$0xff]   ;;  %v1380_v22 = vld [vmem:[%s2061_s1 + $0x50] ss:$8 sps:$4 sm:$0xff]  }
   0x8   :  { %917 = vmatpush1.bf16.msra.mxu0 %v1357_v7  ;;  %812 = vmatprep.subr.bf16.mxu1 %v1358_v8  ;;  %v1375_v19 = vld [vmem:[%s2061_s1 + $0x240] ss:$8 sps:$4 sm:$0xff]   ;;  %v1378_v21 = vld [vmem:[%s2061_s1 + $0x254] ss:$8 sps:$4 sm:$0xff]   ;;  %v1381_v23 = vld [vmem:[%s2061_s1 + $0x250] ss:$8 sps:$4 sm:$0xff]  }
   0x9   :  { %918 = vmatprep.subr.bf16.mxu0 %v1360_v9  ;;  %v1382_v24 = vld [vmem:[%s2061_s1 + $0x64] ss:$8 sps:$4 sm:$0xff]   ;;  %v1386_v26 = vld [vmem:[%s2061_s1 + $0x60] ss:$8 sps:$4 sm:$0xff]   ;;  %v1388_v28 = vld [vmem:[%s2061_s1 + $0x74] ss:$8 sps:$4 sm:$0xff]  }
   0xa   :  { %v1384_v25 = vld [vmem:[%s2061_s1 + $0x264] ss:$8 sps:$4 sm:$0xff]   ;;  %v1387_v27 = vld [vmem:[%s2061_s1 + $0x260] ss:$8 sps:$4 sm:$0xff]   ;;  %v1390_v29 = vld [vmem:[%s2061_s1 + $0x274] ss:$8 sps:$4 sm:$0xff]  }
   0xb   :  { %813 = vmatpush1.bf16.msra.mxu1 %v1362_v10  ;;  %v1392_v30 = vld [vmem:[%s2061_s1 + $0x70] ss:$8 sps:$4 sm:$0xff]   ;;  %v1394_v32 = vld [vmem:[%s2061_s1 + $0x84] ss:$8 sps:$4 sm:$0xff]   ;;  %v1398_v34 = vld [vmem:[%s2061_s1 + $0x80] ss:$8 sps:$4 sm:$0xff]  }
   0xc   :  { %919 = vmatpush1.bf16.msra.mxu0 %v1363_v11  ;;  %814 = vmatprep.subr.bf16.mxu1 %v1364_v12  ;;  %v1393_v31 = vld [vmem:[%s2061_s1 + $0x270] ss:$8 sps:$4 sm:$0xff]   ;;  %v1396_v33 = vld [vmem:[%s2061_s1 + $0x284] ss:$8 sps:$4 sm:$0xff]   ;;  %v1399_v35 = vld [vmem:[%s2061_s1 + $0x280] ss:$8 sps:$4 sm:$0xff]  }
   0xd   :  { %920 = vmatprep.subr.bf16.mxu0 %v1366_v13  ;;  %v1400_v36 = vld [vmem:[%s2061_s1 + $0x94] ss:$8 sps:$4 sm:$0xff]   ;;  %v1404_v38 = vld [vmem:[%s2061_s1 + $0x90] ss:$8 sps:$4 sm:$0xff]   ;;  %v1406_v40 = vld [vmem:[%s2061_s1 + $0xa4] ss:$8 sps:$4 sm:$0xff]  }
   0xe   :  { %v1402_v37 = vld [vmem:[%s2061_s1 + $0x294] ss:$8 sps:$4 sm:$0xff]   ;;  %v1405_v39 = vld [vmem:[%s2061_s1 + $0x290] ss:$8 sps:$4 sm:$0xff]   ;;  %v1408_v41 = vld [vmem:[%s2061_s1 + $0x2a4] ss:$8 sps:$4 sm:$0xff]  }
   0xf   :  { %815 = vmatpush1.bf16.msra.mxu1 %v1368_v14  ;;  %v1410_v42 = vld [vmem:[%s2061_s1 + $0xa0] ss:$8 sps:$4 sm:$0xff]   ;;  %v1412_v44 = vld [vmem:[%s2061_s1 + $0xb4] ss:$8 sps:$4 sm:$0xff]   ;;  %v1416_v46 = vld [vmem:[%s2061_s1 + $0xb0] ss:$8 sps:$4 sm:$0xff]  }
  0x10   :  { %921 = vmatpush1.bf16.msra.mxu0 %v1369_v15  ;;  %816 = vmatprep.subr.bf16.mxu1 %v1370_v16  ;;  %v1411_v43 = vld [vmem:[%s2061_s1 + $0x2a0] ss:$8 sps:$4 sm:$0xff]   ;;  %v1414_v45 = vld [vmem:[%s2061_s1 + $0x2b4] ss:$8 sps:$4 sm:$0xff]   ;;  %v1417_v47 = vld [vmem:[%s2061_s1 + $0x2b0] ss:$8 sps:$4 sm:$0xff]  }
  0x11   :  { %922 = vmatprep.subr.bf16.mxu0 %v1372_v17  ;;  %v1444_v48 = vld [vmem:[%s2062_s0 + $0x4] ss:$28 sps:$4 sm:$0xff]   ;;  %v1450_v51 = vld [vmem:[%s2062_s0 + $0x14] ss:$28 sps:$4 sm:$0xff]   ;;  %v1484_v10 = vld [vmem:[%s2062_s0 + $0x4c] ss:$28 sps:$4 sm:$0xff]  }
  0x12   :  { %v1418_v49 = vld [vmem:[%s2061_s1 + $0xc4] ss:$8 sps:$4 sm:$0xff]   ;;  %840 = vmatprep.mubr.bf16.mxu1 %v1444_v48  ;;  %v1422_v52 = vld [vmem:[%s2061_s1 + $0xc0] ss:$8 sps:$4 sm:$0xff]   ;;  %v1424_v54 = vld [vmem:[%s2061_s1 + $0xd4] ss:$8 sps:$4 sm:$0xff]   ;;  %946 = vmatprep.mubr.bf16.mxu0 %v1450_v51 }
  0x13   :  { %817 = vmatpush1.bf16.msra.mxu1 %v1374_v18  ;;  %v1420_v50 = vld [vmem:[%s2061_s1 + $0x2c4] ss:$8 sps:$4 sm:$0xff]   ;;  %v1423_v53 = vld [vmem:[%s2061_s1 + $0x2c0] ss:$8 sps:$4 sm:$0xff]   ;;  %v1426_v55 = vld [vmem:[%s2061_s1 + $0x2d4] ss:$8 sps:$4 sm:$0xff]  }
  0x14   :  { %923 = vmatpush1.bf16.msra.mxu0 %v1375_v19  ;;  %818 = vmatprep.subr.bf16.mxu1 %v1376_v20  ;;  %v1428_v56 = vld [vmem:[%s2061_s1 + $0xd0] ss:$8 sps:$4 sm:$0xff]   ;;  %v1430_v58 = vld [vmem:[%s2061_s1 + $0xe4] ss:$8 sps:$4 sm:$0xff]   ;;  %v1434_v60 = vld [vmem:[%s2061_s1 + $0xe0] ss:$8 sps:$4 sm:$0xff]  }
  0x15   :  { %924 = vmatprep.subr.bf16.mxu0 %v1378_v21  ;;  %v1429_v57 = vld [vmem:[%s2061_s1 + $0x2d0] ss:$8 sps:$4 sm:$0xff]   ;;  %v1432_v59 = vld [vmem:[%s2061_s1 + $0x2e4] ss:$8 sps:$4 sm:$0xff]   ;;  %v1435_v61 = vld [vmem:[%s2061_s1 + $0x2e0] ss:$8 sps:$4 sm:$0xff]  }
  0x16   :  { %v1436_v62 = vld [vmem:[%s2061_s1 + $0xf4] ss:$8 sps:$4 sm:$0xff]   ;;  %v1440_v0 = vld [vmem:[%s2061_s1 + $0xf0] ss:$8 sps:$4 sm:$0xff]   ;;  %v1447_v2 = vld [vmem:[%s2061_s1 + $0x104] ss:$8 sps:$4 sm:$0xff]  }
  0x17   :  { %819 = vmatpush1.bf16.msra.mxu1 %v1380_v22  ;;  %v1438_v63 = vld [vmem:[%s2061_s1 + $0x2f4] ss:$8 sps:$4 sm:$0xff]   ;;  %v1441_v1 = vld [vmem:[%s2061_s1 + $0x2f0] ss:$8 sps:$4 sm:$0xff]   ;;  %v1453_v3 = vld [vmem:[%s2061_s1 + $0x304] ss:$8 sps:$4 sm:$0xff]  }
  0x18   :  { %925 = vmatpush1.bf16.msra.mxu0 %v1381_v23  ;;  %820 = vmatprep.subr.bf16.mxu1 %v1382_v24  ;;  %v1442_v4 = vld [vmem:[%s2062_s0] ss:$28 sps:$4 sm:$0xff]   ;;  %v1448_v6 = vld [vmem:[%s2062_s0 + $0x10] ss:$28 sps:$4 sm:$0xff]   ;;  %v1489_v16 = vld [vmem:[%s2062_s0 + $0x48] ss:$28 sps:$4 sm:$0xff]  }
  0x19   :  { %926 = vmatprep.subr.bf16.mxu0 %v1384_v25  ;;  %v1445_v5 = vld [vmem:[%s2061_s1 + $0x100] ss:$8 sps:$4 sm:$0xff]   ;;  %v1456_v8 = vld [vmem:[%s2061_s1 + $0x114] ss:$8 sps:$4 sm:$0xff]   ;;  %v1454_v11 = vld [vmem:[%s2061_s1 + $0x110] ss:$8 sps:$4 sm:$0xff]  }
  0x1a   :  { %v1451_v7 = vld [vmem:[%s2061_s1 + $0x300] ss:$8 sps:$4 sm:$0xff]   ;;  %v1459_v9 = vld [vmem:[%s2061_s1 + $0x314] ss:$8 sps:$4 sm:$0xff]   ;;  %v1457_v12 = vld [vmem:[%s2061_s1 + $0x310] ss:$8 sps:$4 sm:$0xff]  }
  0x1b   :  { %821 = vmatpush1.bf16.msra.mxu1 %v1386_v26  ;;  %v1462_v13 = vld [vmem:[%s2061_s1 + $0x124] ss:$8 sps:$4 sm:$0xff]   ;;  %v1460_v15 = vld [vmem:[%s2061_s1 + $0x120] ss:$8 sps:$4 sm:$0xff]   ;;  %v1468_v18 = vld [vmem:[%s2061_s1 + $0x134] ss:$8 sps:$4 sm:$0xff]  }
  0x1c   :  { %927 = vmatpush1.bf16.msra.mxu0 %v1387_v27  ;;  %822 = vmatprep.subr.bf16.mxu1 %v1388_v28  ;;  %v1465_v14 = vld [vmem:[%s2061_s1 + $0x324] ss:$8 sps:$4 sm:$0xff]   ;;  %v1463_v17 = vld [vmem:[%s2061_s1 + $0x320] ss:$8 sps:$4 sm:$0xff]   ;;  %v1471_v19 = vld [vmem:[%s2061_s1 + $0x334] ss:$8 sps:$4 sm:$0xff]  }
  0x1d   :  { %928 = vmatprep.subr.bf16.mxu0 %v1390_v29  ;;  %v1466_v20 = vld [vmem:[%s2061_s1 + $0x130] ss:$8 sps:$4 sm:$0xff]   ;;  %v1474_v22 = vld [vmem:[%s2061_s1 + $0x144] ss:$8 sps:$4 sm:$0xff]   ;;  %v1566_v24 = vmov 0  }
  0x1e   :  { %v1469_v21 = vld [vmem:[%s2061_s1 + $0x330] ss:$8 sps:$4 sm:$0xff]   ;;  %v1477_v23 = vld [vmem:[%s2061_s1 + $0x344] ss:$8 sps:$4 sm:$0xff]   ;;  %v1472_v27 = vld [vmem:[%s2061_s1 + $0x140] ss:$8 sps:$4 sm:$0xff]  }
  0x1f   :  { %823 = vmatpush1.bf16.msra.mxu1 %v1392_v30  ;;  %v1519_v25 = vld [vmem:[%s2062_s0 + $0x3c] ss:$28 sps:$4 sm:$0xff]   ;;  %v1475_v28 = vld [vmem:[%s2061_s1 + $0x340] ss:$8 sps:$4 sm:$0xff]   ;;  %v1518_v48 = vld [vmem:[%s2062_s0 + $0x50] ss:$28 sps:$4 sm:$0xff]  }
  0x20   :  { %929 = vmatpush1.bf16.msra.mxu0 %v1393_v31  ;;  %824 = vmatprep.subr.bf16.mxu1 %v1394_v32  ;;  %v1521_v26 = vld [vmem:[%s2062_s0 + $0x38] ss:$28 sps:$4 sm:$0xff]   ;;  %v1530_v31 = vld [vmem:[%s2062_s0 + $0xc] ss:$28 sps:$4 sm:$0xff]  }
  0x21   :  { %930 = vmatprep.subr.bf16.mxu0 %v1396_v33  ;;  %v1480_v29 = vld [vmem:[%s2061_s1 + $0x154] ss:$8 sps:$4 sm:$0xff]   ;;  %v1478_v32 = vld [vmem:[%s2061_s1 + $0x150] ss:$8 sps:$4 sm:$0xff]  }
  0x22   :  { %v1483_v30 = vld [vmem:[%s2061_s1 + $0x354] ss:$8 sps:$4 sm:$0xff]   ;;  %v1481_v33 = vld [vmem:[%s2061_s1 + $0x350] ss:$8 sps:$4 sm:$0xff]  }
  0x23   :  { %825 = vmatpush1.bf16.msra.mxu1 %v1398_v34  ;;  %v1488_v34 = vld [vmem:[%s2061_s1 + $0x164] ss:$8 sps:$4 sm:$0xff]   ;;  %v1509_v51 = vld [vmem:[%s2061_s1 + $0x1b0] ss:$8 sps:$4 sm:$0xff]  }
  0x24   :  { %931 = vmatpush1.bf16.msra.mxu0 %v1399_v35  ;;  %826 = vmatprep.subr.bf16.mxu1 %v1400_v36  ;;  %v1492_v35 = vld [vmem:[%s2061_s1 + $0x364] ss:$8 sps:$4 sm:$0xff]   ;;  %v1486_v36 = vld [vmem:[%s2061_s1 + $0x160] ss:$8 sps:$4 sm:$0xff]  }
  0x25   :  { %932 = vmatprep.subr.bf16.mxu0 %v1402_v37  ;;  %v1490_v37 = vld [vmem:[%s2061_s1 + $0x360] ss:$8 sps:$4 sm:$0xff]  }
  0x27   :  { %827 = vmatpush1.bf16.msra.mxu1 %v1404_v38  ;;  %v1495_v38 = vld [vmem:[%s2061_s1 + $0x174] ss:$8 sps:$4 sm:$0xff]  }
  0x28   :  { %933 = vmatpush1.bf16.msra.mxu0 %v1405_v39  ;;  %828 = vmatprep.subr.bf16.mxu1 %v1406_v40  ;;  %v1498_v39 = vld [vmem:[%s2061_s1 + $0x374] ss:$8 sps:$4 sm:$0xff]   ;;  %v1493_v40 = vld [vmem:[%s2061_s1 + $0x170] ss:$8 sps:$4 sm:$0xff]  }
  0x29   :  { %934 = vmatprep.subr.bf16.mxu0 %v1408_v41  ;;  %v1496_v41 = vld [vmem:[%s2061_s1 + $0x370] ss:$8 sps:$4 sm:$0xff]  }
  0x2b   :  { %829 = vmatpush1.bf16.msra.mxu1 %v1410_v42  ;;  %v1501_v42 = vld [vmem:[%s2061_s1 + $0x184] ss:$8 sps:$4 sm:$0xff]  }
  0x2c   :  { %935 = vmatpush1.bf16.msra.mxu0 %v1411_v43  ;;  %830 = vmatprep.subr.bf16.mxu1 %v1412_v44  ;;  %v1502_v43 = vld [vmem:[%s2062_s0 + $0x18] ss:$28 sps:$4 sm:$0xff]   ;;  %v1499_v44 = vld [vmem:[%s2061_s1 + $0x180] ss:$8 sps:$4 sm:$0xff]  }
  0x2d   :  { %936 = vmatprep.subr.bf16.mxu0 %v1414_v45  ;;  %v1505_v45 = vld [vmem:[%s2061_s1 + $0x194] ss:$8 sps:$4 sm:$0xff]  }
  0x2f   :  { %831 = vmatpush1.bf16.msra.mxu1 %v1416_v46  ;;  %v1503_v46 = vld [vmem:[%s2061_s1 + $0x190] ss:$8 sps:$4 sm:$0xff]  }
  0x30   :  { %937 = vmatpush1.bf16.msra.mxu0 %v1417_v47  ;;  %832 = vmatprep.subr.bf16.mxu1 %v1418_v49  ;;  %v1508_v47 = vld [vmem:[%s2061_s1 + $0x1a4] ss:$8 sps:$4 sm:$0xff]   ;;  %v1506_v49 = vld [vmem:[%s2061_s1 + $0x1a0] ss:$8 sps:$4 sm:$0xff]  }
  0x31   :  { %938 = vmatprep.subr.bf16.mxu0 %v1420_v50  ;;  %v1511_v50 = vld [vmem:[%s2061_s1 + $0x1b4] ss:$8 sps:$4 sm:$0xff]  }
  0x33   :  { %833 = vmatpush1.bf16.msra.mxu1 %v1422_v52  ;;  %v1514_v52 = vld [vmem:[%s2061_s1 + $0x1c4] ss:$8 sps:$4 sm:$0xff]  }
  0x34   :  { %939 = vmatpush1.bf16.msra.mxu0 %v1423_v53  ;;  %834 = vmatprep.subr.bf16.mxu1 %v1424_v54  ;;  %v1512_v53 = vld [vmem:[%s2061_s1 + $0x1c0] ss:$8 sps:$4 sm:$0xff]   ;;  %v1517_v54 = vld [vmem:[%s2061_s1 + $0x1d4] ss:$8 sps:$4 sm:$0xff]  }
  0x35   :  { %940 = vmatprep.subr.bf16.mxu0 %v1426_v55  ;;  %v1515_v55 = vld [vmem:[%s2061_s1 + $0x1d0] ss:$8 sps:$4 sm:$0xff]  }
  0x37   :  { %835 = vmatpush1.bf16.msra.mxu1 %v1428_v56  ;;  %v1524_v56 = vld [vmem:[%s2061_s1 + $0x1e4] ss:$8 sps:$4 sm:$0xff]  }
  0x38   :  { %941 = vmatpush1.bf16.msra.mxu0 %v1429_v57  ;;  %836 = vmatprep.subr.bf16.mxu1 %v1430_v58  ;;  %v1522_v57 = vld [vmem:[%s2061_s1 + $0x1e0] ss:$8 sps:$4 sm:$0xff]   ;;  %v1527_v58 = vld [vmem:[%s2061_s1 + $0x1f4] ss:$8 sps:$4 sm:$0xff]  }
  0x39   :  { %942 = vmatprep.subr.bf16.mxu0 %v1432_v59  ;;  %v1525_v59 = vld [vmem:[%s2061_s1 + $0x1f0] ss:$8 sps:$4 sm:$0xff]  }
  0x3b   :  { %837 = vmatpush1.bf16.msra.mxu1 %v1434_v60  ;;  %v1528_v60 = vld [vmem:[%s2062_s0 + $0x8] ss:$28 sps:$4 sm:$0xff]  }
  0x3c   :  { %943 = vmatpush1.bf16.msra.mxu0 %v1435_v61  ;;  %838 = vmatprep.subr.bf16.mxu1 %v1436_v62  ;;  %v1531_v61 = vld [vmem:[%s2062_s0 + $0x44] ss:$28 sps:$4 sm:$0xff]  }
  0x3d   :  { %944 = vmatprep.subr.bf16.mxu0 %v1438_v63  ;;  %v1533_v62 = vld [vmem:[%s2062_s0 + $0x40] ss:$28 sps:$4 sm:$0xff]  }
  0x3f   :  { %839 = vmatpush1.bf16.msra.mxu1 %v1440_v0 }
  0x40   :  { %945 = vmatpush1.bf16.msra.mxu0 %v1441_v1  ;;  %861 = vmatprep.subr.bf16.mxu1 %v1447_v2 }
  0x41   :  { %967 = vmatprep.subr.bf16.mxu0 %v1453_v3 }
  0x42   :  { %841 = vmatmul.mubr.bf16.vlgmr.msra.gmra.mrb[0].mxu1 %v1442_v4 }
  0x43   :  { %947 = vmatmul.mubr.bf16.vlgmr.msra.gmra.mrb[0].mxu0 %v1448_v6  ;;  %862 = vmatpush1.bf16.msra.mxu1 %v1445_v5 }
  0x44   :  { %968 = vmatpush1.bf16.msra.mxu0 %v1451_v7  ;;  %863 = vmatprep.subr.bf16.mxu1 %v1456_v8  ;;  %v24_v7 = vld [vmem:[%s2063_s2] sm:$0xff] }
  0x45   :  { %969 = vmatprep.subr.bf16.mxu0 %v1459_v9  ;;  %956 = vmatprep.mubr.bf16.mxu0 %v1484_v10  ;;  %v25_v10 = vld [vmem:[%s2063_s2 + $0x8] sm:$0xff] }
  0x46   :  { %850 = vmatprep.mubr.bf16.mxu1 %v1519_v25 }
  0x47   :  { %864 = vmatpush1.bf16.msra.mxu1 %v1454_v11 }
  0x48   :  { %970 = vmatpush1.bf16.msra.mxu0 %v1457_v12  ;;  %865 = vmatprep.subr.bf16.mxu1 %v1462_v13  ;;  %v26_v13 = vld [vmem:[%s2063_s2 + $0x10] sm:$0xff] }
  0x49   :  { %971 = vmatprep.subr.bf16.mxu0 %v1465_v14 }
  0x4a   :  { %851 = vmatmul.mubr.bf16.gmra.mrb[4].mxu1 %v1521_v26  ;;  %v29_v26 = vld [vmem:[%s2063_s2 + $0x28] sm:$0xff] }
  0x4b   :  { %957 = vmatmul.mubr.bf16.gmra.mrb[4].mxu0 %v1489_v16  ;;  %866 = vmatpush1.bf16.msra.mxu1 %v1460_v15 }
  0x4c   :  { %972 = vmatpush1.bf16.msra.mxu0 %v1463_v17  ;;  %867 = vmatprep.subr.bf16.mxu1 %v1468_v18  ;;  %v27_v17 = vld [vmem:[%s2063_s2 + $0x18] sm:$0xff] }
  0x4d   :  { %973 = vmatprep.subr.bf16.mxu0 %v1471_v19  ;;  %999 = vmatprep.mubr.bf16.mxu0 %v1566_v24 }
  0x4e   :  { %893 = vmatprep.mubr.bf16.mxu1 %v1530_v31 }
  0x4f   :  { %868 = vmatpush1.bf16.msra.mxu1 %v1466_v20 }
  0x50   :  { %974 = vmatpush1.bf16.msra.mxu0 %v1469_v21  ;;  %869 = vmatprep.subr.bf16.mxu1 %v1474_v22 }
  0x51   :  { %975 = vmatprep.subr.bf16.mxu0 %v1477_v23  ;;  %v28_v23 = vld [vmem:[%s2063_s2 + $0x20] sm:$0xff] }
  0x53   :  { %870 = vmatpush1.bf16.msra.mxu1 %v1472_v27 }
  0x54   :  { %976 = vmatpush1.bf16.msra.mxu0 %v1475_v28  ;;  %871 = vmatprep.subr.bf16.mxu1 %v1480_v29  ;;  %v30_v29 = vld [vmem:[%s2063_s2 + $0x30] sm:$0xff] }
  0x55   :  { %977 = vmatprep.subr.bf16.mxu0 %v1483_v30 }
  0x57   :  { %872 = vmatpush1.bf16.msra.mxu1 %v1478_v32 }
  0x58   :  { %978 = vmatpush1.bf16.msra.mxu0 %v1481_v33  ;;  %873 = vmatprep.subr.bf16.mxu1 %v1488_v34  ;;  %v31_v33 = vld [vmem:[%s2063_s2 + $0x38] sm:$0xff]  ;;  %s1568_s2 = smov 96  }
  0x59   :  { %979 = vmatprep.subr.bf16.mxu0 %v1492_v35 }
  0x5b   :  { %874 = vmatpush1.bf16.msra.mxu1 %v1486_v36 }
  0x5c   :  { %980 = vmatpush1.bf16.msra.mxu0 %v1490_v37  ;;  %875 = vmatprep.subr.bf16.mxu1 %v1495_v38 }
  0x5d   :  { %981 = vmatprep.subr.bf16.mxu0 %v1498_v39 }
  0x5f   :  { %876 = vmatpush1.bf16.msra.mxu1 %v1493_v40 }
  0x60   :  { %982 = vmatpush1.bf16.msra.mxu0 %v1496_v41  ;;  %877 = vmatprep.subr.bf16.mxu1 %v1501_v42 }
  0x63   :  { %1000 = vmatmul.mubr.bf16.vlgmr.msra.gmra.mrb[0].mxu0 %v1502_v43  ;;  %878 = vmatpush1.bf16.msra.mxu1 %v1499_v44 }
  0x64   :  { %1009 = vmatprep.mubr.bf16.mxu0 %v1566_v24  ;;  %879 = vmatprep.subr.bf16.mxu1 %v1505_v45 }
  0x67   :  { %880 = vmatpush1.bf16.msra.mxu1 %v1503_v46 }
  0x68   :  { %881 = vmatprep.subr.bf16.mxu1 %v1508_v47 }
  0x6b   :  { %1010 = vmatmul.mubr.bf16.gmra.mrb[4].mxu0 %v1518_v48  ;;  %882 = vmatpush1.bf16.msra.mxu1 %v1506_v49 }
  0x6c   :  { %883 = vmatprep.subr.bf16.mxu1 %v1511_v50 }
  0x6f   :  { %884 = vmatpush1.bf16.msra.mxu1 %v1509_v51 }
  0x70   :  { %885 = vmatprep.subr.bf16.mxu1 %v1514_v52 }
  0x73   :  { %886 = vmatpush1.bf16.msra.mxu1 %v1512_v53 }
  0x74   :  { %887 = vmatprep.subr.bf16.mxu1 %v1517_v54 }
  0x77   :  { %888 = vmatpush1.bf16.msra.mxu1 %v1515_v55 }
  0x78   :  { %889 = vmatprep.subr.bf16.mxu1 %v1524_v56 }
  0x7b   :  { %890 = vmatpush1.bf16.msra.mxu1 %v1522_v57 }
  0x7c   :  { %891 = vmatprep.subr.bf16.mxu1 %v1527_v58 }
  0x7f   :  { %892 = vmatpush1.bf16.msra.mxu1 %v1525_v59 }
  0x82   :  { %894 = vmatmul.mubr.bf16.vlgmr.msra.gmra.mrb[0].mxu1 %v1528_v60 }
  0x83   :  { %903 = vmatprep.mubr.bf16.mxu1 %v1531_v61 }
  0x8a   :  { %904 = vmatmul.mubr.bf16.gmra.mrb[4].mxu1 %v1533_v62 }
 0x136   :  { %v1001_v63 = vpop.f32.mrb[0].mxu0 }
 0x137   :  { %v1003_v0 = vpop.f32.mrb[1].mxu0 }
 0x138   :  { %v1005_v1 = vpop.f32.mrb[2].mxu0 }
 0x139   :  { %v1007_v2 = vpop.f32.mrb[3].mxu0 }
 0x13e   :  { %v1011_v3 = vpop.f32.mrb[4].mxu0 }
 0x13f   :  { %v1013_v4 = vpop.f32.mrb[5].mxu0 }
 0x140   :  { %v1015_v5 = vpop.f32.mrb[6].mxu0 }
 0x141   :  { %v1017_v6 = vpop.f32.mrb[7].mxu0 }
 0x155   :  { %v895_v8 = vpop.f32.mrb[0].mxu1 }
 0x156   :  { %v1319_v9 = vadd.f32 %v1001_v63, %v895_v8  ;;  %v897_v11 = vpop.f32.mrb[1].mxu1 }
 0x157   :  { %v1320_v12 = vadd.f32 %v1003_v0, %v897_v11  ;;  %v899_v14 = vpop.f32.mrb[2].mxu1 }
 0x158   :  { %v1020_v15 = vadd.f32 %v1319_v9, %v24_v7  ;;  %v1321_v16 = vadd.f32 %v1005_v1, %v899_v14  ;;  %v901_v18 = vpop.f32.mrb[3].mxu1  ;;  %v1078_v14 = vld [vmem:[%s2065_s3 + $0x18] sm:$0xff] }
 0x159   :  { %v1021_v19 = vadd.f32 %v1320_v12, %v25_v10  ;;  %v1322_v20 = vadd.f32 %v1007_v2, %v901_v18  ;;  %v1077_v10 = vld [vmem:[%s2065_s3 + $0x10] sm:$0xff] }
 0x15a   :  { %1534 = vtanh.f32 %v1020_v15  ;;  %v1022_v21 = vadd.f32 %v1321_v16, %v26_v13  ;;  %v1315_v43 = vmul.f32 -1.442695, %v1020_v15 }
 0x15b   :  { %1177 = vst [vmem:[%s2064_s5] sm:$0xff] %v1021_v19  ;;  %v1023_v22 = vadd.f32 %v1322_v20, %v27_v17 }
 0x15c   :  { %1536 = vtanh.f32 %v1022_v21  ;;  %v1316_v44 = vmul.f32 -1.442695, %v1022_v21 }
 0x15d   :  { %1178 = vst [vmem:[%s2064_s5 + $0x8] sm:$0xff] %v1023_v22  ;;  %v905_v24 = vpop.f32.mrb[4].mxu1 }
 0x15e   :  { %v1323_v25 = vadd.f32 %v1011_v3, %v905_v24  ;;  %v907_v27 = vpop.f32.mrb[5].mxu1  ;;  %v1075_v3 = vld [vmem:[%s2065_s3] sm:$0xff] }
 0x15f   :  { %v1324_v28 = vadd.f32 %v1013_v4, %v907_v27  ;;  %v909_v30 = vpop.f32.mrb[6].mxu1 }
 0x160   :  { %v1024_v31 = vadd.f32 %v1323_v25, %v28_v23  ;;  %v1325_v32 = vadd.f32 %v1015_v5, %v909_v30  ;;  %v911_v34 = vpop.f32.mrb[7].mxu1 }
 0x161   :  { %v1025_v35 = vadd.f32 %v1324_v28, %v29_v26  ;;  %v1326_v36 = vadd.f32 %v1017_v6, %v911_v34  ;;  %v1076_v6 = vld [vmem:[%s2065_s3 + $0x8] sm:$0xff] }
 0x162   :  { %1538 = vtanh.f32 %v1024_v31  ;;  %v1026_v37 = vadd.f32 %v1325_v32, %v30_v29  ;;  %v1317_v45 = vmul.f32 -1.442695, %v1024_v31 }
 0x163   :  { %1179 = vst [vmem:[%s2064_s5 + $0x10] sm:$0xff] %v1025_v35  ;;  %v1027_v38 = vadd.f32 %v1326_v36, %v31_v33 }
 0x164   :  { %v1535_v39 = vpop.eup %1534  ;;  %1540 = vtanh.f32 %v1026_v37  ;;  %v1318_v46 = vmul.f32 -1.442695, %v1026_v37 }
 0x165   :  { %1180 = vst [vmem:[%s2064_s5 + $0x18] sm:$0xff] %v1027_v38  ;;  %1087 = vrot.lane.b32.xlu0 %v1535_v39, %s1567_s17  ;;  %1542 = vpow2.f32 %v1315_v43 }
 0x166   :  { %v1537_v40 = vpop.eup %1536  ;;  %1544 = vpow2.f32 %v1316_v44 }
 0x167   :  { %1546 = vpow2.f32 %v1317_v45 }
 0x168   :  { %1548 = vpow2.f32 %v1318_v46 }
 0x169   :  { %1089 = vrot.lane.b32.xlu0 %v1537_v40, %s1567_s17 }
 0x16c   :  { %v1539_v41 = vpop.eup %1538 }
 0x16d   :  { %1091 = vrot.lane.b32.xlu1 %v1539_v41, %s1567_s17 }
 0x16e   :  { %v1541_v42 = vpop.eup %1540 }
 0x16f   :  { %v1543_v47 = vpop.eup %1542 }
 0x170   :  { %v1059_v48 = vadd.f32 1.0, %v1543_v47  ;;  %v1545_v49 = vpop.eup %1544 }
 0x171   :  { %1093 = vrot.lane.b32.xlu1 %v1541_v42, %s1567_s17  ;;  %v1060_v50 = vadd.f32 1.0, %v1545_v49  ;;  %v1547_v51 = vpop.eup %1546 }
 0x172   :  { %1550 = vrcp.f32 %v1059_v48  ;;  %v1061_v52 = vadd.f32 1.0, %v1547_v51  ;;  %v1549_v53 = vpop.eup %1548 }
 0x173   :  { %1552 = vrcp.f32 %v1060_v50  ;;  %v1062_v54 = vadd.f32 1.0, %v1549_v53 }
 0x174   :  { %1554 = vrcp.f32 %v1061_v52 }
 0x175   :  { %1556 = vrcp.f32 %v1062_v54 }
 0x17c   :  { %v1551_v55 = vpop.eup %1550 }
 0x17d   :  { %v1553_v58 = vpop.eup %1552  ;;  %v1079_v4 = vmul.f32 %v1551_v55, %v1075_v3 }
 0x17e   :  { %v1555_v61 = vpop.eup %1554  ;;  %v1080_v8 = vmul.f32 %v1553_v58, %v1076_v6 }
 0x17f   :  { %v1557_v0 = vpop.eup %1556  ;;  %v1081_v12 = vmul.f32 %v1555_v61, %v1077_v10 }
 0x180   :  { %v1082_v16 = vmul.f32 %v1557_v0, %v1078_v14 }
 0x1d7   :  { %v1088_v56 = vpop.permute.xlu0 %1087 }
 0x1d8   :  { %v1099_v57 = vmul.f32 %v1551_v55, %v1088_v56 }
 0x1da   :  { %1107 = vrot.lane.b32.xlu0 %v1099_v57, %s1568_s2 }
 0x1db   :  { %v1090_v59 = vpop.permute.xlu0 %1089 }
 0x1dc   :  { %v1100_v60 = vmul.f32 %v1553_v58, %v1090_v59 }
 0x1de   :  { %1109 = vrot.lane.b32.xlu1 %v1100_v60, %s1568_s2 }
 0x1df   :  { %v1092_v62 = vpop.permute.xlu1 %1091 }
 0x1e0   :  { %v1101_v63 = vmul.f32 %v1555_v61, %v1092_v62 }
 0x1e2   :  { %1111 = vrot.lane.b32.xlu0 %v1101_v63, %s1568_s2 }
 0x1e3   :  { %v1094_v1 = vpop.permute.xlu1 %1093 }
 0x1e4   :  { %v1102_v2 = vmul.f32 %v1557_v0, %v1094_v1 }
 0x1e6   :  { %1113 = vrot.lane.b32.xlu1 %v1102_v2, %s1568_s2 }
 0x24c   :  { %v1108_v5 = vpop.permute.xlu0 %1107 }
 0x24d   :  { %v1119_v7 = vadd.f32 %v1108_v5, %v1079_v4 }
 0x24f   :  { %1558 = vtanh.f32 %v1119_v7 }
 0x250   :  { %v1110_v9 = vpop.permute.xlu1 %1109 }
 0x251   :  { %v1120_v11 = vadd.f32 %v1110_v9, %v1080_v8 }
 0x253   :  { %1560 = vtanh.f32 %v1120_v11 }
 0x254   :  { %v1112_v13 = vpop.permute.xlu0 %1111 }
 0x255   :  { %v1121_v15 = vadd.f32 %v1112_v13, %v1081_v12 }
 0x257   :  { %1562 = vtanh.f32 %v1121_v15 }
 0x258   :  { %v1114_v17 = vpop.permute.xlu1 %1113 }
 0x259   :  { %v1559_v18 = vpop.eup %1558  ;;  %v1122_v19 = vadd.f32 %v1114_v17, %v1082_v16 }
 0x25a   :  { %1131 = vrot.lane.b32.xlu0 %v1559_v18, %s1567_s17 }
 0x25b   :  { %1564 = vtanh.f32 %v1122_v19 }
 0x25d   :  { %v1561_v20 = vpop.eup %1560 }
 0x25e   :  { %1133 = vrot.lane.b32.xlu1 %v1561_v20, %s1567_s17 }
 0x261   :  { %v1563_v21 = vpop.eup %1562 }
 0x262   :  { %1135 = vrot.lane.b32.xlu0 %v1563_v21, %s1567_s17 }
 0x265   :  { %v1565_v22 = vpop.eup %1564 }
 0x266   :  { %1137 = vrot.lane.b32.xlu1 %v1565_v22, %s1567_s17 }
 0x2cc   :  { %v1132_v23 = vpop.permute.xlu0 %1131 }
 0x2cd   :  { %v1143_v24 = vmul.f32 %v1551_v55, %v1132_v23 }
 0x2cf   :  { %1151 = vrot.lane.b32.xlu0 %v1143_v24, %s1568_s2 }
 0x2d0   :  { %v1134_v25 = vpop.permute.xlu1 %1133 }
 0x2d1   :  { %v1144_v26 = vmul.f32 %v1553_v58, %v1134_v25 }
 0x2d3   :  { %1153 = vrot.lane.b32.xlu1 %v1144_v26, %s1568_s2 }
 0x2d4   :  { %v1136_v27 = vpop.permute.xlu0 %1135 }
 0x2d5   :  { %v1145_v28 = vmul.f32 %v1555_v61, %v1136_v27 }
 0x2d7   :  { %1155 = vrot.lane.b32.xlu0 %v1145_v28, %s1568_s2 }
 0x2d8   :  { %v1138_v29 = vpop.permute.xlu1 %1137 }
 0x2d9   :  { %v1146_v30 = vmul.f32 %v1557_v0, %v1138_v29 }
 0x2db   :  { %1157 = vrot.lane.b32.xlu1 %v1146_v30, %s1568_s2 }
 0x341   :  { %v1152_v31 = vpop.permute.xlu0 %1151 }
 0x342   :  { %v1164_v32 = vsel %vm1163_vm0, %v1119_v7, %v1152_v31 }
 0x343   :  { %v1169_v33 = vsel %vm1168_vm1, %v1164_v32, 0.0 }
 0x344   :  { %1173 = vst [vmem:[%s2066_s4] sm:$0xff] %v1169_v33 }
 0x345   :  { %v1154_v34 = vpop.permute.xlu1 %1153 }
 0x346   :  { %v1165_v35 = vsel %vm1163_vm0, %v1120_v11, %v1154_v34 }
 0x347   :  { %v1170_v36 = vsel %vm1168_vm1, %v1165_v35, 0.0 }
 0x348   :  { %1174 = vst [vmem:[%s2066_s4 + $0x8] sm:$0xff] %v1170_v36 }
 0x349   :  { %v1156_v37 = vpop.permute.xlu0 %1155 }
 0x34a   :  { %v1166_v38 = vsel %vm1163_vm0, %v1121_v15, %v1156_v37 }
 0x34b   :  { %v1171_v39 = vsel %vm1168_vm1, %v1166_v38, 0.0 }
 0x34c   :  { %1175 = vst [vmem:[%s2066_s4 + $0x10] sm:$0xff] %v1171_v39 }
 0x34d   :  { %v1158_v40 = vpop.permute.xlu1 %1157 }
 0x34e   :  { %v1167_v41 = vsel %vm1163_vm0, %v1122_v19, %v1158_v40 }
 0x34f   :  { %v1172_v42 = vsel %vm1168_vm1, %v1167_v41, 0.0 }
 0x350   :  { %1176 = vst [vmem:[%s2066_s4 + $0x18] sm:$0xff] %v1172_v42 }

// kernel: _gqn_apply.30
= control target key start
LH: loop header
LB: loop body
LE: loop exit
PB: predicated region body
PF: predicated region fallthrough
CT: control target
= control target key end

     0   :  { %vm920_vm0 = vcmask 64512   ;;  %vm925_vm1 = vcmask 130048   ;;  %s1561_s1 = inlined_call_operand.vmem [shape: bf16[896,128], index: 1, kind: input, shape index: {}]   ;;  %s1562_s0 = inlined_call_operand.vmem [shape: bf16[32,896], index: 0, kind: input, shape index: {}]   ;;  %s1563_s3 = inlined_call_operand.vmem [shape: f32[32,128], index: 3, kind: input, shape index: {}]   ;;  %s1564_s2 = inlined_call_operand.vmem [shape: f32[1,128], index: 2, kind: input, shape index: {}]   ;;  %s1565_s4 = inlined_call_operand.vmem [shape: f32[32,128], index: 4, kind: output, shape index: {}]  }
   0x1   :  { %v1129_v0 = vld [vmem:[%s1561_s1 + $0x40] sm:$0xff]   ;;  %v1133_v4 = vld [vmem:[%s1561_s1 + $0x48] sm:$0xff]   ;;  %v1137_v8 = vld [vmem:[%s1561_s1 + $0x50] sm:$0xff]  }
   0x2   :  { %v1130_v1 = vld [vmem:[%s1561_s1 + $0xc0] sm:$0xff]   ;;  %1013 = vmatprep.subr.bf16.mxu0 %v1129_v0  ;;  %v1134_v5 = vld [vmem:[%s1561_s1 + $0xc8] sm:$0xff]   ;;  %v1138_v9 = vld [vmem:[%s1561_s1 + $0xd0] sm:$0xff]  }
   0x3   :  { %v1131_v2 = vld [vmem:[%s1561_s1] sm:$0xff]   ;;  %1041 = vmatprep.subr.bf16.mxu1 %v1130_v1  ;;  %v1135_v6 = vld [vmem:[%s1561_s1 + $0x8] sm:$0xff]   ;;  %v1139_v10 = vld [vmem:[%s1561_s1 + $0x10] sm:$0xff]  }
   0x4   :  { %v1132_v3 = vld [vmem:[%s1561_s1 + $0x80] sm:$0xff]   ;;  %1014 = vmatpush3.bf16.msra.mxu0 %v1131_v2  ;;  %v1136_v7 = vld [vmem:[%s1561_s1 + $0x88] sm:$0xff]   ;;  %v1140_v11 = vld [vmem:[%s1561_s1 + $0x90] sm:$0xff]  }
   0x5   :  { %1042 = vmatpush3.bf16.msra.mxu1 %v1132_v3  ;;  %1015 = vmatprep.subr.bf16.mxu0 %v1133_v4  ;;  %v1141_v12 = vld [vmem:[%s1561_s1 + $0x58] sm:$0xff]   ;;  %v1145_v16 = vld [vmem:[%s1561_s1 + $0x60] sm:$0xff]   ;;  %v1149_v20 = vld [vmem:[%s1561_s1 + $0x68] sm:$0xff]  }
   0x6   :  { %1043 = vmatprep.subr.bf16.mxu1 %v1134_v5  ;;  %v1142_v13 = vld [vmem:[%s1561_s1 + $0xd8] sm:$0xff]   ;;  %v1146_v17 = vld [vmem:[%s1561_s1 + $0xe0] sm:$0xff]   ;;  %v1150_v21 = vld [vmem:[%s1561_s1 + $0xe8] sm:$0xff]  }
   0x7   :  { %v1143_v14 = vld [vmem:[%s1561_s1 + $0x18] sm:$0xff]   ;;  %v1147_v18 = vld [vmem:[%s1561_s1 + $0x20] sm:$0xff]   ;;  %v1151_v22 = vld [vmem:[%s1561_s1 + $0x28] sm:$0xff]  }
   0x8   :  { %1016 = vmatpush3.bf16.msra.mxu0 %v1135_v6  ;;  %v1144_v15 = vld [vmem:[%s1561_s1 + $0x98] sm:$0xff]   ;;  %v1148_v19 = vld [vmem:[%s1561_s1 + $0xa0] sm:$0xff]   ;;  %v1152_v23 = vld [vmem:[%s1561_s1 + $0xa8] sm:$0xff]  }
   0x9   :  { %1044 = vmatpush3.bf16.msra.mxu1 %v1136_v7  ;;  %1017 = vmatprep.subr.bf16.mxu0 %v1137_v8  ;;  %v1153_v24 = vld [vmem:[%s1561_s1 + $0x70] sm:$0xff]   ;;  %v1157_v28 = vld [vmem:[%s1561_s1 + $0x78] sm:$0xff]   ;;  %v1163_v33 = vld [vmem:[%s1562_s0 + $0x4] ss:$28 sps:$4 sm:$0xff]  }
   0xa   :  { %1045 = vmatprep.subr.bf16.mxu1 %v1138_v9  ;;  %v1154_v25 = vld [vmem:[%s1561_s1 + $0xf0] sm:$0xff]   ;;  %v1158_v29 = vld [vmem:[%s1561_s1 + $0xf8] sm:$0xff]   ;;  %v1164_v34 = vld [vmem:[%s1562_s0 + $0x8] ss:$28 sps:$4 sm:$0xff]   ;;  %605 = vmatprep.mubr.bf16.mxu0 %v1163_v33 }
   0xb   :  { %v1155_v26 = vld [vmem:[%s1561_s1 + $0x30] sm:$0xff]   ;;  %v1159_v30 = vld [vmem:[%s1561_s1 + $0x38] sm:$0xff]   ;;  %v1166_v35 = vld [vmem:[%s1562_s0 + $0xc] ss:$28 sps:$4 sm:$0xff]  }
   0xc   :  { %1018 = vmatpush3.bf16.msra.mxu0 %v1139_v10  ;;  %v1156_v27 = vld [vmem:[%s1561_s1 + $0xb0] sm:$0xff]   ;;  %v1160_v31 = vld [vmem:[%s1561_s1 + $0xb8] sm:$0xff]   ;;  %v1167_v36 = vld [vmem:[%s1561_s1 + $0x140] sm:$0xff]   ;;  %654 = vmatprep.mubr.bf16.mxu1 %v1166_v35 }
   0xd   :  { %1046 = vmatpush3.bf16.msra.mxu1 %v1140_v11  ;;  %1019 = vmatprep.subr.bf16.mxu0 %v1141_v12  ;;  %v1161_v32 = vld [vmem:[%s1562_s0] ss:$28 sps:$4 sm:$0xff]   ;;  %v1169_v38 = vld [vmem:[%s1561_s1 + $0x148] sm:$0xff]   ;;  %v1172_v41 = vld [vmem:[%s1561_s1 + $0x150] sm:$0xff]  }
   0xe   :  { %1047 = vmatprep.subr.bf16.mxu1 %v1142_v13  ;;  %v1168_v37 = vld [vmem:[%s1561_s1 + $0x100] sm:$0xff]   ;;  %v1171_v40 = vld [vmem:[%s1561_s1 + $0x108] sm:$0xff]   ;;  %v1174_v43 = vld [vmem:[%s1561_s1 + $0x110] sm:$0xff]  }
   0xf   :  { %v1170_v39 = vld [vmem:[%s1561_s1 + $0x180] sm:$0xff]   ;;  %v1173_v42 = vld [vmem:[%s1561_s1 + $0x188] sm:$0xff]   ;;  %v1175_v44 = vld [vmem:[%s1561_s1 + $0x158] sm:$0xff]  }
  0x10   :  { %1020 = vmatpush3.bf16.msra.mxu0 %v1143_v14  ;;  %v1176_v45 = vld [vmem:[%s1561_s1 + $0x190] sm:$0xff]   ;;  %v1177_v46 = vld [vmem:[%s1561_s1 + $0x118] sm:$0xff]   ;;  %v1178_v47 = vld [vmem:[%s1561_s1 + $0x160] sm:$0xff]  }
  0x11   :  { %1048 = vmatpush3.bf16.msra.mxu1 %v1144_v15  ;;  %1021 = vmatprep.subr.bf16.mxu0 %v1145_v16  ;;  %v1179_v48 = vld [vmem:[%s1561_s1 + $0x198] sm:$0xff]   ;;  %v1180_v49 = vld [vmem:[%s1561_s1 + $0x120] sm:$0xff]   ;;  %v1185_v52 = vld [vmem:[%s1561_s1 + $0x168] sm:$0xff]  }
  0x12   :  { %1049 = vmatprep.subr.bf16.mxu1 %v1146_v17  ;;  %v1181_v50 = vld [vmem:[%s1562_s0 + $0x3c] ss:$28 sps:$4 sm:$0xff]   ;;  %v1183_v51 = vld [vmem:[%s1562_s0 + $0x44] ss:$28 sps:$4 sm:$0xff]   ;;  %v1189_v56 = vld [vmem:[%s1561_s1 + $0x128] sm:$0xff]  }
  0x13   :  { %v1186_v53 = vld [vmem:[%s1561_s1 + $0x1a0] sm:$0xff]   ;;  %v1187_v54 = vld [vmem:[%s1562_s0 + $0x38] ss:$28 sps:$4 sm:$0xff]   ;;  %v1191_v58 = vld [vmem:[%s1561_s1 + $0x1a8] sm:$0xff]  }
  0x14   :  { %1022 = vmatpush3.bf16.msra.mxu0 %v1147_v18  ;;  %v1188_v55 = vld [vmem:[%s1562_s0 + $0x40] ss:$28 sps:$4 sm:$0xff]   ;;  %v1190_v57 = vld [vmem:[%s1561_s1 + $0x170] sm:$0xff]   ;;  %v1202_v3 = vld [vmem:[%s1562_s0 + $0x4c] ss:$28 sps:$4 sm:$0xff]  }
  0x15   :  { %1050 = vmatpush3.bf16.msra.mxu1 %v1148_v19  ;;  %1023 = vmatprep.subr.bf16.mxu0 %v1149_v20  ;;  %v1192_v59 = vld [vmem:[%s1561_s1 + $0x130] sm:$0xff]   ;;  %v1193_v60 = vld [vmem:[%s1561_s1 + $0x178] sm:$0xff]   ;;  %v1455_v4 = vld [vmem:[%s1563_s3] sm:$0xff] }
  0x16   :  { %1051 = vmatprep.subr.bf16.mxu1 %v1150_v21  ;;  %v1194_v61 = vld [vmem:[%s1561_s1 + $0x1b0] sm:$0xff]   ;;  %v1195_v62 = vld [vmem:[%s1561_s1 + $0x138] sm:$0xff]   ;;  %v1460_v5 = vld [vmem:[%s1563_s3 + $0x8] sm:$0xff]  ;;  %v796_v7 = vsub.f32 0.0, %v1455_v4 }
  0x17   :  { %v1198_v63 = vld [vmem:[%s1562_s0 + $0x14] ss:$28 sps:$4 sm:$0xff]   ;;  %v1199_v0 = vld [vmem:[%s1561_s1 + $0x1b8] sm:$0xff]   ;;  %v797_v8 = vsub.f32 0.0, %v1460_v5  ;;  %v1204_v17 = vld [vmem:[%s1562_s0 + $0x48] ss:$28 sps:$4 sm:$0xff]  }
  0x18   :  { %1024 = vmatpush3.bf16.msra.mxu0 %v1151_v22  ;;  %v1200_v1 = vld [vmem:[%s1562_s0 + $0x18] ss:$28 sps:$4 sm:$0xff]   ;;  %v1196_v2 = vld [vmem:[%s1562_s0 + $0x10] ss:$28 sps:$4 sm:$0xff]   ;;  %v800_v13 = vmul.f32 1.442695, %v796_v7 }
  0x19   :  { %1052 = vmatpush3.bf16.msra.mxu1 %v1152_v23  ;;  %1025 = vmatprep.subr.bf16.mxu0 %v1153_v24  ;;  %v1465_v6 = vld [vmem:[%s1563_s3 + $0x18] sm:$0xff]  ;;  %v1473_v10 = vld [vmem:[%s1563_s3 + $0x10] sm:$0xff]  ;;  %v802_v14 = vmul.f32 1.442695, %v797_v8  ;;  %s1221_s3 = smov 120  }
  0x1a   :  { %1053 = vmatprep.subr.bf16.mxu1 %v1154_v25  ;;  %v799_v9 = vsub.f32 0.0, %v1465_v6  ;;  %v1201_v11 = vld [vmem:[%s1562_s0 + $0x50] ss:$28 sps:$4 sm:$0xff]   ;;  %v798_v12 = vsub.f32 0.0, %v1473_v10  ;;  %1205 = vpow2.f32 %v800_v13 }
  0x1b   :  { %1207 = vpow2.f32 %v802_v14 }
  0x1c   :  { %1026 = vmatpush3.bf16.msra.mxu0 %v1155_v26  ;;  %v804_v15 = vmul.f32 1.442695, %v798_v12  ;;  %v806_v16 = vmul.f32 1.442695, %v799_v9 }
  0x1d   :  { %1054 = vmatpush3.bf16.msra.mxu1 %v1156_v27  ;;  %1027 = vmatprep.subr.bf16.mxu0 %v1157_v28 }
  0x1e   :  { %1055 = vmatprep.subr.bf16.mxu1 %v1158_v29  ;;  %1209 = vpow2.f32 %v804_v15 }
  0x1f   :  { %1211 = vpow2.f32 %v806_v16 }
  0x20   :  { %1028 = vmatpush3.bf16.msra.mxu0 %v1159_v30 }
  0x21   :  { %1056 = vmatpush3.bf16.msra.mxu1 %v1160_v31  ;;  %1069 = vmatprep.subr.bf16.mxu0 %v1167_v36 }
  0x22   :  { %1107 = vmatprep.subr.bf16.mxu1 %v1170_v39 }
  0x23   :  { %606 = vmatmul.mubr.bf16.vlgmr.msra.gmra.mrb[0].mxu0 %v1161_v32 }
  0x24   :  { %655 = vmatmul.mubr.bf16.vlgmr.msra.gmra.mrb[0].mxu1 %v1164_v34  ;;  %1070 = vmatpush3.bf16.msra.mxu0 %v1168_v37  ;;  %v1482_v18 = vpop.eup %1205 }
  0x25   :  { %1071 = vmatprep.subr.bf16.mxu0 %v1169_v38  ;;  %1108 = vmatpush3.bf16.msra.mxu1 %v1170_v39  ;;  %v1484_v19 = vpop.eup %1207 }
  0x26   :  { %1109 = vmatprep.subr.bf16.mxu1 %v1173_v42  ;;  %613 = vmatprep.mubr.bf16.mxu0 %v1181_v50 }
  0x27   :  { %662 = vmatprep.mubr.bf16.mxu1 %v1183_v51  ;;  %860 = vrot.lane.b32.xlu0 %v1482_v18, %s1221_s3 }
  0x28   :  { %1072 = vmatpush3.bf16.msra.mxu0 %v1171_v40  ;;  %v1488_v20 = vpop.eup %1209 }
  0x29   :  { %1073 = vmatprep.subr.bf16.mxu0 %v1172_v41  ;;  %1110 = vmatpush3.bf16.msra.mxu1 %v1173_v42  ;;  %v1492_v21 = vpop.eup %1211 }
  0x2a   :  { %1111 = vmatprep.subr.bf16.mxu1 %v1176_v45  ;;  %864 = vrot.lane.b32.xlu1 %v1488_v20, %s1221_s3 }
  0x2b   :  { %614 = vmatmul.mubr.bf16.gmra.mrb[4].mxu0 %v1187_v54  ;;  %862 = vrot.lane.b32.xlu0 %v1484_v19, %s1221_s3 }
  0x2c   :  { %1074 = vmatpush3.bf16.msra.mxu0 %v1174_v43  ;;  %663 = vmatmul.mubr.bf16.gmra.mrb[4].mxu1 %v1188_v55 }
  0x2d   :  { %1075 = vmatprep.subr.bf16.mxu0 %v1175_v44  ;;  %1112 = vmatpush3.bf16.msra.mxu1 %v1176_v45 }
  0x2e   :  { %1113 = vmatprep.subr.bf16.mxu1 %v1179_v48  ;;  %703 = vmatprep.mubr.bf16.mxu0 %v1198_v63 }
  0x2f   :  { %1123 = vmatprep.mubr.bf16.mxu1 %v1200_v1  ;;  %866 = vrot.lane.b32.xlu1 %v1492_v21, %s1221_s3 }
  0x30   :  { %1076 = vmatpush3.bf16.msra.mxu0 %v1177_v46  ;;  %812 = vrot.lane.b32.xlu0 %v1455_v4, %s1221_s3 }
  0x31   :  { %1077 = vmatprep.subr.bf16.mxu0 %v1178_v47  ;;  %1114 = vmatpush3.bf16.msra.mxu1 %v1179_v48 }
  0x32   :  { %1115 = vmatprep.subr.bf16.mxu1 %v1186_v53 }
  0x33   :  { %814 = vrot.lane.b32.xlu1 %v1460_v5, %s1221_s3 }
  0x34   :  { %1078 = vmatpush3.bf16.msra.mxu0 %v1180_v49  ;;  %816 = vrot.lane.b32.xlu0 %v1473_v10, %s1221_s3 }
  0x35   :  { %1079 = vmatprep.subr.bf16.mxu0 %v1185_v52  ;;  %1116 = vmatpush3.bf16.msra.mxu1 %v1186_v53 }
  0x36   :  { %1117 = vmatprep.subr.bf16.mxu1 %v1191_v58 }
  0x37   :  { %818 = vrot.lane.b32.xlu1 %v1465_v6, %s1221_s3 }
  0x38   :  { %1080 = vmatpush3.bf16.msra.mxu0 %v1189_v56 }
  0x39   :  { %1081 = vmatprep.subr.bf16.mxu0 %v1190_v57  ;;  %1118 = vmatpush3.bf16.msra.mxu1 %v1191_v58 }
  0x3a   :  { %1119 = vmatprep.subr.bf16.mxu1 %v1194_v61 }
  0x3c   :  { %1082 = vmatpush3.bf16.msra.mxu0 %v1192_v59  ;;  %v938_v59 = vld [vmem:[%s1564_s2] ss:$0 sm:$0xff]  ;;  %s1222_s2 = smov 8  }
  0x3d   :  { %1083 = vmatprep.subr.bf16.mxu0 %v1193_v60  ;;  %1120 = vmatpush3.bf16.msra.mxu1 %v1194_v61 }
  0x3e   :  { %1121 = vmatprep.subr.bf16.mxu1 %v1199_v0 }
  0x40   :  { %1084 = vmatpush3.bf16.msra.mxu0 %v1195_v62 }
  0x41   :  { %1122 = vmatpush3.bf16.msra.mxu1 %v1199_v0 }
  0x43   :  { %704 = vmatmul.mubr.bf16.vlgmr.msra.gmra.mrb[8].mxu0 %v1196_v2 }
  0x44   :  { %711 = vmatprep.mubr.bf16.mxu0 %v1202_v3  ;;  %1124 = vmatmul.mubr.bf16.vlgmr.msra.gmra.mrb[8].mxu1 %v1201_v11 }
  0x4b   :  { %712 = vmatmul.mubr.bf16.gmra.mrb[12].mxu0 %v1204_v17 }
  0x99   :  { %v861_v0 = vpop.permute.xlu0 %860 }
  0x9d   :  { %v863_v17 = vpop.permute.xlu0 %862 }
  0xf6   :  { %v1029_v22 = vpop.f32.mrb[0].mxu0 }
  0xf7   :  { %v1057_v23 = vpop.f32.mrb[0].mxu1  ;;  %v1030_v24 = vpop.f32.mrb[1].mxu0 }
  0xf8   :  { %v1031_v25 = vadd.f32 %v1030_v24, %v1029_v22  ;;  %v1058_v26 = vpop.f32.mrb[1].mxu1  ;;  %v1032_v27 = vpop.f32.mrb[2].mxu0 }
  0xf9   :  { %v1059_v28 = vadd.f32 %v1058_v26, %v1057_v23  ;;  %v1060_v29 = vpop.f32.mrb[2].mxu1  ;;  %v1033_v30 = vpop.f32.mrb[3].mxu0 }
  0xfa   :  { %v1034_v31 = vadd.f32 %v1033_v30, %v1032_v27  ;;  %v1061_v32 = vpop.f32.mrb[3].mxu1  ;;  %v865_v26 = vpop.permute.xlu1 %864 }
  0xfb   :  { %v657_v33 = vadd.f32 %v1059_v28, %v1031_v25  ;;  %v1062_v34 = vadd.f32 %v1061_v32, %v1060_v29 }
  0xfd   :  { %v660_v35 = vadd.f32 %v1062_v34, %v1034_v31 }
  0xfe   :  { %v1035_v36 = vpop.f32.mrb[4].mxu0  ;;  %v867_v34 = vpop.permute.xlu1 %866 }
  0xff   :  { %v1063_v37 = vpop.f32.mrb[4].mxu1  ;;  %v1036_v38 = vpop.f32.mrb[5].mxu0 }
 0x100   :  { %v1037_v39 = vadd.f32 %v1036_v38, %v1035_v36  ;;  %v1064_v40 = vpop.f32.mrb[5].mxu1  ;;  %v1038_v41 = vpop.f32.mrb[6].mxu0 }
 0x101   :  { %v1065_v42 = vadd.f32 %v1064_v40, %v1063_v37  ;;  %v1066_v43 = vpop.f32.mrb[6].mxu1  ;;  %v1039_v44 = vpop.f32.mrb[7].mxu0 }
 0x102   :  { %v1040_v45 = vadd.f32 %v1039_v44, %v1038_v41  ;;  %v1067_v46 = vpop.f32.mrb[7].mxu1  ;;  %v813_v41 = vpop.permute.xlu0 %812 }
 0x103   :  { %v665_v47 = vadd.f32 %v1065_v42, %v1037_v39  ;;  %v1068_v48 = vadd.f32 %v1067_v46, %v1066_v43  ;;  %v815_v44 = vpop.permute.xlu1 %814 }
 0x105   :  { %v668_v49 = vadd.f32 %v1068_v48, %v1040_v45 }
 0x106   :  { %v817_v46 = vpop.permute.xlu0 %816 }
 0x116   :  { %v1085_v50 = vpop.f32.mrb[8].mxu0 }
 0x117   :  { %v1086_v51 = vpop.f32.mrb[9].mxu0  ;;  %v1125_v55 = vpop.f32.mrb[8].mxu1 }
 0x118   :  { %v1087_v52 = vadd.f32 %v1086_v51, %v1085_v50  ;;  %v1088_v53 = vpop.f32.mrb[10].mxu0  ;;  %v754_v58 = vpop.f32.mrb[9].mxu1 }
 0x119   :  { %v1089_v54 = vpop.f32.mrb[11].mxu0  ;;  %v1126_v60 = vpop.f32.mrb[10].mxu1 }
 0x11a   :  { %v1090_v56 = vadd.f32 %v1089_v54, %v1088_v53  ;;  %v706_v57 = vadd.f32 %v1087_v52, %v657_v33  ;;  %v757_v63 = vpop.f32.mrb[11].mxu1 }
 0x11c   :  { %v755_v61 = vadd.f32 %v754_v58, %v706_v57  ;;  %v709_v62 = vadd.f32 %v1090_v56, %v660_v35 }
 0x11e   :  { %v1509_v1 = vadd.f32 %v938_v59, %v755_v61  ;;  %v758_v2 = vadd.f32 %v757_v63, %v709_v62  ;;  %v1091_v3 = vpop.f32.mrb[12].mxu0 }
 0x11f   :  { %v1092_v7 = vpop.f32.mrb[13].mxu0 }
 0x120   :  { %v788_v8 = vmul.f32 1.442695, %v1509_v1  ;;  %v1512_v9 = vadd.f32 %v938_v59, %v758_v2  ;;  %v852_v11 = vsub.f32 %v1509_v1, %v1455_v4  ;;  %v1093_v12 = vadd.f32 %v1092_v7, %v1091_v3  ;;  %v1094_v13 = vpop.f32.mrb[14].mxu0 }
 0x121   :  { %v1095_v14 = vpop.f32.mrb[15].mxu0 }
 0x122   :  { %v790_v15 = vmul.f32 1.442695, %v1512_v9  ;;  %v872_v16 = vmul.f32 %v861_v0, %v852_v11  ;;  %v714_v22 = vadd.f32 %v1093_v12, %v665_v47  ;;  %v1096_v23 = vadd.f32 %v1095_v14, %v1094_v13 }
 0x123   :  { %v853_v24 = vsub.f32 %v1512_v9, %v1460_v5  ;;  %1213 = vpow2.f32 %v788_v8  ;;  %v908_v57 = vmul.f32 2.0, %v852_v11 }
 0x124   :  { %v880_v25 = vmul.f32 %v872_v16, %v872_v16  ;;  %v763_v27 = vadd.f32 %v1125_v55, %v714_v22  ;;  %v717_v28 = vadd.f32 %v1096_v23, %v668_v49  ;;  %1215 = vpow2.f32 %v790_v15 }
 0x125   :  { %v873_v29 = vmul.f32 %v863_v17, %v853_v24  ;;  %v909_v63 = vmul.f32 2.0, %v853_v24 }
 0x126   :  { %888 = vrot.lane.b32.xlu0 %v880_v25, %s1222_s2  ;;  %v1519_v4 = vadd.f32 %v938_v59, %v763_v27  ;;  %v766_v30 = vadd.f32 %v1126_v60, %v717_v28 }
 0x127   :  { %v881_v31 = vmul.f32 %v873_v29, %v873_v29 }
 0x128   :  { %v792_v32 = vmul.f32 1.442695, %v1519_v4  ;;  %v1522_v33 = vadd.f32 %v938_v59, %v766_v30  ;;  %v854_v5 = vsub.f32 %v1519_v4, %v1473_v10 }
 0x129   :  { %890 = vrot.lane.b32.xlu1 %v881_v31, %s1222_s2 }
 0x12a   :  { %v794_v35 = vmul.f32 1.442695, %v1522_v33  ;;  %v874_v36 = vmul.f32 %v865_v26, %v854_v5  ;;  %v855_v37 = vsub.f32 %v1522_v33, %v1465_v6  ;;  %1217 = vpow2.f32 %v792_v32  ;;  %v819_v6 = vpop.permute.xlu1 %818 }
 0x12b   :  { %v910_v13 = vmul.f32 2.0, %v854_v5 }
 0x12c   :  { %v882_v38 = vmul.f32 %v874_v36, %v874_v36  ;;  %v875_v39 = vmul.f32 %v867_v34, %v855_v37  ;;  %1219 = vpow2.f32 %v794_v35  ;;  %v911_v11 = vmul.f32 2.0, %v855_v37 }
 0x12d   :  { %v1214_v40 = vpop.eup %1213 }
 0x12e   :  { %v883_v42 = vmul.f32 %v875_v39, %v875_v39  ;;  %892 = vrot.lane.b32.xlu0 %v882_v38, %s1222_s2  ;;  %v1216_v43 = vpop.eup %1215  ;;  %v824_v45 = vmul.f32 %v1214_v40, %v813_v41  ;;  %v848_v51 = vmul.f32 %v1214_v40, %v1482_v18 }
 0x12f   :  { %v825_v10 = vmul.f32 %v1216_v43, %v815_v44  ;;  %v849_v52 = vmul.f32 %v1216_v43, %v1484_v19 }
 0x130   :  { %894 = vrot.lane.b32.xlu1 %v883_v42, %s1222_s2  ;;  %v876_v53 = vmul.f32 %v848_v51, %v848_v51 }
 0x131   :  { %v877_v56 = vmul.f32 %v849_v52, %v849_v52 }
 0x132   :  { %832 = vrot.lane.b32.xlu0 %v824_v45, %s1221_s3 }
 0x134   :  { %834 = vrot.lane.b32.xlu1 %v825_v10, %s1221_s3  ;;  %v1218_v47 = vpop.eup %1217 }
 0x135   :  { %v826_v48 = vmul.f32 %v1218_v47, %v817_v46  ;;  %v850_v61 = vmul.f32 %v1218_v47, %v1488_v20 }
 0x136   :  { %v1220_v49 = vpop.eup %1219 }
 0x137   :  { %v827_v50 = vmul.f32 %v1220_v49, %v819_v6  ;;  %836 = vrot.lane.b32.xlu0 %v826_v48, %s1221_s3  ;;  %v851_v2 = vmul.f32 %v1220_v49, %v1492_v21  ;;  %v878_v7 = vmul.f32 %v850_v61, %v850_v61 }
 0x139   :  { %838 = vrot.lane.b32.xlu1 %v827_v50, %s1221_s3  ;;  %v879_v19 = vmul.f32 %v851_v2, %v851_v2 }
 0x198   :  { %v889_v54 = vpop.permute.xlu0 %888 }
 0x199   :  { %v900_v55 = vadd.f32 %v889_v54, %v876_v53 }
 0x19b   :  { %v1009_v58 = vadd.f32 -1.0, %v900_v55  ;;  %v891_v59 = vpop.permute.xlu1 %890 }
 0x19c   :  { %v901_v60 = vadd.f32 %v891_v59, %v877_v56 }
 0x19d   :  { %v912_v62 = vsub.f32 %v1009_v58, %v908_v57 }
 0x19e   :  { %v1010_v0 = vadd.f32 -1.0, %v901_v60 }
 0x19f   :  { %v916_v17 = vmul.f32 0.5, %v912_v62 }
 0x1a0   :  { %v913_v3 = vsub.f32 %v1010_v0, %v909_v63  ;;  %v893_v18 = vpop.permute.xlu0 %892 }
 0x1a1   :  { %v902_v8 = vadd.f32 %v893_v18, %v878_v7 }
 0x1a2   :  { %v895_v12 = vpop.permute.xlu1 %894  ;;  %v917_v21 = vmul.f32 0.5, %v913_v3 }
 0x1a3   :  { %v1011_v14 = vadd.f32 -1.0, %v902_v8  ;;  %v903_v15 = vadd.f32 %v895_v12, %v879_v19 }
 0x1a4   :  { %v833_v16 = vpop.permute.xlu0 %832 }
 0x1a5   :  { %v914_v20 = vsub.f32 %v1011_v14, %v910_v13  ;;  %v1012_v22 = vadd.f32 -1.0, %v903_v15  ;;  %v844_v23 = vadd.f32 %v833_v16, %v1509_v1 }
 0x1a6   :  { %v835_v24 = vpop.permute.xlu1 %834 }
 0x1a7   :  { %v915_v25 = vsub.f32 %v1012_v22, %v911_v11  ;;  %v921_v26 = vsel %vm920_vm0, %v844_v23, %v916_v17  ;;  %v845_v27 = vadd.f32 %v835_v24, %v1512_v9  ;;  %v918_v32 = vmul.f32 0.5, %v914_v20 }
 0x1a8   :  { %v926_v28 = vsel %vm925_vm1, %v921_v26, 0.0 }
 0x1a9   :  { %930 = vst [vmem:[%s1565_s4] sm:$0xff] %v926_v28  ;;  %v922_v29 = vsel %vm920_vm0, %v845_v27, %v917_v21  ;;  %v837_v31 = vpop.permute.xlu0 %836  ;;  %v919_v9 = vmul.f32 0.5, %v915_v25 }
 0x1aa   :  { %v927_v30 = vsel %vm925_vm1, %v922_v29, 0.0  ;;  %v846_v1 = vadd.f32 %v837_v31, %v1519_v4 }
 0x1ab   :  { %931 = vst [vmem:[%s1565_s4 + $0x8] sm:$0xff] %v927_v30  ;;  %v839_v5 = vpop.permute.xlu1 %838 }
 0x1ac   :  { %v923_v34 = vsel %vm920_vm0, %v846_v1, %v918_v32  ;;  %v847_v35 = vadd.f32 %v839_v5, %v1522_v33 }
 0x1ad   :  { %v928_v36 = vsel %vm925_vm1, %v923_v34, 0.0 }
 0x1ae   :  { %932 = vst [vmem:[%s1565_s4 + $0x10] sm:$0xff] %v928_v36  ;;  %v924_v37 = vsel %vm920_vm0, %v847_v35, %v919_v9 }
 0x1af   :  { %v929_v38 = vsel %vm925_vm1, %v924_v37, 0.0 }
 0x1b0   :  { %933 = vst [vmem:[%s1565_s4 + $0x18] sm:$0xff] %v929_v38 }

// kernel: _gqn_apply.32
= control target key start
LH: loop header
LB: loop body
LE: loop exit
PB: predicated region body
PF: predicated region fallthrough
CT: control target
= control target key end

     0   :  { %s710_s19 = smov 64   ;;  %vm371_vm0 = vcmask 261120   ;;  %vm376_vm1 = vcmask 523264   ;;  %s958_s1 = inlined_call_operand.vmem [shape: bf16[256,128], index: 1, kind: input, shape index: {}]   ;;  %s959_s0 = inlined_call_operand.vmem [shape: bf16[32,256], index: 0, kind: input, shape index: {}]   ;;  %s960_s2 = inlined_call_operand.vmem [shape: f32[32,128], index: 2, kind: input, shape index: {}]   ;;  %s961_s3 = inlined_call_operand.vmem [shape: f32[32,128], index: 3, kind: input, shape index: {}]   ;;  %s962_s4 = inlined_call_operand.vmem [shape: bf16[32,512], index: 4, kind: input, shape index: {}]   ;;  %s963_s5 = inlined_call_operand.vmem [shape: f32[32,128], index: 5, kind: output, shape index: {0}]   ;;  %s964_s6 = inlined_call_operand.vmem [shape: f32[32,512], index: 6, kind: output, shape index: {1}]  }
   0x1   :  { %v644_v0 = vld [vmem:[%s958_s1 + $0x40] sm:$0xff]   ;;  %v646_v2 = vld [vmem:[%s958_s1 + $0x48] sm:$0xff]   ;;  %v648_v4 = vld [vmem:[%s958_s1 + $0x50] sm:$0xff]  }
   0x2   :  { %v645_v1 = vld [vmem:[%s958_s1] sm:$0xff]   ;;  %613 = vmatprep.subr.bf16.mxu0 %v644_v0  ;;  %v647_v3 = vld [vmem:[%s958_s1 + $0x8] sm:$0xff]   ;;  %v649_v5 = vld [vmem:[%s958_s1 + $0x10] sm:$0xff]  }
   0x3   :  { %614 = vmatpush3.bf16.msra.mxu0 %v645_v1  ;;  %v650_v6 = vld [vmem:[%s958_s1 + $0x58] sm:$0xff]   ;;  %v652_v8 = vld [vmem:[%s958_s1 + $0x60] sm:$0xff]   ;;  %v654_v10 = vld [vmem:[%s958_s1 + $0x68] sm:$0xff]  }
   0x4   :  { %615 = vmatprep.subr.bf16.mxu0 %v646_v2  ;;  %v651_v7 = vld [vmem:[%s958_s1 + $0x18] sm:$0xff]   ;;  %v653_v9 = vld [vmem:[%s958_s1 + $0x20] sm:$0xff]   ;;  %v655_v12 = vld [vmem:[%s958_s1 + $0x28] sm:$0xff]  }
   0x5   :  { %v662_v11 = vld [vmem:[%s959_s0 + $0x4] ss:$8 sps:$4 sm:$0xff]   ;;  %v656_v13 = vld [vmem:[%s958_s1 + $0x70] sm:$0xff]   ;;  %v658_v15 = vld [vmem:[%s958_s1 + $0x78] sm:$0xff]  }
   0x6   :  { %223 = vmatprep.mubr.bf16.mxu0 %v662_v11  ;;  %v657_v14 = vld [vmem:[%s958_s1 + $0x30] sm:$0xff]   ;;  %v659_v16 = vld [vmem:[%s958_s1 + $0x38] sm:$0xff]   ;;  %v660_v17 = vld [vmem:[%s959_s0] ss:$8 sps:$4 sm:$0xff]  }
   0x7   :  { %616 = vmatpush3.bf16.msra.mxu0 %v647_v3  ;;  %v663_v18 = vld [vmem:[%s959_s0 + $0x14] ss:$8 sps:$4 sm:$0xff]   ;;  %v665_v19 = vld [vmem:[%s959_s0 + $0x10] ss:$8 sps:$4 sm:$0xff]   ;;  %v27_v21 = vld [vmem:[%s960_s2] sm:$0xff] }
   0x8   :  { %617 = vmatprep.subr.bf16.mxu0 %v648_v4  ;;  %v28_v25 = vld [vmem:[%s960_s2 + $0x8] sm:$0xff]  ;;  %v29_v31 = vld [vmem:[%s960_s2 + $0x10] sm:$0xff]  ;;  %v30_v35 = vld [vmem:[%s960_s2 + $0x18] sm:$0xff]  ;;  %s711_s2 = smov 96  }
   0x9   :  { %v283_v4 = vld [vmem:[%s961_s3] sm:$0xff]  ;;  %v285_v11 = vld [vmem:[%s961_s3 + $0x10] sm:$0xff] }
   0xb   :  { %618 = vmatpush3.bf16.msra.mxu0 %v649_v5 }
   0xc   :  { %619 = vmatprep.subr.bf16.mxu0 %v650_v6 }
   0xf   :  { %620 = vmatpush3.bf16.msra.mxu0 %v651_v7  ;;  %v284_v7 = vld [vmem:[%s961_s3 + $0x8] sm:$0xff] }
  0x10   :  { %621 = vmatprep.subr.bf16.mxu0 %v652_v8 }
  0x13   :  { %622 = vmatpush3.bf16.msra.mxu0 %v653_v9 }
  0x14   :  { %623 = vmatprep.subr.bf16.mxu0 %v654_v10 }
  0x17   :  { %624 = vmatpush3.bf16.msra.mxu0 %v655_v12 }
  0x18   :  { %625 = vmatprep.subr.bf16.mxu0 %v656_v13 }
  0x1b   :  { %626 = vmatpush3.bf16.msra.mxu0 %v657_v14 }
  0x1c   :  { %627 = vmatprep.subr.bf16.mxu0 %v658_v15  ;;  %v286_v15 = vld [vmem:[%s961_s3 + $0x18] sm:$0xff] }
  0x1f   :  { %628 = vmatpush3.bf16.msra.mxu0 %v659_v16 }
  0x22   :  { %224 = vmatmul.mubr.bf16.vlgmr.msra.gmra.mrb[0].mxu0 %v660_v17 }
  0x23   :  { %231 = vmatprep.mubr.bf16.mxu0 %v663_v18 }
  0x2a   :  { %232 = vmatmul.mubr.bf16.gmra.mrb[4].mxu0 %v665_v19 }
  0xf5   :  { %v629_v20 = vpop.f32.mrb[0].mxu0 }
  0xf6   :  { %v630_v22 = vpop.f32.mrb[1].mxu0 }
  0xf7   :  { %v631_v23 = vadd.f32 %v630_v22, %v629_v20  ;;  %v632_v24 = vpop.f32.mrb[2].mxu0 }
  0xf8   :  { %v633_v26 = vpop.f32.mrb[3].mxu0 }
  0xf9   :  { %v240_v27 = vadd.f32 %v631_v23, %v27_v21  ;;  %v634_v28 = vadd.f32 %v633_v26, %v632_v24  ;;  %v666_v24 = vld [vmem:[%s962_s4 + $0x4] ss:$16 sps:$4 sm:$0xff]   ;;  %v668_v26 = vld [vmem:[%s962_s4] ss:$16 sps:$4 sm:$0xff]  }
  0xfa   :  { %447 = vmatprep.subr.bf16.mxu1 %v666_v24 }
  0xfb   :  { %678 = vtanh.f32 %v240_v27  ;;  %v241_v29 = vadd.f32 %v634_v28, %v28_v25  ;;  %v597_v44 = vmul.f32 -1.442695, %v240_v27  ;;  %v712_v25 = vmov 0   ;;  %v669_v27 = vld [vmem:[%s962_s4 + $0x24] ss:$16 sps:$4 sm:$0xff]   ;;  %448 = vmatpush1.bf16.msra.mxu1 %v668_v26 }
  0xfc   :  { %479 = vmatprep.mubr.bf16.mxu1 %v712_v25  ;;  %v671_v28 = vld [vmem:[%s962_s4 + $0x20] ss:$16 sps:$4 sm:$0xff]   ;;  %449 = vmatprep.subr.bf16.mxu1 %v669_v27 }
  0xfd   :  { %v635_v30 = vpop.f32.mrb[4].mxu0  ;;  %680 = vtanh.f32 %v241_v29  ;;  %v598_v45 = vmul.f32 -1.442695, %v241_v29  ;;  %v674_v29 = vld [vmem:[%s962_s4 + $0xc] ss:$16 sps:$4 sm:$0xff]  }
  0xfe   :  { %v636_v32 = vpop.f32.mrb[5].mxu0 }
  0xff   :  { %v637_v33 = vadd.f32 %v636_v32, %v635_v30  ;;  %v638_v34 = vpop.f32.mrb[6].mxu0  ;;  %450 = vmatpush1.bf16.msra.mxu1 %v671_v28 }
 0x100   :  { %v639_v36 = vpop.f32.mrb[7].mxu0  ;;  %500 = vmatprep.subr.bf16.mxu1 %v674_v29 }
 0x101   :  { %v242_v37 = vadd.f32 %v637_v33, %v29_v31  ;;  %v640_v38 = vadd.f32 %v639_v36, %v638_v34 }
 0x103   :  { %682 = vtanh.f32 %v242_v37  ;;  %v243_v39 = vadd.f32 %v640_v38, %v30_v35  ;;  %v599_v46 = vmul.f32 -1.442695, %v242_v37 }
 0x105   :  { %v679_v40 = vpop.eup %678  ;;  %684 = vtanh.f32 %v243_v39  ;;  %v600_v47 = vmul.f32 -1.442695, %v243_v39 }
 0x106   :  { %295 = vrot.lane.b32.xlu0 %v679_v40, %s710_s19  ;;  %686 = vpow2.f32 %v597_v44  ;;  %v672_v40 = vld [vmem:[%s962_s4 + $0x8] ss:$16 sps:$4 sm:$0xff]  }
 0x107   :  { %v681_v41 = vpop.eup %680  ;;  %688 = vpow2.f32 %v598_v45 }
 0x108   :  { %690 = vpow2.f32 %v599_v46 }
 0x109   :  { %692 = vpow2.f32 %v600_v47 }
 0x10a   :  { %297 = vrot.lane.b32.xlu0 %v681_v41, %s710_s19  ;;  %v677_v41 = vld [vmem:[%s962_s4 + $0x2c] ss:$16 sps:$4 sm:$0xff]  }
 0x10d   :  { %v683_v42 = vpop.eup %682 }
 0x10e   :  { %299 = vrot.lane.b32.xlu1 %v683_v42, %s710_s19 }
 0x10f   :  { %v685_v43 = vpop.eup %684 }
 0x110   :  { %v687_v48 = vpop.eup %686 }
 0x111   :  { %v267_v49 = vadd.f32 1.0, %v687_v48  ;;  %v689_v50 = vpop.eup %688 }
 0x112   :  { %301 = vrot.lane.b32.xlu1 %v685_v43, %s710_s19  ;;  %v268_v51 = vadd.f32 1.0, %v689_v50  ;;  %v691_v52 = vpop.eup %690  ;;  %v675_v43 = vld [vmem:[%s962_s4 + $0x28] ss:$16 sps:$4 sm:$0xff]  }
 0x113   :  { %694 = vrcp.f32 %v267_v49  ;;  %v269_v53 = vadd.f32 1.0, %v691_v52  ;;  %v693_v54 = vpop.eup %692 }
 0x114   :  { %696 = vrcp.f32 %v268_v51  ;;  %v270_v55 = vadd.f32 1.0, %v693_v54 }
 0x115   :  { %698 = vrcp.f32 %v269_v53 }
 0x116   :  { %700 = vrcp.f32 %v270_v55 }
 0x11d   :  { %v695_v56 = vpop.eup %694 }
 0x11e   :  { %v697_v59 = vpop.eup %696  ;;  %v287_v5 = vmul.f32 %v695_v56, %v283_v4 }
 0x11f   :  { %v699_v62 = vpop.eup %698  ;;  %v288_v9 = vmul.f32 %v697_v59, %v284_v7 }
 0x120   :  { %v701_v1 = vpop.eup %700  ;;  %v289_v13 = vmul.f32 %v699_v62, %v285_v11 }
 0x121   :  { %v290_v17 = vmul.f32 %v701_v1, %v286_v15 }
 0x178   :  { %v296_v57 = vpop.permute.xlu0 %295 }
 0x179   :  { %v307_v58 = vmul.f32 %v695_v56, %v296_v57 }
 0x17b   :  { %315 = vrot.lane.b32.xlu0 %v307_v58, %s711_s2 }
 0x17c   :  { %v298_v60 = vpop.permute.xlu0 %297 }
 0x17d   :  { %v308_v61 = vmul.f32 %v697_v59, %v298_v60 }
 0x17f   :  { %317 = vrot.lane.b32.xlu1 %v308_v61, %s711_s2 }
 0x180   :  { %v300_v63 = vpop.permute.xlu1 %299 }
 0x181   :  { %v309_v0 = vmul.f32 %v699_v62, %v300_v63 }
 0x183   :  { %319 = vrot.lane.b32.xlu0 %v309_v0, %s711_s2 }
 0x184   :  { %v302_v2 = vpop.permute.xlu1 %301 }
 0x185   :  { %v310_v3 = vmul.f32 %v701_v1, %v302_v2 }
 0x187   :  { %321 = vrot.lane.b32.xlu1 %v310_v3, %s711_s2 }
 0x1ed   :  { %v316_v6 = vpop.permute.xlu0 %315 }
 0x1ee   :  { %v834_v8 = vadd.f32 %v316_v6, %v287_v5 }
 0x1f0   :  { %702 = vtanh.f32 %v834_v8 }
 0x1f1   :  { %v318_v10 = vpop.permute.xlu1 %317 }
 0x1f2   :  { %v840_v12 = vadd.f32 %v318_v10, %v288_v9 }
 0x1f4   :  { %704 = vtanh.f32 %v840_v12 }
 0x1f5   :  { %v320_v14 = vpop.permute.xlu0 %319 }
 0x1f6   :  { %v329_v16 = vadd.f32 %v320_v14, %v289_v13 }
 0x1f8   :  { %706 = vtanh.f32 %v329_v16 }
 0x1f9   :  { %v322_v18 = vpop.permute.xlu1 %321 }
 0x1fa   :  { %v703_v19 = vpop.eup %702  ;;  %v846_v20 = vadd.f32 %v322_v18, %v290_v17 }
 0x1fb   :  { %339 = vrot.lane.b32.xlu0 %v703_v19, %s710_s19 }
 0x1fc   :  { %708 = vtanh.f32 %v846_v20 }
 0x1fe   :  { %v705_v21 = vpop.eup %704 }
 0x1ff   :  { %341 = vrot.lane.b32.xlu1 %v705_v21, %s710_s19 }
 0x202   :  { %v707_v22 = vpop.eup %706 }
 0x203   :  { %343 = vrot.lane.b32.xlu0 %v707_v22, %s710_s19 }
 0x206   :  { %v709_v23 = vpop.eup %708 }
 0x207   :  { %345 = vrot.lane.b32.xlu1 %v709_v23, %s710_s19 }
 0x26d   :  { %v340_v30 = vpop.permute.xlu0 %339 }
 0x26e   :  { %v351_v32 = vmul.f32 %v695_v56, %v340_v30 }
 0x271   :  { %v342_v31 = vpop.permute.xlu1 %341 }
 0x272   :  { %v352_v33 = vmul.f32 %v697_v59, %v342_v31 }
 0x274   :  { %v385_v34 = vpack.c.bf16 %v352_v33, %v351_v32 }
 0x275   :  { %v344_v35 = vpop.permute.xlu0 %343 }
 0x276   :  { %397 = vrot.lane.b32.xlu0 %v385_v34, %s710_s19  ;;  %v353_v37 = vmul.f32 %v699_v62, %v344_v35 }
 0x279   :  { %v346_v36 = vpop.permute.xlu1 %345 }
 0x27a   :  { %v354_v38 = vmul.f32 %v701_v1, %v346_v36  ;;  %359 = vrot.lane.b32.xlu0 %v351_v32, %s711_s2 }
 0x27c   :  { %v386_v39 = vpack.c.bf16 %v354_v38, %v353_v37 }
 0x27e   :  { %363 = vrot.lane.b32.xlu0 %v353_v37, %s711_s2  ;;  %399 = vrot.lane.b32.xlu1 %v386_v39, %s710_s19 }
 0x282   :  { %361 = vrot.lane.b32.xlu1 %v352_v33, %s711_s2 }
 0x286   :  { %365 = vrot.lane.b32.xlu1 %v354_v38, %s711_s2 }
 0x2e8   :  { %v398_v42 = vpop.permute.xlu0 %397 }
 0x2e9   :  { %609 = vmatmul.mubr.msk.bf16.vlgmr.msra.gmra.mrb[0].mxu1 %vm371_vm0, %v398_v42 }
 0x2ea   :  { %501 = vmatpush1.bf16.msra.mxu1 %v672_v40  ;;  %489 = vmatprep.mubr.bf16.mxu1 %v712_v25 }
 0x2eb   :  { %502 = vmatprep.subr.bf16.mxu1 %v677_v41 }
 0x2ec   :  { %v360_v44 = vpop.permute.xlu0 %359 }
 0x2ed   :  { %v372_v45 = vsel %vm371_vm0, %v834_v8, %v360_v44 }
 0x2ee   :  { %v377_v46 = vsel %vm376_vm1, %v372_v45, 0.0  ;;  %503 = vmatpush1.bf16.msra.mxu1 %v675_v43 }
 0x2ef   :  { %381 = vst [vmem:[%s963_s5] sm:$0xff] %v377_v46 }
 0x2f0   :  { %v400_v47 = vpop.permute.xlu1 %399  ;;  %v364_v48 = vpop.permute.xlu0 %363 }
 0x2f1   :  { %v374_v49 = vsel %vm371_vm0, %v329_v16, %v364_v48  ;;  %610 = vmatmul.mubr.msk.bf16.gmra.mrb[4].mxu1 %vm371_vm0, %v400_v47 }
 0x2f2   :  { %v379_v50 = vsel %vm376_vm1, %v374_v49, 0.0  ;;  %532 = vmatprep.mubr.bf16.mxu1 %v712_v25 }
 0x2f3   :  { %383 = vst [vmem:[%s963_s5 + $0x10] sm:$0xff] %v379_v50 }
 0x2f4   :  { %v362_v51 = vpop.permute.xlu1 %361 }
 0x2f5   :  { %v373_v52 = vsel %vm371_vm0, %v840_v12, %v362_v51 }
 0x2f6   :  { %v378_v53 = vsel %vm376_vm1, %v373_v52, 0.0 }
 0x2f7   :  { %382 = vst [vmem:[%s963_s5 + $0x8] sm:$0xff] %v378_v53 }
 0x2f8   :  { %v366_v54 = vpop.permute.xlu1 %365 }
 0x2f9   :  { %v375_v55 = vsel %vm371_vm0, %v846_v20, %v366_v54  ;;  %611 = vmatmul.mubr.msk.bf16.vlgmr.msra.gmra.mrb[8].mxu1 %vm371_vm0, %v398_v42 }
 0x2fa   :  { %v380_v56 = vsel %vm376_vm1, %v375_v55, 0.0  ;;  %542 = vmatprep.mubr.bf16.mxu1 %v712_v25 }
 0x2fb   :  { %384 = vst [vmem:[%s963_s5 + $0x18] sm:$0xff] %v380_v56 }
 0x301   :  { %612 = vmatmul.mubr.msk.bf16.gmra.mrb[12].mxu1 %vm371_vm0, %v400_v47 }
 0x3bc   :  { %v481_v57 = vpop.f32.mrb[0].mxu1 }
 0x3bd   :  { %553 = vst [vmem:[%s964_s6] sm:$0xff] %v481_v57  ;;  %v483_v58 = vpop.f32.mrb[1].mxu1 }
 0x3be   :  { %554 = vst [vmem:[%s964_s6 + $0x8] sm:$0xff] %v483_v58  ;;  %v485_v59 = vpop.f32.mrb[2].mxu1 }
 0x3bf   :  { %557 = vst [vmem:[%s964_s6 + $0x20] sm:$0xff] %v485_v59  ;;  %v487_v60 = vpop.f32.mrb[3].mxu1 }
 0x3c0   :  { %558 = vst [vmem:[%s964_s6 + $0x28] sm:$0xff] %v487_v60 }
 0x3c4   :  { %v491_v61 = vpop.f32.mrb[4].mxu1 }
 0x3c5   :  { %561 = vst [vmem:[%s964_s6 + $0x40] sm:$0xff] %v491_v61  ;;  %v493_v62 = vpop.f32.mrb[5].mxu1 }
 0x3c6   :  { %562 = vst [vmem:[%s964_s6 + $0x48] sm:$0xff] %v493_v62  ;;  %v495_v63 = vpop.f32.mrb[6].mxu1 }
 0x3c7   :  { %565 = vst [vmem:[%s964_s6 + $0x60] sm:$0xff] %v495_v63  ;;  %v497_v0 = vpop.f32.mrb[7].mxu1 }
 0x3c8   :  { %566 = vst [vmem:[%s964_s6 + $0x68] sm:$0xff] %v497_v0 }
 0x3cc   :  { %v534_v1 = vpop.f32.mrb[8].mxu1 }
 0x3cd   :  { %555 = vst [vmem:[%s964_s6 + $0x10] sm:$0xff] %v534_v1  ;;  %v536_v2 = vpop.f32.mrb[9].mxu1 }
 0x3ce   :  { %556 = vst [vmem:[%s964_s6 + $0x18] sm:$0xff] %v536_v2  ;;  %v538_v3 = vpop.f32.mrb[10].mxu1 }
 0x3cf   :  { %559 = vst [vmem:[%s964_s6 + $0x30] sm:$0xff] %v538_v3  ;;  %v540_v4 = vpop.f32.mrb[11].mxu1 }
 0x3d0   :  { %560 = vst [vmem:[%s964_s6 + $0x38] sm:$0xff] %v540_v4 }
 0x3d4   :  { %v544_v5 = vpop.f32.mrb[12].mxu1 }
 0x3d5   :  { %563 = vst [vmem:[%s964_s6 + $0x50] sm:$0xff] %v544_v5  ;;  %v546_v6 = vpop.f32.mrb[13].mxu1 }
 0x3d6   :  { %564 = vst [vmem:[%s964_s6 + $0x58] sm:$0xff] %v546_v6  ;;  %v548_v7 = vpop.f32.mrb[14].mxu1 }
 0x3d7   :  { %567 = vst [vmem:[%s964_s6 + $0x70] sm:$0xff] %v548_v7  ;;  %v550_v8 = vpop.f32.mrb[15].mxu1 }
 0x3d8   :  { %568 = vst [vmem:[%s964_s6 + $0x78] sm:$0xff] %v550_v8 }

// kernel: _gqn_apply.38
= control target key start
LH: loop header
LB: loop body
LE: loop exit
PB: predicated region body
PF: predicated region fallthrough
CT: control target
= control target key end

     0   :  { %s1001_s0 = inlined_call_operand.vmem [shape: bf16[32,256], index: 0, kind: input, shape index: {}]   ;;  %s1002_s1 = inlined_call_operand.vmem [shape: bf16[256,128], index: 1, kind: input, shape index: {}]   ;;  %s1003_s2 = inlined_call_operand.vmem [shape: f32[32,128], index: 2, kind: input, shape index: {}]   ;;  %s1004_s3 = inlined_call_operand.vmem [shape: f32[32,128], index: 3, kind: input, shape index: {}]   ;;  %s1005_s4 = inlined_call_operand.vmem [shape: bf16[32,512], index: 4, kind: input, shape index: {}]   ;;  %s1006_s5 = inlined_call_operand.hbm [shape: f32[32,128], index: 5, kind: output, shape index: {0}]   ;;  %s1007_s6 = inlined_call_operand.vmem [shape: f32[32,512], index: 6, kind: output, shape index: {1}]  }
   0x1   :  { %v660_v0 = vld [vmem:[%s1002_s1 + $0x40] sm:$0xff]   ;;  %v662_v2 = vld [vmem:[%s1002_s1 + $0x48] sm:$0xff]   ;;  %v664_v4 = vld [vmem:[%s1002_s1 + $0x50] sm:$0xff]  }
   0x2   :  { %v661_v1 = vld [vmem:[%s1002_s1] sm:$0xff]   ;;  %626 = vmatprep.subr.bf16.mxu0 %v660_v0  ;;  %v663_v3 = vld [vmem:[%s1002_s1 + $0x8] sm:$0xff]   ;;  %v665_v5 = vld [vmem:[%s1002_s1 + $0x10] sm:$0xff]  }
   0x3   :  { %627 = vmatpush3.bf16.msra.mxu0 %v661_v1  ;;  %v666_v6 = vld [vmem:[%s1002_s1 + $0x58] sm:$0xff]   ;;  %v668_v8 = vld [vmem:[%s1002_s1 + $0x60] sm:$0xff]   ;;  %v670_v10 = vld [vmem:[%s1002_s1 + $0x68] sm:$0xff]  }
   0x4   :  { %628 = vmatprep.subr.bf16.mxu0 %v662_v2  ;;  %v667_v7 = vld [vmem:[%s1002_s1 + $0x18] sm:$0xff]   ;;  %v669_v9 = vld [vmem:[%s1002_s1 + $0x20] sm:$0xff]   ;;  %v671_v12 = vld [vmem:[%s1002_s1 + $0x28] sm:$0xff]  }
   0x5   :  { %v678_v11 = vld [vmem:[%s1001_s0 + $0x4] ss:$8 sps:$4 sm:$0xff]   ;;  %v672_v13 = vld [vmem:[%s1002_s1 + $0x70] sm:$0xff]  }
   0x6   :  { %224 = vmatprep.mubr.bf16.mxu0 %v678_v11 }
   0x7   :  { %629 = vmatpush3.bf16.msra.mxu0 %v663_v3 }
   0x8   :  { %630 = vmatprep.subr.bf16.mxu0 %v664_v4 }
   0xb   :  { %631 = vmatpush3.bf16.msra.mxu0 %v665_v5 }
   0xc   :  { %632 = vmatprep.subr.bf16.mxu0 %v666_v6 }
   0xf   :  { %633 = vmatpush3.bf16.msra.mxu0 %v667_v7 }
  0x10   :  { %634 = vmatprep.subr.bf16.mxu0 %v668_v8 }
  0x13   :  { %635 = vmatpush3.bf16.msra.mxu0 %v669_v9 }
  0x14   :  { %636 = vmatprep.subr.bf16.mxu0 %v670_v10 }
  0x15   :  { %12 = vsyncpa [#allocation4], 0  ;;  %v673_v14 = vld [vmem:[%s1002_s1 + $0x30] sm:$0xff]   ;;  %v674_v15 = vld [vmem:[%s1002_s1 + $0x78] sm:$0xff]   ;;  %s750_s19 = smov 64   ;;  %vm372_vm0 = vcmask 261120  }
  0x16   :  { %v675_v16 = vld [vmem:[%s1002_s1 + $0x38] sm:$0xff]   ;;  %v676_v17 = vld [vmem:[%s1001_s0] ss:$8 sps:$4 sm:$0xff]   ;;  %v30_v31 = vld [vmem:[%s1003_s2 + $0x10] sm:$0xff]  ;;  %vm377_vm1 = vcmask 523264  }
  0x17   :  { %637 = vmatpush3.bf16.msra.mxu0 %v671_v12  ;;  %v679_v18 = vld [vmem:[%s1001_s0 + $0x14] ss:$8 sps:$4 sm:$0xff]   ;;  %v681_v19 = vld [vmem:[%s1001_s0 + $0x10] ss:$8 sps:$4 sm:$0xff]   ;;  %v28_v21 = vld [vmem:[%s1003_s2] sm:$0xff] }
  0x18   :  { %638 = vmatprep.subr.bf16.mxu0 %v672_v13  ;;  %v29_v25 = vld [vmem:[%s1003_s2 + $0x8] sm:$0xff]  ;;  %v31_v35 = vld [vmem:[%s1003_s2 + $0x18] sm:$0xff]  ;;  %s751_s2 = smov 96   ;;  %v284_v4 = vld [vmem:[%s1004_s3] sm:$0xff] }
  0x19   :  { %v285_v7 = vld [vmem:[%s1004_s3 + $0x8] sm:$0xff]  ;;  %v286_v11 = vld [vmem:[%s1004_s3 + $0x10] sm:$0xff] }
  0x1b   :  { %639 = vmatpush3.bf16.msra.mxu0 %v673_v14 }
  0x1c   :  { %640 = vmatprep.subr.bf16.mxu0 %v674_v15  ;;  %v287_v15 = vld [vmem:[%s1004_s3 + $0x18] sm:$0xff] }
  0x1f   :  { %641 = vmatpush3.bf16.msra.mxu0 %v675_v16 }
  0x22   :  { %225 = vmatmul.mubr.bf16.vlgmr.msra.gmra.mrb[0].mxu0 %v676_v17 }
  0x23   :  { %232 = vmatprep.mubr.bf16.mxu0 %v679_v18 }
  0x2a   :  { %233 = vmatmul.mubr.bf16.gmra.mrb[4].mxu0 %v681_v19 }
  0xf5   :  { %v642_v20 = vpop.f32.mrb[0].mxu0 }
  0xf6   :  { %v643_v22 = vpop.f32.mrb[1].mxu0 }
  0xf7   :  { %v644_v23 = vadd.f32 %v643_v22, %v642_v20  ;;  %v645_v24 = vpop.f32.mrb[2].mxu0 }
  0xf8   :  { %v646_v26 = vpop.f32.mrb[3].mxu0 }
  0xf9   :  { %v241_v27 = vadd.f32 %v644_v23, %v28_v21  ;;  %v647_v28 = vadd.f32 %v646_v26, %v645_v24  ;;  %v682_v24 = vld [vmem:[%s1005_s4 + $0x4] ss:$16 sps:$4 sm:$0xff]  }
  0xfa   :  { %v685_v26 = vld [vmem:[%s1005_s4 + $0x24] ss:$16 sps:$4 sm:$0xff]   ;;  %448 = vmatprep.subr.bf16.mxu1 %v682_v24 }
  0xfb   :  { %694 = vtanh.f32 %v241_v27  ;;  %v242_v29 = vadd.f32 %v647_v28, %v29_v25  ;;  %v610_v44 = vmul.f32 -1.442695, %v241_v27  ;;  %v684_v25 = vld [vmem:[%s1005_s4] ss:$16 sps:$4 sm:$0xff]   ;;  %v752_v27 = vmov 0  }
  0xfc   :  { %480 = vmatprep.mubr.bf16.mxu1 %v752_v27  ;;  %449 = vmatpush1.bf16.msra.mxu1 %v684_v25  ;;  %v687_v28 = vld [vmem:[%s1005_s4 + $0x20] ss:$16 sps:$4 sm:$0xff]  }
  0xfd   :  { %v648_v30 = vpop.f32.mrb[4].mxu0  ;;  %696 = vtanh.f32 %v242_v29  ;;  %v611_v45 = vmul.f32 -1.442695, %v242_v29  ;;  %450 = vmatprep.subr.bf16.mxu1 %v685_v26  ;;  %v690_v29 = vld [vmem:[%s1005_s4 + $0xc] ss:$16 sps:$4 sm:$0xff]  }
  0xfe   :  { %v649_v32 = vpop.f32.mrb[5].mxu0 }
  0xff   :  { %v650_v33 = vadd.f32 %v649_v32, %v648_v30  ;;  %v651_v34 = vpop.f32.mrb[6].mxu0 }
 0x100   :  { %v652_v36 = vpop.f32.mrb[7].mxu0  ;;  %451 = vmatpush1.bf16.msra.mxu1 %v687_v28 }
 0x101   :  { %v243_v37 = vadd.f32 %v650_v33, %v30_v31  ;;  %v653_v38 = vadd.f32 %v652_v36, %v651_v34  ;;  %501 = vmatprep.subr.bf16.mxu1 %v690_v29 }
 0x103   :  { %698 = vtanh.f32 %v243_v37  ;;  %v244_v39 = vadd.f32 %v653_v38, %v31_v35  ;;  %v612_v46 = vmul.f32 -1.442695, %v243_v37 }
 0x105   :  { %v695_v40 = vpop.eup %694  ;;  %700 = vtanh.f32 %v244_v39  ;;  %v613_v47 = vmul.f32 -1.442695, %v244_v39 }
 0x106   :  { %296 = vrot.lane.b32.xlu0 %v695_v40, %s750_s19  ;;  %702 = vpow2.f32 %v610_v44  ;;  %v688_v40 = vld [vmem:[%s1005_s4 + $0x8] ss:$16 sps:$4 sm:$0xff]  }
 0x107   :  { %v697_v41 = vpop.eup %696  ;;  %704 = vpow2.f32 %v611_v45 }
 0x108   :  { %706 = vpow2.f32 %v612_v46 }
 0x109   :  { %708 = vpow2.f32 %v613_v47 }
 0x10a   :  { %298 = vrot.lane.b32.xlu0 %v697_v41, %s750_s19  ;;  %v693_v41 = vld [vmem:[%s1005_s4 + $0x2c] ss:$16 sps:$4 sm:$0xff]  }
 0x10d   :  { %v699_v42 = vpop.eup %698 }
 0x10e   :  { %300 = vrot.lane.b32.xlu1 %v699_v42, %s750_s19 }
 0x10f   :  { %v701_v43 = vpop.eup %700 }
 0x110   :  { %v703_v48 = vpop.eup %702 }
 0x111   :  { %v268_v49 = vadd.f32 1.0, %v703_v48  ;;  %v705_v50 = vpop.eup %704 }
 0x112   :  { %302 = vrot.lane.b32.xlu1 %v701_v43, %s750_s19  ;;  %v269_v51 = vadd.f32 1.0, %v705_v50  ;;  %v707_v52 = vpop.eup %706  ;;  %v691_v43 = vld [vmem:[%s1005_s4 + $0x28] ss:$16 sps:$4 sm:$0xff]   ;;  %s753_s4 = smov [#allocation3]  }
 0x113   :  { %710 = vrcp.f32 %v268_v49  ;;  %v270_v53 = vadd.f32 1.0, %v707_v52  ;;  %v709_v54 = vpop.eup %708  ;;  %s575_s17 = sshll.u32 %s753_s4, 4  ;;  %s576_s17 = int_to_ptr.vmem [resolvable:$true] %s575_s17 }
 0x114   :  { %712 = vrcp.f32 %v269_v51  ;;  %v271_v55 = vadd.f32 1.0, %v709_v54  ;;  %s726_s18 = scalar_lea.vmem %s576_s17, 512  ;;  %p731_p1 = scmp.lt.s32.totalorder %s576_s17, %s576_s17 }
 0x115   :  { %714 = vrcp.f32 %v270_v53  ;;  %p727_p0 = scmp.ne.s32.totalorder %s576_s17, %s726_s18  ;;  %p732_p2 = scmp.lt.s32.totalorder %s726_s18, %s726_s18 }
 0x116   :  { %716 = vrcp.f32 %v271_v55 }
 0x117   :  { %p733_p3 = por %p732_p2, %p731_p1 }
 0x119   :  { %p734_p4 = pnand %p733_p3, %p727_p0 }
 0x11d   :  { %v711_v56 = vpop.eup %710 }
 0x11e   :  { %v713_v59 = vpop.eup %712  ;;  %v288_v5 = vmul.f32 %v711_v56, %v284_v4 }
 0x11f   :  { %v715_v62 = vpop.eup %714  ;;  %v289_v9 = vmul.f32 %v713_v59, %v285_v7 }
 0x120   :  { %v717_v1 = vpop.eup %716  ;;  %v290_v13 = vmul.f32 %v715_v62, %v286_v11 }
 0x121   :  { %v291_v17 = vmul.f32 %v717_v1, %v287_v15 }
 0x178   :  { %v297_v57 = vpop.permute.xlu0 %296 }
 0x179   :  { %v308_v58 = vmul.f32 %v711_v56, %v297_v57 }
 0x17b   :  { %316 = vrot.lane.b32.xlu0 %v308_v58, %s751_s2 }
 0x17c   :  { %v299_v60 = vpop.permute.xlu0 %298 }
 0x17d   :  { %v309_v61 = vmul.f32 %v713_v59, %v299_v60 }
 0x17f   :  { %318 = vrot.lane.b32.xlu1 %v309_v61, %s751_s2 }
 0x180   :  { %v301_v63 = vpop.permute.xlu1 %300 }
 0x181   :  { %v310_v0 = vmul.f32 %v715_v62, %v301_v63 }
 0x183   :  { %320 = vrot.lane.b32.xlu0 %v310_v0, %s751_s2 }
 0x184   :  { %v303_v2 = vpop.permute.xlu1 %302 }
 0x185   :  { %v311_v3 = vmul.f32 %v717_v1, %v303_v2 }
 0x187   :  { %322 = vrot.lane.b32.xlu1 %v311_v3, %s751_s2 }
 0x1ed   :  { %v317_v6 = vpop.permute.xlu0 %316 }
 0x1ee   :  { %v877_v8 = vadd.f32 %v317_v6, %v288_v5 }
 0x1f0   :  { %718 = vtanh.f32 %v877_v8 }
 0x1f1   :  { %v319_v10 = vpop.permute.xlu1 %318 }
 0x1f2   :  { %v883_v12 = vadd.f32 %v319_v10, %v289_v9 }
 0x1f4   :  { %720 = vtanh.f32 %v883_v12 }
 0x1f5   :  { %v321_v14 = vpop.permute.xlu0 %320 }
 0x1f6   :  { %v330_v16 = vadd.f32 %v321_v14, %v290_v13 }
 0x1f8   :  { %722 = vtanh.f32 %v330_v16 }
 0x1f9   :  { %v323_v18 = vpop.permute.xlu1 %322 }
 0x1fa   :  { %v719_v19 = vpop.eup %718  ;;  %v889_v20 = vadd.f32 %v323_v18, %v291_v17 }
 0x1fb   :  { %340 = vrot.lane.b32.xlu0 %v719_v19, %s750_s19 }
 0x1fc   :  { %724 = vtanh.f32 %v889_v20 }
 0x1fe   :  { %v721_v21 = vpop.eup %720 }
 0x1ff   :  { %342 = vrot.lane.b32.xlu1 %v721_v21, %s750_s19 }
 0x202   :  { %v723_v22 = vpop.eup %722 }
 0x203   :  { %344 = vrot.lane.b32.xlu0 %v723_v22, %s750_s19 }
 0x206   :  { %v725_v23 = vpop.eup %724 }
 0x207   :  { %346 = vrot.lane.b32.xlu1 %v725_v23, %s750_s19 }
 0x26d   :  { %v341_v30 = vpop.permute.xlu0 %340 }
 0x26e   :  { %v352_v32 = vmul.f32 %v711_v56, %v341_v30 }
 0x271   :  { %v343_v31 = vpop.permute.xlu1 %342 }
 0x272   :  { %v353_v33 = vmul.f32 %v713_v59, %v343_v31 }
 0x274   :  { %v386_v34 = vpack.c.bf16 %v353_v33, %v352_v32 }
 0x275   :  { %v345_v35 = vpop.permute.xlu0 %344 }
 0x276   :  { %398 = vrot.lane.b32.xlu0 %v386_v34, %s750_s19  ;;  %v354_v37 = vmul.f32 %v715_v62, %v345_v35 }
 0x279   :  { %v347_v36 = vpop.permute.xlu1 %346 }
 0x27a   :  { %v355_v38 = vmul.f32 %v717_v1, %v347_v36  ;;  %360 = vrot.lane.b32.xlu0 %v352_v32, %s751_s2 }
 0x27c   :  { %v387_v39 = vpack.c.bf16 %v355_v38, %v354_v37 }
 0x27e   :  { %364 = vrot.lane.b32.xlu0 %v354_v37, %s751_s2  ;;  %400 = vrot.lane.b32.xlu1 %v387_v39, %s750_s19 }
 0x282   :  { %362 = vrot.lane.b32.xlu1 %v353_v33, %s751_s2 }
 0x286   :  { %366 = vrot.lane.b32.xlu1 %v355_v38, %s751_s2 }
 0x2e8   :  { %v399_v42 = vpop.permute.xlu0 %398 }
 0x2e9   :  { %622 = vmatmul.mubr.msk.bf16.vlgmr.msra.gmra.mrb[0].mxu1 %vm372_vm0, %v399_v42 }
 0x2ea   :  { %502 = vmatpush1.bf16.msra.mxu1 %v688_v40  ;;  %490 = vmatprep.mubr.bf16.mxu1 %v752_v27 }
 0x2eb   :  { %503 = vmatprep.subr.bf16.mxu1 %v693_v41 }
 0x2ec   :  { %v361_v44 = vpop.permute.xlu0 %360 }
 0x2ed   :  { %v373_v45 = vsel %vm372_vm0, %v877_v8, %v361_v44 }
 0x2ee   :  { %v378_v46 = vsel %vm377_vm1, %v373_v45, 0.0  ;;  %504 = vmatpush1.bf16.msra.mxu1 %v691_v43 }
 0x2ef   :  { %382 = vst [vmem:[#allocation3] sm:$0xff] %v378_v46 }
 0x2f0   :  { %v401_v47 = vpop.permute.xlu1 %400  ;;  %v365_v48 = vpop.permute.xlu0 %364 }
 0x2f1   :  { %v375_v49 = vsel %vm372_vm0, %v330_v16, %v365_v48  ;;  %623 = vmatmul.mubr.msk.bf16.gmra.mrb[4].mxu1 %vm372_vm0, %v401_v47 }
 0x2f2   :  { %v380_v50 = vsel %vm377_vm1, %v375_v49, 0.0  ;;  %533 = vmatprep.mubr.bf16.mxu1 %v752_v27 }
 0x2f3   :  { %384 = vst [vmem:[#allocation3 + $0x10] sm:$0xff] %v380_v50 }
 0x2f4   :  { %v363_v51 = vpop.permute.xlu1 %362 }
 0x2f5   :  { %v374_v52 = vsel %vm372_vm0, %v883_v12, %v363_v51 }
 0x2f6   :  { %v379_v53 = vsel %vm377_vm1, %v374_v52, 0.0 }
 0x2f7   :  { %383 = vst [vmem:[#allocation3 + $0x8] sm:$0xff] %v379_v53 }
 0x2f8   :  { %v367_v54 = vpop.permute.xlu1 %366 }
 0x2f9   :  { %v376_v55 = vsel %vm372_vm0, %v889_v20, %v367_v54  ;;  %624 = vmatmul.mubr.msk.bf16.vlgmr.msra.gmra.mrb[8].mxu1 %vm372_vm0, %v399_v42 }
 0x2fa   :  { %v381_v56 = vsel %vm377_vm1, %v376_v55, 0.0  ;;  %543 = vmatprep.mubr.bf16.mxu1 %v752_v27 }
 0x2fb   :  { %385 = vst [vmem:[#allocation3 + $0x18] sm:$0xff] %v381_v56 }
 0x301   :  { %625 = vmatmul.mubr.msk.bf16.gmra.mrb[12].mxu1 %vm372_vm0, %v401_v47 }
 0x302   :  { %737 = shalt.err (!%p734_p4)
}
 0x303   :  { %s738_s20 = scalar_lea.hbm %s1006_s5, 512 }
 0x304   :  { %p739_p5 = scmp.ne.s32.totalorder %s1006_s5, %s738_s20  ;;  %p742_p6 = scmp.lt.u32.totalorder %s738_s20, %s1006_s5 }
 0x306   :  { %p744_p7 = pnand %p742_p6, %p739_p5 }
 0x308   :  { %747 = shalt.err (!%p744_p7)
}
 0x309   :  { %s754_s25 = smov 128   ;;  %s755_s26 = smov 8  }
 0x30a   :  { %581 = dma.vmem_to_hbm [thread:$0]  %s576_s17, 512, %s1006_s5, [#allocation4], %s754_s25, %s754_s25, %s755_s26  }
 0x3bc   :  { %v482_v57 = vpop.f32.mrb[0].mxu1 }
 0x3bd   :  { %554 = vst [vmem:[%s1007_s6] sm:$0xff] %v482_v57  ;;  %v484_v58 = vpop.f32.mrb[1].mxu1 }
 0x3be   :  { %555 = vst [vmem:[%s1007_s6 + $0x8] sm:$0xff] %v484_v58  ;;  %v486_v59 = vpop.f32.mrb[2].mxu1 }
 0x3bf   :  { %558 = vst [vmem:[%s1007_s6 + $0x20] sm:$0xff] %v486_v59  ;;  %v488_v60 = vpop.f32.mrb[3].mxu1 }
 0x3c0   :  { %559 = vst [vmem:[%s1007_s6 + $0x28] sm:$0xff] %v488_v60 }
 0x3c4   :  { %v492_v61 = vpop.f32.mrb[4].mxu1 }
 0x3c5   :  { %562 = vst [vmem:[%s1007_s6 + $0x40] sm:$0xff] %v492_v61  ;;  %v494_v62 = vpop.f32.mrb[5].mxu1 }
 0x3c6   :  { %563 = vst [vmem:[%s1007_s6 + $0x48] sm:$0xff] %v494_v62  ;;  %v496_v63 = vpop.f32.mrb[6].mxu1 }
 0x3c7   :  { %566 = vst [vmem:[%s1007_s6 + $0x60] sm:$0xff] %v496_v63  ;;  %v498_v0 = vpop.f32.mrb[7].mxu1 }
 0x3c8   :  { %567 = vst [vmem:[%s1007_s6 + $0x68] sm:$0xff] %v498_v0 }
 0x3cc   :  { %v535_v1 = vpop.f32.mrb[8].mxu1 }
 0x3cd   :  { %556 = vst [vmem:[%s1007_s6 + $0x10] sm:$0xff] %v535_v1  ;;  %v537_v2 = vpop.f32.mrb[9].mxu1 }
 0x3ce   :  { %557 = vst [vmem:[%s1007_s6 + $0x18] sm:$0xff] %v537_v2  ;;  %v539_v3 = vpop.f32.mrb[10].mxu1 }
 0x3cf   :  { %560 = vst [vmem:[%s1007_s6 + $0x30] sm:$0xff] %v539_v3  ;;  %v541_v4 = vpop.f32.mrb[11].mxu1 }
 0x3d0   :  { %561 = vst [vmem:[%s1007_s6 + $0x38] sm:$0xff] %v541_v4 }
 0x3d4   :  { %v545_v5 = vpop.f32.mrb[12].mxu1 }
 0x3d5   :  { %564 = vst [vmem:[%s1007_s6 + $0x50] sm:$0xff] %v545_v5  ;;  %v547_v6 = vpop.f32.mrb[13].mxu1 }
 0x3d6   :  { %565 = vst [vmem:[%s1007_s6 + $0x58] sm:$0xff] %v547_v6  ;;  %v549_v7 = vpop.f32.mrb[14].mxu1 }
 0x3d7   :  { %568 = vst [vmem:[%s1007_s6 + $0x70] sm:$0xff] %v549_v7  ;;  %v551_v8 = vpop.f32.mrb[15].mxu1 }
 0x3d8   :  { %569 = vst [vmem:[%s1007_s6 + $0x78] sm:$0xff] %v551_v8 }
 0x3d9   :  { %748 = dma.done.wait [#allocation4], 512  }
 0x3da   :  { %749 = vsyncadd [#allocation4], 4294966784 }
 0x3db   :  { %589 = vsyncpa [#allocation4], 1 }

// kernel: _gqn_apply.39
= control target key start
LH: loop header
LB: loop body
LE: loop exit
PB: predicated region body
PF: predicated region fallthrough
CT: control target
= control target key end

     0   :  { %s1060_s12 = smov 0   ;;  %s1062_s13 = smov 0   ;;  %s1170_s0 = inlined_call_operand.vmem [shape: bf16[512,128], index: 0, kind: input, shape index: {}]   ;;  %s1171_s1 = inlined_call_operand.vmem [shape: bf16[128,128], index: 1, kind: input, shape index: {}]   ;;  %s1172_s2 = inlined_call_operand.vmem [shape: f32[1,128], index: 2, kind: input, shape index: {}]   ;;  %s1173_s3 = inlined_call_operand.vmem [shape: f32[512,128], index: 3, kind: output, shape index: {}]  }
   0x1   :  { %s1064_s14 = smov 0  }
   0x2 LB: > { %s32_s15 = sadd.s32 1, %s1034_s13  ;;  %p808_p0 = scmp.ge.s32.totalorder %s1038_s14, 1  ;;  %s1038_s14 = sphi %s1064_s14, %s13_s14   ;;  %s1034_s13 = sphi %s1062_s13, %s1175_s13   ;;  %s1030_s12 = sphi %s1060_s12, %s1174_s12  }
   0x3   : > { %p34_p1 = scmp.ge.s32.totalorder %s32_s15, 4  ;;  %p188_p2 = scmp.lt.s32.totalorder %s1038_s14, 5 }
   0x5   : > { %s1177_s15 = smov (%p34_p1, %s32_s15), 0  ;;  %p189_p3 = pnand %p808_p0, %p188_p2 }
   0x6   : > { %v936_v0 = vld [vmem:[%s1171_s1] sm:$0xff] (!%p189_p3)   ;;  %s809_s18 = sshll.u32 (!%p189_p3), %s1030_s12, 4  ;;  %v937_v1 = vld [vmem:[%s1171_s1 + $0x8] sm:$0xff] (!%p189_p3)   ;;  %v938_v2 = vld [vmem:[%s1171_s1 + $0x10] sm:$0xff] (!%p189_p3)  }
   0x7   : > { %192 = sbr.rel (%p189_p3) target bundleno = 308 (0x134), region = 32  ;;  %p230_p4 = scmp.lt.s32.totalorder (!%p189_p3), %s809_s18, 63  ;;  %864 = vmatprep.subr.bf16.mxu0 (!%p189_p3), %v936_v0  ;;  %896 = vmatprep.subr.bf16.mxu1 (!%p189_p3), %v936_v0  ;;  %v939_v3 = vld [vmem:[%s1171_s1 + $0x18] sm:$0xff] (!%p189_p3)   ;;  %v940_v6 = vld [vmem:[%s1171_s1 + $0x20] sm:$0xff] (!%p189_p3)   ;;  %v941_v7 = vld [vmem:[%s1171_s1 + $0x28] sm:$0xff] (!%p189_p3)  }
   0x8   : > { %865 = vmatpush3.bf16.msra.mxu0 (!%p189_p3), %v936_v0  ;;  %904 = vmatpush3.bf16.msra.mxu1 (!%p189_p3), %v936_v0  ;;  %v942_v8 = vld [vmem:[%s1171_s1 + $0x30] sm:$0xff] (!%p189_p3)   ;;  %v943_v9 = vld [vmem:[%s1171_s1 + $0x38] sm:$0xff] (!%p189_p3)   ;;  %v1121_v16 = vld [vmem:[%s1172_s2] ss:$0 sm:$0xff] (!%p189_p3) }
   0x9   : > { %866 = vmatprep.subr.bf16.mxu0 (!%p189_p3), %v937_v1  ;;  %897 = vmatprep.subr.bf16.mxu1 (!%p189_p3), %v937_v1 }
   0xc   : > { %867 = vmatpush3.bf16.msra.mxu0 (!%p189_p3), %v937_v1  ;;  %905 = vmatpush3.bf16.msra.mxu1 (!%p189_p3), %v937_v1 }
   0xd   : > { %868 = vmatprep.subr.bf16.mxu0 (!%p189_p3), %v938_v2  ;;  %898 = vmatprep.subr.bf16.mxu1 (!%p189_p3), %v938_v2 }
   0xe   : > { %s1179_s18 = smov (!%p230_p4, %s809_s18), 63 }
   0xf   : > { %s810_s23 = sshll.u32 %s1179_s18, 2  ;;  %s812_s12 = sshll.u32 %s1179_s18, 3 }
  0x10   : > { %s1093_s26 = scalar_lea.vmem %s1170_s0, %s810_s23  ;;  %869 = vmatpush3.bf16.msra.mxu0 %v938_v2  ;;  %906 = vmatpush3.bf16.msra.mxu1 %v938_v2  ;;  %s1143_s19 = scalar_lea.vmem %s1173_s3, %s812_s12 }
  0x11   : > { %v944_v4 = vld [vmem:[%s1093_s26] sm:$0xff]   ;;  %870 = vmatprep.subr.bf16.mxu0 %v939_v3  ;;  %899 = vmatprep.subr.bf16.mxu1 %v939_v3  ;;  %v946_v10 = vld [vmem:[%s1093_s26 + $0x8] sm:$0xff]   ;;  %v948_v12 = vld [vmem:[%s1093_s26 + $0x10] sm:$0xff]  }
  0x12   : > { %v945_v5 = vld [vmem:[%s1093_s26 + $0x20] sm:$0xff]   ;;  %880 = vmatprep.mubr.bf16.mxu0 %v944_v4  ;;  %v947_v11 = vld [vmem:[%s1093_s26 + $0x28] sm:$0xff]   ;;  %v949_v13 = vld [vmem:[%s1093_s26 + $0x30] sm:$0xff]  }
  0x13   : > { %888 = vmatprep.mubr.bf16.mxu1 %v945_v5  ;;  %v950_v14 = vld [vmem:[%s1093_s26 + $0x18] sm:$0xff]  }
  0x14   : > { %871 = vmatpush3.bf16.msra.mxu0 %v939_v3  ;;  %907 = vmatpush3.bf16.msra.mxu1 %v939_v3  ;;  %v951_v15 = vld [vmem:[%s1093_s26 + $0x38] sm:$0xff]  }
  0x15   : > { %872 = vmatprep.subr.bf16.mxu0 %v940_v6  ;;  %900 = vmatprep.subr.bf16.mxu1 %v940_v6 }
  0x18   : > { %873 = vmatpush3.bf16.msra.mxu0 %v940_v6  ;;  %908 = vmatpush3.bf16.msra.mxu1 %v940_v6 }
  0x19   : > { %874 = vmatprep.subr.bf16.mxu0 %v941_v7  ;;  %901 = vmatprep.subr.bf16.mxu1 %v941_v7 }
  0x1c   : > { %875 = vmatpush3.bf16.msra.mxu0 %v941_v7  ;;  %909 = vmatpush3.bf16.msra.mxu1 %v941_v7 }
  0x1d   : > { %876 = vmatprep.subr.bf16.mxu0 %v942_v8  ;;  %902 = vmatprep.subr.bf16.mxu1 %v942_v8 }
  0x20   : > { %877 = vmatpush3.bf16.msra.mxu0 %v942_v8  ;;  %910 = vmatpush3.bf16.msra.mxu1 %v942_v8 }
  0x21   : > { %878 = vmatprep.subr.bf16.mxu0 %v943_v9  ;;  %903 = vmatprep.subr.bf16.mxu1 %v943_v9 }
  0x24   : > { %879 = vmatpush3.bf16.msra.mxu0 %v943_v9  ;;  %911 = vmatpush3.bf16.msra.mxu1 %v943_v9 }
  0x27   : > { %881 = vmatmul.mubr.bf16.vlgmr.msra.gmra.mrb[0].mxu0 %v946_v10  ;;  %889 = vmatmul.mubr.bf16.vlgmr.msra.gmra.mrb[0].mxu1 %v947_v11 }
  0x28   : > { %884 = vmatprep.mubr.bf16.mxu0 %v948_v12  ;;  %892 = vmatprep.mubr.bf16.mxu1 %v949_v13 }
  0x2f   : > { %885 = vmatmul.mubr.bf16.gmra.mrb[4].mxu0 %v950_v14  ;;  %893 = vmatmul.mubr.bf16.gmra.mrb[4].mxu1 %v951_v15 }
  0xfa   : > { %v882_v17 = vpop.f32.mrb[0].mxu0  ;;  %v890_v18 = vpop.f32.mrb[0].mxu1 }
  0xfb   : > { %v530_v19 = vadd.f32 %v882_v17, %v1121_v16  ;;  %v538_v20 = vadd.f32 %v890_v18, %v1121_v16  ;;  %v465_v21 = vpop.f32.mrb[1].mxu0  ;;  %v497_v22 = vpop.f32.mrb[1].mxu1 }
  0xfc   : > { %v528_v23 = vadd.f32 %v1121_v16, %v465_v21  ;;  %v536_v24 = vadd.f32 %v1121_v16, %v497_v22  ;;  %v883_v25 = vpop.f32.mrb[2].mxu0  ;;  %v891_v26 = vpop.f32.mrb[2].mxu1 }
  0xfd   : > { %v832_v27 = vmul.f32 -1.442695, %v530_v19  ;;  %v840_v28 = vmul.f32 -1.442695, %v538_v20  ;;  %v531_v29 = vadd.f32 %v883_v25, %v1121_v16  ;;  %v539_v30 = vadd.f32 %v891_v26, %v1121_v16  ;;  %v468_v31 = vpop.f32.mrb[3].mxu0  ;;  %v500_v32 = vpop.f32.mrb[3].mxu1 }
  0xfe   : > { %v830_v33 = vmul.f32 -1.442695, %v528_v23  ;;  %v838_v34 = vmul.f32 -1.442695, %v536_v24  ;;  %v529_v35 = vadd.f32 %v1121_v16, %v468_v31  ;;  %v537_v36 = vadd.f32 %v1121_v16, %v500_v32 }
  0xff   : > { %952 = vpow2.f32 %v832_v27  ;;  %v833_v37 = vmul.f32 -1.442695, %v531_v29  ;;  %v841_v38 = vmul.f32 -1.442695, %v539_v30 }
 0x100   : > { %954 = vpow2.f32 %v840_v28  ;;  %v831_v39 = vmul.f32 -1.442695, %v529_v35  ;;  %v839_v40 = vmul.f32 -1.442695, %v537_v36 }
 0x101   : > { %956 = vpow2.f32 %v830_v33 }
 0x102   : > { %958 = vpow2.f32 %v838_v34  ;;  %v886_v41 = vpop.f32.mrb[4].mxu0  ;;  %v894_v42 = vpop.f32.mrb[4].mxu1 }
 0x103   : > { %960 = vpow2.f32 %v833_v37  ;;  %v534_v43 = vadd.f32 %v886_v41, %v1121_v16  ;;  %v542_v44 = vadd.f32 %v894_v42, %v1121_v16  ;;  %v481_v45 = vpop.f32.mrb[5].mxu0  ;;  %v513_v46 = vpop.f32.mrb[5].mxu1 }
 0x104   : > { %962 = vpow2.f32 %v841_v38  ;;  %v532_v47 = vadd.f32 %v1121_v16, %v481_v45  ;;  %v540_v48 = vadd.f32 %v1121_v16, %v513_v46  ;;  %v887_v49 = vpop.f32.mrb[6].mxu0  ;;  %v895_v50 = vpop.f32.mrb[6].mxu1 }
 0x105   : > { %964 = vpow2.f32 %v831_v39  ;;  %v836_v51 = vmul.f32 -1.442695, %v534_v43  ;;  %v844_v52 = vmul.f32 -1.442695, %v542_v44  ;;  %v535_v53 = vadd.f32 %v887_v49, %v1121_v16  ;;  %v484_v54 = vpop.f32.mrb[7].mxu0  ;;  %v516_v55 = vpop.f32.mrb[7].mxu1 }
 0x106   : > { %966 = vpow2.f32 %v839_v40  ;;  %v834_v56 = vmul.f32 -1.442695, %v532_v47  ;;  %v842_v57 = vmul.f32 -1.442695, %v540_v48  ;;  %v543_v12 = vadd.f32 %v895_v50, %v1121_v16 }
 0x107   : > { %968 = vpow2.f32 %v836_v51  ;;  %v837_v58 = vmul.f32 -1.442695, %v535_v53  ;;  %v533_v15 = vadd.f32 %v1121_v16, %v484_v54  ;;  %v541_v19 = vadd.f32 %v1121_v16, %v516_v55 }
 0x108   : > { %970 = vpow2.f32 %v844_v52  ;;  %v845_v24 = vmul.f32 -1.442695, %v543_v12 }
 0x109   : > { %v953_v59 = vpop.eup %952  ;;  %972 = vpow2.f32 %v834_v56  ;;  %v835_v16 = vmul.f32 -1.442695, %v533_v15  ;;  %v843_v28 = vmul.f32 -1.442695, %v541_v19 }
 0x10a   : > { %v955_v60 = vpop.eup %954  ;;  %v629_v61 = vadd.f32 1.0, %v953_v59  ;;  %974 = vpow2.f32 %v842_v57 }
 0x10b   : > { %v957_v62 = vpop.eup %956  ;;  %v637_v63 = vadd.f32 1.0, %v955_v60  ;;  %976 = vpow2.f32 %v837_v58 }
 0x10c   : > { %v959_v0 = vpop.eup %958  ;;  %978 = vrcp.f32 %v629_v61  ;;  %v627_v1 = vadd.f32 1.0, %v957_v62 }
 0x10d   : > { %v961_v2 = vpop.eup %960  ;;  %980 = vrcp.f32 %v637_v63  ;;  %v635_v3 = vadd.f32 1.0, %v959_v0 }
 0x10e   : > { %v963_v4 = vpop.eup %962  ;;  %982 = vrcp.f32 %v627_v1  ;;  %v630_v5 = vadd.f32 1.0, %v961_v2 }
 0x10f   : > { %v965_v6 = vpop.eup %964  ;;  %984 = vrcp.f32 %v635_v3  ;;  %v638_v7 = vadd.f32 1.0, %v963_v4 }
 0x110   : > { %v967_v8 = vpop.eup %966  ;;  %986 = vrcp.f32 %v630_v5  ;;  %v628_v9 = vadd.f32 1.0, %v965_v6 }
 0x111   : > { %v969_v10 = vpop.eup %968  ;;  %988 = vrcp.f32 %v638_v7  ;;  %v636_v11 = vadd.f32 1.0, %v967_v8 }
 0x112   : > { %v971_v13 = vpop.eup %970  ;;  %990 = vrcp.f32 %v628_v9  ;;  %v633_v14 = vadd.f32 1.0, %v969_v10 }
 0x113   : > { %v973_v17 = vpop.eup %972  ;;  %992 = vrcp.f32 %v636_v11  ;;  %v641_v18 = vadd.f32 1.0, %v971_v13 }
 0x114   : > { %v975_v20 = vpop.eup %974  ;;  %994 = vrcp.f32 %v633_v14  ;;  %v631_v21 = vadd.f32 1.0, %v973_v17 }
 0x115   : > { %v977_v22 = vpop.eup %976  ;;  %996 = vrcp.f32 %v641_v18  ;;  %v639_v23 = vadd.f32 1.0, %v975_v20 }
 0x116   : > { %v979_v25 = vpop.eup %978  ;;  %998 = vrcp.f32 %v631_v21  ;;  %v634_v26 = vadd.f32 1.0, %v977_v22 }
 0x117   : > { %v981_v27 = vpop.eup %980  ;;  %677 = vst [vmem:[%s1143_s19 + $0x10] sm:$0xff] %v979_v25  ;;  %1000 = vrcp.f32 %v639_v23 }
 0x118   : > { %v983_v29 = vpop.eup %982  ;;  %685 = vst [vmem:[%s1143_s19 + $0x50] sm:$0xff] %v981_v27  ;;  %1002 = vrcp.f32 %v634_v26 }
 0x119   : > { %v985_v30 = vpop.eup %984  ;;  %675 = vst [vmem:[%s1143_s19] sm:$0xff] %v983_v29  ;;  %1004 = vpow2.f32 %v845_v24 }
 0x11a   : > { %v987_v31 = vpop.eup %986  ;;  %683 = vst [vmem:[%s1143_s19 + $0x40] sm:$0xff] %v985_v30  ;;  %1006 = vpow2.f32 %v835_v16 }
 0x11b   : > { %v989_v32 = vpop.eup %988  ;;  %678 = vst [vmem:[%s1143_s19 + $0x18] sm:$0xff] %v987_v31  ;;  %1008 = vpow2.f32 %v843_v28 }
 0x11c   : > { %v991_v33 = vpop.eup %990  ;;  %686 = vst [vmem:[%s1143_s19 + $0x58] sm:$0xff] %v989_v32 }
 0x11d   : > { %v993_v34 = vpop.eup %992  ;;  %676 = vst [vmem:[%s1143_s19 + $0x8] sm:$0xff] %v991_v33 }
 0x11e   : > { %v995_v35 = vpop.eup %994  ;;  %684 = vst [vmem:[%s1143_s19 + $0x48] sm:$0xff] %v993_v34 }
 0x11f   : > { %v997_v36 = vpop.eup %996  ;;  %681 = vst [vmem:[%s1143_s19 + $0x30] sm:$0xff] %v995_v35 }
 0x120   : > { %v999_v37 = vpop.eup %998  ;;  %689 = vst [vmem:[%s1143_s19 + $0x70] sm:$0xff] %v997_v36 }
 0x121   : > { %v1001_v38 = vpop.eup %1000  ;;  %679 = vst [vmem:[%s1143_s19 + $0x20] sm:$0xff] %v999_v37 }
 0x122   : > { %v1003_v39 = vpop.eup %1002  ;;  %687 = vst [vmem:[%s1143_s19 + $0x60] sm:$0xff] %v1001_v38 }
 0x123   : > { %v1005_v40 = vpop.eup %1004  ;;  %682 = vst [vmem:[%s1143_s19 + $0x38] sm:$0xff] %v1003_v39 }
 0x124   : > { %v1007_v41 = vpop.eup %1006  ;;  %v642_v42 = vadd.f32 1.0, %v1005_v40 }
 0x125   : > { %v1009_v43 = vpop.eup %1008  ;;  %v632_v44 = vadd.f32 1.0, %v1007_v41 }
 0x126   : > { %1010 = vrcp.f32 %v642_v42  ;;  %v640_v45 = vadd.f32 1.0, %v1009_v43 }
 0x127   : > { %1012 = vrcp.f32 %v632_v44 }
 0x128   : > { %1014 = vrcp.f32 %v640_v45 }
 0x130   : > { %v1011_v46 = vpop.eup %1010 }
 0x131   : > { %v1013_v47 = vpop.eup %1012  ;;  %690 = vst [vmem:[%s1143_s19 + $0x78] sm:$0xff] %v1011_v46 }
 0x132   : > { %v1015_v48 = vpop.eup %1014  ;;  %680 = vst [vmem:[%s1143_s19 + $0x28] sm:$0xff] %v1013_v47 }
 0x133   : > { %688 = vst [vmem:[%s1143_s19 + $0x68] sm:$0xff] %v1015_v48 }
 0x134 PF: > { %s13_s14 = sadd.s32 1, %s1038_s14   ;;  %s1174_s12 = smov %s1034_s13 }
 0x135   : > { %p10_p5 = scmp.ge.s32.totalorder %s13_s14, 6   ;;  %s1175_s13 = smov %s1177_s15 }
 0x137   :  { %12 = sbr.rel (!%p10_p5) target bundleno = 2 (0x2), region = 76 }

</bundles_post_ra>
